<compile_context>
chip_gen: v6e
topology: v6e:2x2x1
jax: 0.10.0
libtpu: 0.0.40
codegen_flags: <defaults>
</compile_context>

<pallas_src>
import numpy as np

import jax
import jax.numpy as jnp
from jax.experimental import pallas as pl

# ----------------------------------------------------------------------------
# Small, module-consistent configuration (synthetic weights, DCGAN-style init)
# ----------------------------------------------------------------------------
BATCH = 2
Z_SIZE = 16        # nn.ConvTranspose2d(z_size, ...)
G_CH = 8           # g_channel
CHANNEL = 3        # output image channels
KSIZE = 4
IMG = 64
EPS = 1e-5         # BatchNorm2d default eps

# (Cin, Cout, stride, pad) for the 5 ConvTranspose2d layers of GNet.main
LAYER_CFG = [
    (Z_SIZE,   8 * G_CH, 1, 0),
    (8 * G_CH, 4 * G_CH, 2, 1),
    (4 * G_CH, 2 * G_CH, 2, 1),
    (2 * G_CH, 1 * G_CH, 2, 1),
    (1 * G_CH, CHANNEL,  2, 1),
]
SPATIAL = [1, 4, 8, 16, 32, 64]   # feature-map side length before each layer


# ----------------------------------------------------------------------------
# In-kernel building blocks (everything is 2-D matmuls / elementwise / axis-0
# reductions -- the safest, best-supported Mosaic constructs).
# ----------------------------------------------------------------------------
def _convt(x, l_ref, g_ref):
    """ConvTranspose2d as  sum_ky (L_ky @ x) @ G_ky, accumulated in registers.

    x:     (B*H_in, W_in*C_in)   activation, rows=(b, y), cols=(x, c)
    l_ref: (4, B*H_out, B*H_in)  static 0/1 row-placement operators
    g_ref: (4, W_in*C_in, W_out*C_out)  banded column/channel operators
    """
    out = None
    for ky in range(KSIZE):
        rows = jnp.dot(l_ref[ky], x, preferred_element_type=jnp.float32)
        term = jnp.dot(rows, g_ref[ky], preferred_element_type=jnp.float32)
        out = term if out is None else out + term
    return out


def _bn_relu(y, p_ref, gb_ref):
    """Training-mode BatchNorm (two-pass batch stats) + ReLU.

    y:      (B*H, W*C) pre-activation.
    p_ref:  (W*C, W*C) per-channel averaging + broadcast projection
            P[(x,c),(x',c')] = delta(c,c') / W.
    gb_ref: (2, W*C) tiled gamma / beta.
    """
    p = p_ref[...]
    mean_bc = jnp.dot(jnp.mean(y, axis=0, keepdims=True), p,
                      preferred_element_type=jnp.float32)
    d = y - mean_bc
    var_bc = jnp.dot(jnp.mean(d * d, axis=0, keepdims=True), p,
                     preferred_element_type=jnp.float32)
    yn = d * jax.lax.rsqrt(var_bc + EPS) * gb_ref[0:1, :] + gb_ref[1:2, :]
    return jnp.maximum(yn, 0.0)


def _gnet_kernel(z_ref,
                 l0_ref, g0_ref, p0_ref, gb0_ref,
                 l1_ref, g1_ref, p1_ref, gb1_ref,
                 l2_ref, g2_ref, p2_ref, gb2_ref,
                 l3_ref, g3_ref, p3_ref, gb3_ref,
                 l4_ref, g4_ref,
                 out_ref):
    """Whole GNet forward.  Everything stays in VMEM / registers."""
    x = z_ref[...]                                          # (B, z_size)
    x = _bn_relu(_convt(x, l0_ref, g0_ref), p0_ref, gb0_ref)   # (B*4,   256)
    x = _bn_relu(_convt(x, l1_ref, g1_ref), p1_ref, gb1_ref)   # (B*8,   256)
    x = _bn_relu(_convt(x, l2_ref, g2_ref), p2_ref, gb2_ref)   # (B*16,  256)
    x = _bn_relu(_convt(x, l3_ref, g3_ref), p3_ref, gb3_ref)   # (B*32,  256)
    out_ref[...] = jnp.tanh(_convt(x, l4_ref, g4_ref))         # (B*64,  192)


# ----------------------------------------------------------------------------
# pallas_call wrapper (single fused call, whole arrays resident in VMEM)
# ----------------------------------------------------------------------------
def gnet_forward(x_nchw, ops):
    """x_nchw: (B, z_size, 1, 1) -> (B, 3, 64, 64), matching PyTorch GNet."""
    z2d = x_nchw.reshape(BATCH, Z_SIZE).astype(jnp.float32)
    y = pl.pallas_call(
        _gnet_kernel,
        out_shape=jax.ShapeDtypeStruct((BATCH * IMG, IMG * CHANNEL),
                                       jnp.float32),
    )(z2d, *ops)
    img = y.reshape(BATCH, IMG, IMG, CHANNEL)               # (b, y, x, c)
    return jnp.transpose(img, (0, 3, 1, 2))                 # NCHW


# ----------------------------------------------------------------------------
# Offline operand prep: operator matrices built once from the weights (numpy).
# ----------------------------------------------------------------------------
def _row_operator(h_in, h_out, stride, pad, ky):
    """(B*H_out, B*H_in) 0/1 matrix placing input row iy at stride*iy-pad+ky."""
    m = np.zeros((h_out, h_in), np.float32)
    for iy in range(h_in):
        oy = stride * iy - pad + ky
        if 0 <= oy < h_out:
            m[oy, iy] = 1.0
    return np.kron(np.eye(BATCH, dtype=np.float32), m)


def _col_operator(w, w_in, w_out, stride, pad, ky):
    """(W_in*Cin, W_out*Cout) banded operator folding kx taps + channels."""
    cin, cout = w.shape[0], w.shape[1]
    g = np.zeros((w_in * cin, w_out * cout), np.float32)
    for ix in range(w_in):
        for kx in range(KSIZE):
            ox = stride * ix - pad + kx
            if 0 <= ox < w_out:
                g[ix * cin:(ix + 1) * cin,
                  ox * cout:(ox + 1) * cout] = w[:, :, ky, kx]
    return g


def prepare_operands(params):
    """Flat operand list [L0,G0,P0,GB0, ..., L3,G3,P3,GB3, L4,G4]."""
    ops = []
    n = len(LAYER_CFG)
    for l, ((cin, cout, stride, pad), p) in enumerate(zip(LAYER_CFG, params)):
        w = np.asarray(p["w"], dtype=np.float32)            # (Cin, Cout, 4, 4)
        h_in, h_out = SPATIAL[l], SPATIAL[l + 1]
        L = np.stack([_row_operator(h_in, h_out, stride, pad, ky)
                      for ky in range(KSIZE)])
        G = np.stack([_col_operator(w, h_in, h_out, stride, pad, ky)
                      for ky in range(KSIZE)])
        ops.append(jnp.asarray(L))
        ops.append(jnp.asarray(G))
        if l < n - 1:
            P = np.kron(np.ones((h_out, h_out), np.float32) / h_out,
                        np.eye(cout, dtype=np.float32))
            gamma_bc = np.tile(np.asarray(p["gamma"], np.float32), h_out)
            beta_bc = np.tile(np.asarray(p["beta"], np.float32), h_out)
            ops.append(jnp.asarray(P))
            ops.append(jnp.asarray(np.stack([gamma_bc, beta_bc], axis=0)))
    return ops


def init_params(key):
    params = []
    for (cin, cout, _, _) in LAYER_CFG:
        key, kw, kg = jax.random.split(key, 3)
        w = 0.02 * jax.random.normal(kw, (cin, cout, KSIZE, KSIZE), jnp.float32)
        gamma = 1.0 + 0.02 * jax.random.normal(kg, (cout,), jnp.float32)
        beta = jnp.zeros((cout,), jnp.float32)
        params.append({"w": w, "gamma": gamma, "beta": beta})
    return params


# ----------------------------------------------------------------------------
# Pure-XLA reference (identical semantics: training-mode BN batch stats)
# ----------------------------------------------------------------------------
def gnet_reference(x_nchw, params):
    x = x_nchw.astype(jnp.float32)
    n = len(LAYER_CFG)
    for idx, ((_, _, stride, pad), p) in enumerate(zip(LAYER_CFG, params)):
        rhs = jnp.transpose(p["w"], (1, 0, 2, 3))[:, :, ::-1, ::-1]
        ep = KSIZE - 1 - pad
        x = jax.lax.conv_general_dilated(
            x, rhs, window_strides=(1, 1), padding=[(ep, ep), (ep, ep)],
            lhs_dilation=(stride, stride), rhs_dilation=(1, 1),
            dimension_numbers=("NCHW", "OIHW", "NCHW"),
            precision=jax.lax.Precision.HIGHEST)
        if idx < n - 1:
            mean = jnp.mean(x, axis=(0, 2, 3), keepdims=True)
            var = jnp.mean((x - mean) ** 2, axis=(0, 2, 3), keepdims=True)
            x = (x - mean) * jax.lax.rsqrt(var + EPS)
            x = x * p["gamma"].reshape(1, -1, 1, 1) + p["beta"].reshape(1, -1, 1, 1)
            x = jnp.maximum(x, 0.0)
        else:
            x = jnp.tanh(x)
    return x


# ----------------------------------------------------------------------------
if __name__ == "__main__":
    key = jax.random.PRNGKey(0)
    key, kx = jax.random.split(key)
    x = jax.random.normal(kx, (BATCH, Z_SIZE, 1, 1), jnp.float32)
    params = init_params(key)
    ops = prepare_operands(params)                 # built once, outside jit

    out = jax.block_until_ready(jax.jit(gnet_forward)(x, ops))

    assert out.shape == (BATCH, CHANNEL, IMG, IMG), out.shape
    assert out.dtype == jnp.float32
    assert bool(jnp.all(jnp.isfinite(out)))
    assert bool(jnp.all(jnp.abs(out) <= 1.0))      # tanh range

    # Numerical check vs XLA reference (loose enough for MXU pass-precision
    # differences, tight enough to catch any operator-construction / BN bug).
    ref = jax.block_until_ready(jax.jit(gnet_reference)(x, params))
    err = float(jnp.max(jnp.abs(out - ref)))
    assert err < 2e-2, f"mismatch vs XLA reference: max abs err = {err}"

    print("KERNEL_OK")
</pallas_src>

<mosaic_0001>
module attributes {stable_mosaic.version = 11 : i64} {
  func.func @_gnet_kernel(%arg0: memref<2x16xf32, #tpu.memory_space<vmem>>, %arg1: memref<4x8x2xf32, #tpu.memory_space<vmem>>, %arg2: memref<4x16x256xf32, #tpu.memory_space<vmem>>, %arg3: memref<256x256xf32, #tpu.memory_space<vmem>>, %arg4: memref<2x256xf32, #tpu.memory_space<vmem>>, %arg5: memref<4x16x8xf32, #tpu.memory_space<vmem>>, %arg6: memref<4x256x256xf32, #tpu.memory_space<vmem>>, %arg7: memref<256x256xf32, #tpu.memory_space<vmem>>, %arg8: memref<2x256xf32, #tpu.memory_space<vmem>>, %arg9: memref<4x32x16xf32, #tpu.memory_space<vmem>>, %arg10: memref<4x256x256xf32, #tpu.memory_space<vmem>>, %arg11: memref<256x256xf32, #tpu.memory_space<vmem>>, %arg12: memref<2x256xf32, #tpu.memory_space<vmem>>, %arg13: memref<4x64x32xf32, #tpu.memory_space<vmem>>, %arg14: memref<4x256x256xf32, #tpu.memory_space<vmem>>, %arg15: memref<256x256xf32, #tpu.memory_space<vmem>>, %arg16: memref<2x256xf32, #tpu.memory_space<vmem>>, %arg17: memref<4x128x64xf32, #tpu.memory_space<vmem>>, %arg18: memref<4x256x192xf32, #tpu.memory_space<vmem>>, %arg19: memref<128x192xf32, #tpu.memory_space<vmem>>) attributes {dimension_semantics = [], scalar_prefetch = 0 : i64, scratch_operands = 0 : i64, tpu.core_type = #tpu.core_type<tc>} {
    %c0 = arith.constant 0 : index
    %c0_0 = arith.constant 0 : index
    %0 = vector.load %arg0[%c0, %c0_0] : memref<2x16xf32, #tpu.memory_space<vmem>>, vector<2x16xf32>
    %c0_1 = arith.constant 0 : index
    %c0_2 = arith.constant 0 : index
    %c0_3 = arith.constant 0 : index
    %1 = vector.load %arg1[%c0_1, %c0_2, %c0_3] : memref<4x8x2xf32, #tpu.memory_space<vmem>>, vector<1x8x2xf32>
    %2 = vector.shape_cast %1 : vector<1x8x2xf32> to vector<8x2xf32>
    %cst = arith.constant dense<0.000000e+00> : vector<8x16xf32>
    %3 = tpu.matmul %2, %0, %cst {dimension_numbers = #tpu.dot_dimension_numbers<[1], [0], [0], [1], [0, 0, 1, 1], [], []>} : vector<8x2xf32>, vector<2x16xf32>, vector<8x16xf32> -> vector<8x16xf32>
    %c0_4 = arith.constant 0 : index
    %c0_5 = arith.constant 0 : index
    %c0_6 = arith.constant 0 : index
    %4 = vector.load %arg2[%c0_4, %c0_5, %c0_6] : memref<4x16x256xf32, #tpu.memory_space<vmem>>, vector<1x16x256xf32>
    %5 = vector.shape_cast %4 : vector<1x16x256xf32> to vector<16x256xf32>
    %cst_7 = arith.constant dense<0.000000e+00> : vector<8x256xf32>
    %6 = tpu.matmul %3, %5, %cst_7 {dimension_numbers = #tpu.dot_dimension_numbers<[1], [0], [0], [1], [0, 0, 1, 1], [], []>} : vector<8x16xf32>, vector<16x256xf32>, vector<8x256xf32> -> vector<8x256xf32>
    %c1 = arith.constant 1 : index
    %c0_8 = arith.constant 0 : index
    %c0_9 = arith.constant 0 : index
    %7 = vector.load %arg1[%c1, %c0_8, %c0_9] : memref<4x8x2xf32, #tpu.memory_space<vmem>>, vector<1x8x2xf32>
    %8 = vector.shape_cast %7 : vector<1x8x2xf32> to vector<8x2xf32>
    %cst_10 = arith.constant dense<0.000000e+00> : vector<8x16xf32>
    %9 = tpu.matmul %8, %0, %cst_10 {dimension_numbers = #tpu.dot_dimension_numbers<[1], [0], [0], [1], [0, 0, 1, 1], [], []>} : vector<8x2xf32>, vector<2x16xf32>, vector<8x16xf32> -> vector<8x16xf32>
    %c1_11 = arith.constant 1 : index
    %c0_12 = arith.constant 0 : index
    %c0_13 = arith.constant 0 : index
    %10 = vector.load %arg2[%c1_11, %c0_12, %c0_13] : memref<4x16x256xf32, #tpu.memory_space<vmem>>, vector<1x16x256xf32>
    %11 = vector.shape_cast %10 : vector<1x16x256xf32> to vector<16x256xf32>
    %cst_14 = arith.constant dense<0.000000e+00> : vector<8x256xf32>
    %12 = tpu.matmul %9, %11, %cst_14 {dimension_numbers = #tpu.dot_dimension_numbers<[1], [0], [0], [1], [0, 0, 1, 1], [], []>} : vector<8x16xf32>, vector<16x256xf32>, vector<8x256xf32> -> vector<8x256xf32>
    %13 = arith.addf %6, %12 : vector<8x256xf32>
    %c2 = arith.constant 2 : index
    %c0_15 = arith.constant 0 : index
    %c0_16 = arith.constant 0 : index
    %14 = vector.load %arg1[%c2, %c0_15, %c0_16] : memref<4x8x2xf32, #tpu.memory_space<vmem>>, vector<1x8x2xf32>
    %15 = vector.shape_cast %14 : vector<1x8x2xf32> to vector<8x2xf32>
    %cst_17 = arith.constant dense<0.000000e+00> : vector<8x16xf32>
    %16 = tpu.matmul %15, %0, %cst_17 {dimension_numbers = #tpu.dot_dimension_numbers<[1], [0], [0], [1], [0, 0, 1, 1], [], []>} : vector<8x2xf32>, vector<2x16xf32>, vector<8x16xf32> -> vector<8x16xf32>
    %c2_18 = arith.constant 2 : index
    %c0_19 = arith.constant 0 : index
    %c0_20 = arith.constant 0 : index
    %17 = vector.load %arg2[%c2_18, %c0_19, %c0_20] : memref<4x16x256xf32, #tpu.memory_space<vmem>>, vector<1x16x256xf32>
    %18 = vector.shape_cast %17 : vector<1x16x256xf32> to vector<16x256xf32>
    %cst_21 = arith.constant dense<0.000000e+00> : vector<8x256xf32>
    %19 = tpu.matmul %16, %18, %cst_21 {dimension_numbers = #tpu.dot_dimension_numbers<[1], [0], [0], [1], [0, 0, 1, 1], [], []>} : vector<8x16xf32>, vector<16x256xf32>, vector<8x256xf32> -> vector<8x256xf32>
    %20 = arith.addf %13, %19 : vector<8x256xf32>
    %c3 = arith.constant 3 : index
    %c0_22 = arith.constant 0 : index
    %c0_23 = arith.constant 0 : index
    %21 = vector.load %arg1[%c3, %c0_22, %c0_23] : memref<4x8x2xf32, #tpu.memory_space<vmem>>, vector<1x8x2xf32>
    %22 = vector.shape_cast %21 : vector<1x8x2xf32> to vector<8x2xf32>
    %cst_24 = arith.constant dense<0.000000e+00> : vector<8x16xf32>
    %23 = tpu.matmul %22, %0, %cst_24 {dimension_numbers = #tpu.dot_dimension_numbers<[1], [0], [0], [1], [0, 0, 1, 1], [], []>} : vector<8x2xf32>, vector<2x16xf32>, vector<8x16xf32> -> vector<8x16xf32>
    %c3_25 = arith.constant 3 : index
    %c0_26 = arith.constant 0 : index
    %c0_27 = arith.constant 0 : index
    %24 = vector.load %arg2[%c3_25, %c0_26, %c0_27] : memref<4x16x256xf32, #tpu.memory_space<vmem>>, vector<1x16x256xf32>
    %25 = vector.shape_cast %24 : vector<1x16x256xf32> to vector<16x256xf32>
    %cst_28 = arith.constant dense<0.000000e+00> : vector<8x256xf32>
    %26 = tpu.matmul %23, %25, %cst_28 {dimension_numbers = #tpu.dot_dimension_numbers<[1], [0], [0], [1], [0, 0, 1, 1], [], []>} : vector<8x16xf32>, vector<16x256xf32>, vector<8x256xf32> -> vector<8x256xf32>
    %27 = arith.addf %20, %26 : vector<8x256xf32>
    %c0_29 = arith.constant 0 : index
    %c0_30 = arith.constant 0 : index
    %28 = vector.load %arg3[%c0_29, %c0_30] : memref<256x256xf32, #tpu.memory_space<vmem>>, vector<256x256xf32>
    %cst_31 = arith.constant dense<0.000000e+00> : vector<256xf32>
    %29 = vector.multi_reduction <add>, %27, %cst_31 [0] : vector<8x256xf32> to vector<256xf32>
    %30 = vector.shape_cast %29 : vector<256xf32> to vector<1x256xf32>
    %cst_32 = arith.constant 8.000000e+00 : f32
    %31 = vector.broadcast %cst_32 : f32 to vector<1x256xf32>
    %32 = arith.divf %30, %31 : vector<1x256xf32>
    %cst_33 = arith.constant dense<0.000000e+00> : vector<1x256xf32>
    %33 = tpu.matmul %32, %28, %cst_33 {dimension_numbers = #tpu.dot_dimension_numbers<[1], [0], [0], [1], [0, 0, 1, 1], [], []>} : vector<1x256xf32>, vector<256x256xf32>, vector<1x256xf32> -> vector<1x256xf32>
    %34 = vector.broadcast %33 : vector<1x256xf32> to vector<8x256xf32>
    %35 = arith.subf %27, %34 : vector<8x256xf32>
    %36 = arith.mulf %35, %35 : vector<8x256xf32>
    %cst_34 = arith.constant dense<0.000000e+00> : vector<256xf32>
    %37 = vector.multi_reduction <add>, %36, %cst_34 [0] : vector<8x256xf32> to vector<256xf32>
    %38 = vector.shape_cast %37 : vector<256xf32> to vector<1x256xf32>
    %cst_35 = arith.constant 8.000000e+00 : f32
    %39 = vector.broadcast %cst_35 : f32 to vector<1x256xf32>
    %40 = arith.divf %38, %39 : vector<1x256xf32>
    %cst_36 = arith.constant dense<0.000000e+00> : vector<1x256xf32>
    %41 = tpu.matmul %40, %28, %cst_36 {dimension_numbers = #tpu.dot_dimension_numbers<[1], [0], [0], [1], [0, 0, 1, 1], [], []>} : vector<1x256xf32>, vector<256x256xf32>, vector<1x256xf32> -> vector<1x256xf32>
    %cst_37 = arith.constant 9.99999974E-6 : f32
    %42 = vector.broadcast %cst_37 : f32 to vector<1x256xf32>
    %43 = arith.addf %41, %42 : vector<1x256xf32>
    %44 = math.rsqrt %43 : vector<1x256xf32>
    %45 = vector.broadcast %44 : vector<1x256xf32> to vector<8x256xf32>
    %46 = arith.mulf %35, %45 : vector<8x256xf32>
    %c0_38 = arith.constant 0 : index
    %c0_39 = arith.constant 0 : index
    %47 = vector.load %arg4[%c0_38, %c0_39] : memref<2x256xf32, #tpu.memory_space<vmem>>, vector<1x256xf32>
    %48 = vector.broadcast %47 : vector<1x256xf32> to vector<8x256xf32>
    %49 = arith.mulf %46, %48 : vector<8x256xf32>
    %c1_40 = arith.constant 1 : index
    %c0_41 = arith.constant 0 : index
    %50 = vector.load %arg4[%c1_40, %c0_41] : memref<2x256xf32, #tpu.memory_space<vmem>>, vector<1x256xf32>
    %51 = vector.broadcast %50 : vector<1x256xf32> to vector<8x256xf32>
    %52 = arith.addf %49, %51 : vector<8x256xf32>
    %cst_42 = arith.constant 0.000000e+00 : f32
    %53 = vector.broadcast %cst_42 : f32 to vector<8x256xf32>
    %54 = arith.maximumf %52, %53 : vector<8x256xf32>
    %c0_43 = arith.constant 0 : index
    %c0_44 = arith.constant 0 : index
    %c0_45 = arith.constant 0 : index
    %55 = vector.load %arg5[%c0_43, %c0_44, %c0_45] : memref<4x16x8xf32, #tpu.memory_space<vmem>>, vector<1x16x8xf32>
    %56 = vector.shape_cast %55 : vector<1x16x8xf32> to vector<16x8xf32>
    %cst_46 = arith.constant dense<0.000000e+00> : vector<16x256xf32>
    %57 = tpu.matmul %56, %54, %cst_46 {dimension_numbers = #tpu.dot_dimension_numbers<[1], [0], [0], [1], [0, 0, 1, 1], [], []>} : vector<16x8xf32>, vector<8x256xf32>, vector<16x256xf32> -> vector<16x256xf32>
    %c0_47 = arith.constant 0 : index
    %c0_48 = arith.constant 0 : index
    %c0_49 = arith.constant 0 : index
    %58 = vector.load %arg6[%c0_47, %c0_48, %c0_49] : memref<4x256x256xf32, #tpu.memory_space<vmem>>, vector<1x256x256xf32>
    %59 = vector.shape_cast %58 : vector<1x256x256xf32> to vector<256x256xf32>
    %cst_50 = arith.constant dense<0.000000e+00> : vector<16x256xf32>
    %60 = tpu.matmul %57, %59, %cst_50 {dimension_numbers = #tpu.dot_dimension_numbers<[1], [0], [0], [1], [0, 0, 1, 1], [], []>} : vector<16x256xf32>, vector<256x256xf32>, vector<16x256xf32> -> vector<16x256xf32>
    %c1_51 = arith.constant 1 : index
    %c0_52 = arith.constant 0 : index
    %c0_53 = arith.constant 0 : index
    %61 = vector.load %arg5[%c1_51, %c0_52, %c0_53] : memref<4x16x8xf32, #tpu.memory_space<vmem>>, vector<1x16x8xf32>
    %62 = vector.shape_cast %61 : vector<1x16x8xf32> to vector<16x8xf32>
    %cst_54 = arith.constant dense<0.000000e+00> : vector<16x256xf32>
    %63 = tpu.matmul %62, %54, %cst_54 {dimension_numbers = #tpu.dot_dimension_numbers<[1], [0], [0], [1], [0, 0, 1, 1], [], []>} : vector<16x8xf32>, vector<8x256xf32>, vector<16x256xf32> -> vector<16x256xf32>
    %c1_55 = arith.constant 1 : index
    %c0_56 = arith.constant 0 : index
    %c0_57 = arith.constant 0 : index
    %64 = vector.load %arg6[%c1_55, %c0_56, %c0_57] : memref<4x256x256xf32, #tpu.memory_space<vmem>>, vector<1x256x256xf32>
    %65 = vector.shape_cast %64 : vector<1x256x256xf32> to vector<256x256xf32>
    %cst_58 = arith.constant dense<0.000000e+00> : vector<16x256xf32>
    %66 = tpu.matmul %63, %65, %cst_58 {dimension_numbers = #tpu.dot_dimension_numbers<[1], [0], [0], [1], [0, 0, 1, 1], [], []>} : vector<16x256xf32>, vector<256x256xf32>, vector<16x256xf32> -> vector<16x256xf32>
    %67 = arith.addf %60, %66 : vector<16x256xf32>
    %c2_59 = arith.constant 2 : index
    %c0_60 = arith.constant 0 : index
    %c0_61 = arith.constant 0 : index
    %68 = vector.load %arg5[%c2_59, %c0_60, %c0_61] : memref<4x16x8xf32, #tpu.memory_space<vmem>>, vector<1x16x8xf32>
    %69 = vector.shape_cast %68 : vector<1x16x8xf32> to vector<16x8xf32>
    %cst_62 = arith.constant dense<0.000000e+00> : vector<16x256xf32>
    %70 = tpu.matmul %69, %54, %cst_62 {dimension_numbers = #tpu.dot_dimension_numbers<[1], [0], [0], [1], [0, 0, 1, 1], [], []>} : vector<16x8xf32>, vector<8x256xf32>, vector<16x256xf32> -> vector<16x256xf32>
    %c2_63 = arith.constant 2 : index
    %c0_64 = arith.constant 0 : index
    %c0_65 = arith.constant 0 : index
    %71 = vector.load %arg6[%c2_63, %c0_64, %c0_65] : memref<4x256x256xf32, #tpu.memory_space<vmem>>, vector<1x256x256xf32>
    %72 = vector.shape_cast %71 : vector<1x256x256xf32> to vector<256x256xf32>
    %cst_66 = arith.constant dense<0.000000e+00> : vector<16x256xf32>
    %73 = tpu.matmul %70, %72, %cst_66 {dimension_numbers = #tpu.dot_dimension_numbers<[1], [0], [0], [1], [0, 0, 1, 1], [], []>} : vector<16x256xf32>, vector<256x256xf32>, vector<16x256xf32> -> vector<16x256xf32>
    %74 = arith.addf %67, %73 : vector<16x256xf32>
    %c3_67 = arith.constant 3 : index
    %c0_68 = arith.constant 0 : index
    %c0_69 = arith.constant 0 : index
    %75 = vector.load %arg5[%c3_67, %c0_68, %c0_69] : memref<4x16x8xf32, #tpu.memory_space<vmem>>, vector<1x16x8xf32>
    %76 = vector.shape_cast %75 : vector<1x16x8xf32> to vector<16x8xf32>
    %cst_70 = arith.constant dense<0.000000e+00> : vector<16x256xf32>
    %77 = tpu.matmul %76, %54, %cst_70 {dimension_numbers = #tpu.dot_dimension_numbers<[1], [0], [0], [1], [0, 0, 1, 1], [], []>} : vector<16x8xf32>, vector<8x256xf32>, vector<16x256xf32> -> vector<16x256xf32>
    %c3_71 = arith.constant 3 : index
    %c0_72 = arith.constant 0 : index
    %c0_73 = arith.constant 0 : index
    %78 = vector.load %arg6[%c3_71, %c0_72, %c0_73] : memref<4x256x256xf32, #tpu.memory_space<vmem>>, vector<1x256x256xf32>
    %79 = vector.shape_cast %78 : vector<1x256x256xf32> to vector<256x256xf32>
    %cst_74 = arith.constant dense<0.000000e+00> : vector<16x256xf32>
    %80 = tpu.matmul %77, %79, %cst_74 {dimension_numbers = #tpu.dot_dimension_numbers<[1], [0], [0], [1], [0, 0, 1, 1], [], []>} : vector<16x256xf32>, vector<256x256xf32>, vector<16x256xf32> -> vector<16x256xf32>
    %81 = arith.addf %74, %80 : vector<16x256xf32>
    %c0_75 = arith.constant 0 : index
    %c0_76 = arith.constant 0 : index
    %82 = vector.load %arg7[%c0_75, %c0_76] : memref<256x256xf32, #tpu.memory_space<vmem>>, vector<256x256xf32>
    %cst_77 = arith.constant dense<0.000000e+00> : vector<256xf32>
    %83 = vector.multi_reduction <add>, %81, %cst_77 [0] : vector<16x256xf32> to vector<256xf32>
    %84 = vector.shape_cast %83 : vector<256xf32> to vector<1x256xf32>
    %cst_78 = arith.constant 1.600000e+01 : f32
    %85 = vector.broadcast %cst_78 : f32 to vector<1x256xf32>
    %86 = arith.divf %84, %85 : vector<1x256xf32>
    %cst_79 = arith.constant dense<0.000000e+00> : vector<1x256xf32>
    %87 = tpu.matmul %86, %82, %cst_79 {dimension_numbers = #tpu.dot_dimension_numbers<[1], [0], [0], [1], [0, 0, 1, 1], [], []>} : vector<1x256xf32>, vector<256x256xf32>, vector<1x256xf32> -> vector<1x256xf32>
    %88 = vector.broadcast %87 : vector<1x256xf32> to vector<16x256xf32>
    %89 = arith.subf %81, %88 : vector<16x256xf32>
    %90 = arith.mulf %89, %89 : vector<16x256xf32>
    %cst_80 = arith.constant dense<0.000000e+00> : vector<256xf32>
    %91 = vector.multi_reduction <add>, %90, %cst_80 [0] : vector<16x256xf32> to vector<256xf32>
    %92 = vector.shape_cast %91 : vector<256xf32> to vector<1x256xf32>
    %cst_81 = arith.constant 1.600000e+01 : f32
    %93 = vector.broadcast %cst_81 : f32 to vector<1x256xf32>
    %94 = arith.divf %92, %93 : vector<1x256xf32>
    %cst_82 = arith.constant dense<0.000000e+00> : vector<1x256xf32>
    %95 = tpu.matmul %94, %82, %cst_82 {dimension_numbers = #tpu.dot_dimension_numbers<[1], [0], [0], [1], [0, 0, 1, 1], [], []>} : vector<1x256xf32>, vector<256x256xf32>, vector<1x256xf32> -> vector<1x256xf32>
    %cst_83 = arith.constant 9.99999974E-6 : f32
    %96 = vector.broadcast %cst_83 : f32 to vector<1x256xf32>
    %97 = arith.addf %95, %96 : vector<1x256xf32>
    %98 = math.rsqrt %97 : vector<1x256xf32>
    %99 = vector.broadcast %98 : vector<1x256xf32> to vector<16x256xf32>
    %100 = arith.mulf %89, %99 : vector<16x256xf32>
    %c0_84 = arith.constant 0 : index
    %c0_85 = arith.constant 0 : index
    %101 = vector.load %arg8[%c0_84, %c0_85] : memref<2x256xf32, #tpu.memory_space<vmem>>, vector<1x256xf32>
    %102 = vector.broadcast %101 : vector<1x256xf32> to vector<16x256xf32>
    %103 = arith.mulf %100, %102 : vector<16x256xf32>
    %c1_86 = arith.constant 1 : index
    %c0_87 = arith.constant 0 : index
    %104 = vector.load %arg8[%c1_86, %c0_87] : memref<2x256xf32, #tpu.memory_space<vmem>>, vector<1x256xf32>
    %105 = vector.broadcast %104 : vector<1x256xf32> to vector<16x256xf32>
    %106 = arith.addf %103, %105 : vector<16x256xf32>
    %cst_88 = arith.constant 0.000000e+00 : f32
    %107 = vector.broadcast %cst_88 : f32 to vector<16x256xf32>
    %108 = arith.maximumf %106, %107 : vector<16x256xf32>
    %c0_89 = arith.constant 0 : index
    %c0_90 = arith.constant 0 : index
    %c0_91 = arith.constant 0 : index
    %109 = vector.load %arg9[%c0_89, %c0_90, %c0_91] : memref<4x32x16xf32, #tpu.memory_space<vmem>>, vector<1x32x16xf32>
    %110 = vector.shape_cast %109 : vector<1x32x16xf32> to vector<32x16xf32>
    %cst_92 = arith.constant dense<0.000000e+00> : vector<32x256xf32>
    %111 = tpu.matmul %110, %108, %cst_92 {dimension_numbers = #tpu.dot_dimension_numbers<[1], [0], [0], [1], [0, 0, 1, 1], [], []>} : vector<32x16xf32>, vector<16x256xf32>, vector<32x256xf32> -> vector<32x256xf32>
    %c0_93 = arith.constant 0 : index
    %c0_94 = arith.constant 0 : index
    %c0_95 = arith.constant 0 : index
    %112 = vector.load %arg10[%c0_93, %c0_94, %c0_95] : memref<4x256x256xf32, #tpu.memory_space<vmem>>, vector<1x256x256xf32>
    %113 = vector.shape_cast %112 : vector<1x256x256xf32> to vector<256x256xf32>
    %cst_96 = arith.constant dense<0.000000e+00> : vector<32x256xf32>
    %114 = tpu.matmul %111, %113, %cst_96 {dimension_numbers = #tpu.dot_dimension_numbers<[1], [0], [0], [1], [0, 0, 1, 1], [], []>} : vector<32x256xf32>, vector<256x256xf32>, vector<32x256xf32> -> vector<32x256xf32>
    %c1_97 = arith.constant 1 : index
    %c0_98 = arith.constant 0 : index
    %c0_99 = arith.constant 0 : index
    %115 = vector.load %arg9[%c1_97, %c0_98, %c0_99] : memref<4x32x16xf32, #tpu.memory_space<vmem>>, vector<1x32x16xf32>
    %116 = vector.shape_cast %115 : vector<1x32x16xf32> to vector<32x16xf32>
    %cst_100 = arith.constant dense<0.000000e+00> : vector<32x256xf32>
    %117 = tpu.matmul %116, %108, %cst_100 {dimension_numbers = #tpu.dot_dimension_numbers<[1], [0], [0], [1], [0, 0, 1, 1], [], []>} : vector<32x16xf32>, vector<16x256xf32>, vector<32x256xf32> -> vector<32x256xf32>
    %c1_101 = arith.constant 1 : index
    %c0_102 = arith.constant 0 : index
    %c0_103 = arith.constant 0 : index
    %118 = vector.load %arg10[%c1_101, %c0_102, %c0_103] : memref<4x256x256xf32, #tpu.memory_space<vmem>>, vector<1x256x256xf32>
    %119 = vector.shape_cast %118 : vector<1x256x256xf32> to vector<256x256xf32>
    %cst_104 = arith.constant dense<0.000000e+00> : vector<32x256xf32>
    %120 = tpu.matmul %117, %119, %cst_104 {dimension_numbers = #tpu.dot_dimension_numbers<[1], [0], [0], [1], [0, 0, 1, 1], [], []>} : vector<32x256xf32>, vector<256x256xf32>, vector<32x256xf32> -> vector<32x256xf32>
    %121 = arith.addf %114, %120 : vector<32x256xf32>
    %c2_105 = arith.constant 2 : index
    %c0_106 = arith.constant 0 : index
    %c0_107 = arith.constant 0 : index
    %122 = vector.load %arg9[%c2_105, %c0_106, %c0_107] : memref<4x32x16xf32, #tpu.memory_space<vmem>>, vector<1x32x16xf32>
    %123 = vector.shape_cast %122 : vector<1x32x16xf32> to vector<32x16xf32>
    %cst_108 = arith.constant dense<0.000000e+00> : vector<32x256xf32>
    %124 = tpu.matmul %123, %108, %cst_108 {dimension_numbers = #tpu.dot_dimension_numbers<[1], [0], [0], [1], [0, 0, 1, 1], [], []>} : vector<32x16xf32>, vector<16x256xf32>, vector<32x256xf32> -> vector<32x256xf32>
    %c2_109 = arith.constant 2 : index
    %c0_110 = arith.constant 0 : index
    %c0_111 = arith.constant 0 : index
    %125 = vector.load %arg10[%c2_109, %c0_110, %c0_111] : memref<4x256x256xf32, #tpu.memory_space<vmem>>, vector<1x256x256xf32>
    %126 = vector.shape_cast %125 : vector<1x256x256xf32> to vector<256x256xf32>
    %cst_112 = arith.constant dense<0.000000e+00> : vector<32x256xf32>
    %127 = tpu.matmul %124, %126, %cst_112 {dimension_numbers = #tpu.dot_dimension_numbers<[1], [0], [0], [1], [0, 0, 1, 1], [], []>} : vector<32x256xf32>, vector<256x256xf32>, vector<32x256xf32> -> vector<32x256xf32>
    %128 = arith.addf %121, %127 : vector<32x256xf32>
    %c3_113 = arith.constant 3 : index
    %c0_114 = arith.constant 0 : index
    %c0_115 = arith.constant 0 : index
    %129 = vector.load %arg9[%c3_113, %c0_114, %c0_115] : memref<4x32x16xf32, #tpu.memory_space<vmem>>, vector<1x32x16xf32>
    %130 = vector.shape_cast %129 : vector<1x32x16xf32> to vector<32x16xf32>
    %cst_116 = arith.constant dense<0.000000e+00> : vector<32x256xf32>
    %131 = tpu.matmul %130, %108, %cst_116 {dimension_numbers = #tpu.dot_dimension_numbers<[1], [0], [0], [1], [0, 0, 1, 1], [], []>} : vector<32x16xf32>, vector<16x256xf32>, vector<32x256xf32> -> vector<32x256xf32>
    %c3_117 = arith.constant 3 : index
    %c0_118 = arith.constant 0 : index
    %c0_119 = arith.constant 0 : index
    %132 = vector.load %arg10[%c3_117, %c0_118, %c0_119] : memref<4x256x256xf32, #tpu.memory_space<vmem>>, vector<1x256x256xf32>
    %133 = vector.shape_cast %132 : vector<1x256x256xf32> to vector<256x256xf32>
    %cst_120 = arith.constant dense<0.000000e+00> : vector<32x256xf32>
    %134 = tpu.matmul %131, %133, %cst_120 {dimension_numbers = #tpu.dot_dimension_numbers<[1], [0], [0], [1], [0, 0, 1, 1], [], []>} : vector<32x256xf32>, vector<256x256xf32>, vector<32x256xf32> -> vector<32x256xf32>
    %135 = arith.addf %128, %134 : vector<32x256xf32>
    %c0_121 = arith.constant 0 : index
    %c0_122 = arith.constant 0 : index
    %136 = vector.load %arg11[%c0_121, %c0_122] : memref<256x256xf32, #tpu.memory_space<vmem>>, vector<256x256xf32>
    %cst_123 = arith.constant dense<0.000000e+00> : vector<256xf32>
    %137 = vector.multi_reduction <add>, %135, %cst_123 [0] : vector<32x256xf32> to vector<256xf32>
    %138 = vector.shape_cast %137 : vector<256xf32> to vector<1x256xf32>
    %cst_124 = arith.constant 3.200000e+01 : f32
    %139 = vector.broadcast %cst_124 : f32 to vector<1x256xf32>
    %140 = arith.divf %138, %139 : vector<1x256xf32>
    %cst_125 = arith.constant dense<0.000000e+00> : vector<1x256xf32>
    %141 = tpu.matmul %140, %136, %cst_125 {dimension_numbers = #tpu.dot_dimension_numbers<[1], [0], [0], [1], [0, 0, 1, 1], [], []>} : vector<1x256xf32>, vector<256x256xf32>, vector<1x256xf32> -> vector<1x256xf32>
    %142 = vector.broadcast %141 : vector<1x256xf32> to vector<32x256xf32>
    %143 = arith.subf %135, %142 : vector<32x256xf32>
    %144 = arith.mulf %143, %143 : vector<32x256xf32>
    %cst_126 = arith.constant dense<0.000000e+00> : vector<256xf32>
    %145 = vector.multi_reduction <add>, %144, %cst_126 [0] : vector<32x256xf32> to vector<256xf32>
    %146 = vector.shape_cast %145 : vector<256xf32> to vector<1x256xf32>
    %cst_127 = arith.constant 3.200000e+01 : f32
    %147 = vector.broadcast %cst_127 : f32 to vector<1x256xf32>
    %148 = arith.divf %146, %147 : vector<1x256xf32>
    %cst_128 = arith.constant dense<0.000000e+00> : vector<1x256xf32>
    %149 = tpu.matmul %148, %136, %cst_128 {dimension_numbers = #tpu.dot_dimension_numbers<[1], [0], [0], [1], [0, 0, 1, 1], [], []>} : vector<1x256xf32>, vector<256x256xf32>, vector<1x256xf32> -> vector<1x256xf32>
    %cst_129 = arith.constant 9.99999974E-6 : f32
    %150 = vector.broadcast %cst_129 : f32 to vector<1x256xf32>
    %151 = arith.addf %149, %150 : vector<1x256xf32>
    %152 = math.rsqrt %151 : vector<1x256xf32>
    %153 = vector.broadcast %152 : vector<1x256xf32> to vector<32x256xf32>
    %154 = arith.mulf %143, %153 : vector<32x256xf32>
    %c0_130 = arith.constant 0 : index
    %c0_131 = arith.constant 0 : index
    %155 = vector.load %arg12[%c0_130, %c0_131] : memref<2x256xf32, #tpu.memory_space<vmem>>, vector<1x256xf32>
    %156 = vector.broadcast %155 : vector<1x256xf32> to vector<32x256xf32>
    %157 = arith.mulf %154, %156 : vector<32x256xf32>
    %c1_132 = arith.constant 1 : index
    %c0_133 = arith.constant 0 : index
    %158 = vector.load %arg12[%c1_132, %c0_133] : memref<2x256xf32, #tpu.memory_space<vmem>>, vector<1x256xf32>
    %159 = vector.broadcast %158 : vector<1x256xf32> to vector<32x256xf32>
    %160 = arith.addf %157, %159 : vector<32x256xf32>
    %cst_134 = arith.constant 0.000000e+00 : f32
    %161 = vector.broadcast %cst_134 : f32 to vector<32x256xf32>
    %162 = arith.maximumf %160, %161 : vector<32x256xf32>
    %c0_135 = arith.constant 0 : index
    %c0_136 = arith.constant 0 : index
    %c0_137 = arith.constant 0 : index
    %163 = vector.load %arg13[%c0_135, %c0_136, %c0_137] : memref<4x64x32xf32, #tpu.memory_space<vmem>>, vector<1x64x32xf32>
    %164 = vector.shape_cast %163 : vector<1x64x32xf32> to vector<64x32xf32>
    %cst_138 = arith.constant dense<0.000000e+00> : vector<64x256xf32>
    %165 = tpu.matmul %164, %162, %cst_138 {dimension_numbers = #tpu.dot_dimension_numbers<[1], [0], [0], [1], [0, 0, 1, 1], [], []>} : vector<64x32xf32>, vector<32x256xf32>, vector<64x256xf32> -> vector<64x256xf32>
    %c0_139 = arith.constant 0 : index
    %c0_140 = arith.constant 0 : index
    %c0_141 = arith.constant 0 : index
    %166 = vector.load %arg14[%c0_139, %c0_140, %c0_141] : memref<4x256x256xf32, #tpu.memory_space<vmem>>, vector<1x256x256xf32>
    %167 = vector.shape_cast %166 : vector<1x256x256xf32> to vector<256x256xf32>
    %cst_142 = arith.constant dense<0.000000e+00> : vector<64x256xf32>
    %168 = tpu.matmul %165, %167, %cst_142 {dimension_numbers = #tpu.dot_dimension_numbers<[1], [0], [0], [1], [0, 0, 1, 1], [], []>} : vector<64x256xf32>, vector<256x256xf32>, vector<64x256xf32> -> vector<64x256xf32>
    %c1_143 = arith.constant 1 : index
    %c0_144 = arith.constant 0 : index
    %c0_145 = arith.constant 0 : index
    %169 = vector.load %arg13[%c1_143, %c0_144, %c0_145] : memref<4x64x32xf32, #tpu.memory_space<vmem>>, vector<1x64x32xf32>
    %170 = vector.shape_cast %169 : vector<1x64x32xf32> to vector<64x32xf32>
    %cst_146 = arith.constant dense<0.000000e+00> : vector<64x256xf32>
    %171 = tpu.matmul %170, %162, %cst_146 {dimension_numbers = #tpu.dot_dimension_numbers<[1], [0], [0], [1], [0, 0, 1, 1], [], []>} : vector<64x32xf32>, vector<32x256xf32>, vector<64x256xf32> -> vector<64x256xf32>
    %c1_147 = arith.constant 1 : index
    %c0_148 = arith.constant 0 : index
    %c0_149 = arith.constant 0 : index
    %172 = vector.load %arg14[%c1_147, %c0_148, %c0_149] : memref<4x256x256xf32, #tpu.memory_space<vmem>>, vector<1x256x256xf32>
    %173 = vector.shape_cast %172 : vector<1x256x256xf32> to vector<256x256xf32>
    %cst_150 = arith.constant dense<0.000000e+00> : vector<64x256xf32>
    %174 = tpu.matmul %171, %173, %cst_150 {dimension_numbers = #tpu.dot_dimension_numbers<[1], [0], [0], [1], [0, 0, 1, 1], [], []>} : vector<64x256xf32>, vector<256x256xf32>, vector<64x256xf32> -> vector<64x256xf32>
    %175 = arith.addf %168, %174 : vector<64x256xf32>
    %c2_151 = arith.constant 2 : index
    %c0_152 = arith.constant 0 : index
    %c0_153 = arith.constant 0 : index
    %176 = vector.load %arg13[%c2_151, %c0_152, %c0_153] : memref<4x64x32xf32, #tpu.memory_space<vmem>>, vector<1x64x32xf32>
    %177 = vector.shape_cast %176 : vector<1x64x32xf32> to vector<64x32xf32>
    %cst_154 = arith.constant dense<0.000000e+00> : vector<64x256xf32>
    %178 = tpu.matmul %177, %162, %cst_154 {dimension_numbers = #tpu.dot_dimension_numbers<[1], [0], [0], [1], [0, 0, 1, 1], [], []>} : vector<64x32xf32>, vector<32x256xf32>, vector<64x256xf32> -> vector<64x256xf32>
    %c2_155 = arith.constant 2 : index
    %c0_156 = arith.constant 0 : index
    %c0_157 = arith.constant 0 : index
    %179 = vector.load %arg14[%c2_155, %c0_156, %c0_157] : memref<4x256x256xf32, #tpu.memory_space<vmem>>, vector<1x256x256xf32>
    %180 = vector.shape_cast %179 : vector<1x256x256xf32> to vector<256x256xf32>
    %cst_158 = arith.constant dense<0.000000e+00> : vector<64x256xf32>
    %181 = tpu.matmul %178, %180, %cst_158 {dimension_numbers = #tpu.dot_dimension_numbers<[1], [0], [0], [1], [0, 0, 1, 1], [], []>} : vector<64x256xf32>, vector<256x256xf32>, vector<64x256xf32> -> vector<64x256xf32>
    %182 = arith.addf %175, %181 : vector<64x256xf32>
    %c3_159 = arith.constant 3 : index
    %c0_160 = arith.constant 0 : index
    %c0_161 = arith.constant 0 : index
    %183 = vector.load %arg13[%c3_159, %c0_160, %c0_161] : memref<4x64x32xf32, #tpu.memory_space<vmem>>, vector<1x64x32xf32>
    %184 = vector.shape_cast %183 : vector<1x64x32xf32> to vector<64x32xf32>
    %cst_162 = arith.constant dense<0.000000e+00> : vector<64x256xf32>
    %185 = tpu.matmul %184, %162, %cst_162 {dimension_numbers = #tpu.dot_dimension_numbers<[1], [0], [0], [1], [0, 0, 1, 1], [], []>} : vector<64x32xf32>, vector<32x256xf32>, vector<64x256xf32> -> vector<64x256xf32>
    %c3_163 = arith.constant 3 : index
    %c0_164 = arith.constant 0 : index
    %c0_165 = arith.constant 0 : index
    %186 = vector.load %arg14[%c3_163, %c0_164, %c0_165] : memref<4x256x256xf32, #tpu.memory_space<vmem>>, vector<1x256x256xf32>
    %187 = vector.shape_cast %186 : vector<1x256x256xf32> to vector<256x256xf32>
    %cst_166 = arith.constant dense<0.000000e+00> : vector<64x256xf32>
    %188 = tpu.matmul %185, %187, %cst_166 {dimension_numbers = #tpu.dot_dimension_numbers<[1], [0], [0], [1], [0, 0, 1, 1], [], []>} : vector<64x256xf32>, vector<256x256xf32>, vector<64x256xf32> -> vector<64x256xf32>
    %189 = arith.addf %182, %188 : vector<64x256xf32>
    %c0_167 = arith.constant 0 : index
    %c0_168 = arith.constant 0 : index
    %190 = vector.load %arg15[%c0_167, %c0_168] : memref<256x256xf32, #tpu.memory_space<vmem>>, vector<256x256xf32>
    %cst_169 = arith.constant dense<0.000000e+00> : vector<256xf32>
    %191 = vector.multi_reduction <add>, %189, %cst_169 [0] : vector<64x256xf32> to vector<256xf32>
    %192 = vector.shape_cast %191 : vector<256xf32> to vector<1x256xf32>
    %cst_170 = arith.constant 6.400000e+01 : f32
    %193 = vector.broadcast %cst_170 : f32 to vector<1x256xf32>
    %194 = arith.divf %192, %193 : vector<1x256xf32>
    %cst_171 = arith.constant dense<0.000000e+00> : vector<1x256xf32>
    %195 = tpu.matmul %194, %190, %cst_171 {dimension_numbers = #tpu.dot_dimension_numbers<[1], [0], [0], [1], [0, 0, 1, 1], [], []>} : vector<1x256xf32>, vector<256x256xf32>, vector<1x256xf32> -> vector<1x256xf32>
    %196 = vector.broadcast %195 : vector<1x256xf32> to vector<64x256xf32>
    %197 = arith.subf %189, %196 : vector<64x256xf32>
    %198 = arith.mulf %197, %197 : vector<64x256xf32>
    %cst_172 = arith.constant dense<0.000000e+00> : vector<256xf32>
    %199 = vector.multi_reduction <add>, %198, %cst_172 [0] : vector<64x256xf32> to vector<256xf32>
    %200 = vector.shape_cast %199 : vector<256xf32> to vector<1x256xf32>
    %cst_173 = arith.constant 6.400000e+01 : f32
    %201 = vector.broadcast %cst_173 : f32 to vector<1x256xf32>
    %202 = arith.divf %200, %201 : vector<1x256xf32>
    %cst_174 = arith.constant dense<0.000000e+00> : vector<1x256xf32>
    %203 = tpu.matmul %202, %190, %cst_174 {dimension_numbers = #tpu.dot_dimension_numbers<[1], [0], [0], [1], [0, 0, 1, 1], [], []>} : vector<1x256xf32>, vector<256x256xf32>, vector<1x256xf32> -> vector<1x256xf32>
    %cst_175 = arith.constant 9.99999974E-6 : f32
    %204 = vector.broadcast %cst_175 : f32 to vector<1x256xf32>
    %205 = arith.addf %203, %204 : vector<1x256xf32>
    %206 = math.rsqrt %205 : vector<1x256xf32>
    %207 = vector.broadcast %206 : vector<1x256xf32> to vector<64x256xf32>
    %208 = arith.mulf %197, %207 : vector<64x256xf32>
    %c0_176 = arith.constant 0 : index
    %c0_177 = arith.constant 0 : index
    %209 = vector.load %arg16[%c0_176, %c0_177] : memref<2x256xf32, #tpu.memory_space<vmem>>, vector<1x256xf32>
    %210 = vector.broadcast %209 : vector<1x256xf32> to vector<64x256xf32>
    %211 = arith.mulf %208, %210 : vector<64x256xf32>
    %c1_178 = arith.constant 1 : index
    %c0_179 = arith.constant 0 : index
    %212 = vector.load %arg16[%c1_178, %c0_179] : memref<2x256xf32, #tpu.memory_space<vmem>>, vector<1x256xf32>
    %213 = vector.broadcast %212 : vector<1x256xf32> to vector<64x256xf32>
    %214 = arith.addf %211, %213 : vector<64x256xf32>
    %cst_180 = arith.constant 0.000000e+00 : f32
    %215 = vector.broadcast %cst_180 : f32 to vector<64x256xf32>
    %216 = arith.maximumf %214, %215 : vector<64x256xf32>
    %c0_181 = arith.constant 0 : index
    %c0_182 = arith.constant 0 : index
    %c0_183 = arith.constant 0 : index
    %217 = vector.load %arg17[%c0_181, %c0_182, %c0_183] : memref<4x128x64xf32, #tpu.memory_space<vmem>>, vector<1x128x64xf32>
    %218 = vector.shape_cast %217 : vector<1x128x64xf32> to vector<128x64xf32>
    %cst_184 = arith.constant dense<0.000000e+00> : vector<128x256xf32>
    %219 = tpu.matmul %218, %216, %cst_184 {dimension_numbers = #tpu.dot_dimension_numbers<[1], [0], [0], [1], [0, 0, 1, 1], [], []>} : vector<128x64xf32>, vector<64x256xf32>, vector<128x256xf32> -> vector<128x256xf32>
    %c0_185 = arith.constant 0 : index
    %c0_186 = arith.constant 0 : index
    %c0_187 = arith.constant 0 : index
    %220 = vector.load %arg18[%c0_185, %c0_186, %c0_187] : memref<4x256x192xf32, #tpu.memory_space<vmem>>, vector<1x256x192xf32>
    %221 = vector.shape_cast %220 : vector<1x256x192xf32> to vector<256x192xf32>
    %cst_188 = arith.constant dense<0.000000e+00> : vector<128x192xf32>
    %222 = tpu.matmul %219, %221, %cst_188 {dimension_numbers = #tpu.dot_dimension_numbers<[1], [0], [0], [1], [0, 0, 1, 1], [], []>} : vector<128x256xf32>, vector<256x192xf32>, vector<128x192xf32> -> vector<128x192xf32>
    %c1_189 = arith.constant 1 : index
    %c0_190 = arith.constant 0 : index
    %c0_191 = arith.constant 0 : index
    %223 = vector.load %arg17[%c1_189, %c0_190, %c0_191] : memref<4x128x64xf32, #tpu.memory_space<vmem>>, vector<1x128x64xf32>
    %224 = vector.shape_cast %223 : vector<1x128x64xf32> to vector<128x64xf32>
    %cst_192 = arith.constant dense<0.000000e+00> : vector<128x256xf32>
    %225 = tpu.matmul %224, %216, %cst_192 {dimension_numbers = #tpu.dot_dimension_numbers<[1], [0], [0], [1], [0, 0, 1, 1], [], []>} : vector<128x64xf32>, vector<64x256xf32>, vector<128x256xf32> -> vector<128x256xf32>
    %c1_193 = arith.constant 1 : index
    %c0_194 = arith.constant 0 : index
    %c0_195 = arith.constant 0 : index
    %226 = vector.load %arg18[%c1_193, %c0_194, %c0_195] : memref<4x256x192xf32, #tpu.memory_space<vmem>>, vector<1x256x192xf32>
    %227 = vector.shape_cast %226 : vector<1x256x192xf32> to vector<256x192xf32>
    %cst_196 = arith.constant dense<0.000000e+00> : vector<128x192xf32>
    %228 = tpu.matmul %225, %227, %cst_196 {dimension_numbers = #tpu.dot_dimension_numbers<[1], [0], [0], [1], [0, 0, 1, 1], [], []>} : vector<128x256xf32>, vector<256x192xf32>, vector<128x192xf32> -> vector<128x192xf32>
    %229 = arith.addf %222, %228 : vector<128x192xf32>
    %c2_197 = arith.constant 2 : index
    %c0_198 = arith.constant 0 : index
    %c0_199 = arith.constant 0 : index
    %230 = vector.load %arg17[%c2_197, %c0_198, %c0_199] : memref<4x128x64xf32, #tpu.memory_space<vmem>>, vector<1x128x64xf32>
    %231 = vector.shape_cast %230 : vector<1x128x64xf32> to vector<128x64xf32>
    %cst_200 = arith.constant dense<0.000000e+00> : vector<128x256xf32>
    %232 = tpu.matmul %231, %216, %cst_200 {dimension_numbers = #tpu.dot_dimension_numbers<[1], [0], [0], [1], [0, 0, 1, 1], [], []>} : vector<128x64xf32>, vector<64x256xf32>, vector<128x256xf32> -> vector<128x256xf32>
    %c2_201 = arith.constant 2 : index
    %c0_202 = arith.constant 0 : index
    %c0_203 = arith.constant 0 : index
    %233 = vector.load %arg18[%c2_201, %c0_202, %c0_203] : memref<4x256x192xf32, #tpu.memory_space<vmem>>, vector<1x256x192xf32>
    %234 = vector.shape_cast %233 : vector<1x256x192xf32> to vector<256x192xf32>
    %cst_204 = arith.constant dense<0.000000e+00> : vector<128x192xf32>
    %235 = tpu.matmul %232, %234, %cst_204 {dimension_numbers = #tpu.dot_dimension_numbers<[1], [0], [0], [1], [0, 0, 1, 1], [], []>} : vector<128x256xf32>, vector<256x192xf32>, vector<128x192xf32> -> vector<128x192xf32>
    %236 = arith.addf %229, %235 : vector<128x192xf32>
    %c3_205 = arith.constant 3 : index
    %c0_206 = arith.constant 0 : index
    %c0_207 = arith.constant 0 : index
    %237 = vector.load %arg17[%c3_205, %c0_206, %c0_207] : memref<4x128x64xf32, #tpu.memory_space<vmem>>, vector<1x128x64xf32>
    %238 = vector.shape_cast %237 : vector<1x128x64xf32> to vector<128x64xf32>
    %cst_208 = arith.constant dense<0.000000e+00> : vector<128x256xf32>
    %239 = tpu.matmul %238, %216, %cst_208 {dimension_numbers = #tpu.dot_dimension_numbers<[1], [0], [0], [1], [0, 0, 1, 1], [], []>} : vector<128x64xf32>, vector<64x256xf32>, vector<128x256xf32> -> vector<128x256xf32>
    %c3_209 = arith.constant 3 : index
    %c0_210 = arith.constant 0 : index
    %c0_211 = arith.constant 0 : index
    %240 = vector.load %arg18[%c3_209, %c0_210, %c0_211] : memref<4x256x192xf32, #tpu.memory_space<vmem>>, vector<1x256x192xf32>
    %241 = vector.shape_cast %240 : vector<1x256x192xf32> to vector<256x192xf32>
    %cst_212 = arith.constant dense<0.000000e+00> : vector<128x192xf32>
    %242 = tpu.matmul %239, %241, %cst_212 {dimension_numbers = #tpu.dot_dimension_numbers<[1], [0], [0], [1], [0, 0, 1, 1], [], []>} : vector<128x256xf32>, vector<256x192xf32>, vector<128x192xf32> -> vector<128x192xf32>
    %243 = arith.addf %236, %242 : vector<128x192xf32>
    %244 = math.tanh %243 : vector<128x192xf32>
    %c0_213 = arith.constant 0 : index
    %c0_214 = arith.constant 0 : index
    %245 = vector.load %arg19[%c0_213, %c0_214] : memref<128x192xf32, #tpu.memory_space<vmem>>, vector<128x192xf32>
    tpu.vector_store %arg19[%c0_213, %c0_214], %244 {strides = array<i32>} : memref<128x192xf32, #tpu.memory_space<vmem>>, vector<128x192xf32>,
    return
  }
}

</mosaic_0001>

<bundles_post_ra>
// kernel: gnet_forward.1
= control target key start
LH: loop header
LB: loop body
LE: loop exit
PB: predicated region body
PF: predicated region fallthrough
CT: control target
= control target key end

     0   :  { %s12881_s0 = inlined_call_operand.hbm [shape: f32[2,16], index: 0, kind: input, shape index: {}]   ;;  %s12882_s1 = inlined_call_operand.vmem [shape: f32[4,8,2], index: 1, kind: input, shape index: {}]   ;;  %s12883_s2 = inlined_call_operand.hbm [shape: f32[4,16,256], index: 2, kind: input, shape index: {}]   ;;  %s12884_s3 = inlined_call_operand.vmem [shape: f32[256,256], index: 3, kind: input, shape index: {}]   ;;  %s12885_s4 = inlined_call_operand.vmem [shape: f32[2,256], index: 4, kind: input, shape index: {}]   ;;  %s12886_s5 = inlined_call_operand.vmem [shape: f32[4,16,8], index: 5, kind: input, shape index: {}]   ;;  %s12887_s6 = inlined_call_operand.vmem [shape: f32[4,256,256], index: 6, kind: input, shape index: {}]   ;;  %s12888_s7 = inlined_call_operand.hbm [shape: f32[256,256], index: 7, kind: input, shape index: {}]   ;;  %s12889_s8 = inlined_call_operand.vmem [shape: f32[2,256], index: 8, kind: input, shape index: {}]   ;;  %s12890_s9 = inlined_call_operand.vmem [shape: f32[4,32,16], index: 9, kind: input, shape index: {}]   ;;  %s12891_s10 = inlined_call_operand.vmem [shape: f32[4,256,256], index: 10, kind: input, shape index: {}]   ;;  %s12892_s11 = inlined_call_operand.hbm [shape: f32[256,256], index: 11, kind: input, shape index: {}]   ;;  %s12893_s12 = inlined_call_operand.vmem [shape: f32[2,256], index: 12, kind: input, shape index: {}]   ;;  %s12894_s13 = inlined_call_operand.vmem [shape: f32[4,64,32], index: 13, kind: input, shape index: {}]   ;;  %s12895_s14 = inlined_call_operand.hbm [shape: f32[4,256,256], index: 14, kind: input, shape index: {}]   ;;  %s12896_s15 = inlined_call_operand.hbm [shape: f32[256,256], index: 15, kind: input, shape index: {}]   ;;  %s12897_s16 = inlined_call_operand.vmem [shape: f32[2,256], index: 16, kind: input, shape index: {}]   ;;  %s12898_s17 = inlined_call_operand.vmem [shape: f32[4,128,64], index: 17, kind: input, shape index: {}]   ;;  %s12899_s18 = inlined_call_operand.vmem [shape: f32[4,256,192], index: 18, kind: input, shape index: {}]   ;;  %s12900_s19 = inlined_call_operand.vmem [shape: f32[128,192], index: 19, kind: output, shape index: {}]  }
   0x1   :  { %12923 = sst [smem:[#allocation58_spill]] %s12881_s0 }
   0x2   :  { %12924 = sst [smem:[#allocation59_spill]] %s12882_s1 }
   0x3   :  { %12925 = sst [smem:[#allocation60_spill]] %s12883_s2 }
   0x4   :  { %12926 = sst [smem:[#allocation61_spill]] %s12884_s3 }
   0x5   :  { %24 = vsyncpa [#allocation3], 0 }
   0x6   :  { %25 = vsyncpa [#allocation5], 0 }
   0x7   :  { %26 = vsyncpa [#allocation8], 0 }
   0x8   :  { %27 = vsyncpa [#allocation11], 0  ;;  %s8461_s0 = smov [#allocation4]  }
   0x9   :  { %s45_s30 = sshll.u32 %s8461_s0, 4  ;;  %s46_s30 = int_to_ptr.vmem [resolvable:$true] %s45_s30 }
   0xa   :  { %s8341_s20 = scalar_lea.vmem %s46_s30, 2048  ;;  %p8346_p1 = scmp.lt.s32.totalorder %s46_s30, %s46_s30 }
   0xb   :  { %p8342_p0 = scmp.ne.s32.totalorder %s46_s30, %s8341_s20  ;;  %p8347_p2 = scmp.lt.s32.totalorder %s8341_s20, %s8341_s20 }
   0xd   :  { %p8348_p3 = por %p8347_p2, %p8346_p1 }
   0xf   :  { %p8349_p4 = pnand %p8348_p3, %p8342_p0 }
  0x11   :  { %8352 = shalt.err (!%p8349_p4)
}
  0x12   :  { %s8462_s21 = smov 256   ;;  %s8463_s1 = smov 16  }
  0x13   :  { %s12927_s23 = sld [smem:[#allocation60_spill]]  ;;  %s8464_s24 = smov [#allocation7]  }
  0x14   :  { %s83_s25 = sshll.u32 %s8464_s24, 4  ;;  %s8465_s3 = smov [#allocation2]   ;;  %s84_s25 = int_to_ptr.vmem [resolvable:$true] %s83_s25 }
  0x15   :  { %s34_s26 = sshll.u32 %s8465_s3, 4  ;;  %s8361_s27 = scalar_lea.vmem %s84_s25, 8192  ;;  %s35_s26 = int_to_ptr.vmem [resolvable:$true] %s34_s26 }
  0x16   :  { %p8362_p5 = scmp.ne.s32.totalorder %s84_s25, %s8361_s27  ;;  %p8366_p6 = scmp.lt.s32.totalorder %s84_s25, %s84_s25 }
  0x17   :  { %p8367_p7 = scmp.lt.s32.totalorder %s8361_s27, %s8361_s27 }
  0x19   :  { %51 = dma.hbm_to_vmem [thread:$0]  %s12927_s23, 2048, %s46_s30, [#allocation5], %s8462_s21, %s8462_s21, %s8463_s1  }
  0x1a   :  { %p8368_p8 = por %p8367_p7, %p8366_p6 }
  0x1c   :  { %p8369_p9 = pnand %p8368_p8, %p8362_p5 }
  0x1e   :  { %8372 = shalt.err (!%p8369_p9)
}
  0x1f   :  { %89 = dma.hbm_to_vmem [thread:$0]  %s12892_s11, 8192, %s84_s25, [#allocation8], %s8462_s21, %s8462_s21, %s8463_s1  }
  0x20   :  { %s8381_s0 = scalar_lea.vmem %s35_s26, 32  ;;  %p8386_p11 = scmp.lt.s32.totalorder %s35_s26, %s35_s26 }
  0x21   :  { %p8382_p10 = scmp.ne.s32.totalorder %s35_s26, %s8381_s0  ;;  %p8387_p12 = scmp.lt.s32.totalorder %s8381_s0, %s8381_s0 }
  0x23   :  { %p8388_p13 = por %p8387_p12, %p8386_p11 }
  0x25   :  { %p8389_p0 = pnand %p8388_p13, %p8382_p10 }
  0x27   :  { %8392 = shalt.err (!%p8389_p0)
}
  0x28   :  { %s12928_s22 = sld [smem:[#allocation58_spill]]  ;;  %s8466_s2 = smov [#allocation6]  }
  0x29   :  { %s65_s23 = sshll.u32 %s8466_s2, 4  ;;  %s8467_s24 = smov [#allocation9]   ;;  %s66_s23 = int_to_ptr.vmem [resolvable:$true] %s65_s23 }
  0x2a   :  { %s99_s3 = sshll.u32 %s8467_s24, 4  ;;  %s8401_s27 = scalar_lea.vmem %s66_s23, 8192  ;;  %s100_s3 = int_to_ptr.vmem [resolvable:$true] %s99_s3 }
  0x2b   :  { %p8402_p1 = scmp.ne.s32.totalorder %s66_s23, %s8401_s27  ;;  %p8406_p2 = scmp.lt.s32.totalorder %s66_s23, %s66_s23 }
  0x2c   :  { %p8407_p3 = scmp.lt.s32.totalorder %s8401_s27, %s8401_s27 }
  0x2e   :  { %37 = dma.hbm_to_vmem [thread:$0]  %s12928_s22, 32, %s35_s26, [#allocation3]  }
  0x2f   :  { %p8408_p4 = por %p8407_p3, %p8406_p2 }
  0x31   :  { %p8409_p5 = pnand %p8408_p4, %p8402_p1 }
  0x33   :  { %8412 = shalt.err (!%p8409_p5)
}
  0x34   :  { %71 = dma.hbm_to_vmem [thread:$0]  %s12888_s7, 8192, %s66_s23, [#allocation5], %s8462_s21, %s8462_s21, %s8463_s1  }
  0x35   :  { %s8421_s26 = scalar_lea.vmem %s100_s3, 32768  ;;  %p8426_p7 = scmp.lt.s32.totalorder %s100_s3, %s100_s3 }
  0x36   :  { %p8422_p6 = scmp.ne.s32.totalorder %s100_s3, %s8421_s26  ;;  %p8427_p8 = scmp.lt.s32.totalorder %s8421_s26, %s8421_s26 }
  0x38   :  { %p8428_p9 = por %p8427_p8, %p8426_p7 }
  0x3a   :  { %p8429_p10 = pnand %p8428_p9, %p8422_p6 }
  0x3c   :  { %8432 = shalt.err (!%p8429_p10)
}
  0x3d   :  { %105 = dma.hbm_to_vmem [thread:$0]  %s12895_s14, 32768, %s100_s3, [#allocation8], %s8462_s21, %s8462_s21, %s8463_s1  }
  0x3e   :  { %s8468_s0 = smov [#allocation10]  }
  0x3f   :  { %s111_s30 = sshll.u32 %s8468_s0, 4  ;;  %s112_s30 = int_to_ptr.vmem [resolvable:$true] %s111_s30 }
  0x40   :  { %s8441_s20 = scalar_lea.vmem %s112_s30, 8192  ;;  %p8446_p12 = scmp.lt.s32.totalorder %s112_s30, %s112_s30 }
  0x41   :  { %p8442_p11 = scmp.ne.s32.totalorder %s112_s30, %s8441_s20  ;;  %p8447_p13 = scmp.lt.s32.totalorder %s8441_s20, %s8441_s20 }
  0x43   :  { %p8448_p0 = por %p8447_p13, %p8446_p12 }
  0x45   :  { %p8449_p1 = pnand %p8448_p0, %p8442_p11 }
  0x47   :  { %8452 = shalt.err (!%p8449_p1)
}
  0x48   :  { %117 = dma.hbm_to_vmem [thread:$0]  %s12896_s15, 8192, %s112_s30, [#allocation11], %s8462_s21, %s8462_s21, %s8463_s1  }
  0x49   :  { %8453 = dma.done.wait [#allocation3], 32  }
  0x4a   :  { %8454 = vsyncadd [#allocation3], 4294967264 }
  0x4b   :  { %8455 = dma.done.wait [#allocation5], 10240  }
  0x4c   :  { %8456 = vsyncadd [#allocation5], 4294957056 }
  0x4d   :  { %8457 = dma.done.wait [#allocation8], 40960  }
  0x4e   :  { %8458 = vsyncadd [#allocation8], 4294926336 }
  0x4f   :  { %8459 = dma.done.wait [#allocation11], 8192  }
  0x50   :  { %8460 = vsyncadd [#allocation11], 4294959104  ;;  %v12903_v0 = vmov 0.0   ;;  %vm8470_vm0 = vmmov 0   ;;  %vm148_vm1 = vcmask 1041408   ;;  %vm144_vm2 = vcmask 15360  }
  0x51   :  { %8159 = vmatprep.subr.mxu0 %v12903_v0  ;;  %8164 = vmatprep.subr.mxu1 %v12903_v0  ;;  %v142_v1 = vld [vmem:[#allocation2] sm:$0x3]  ;;  %s12929_s21 = sld [smem:[#allocation59_spill]]  ;;  %v304_v6 = vld [vmem:[#allocation4 + $0x30] sm:$0xff]  ;;  %v303_v8 = vld [vmem:[#allocation4 + $0x28] sm:$0xff]  ;;  %vm306_vm3 = vcmask 130048  }
  0x52   :  { %8161 = vmatprep.mubr.msk.f32.mxu0 %vm8470_vm0, %v12903_v0  ;;  %8166 = vmatprep.mubr.msk.f32.mxu1 %vm8470_vm0, %v12903_v0  ;;  %v305_v4 = vld [vmem:[#allocation4 + $0x38] sm:$0xff]  ;;  %v224_v7 = vld [vmem:[#allocation4 + $0x10] sm:$0xff]  ;;  %v223_v9 = vld [vmem:[#allocation4 + $0x8] sm:$0xff]  ;;  %s12930_s26 = sld [smem:[#allocation61_spill]]  ;;  %vm1059_vm4 = vcmask 64512   ;;  %vm3682_vm5 = vcmask 261120  }
  0x53   :  { %8160 = vmatpush3.msk.msra.mxu0 %vm148_vm1, %v142_v1  ;;  %8165 = vmatpush3.msk.msra.mxu1 %vm148_vm1, %v142_v1  ;;  %v225_v5 = vld [vmem:[#allocation4 + $0x18] sm:$0xff]  ;;  %v302_v10 = vld [vmem:[#allocation4 + $0x20] sm:$0xff]  ;;  %v533_v19 = vld [vmem:[#allocation4 + $0x50] sm:$0xff]  ;;  %vm5419_vm6 = vcmask 523264  }
  0x54   :  { %338 = vmatprep.subr.mxu0 %v305_v4  ;;  %412 = vmatprep.subr.mxu1 %v225_v5  ;;  %v222_v11 = vld [vmem:[#allocation4] sm:$0xff]  ;;  %v534_v18 = vld [vmem:[#allocation4 + $0x58] sm:$0xff]  ;;  %v532_v20 = vld [vmem:[#allocation4 + $0x48] sm:$0xff] }
  0x55   :  { %v531_v21 = vld [vmem:[#allocation4 + $0x40] sm:$0xff]  ;;  %v690_v22 = vld [vmem:[#allocation4 + $0x78] sm:$0xff]  ;;  %v688_v4 = vld [vmem:[#allocation4 + $0x68] sm:$0xff] }
  0x56   :  { %v687_v5 = vld [vmem:[#allocation4 + $0x60] sm:$0xff] }
  0x57   :  { %v143_v2 = vld [vmem:[%s12929_s21] sm:$0xff]  ;;  %v7348_v3 = vld [vmem:[%s12929_s21 + $0x8] sm:$0xff]  ;;  %v7353_v15 = vld [vmem:[%s12929_s21 + $0x10] sm:$0xff] }
  0x58   :  { %8162 = vmatmul.mubr.msk.f32.vlgmr.msra.gmra.mxu0 %vm144_vm2, %v143_v2  ;;  %8167 = vmatmul.mubr.msk.f32.vlgmr.msra.gmra.mxu1 %vm144_vm2, %v7348_v3  ;;  %v7357_v17 = vld [vmem:[%s12929_s21 + $0x18] sm:$0xff]  ;;  %v8649_v24 = vld [vmem:[%s12930_s26 + $0xf0] sm:$0xff]  ;;  %v8654_v25 = vld [vmem:[%s12930_s26 + $0xe8] sm:$0xff] }
  0x59   :  { %339 = vmatpush1.msra.mxu0 %v304_v6  ;;  %413 = vmatpush1.msra.mxu1 %v224_v7  ;;  %v8644_v23 = vld [vmem:[%s12930_s26 + $0xf8] sm:$0xff]  ;;  %v8660_v26 = vld [vmem:[%s12930_s26 + $0xe0] sm:$0xff]  ;;  %v8672_v28 = vld [vmem:[%s12930_s26 + $0xd0] sm:$0xff] }
  0x5a   :  { %340 = vmatprep.subr.mxu0 %v303_v8  ;;  %414 = vmatprep.subr.mxu1 %v223_v9  ;;  %v8666_v27 = vld [vmem:[%s12930_s26 + $0xd8] sm:$0xff]  ;;  %v8678_v29 = vld [vmem:[%s12930_s26 + $0xc8] sm:$0xff]  ;;  %v8684_v30 = vld [vmem:[%s12930_s26 + $0xc0] sm:$0xff] }
  0x5b   :  { %374 = vmatprep.mubr.f32.mxu0 %v12903_v0  ;;  %448 = vmatprep.mubr.f32.mxu1 %v12903_v0  ;;  %v8690_v31 = vld [vmem:[%s12930_s26 + $0xb8] sm:$0xff]  ;;  %v8696_v32 = vld [vmem:[%s12930_s26 + $0xb0] sm:$0xff]  ;;  %v8702_v33 = vld [vmem:[%s12930_s26 + $0xa8] sm:$0xff] }
  0x5c   :  { %341 = vmatpush1.msra.mxu0 %v302_v10  ;;  %415 = vmatpush1.msra.mxu1 %v222_v11  ;;  %v8708_v34 = vld [vmem:[%s12930_s26 + $0xa0] sm:$0xff]  ;;  %v8714_v35 = vld [vmem:[%s12930_s26 + $0x98] sm:$0xff]  ;;  %v8720_v36 = vld [vmem:[%s12930_s26 + $0x90] sm:$0xff] }
  0x5d   :  { %8169 = vmatprep.subr.mxu0 %v12903_v0  ;;  %566 = vmatprep.subr.mxu1 %v534_v18  ;;  %v8726_v37 = vld [vmem:[%s12930_s26 + $0x88] sm:$0xff]  ;;  %v8732_v38 = vld [vmem:[%s12930_s26 + $0x80] sm:$0xff]  ;;  %v8738_v39 = vld [vmem:[%s12930_s26 + $0x78] sm:$0xff] }
  0x5e   :  { %v8744_v40 = vld [vmem:[%s12930_s26 + $0x70] sm:$0xff]  ;;  %v8750_v41 = vld [vmem:[%s12930_s26 + $0x68] sm:$0xff]  ;;  %v8756_v42 = vld [vmem:[%s12930_s26 + $0x60] sm:$0xff] }
  0x5f   :  { %v8762_v43 = vld [vmem:[%s12930_s26 + $0x58] sm:$0xff]  ;;  %v8768_v44 = vld [vmem:[%s12930_s26 + $0x50] sm:$0xff]  ;;  %v8774_v45 = vld [vmem:[%s12930_s26 + $0x48] sm:$0xff] }
  0x60   :  { %v8780_v46 = vld [vmem:[%s12930_s26 + $0x40] sm:$0xff]  ;;  %v8786_v47 = vld [vmem:[%s12930_s26 + $0x38] sm:$0xff]  ;;  %v8792_v48 = vld [vmem:[%s12930_s26 + $0x30] sm:$0xff] }
  0x61   :  { %v8798_v49 = vld [vmem:[%s12930_s26 + $0x28] sm:$0xff]  ;;  %v8804_v50 = vld [vmem:[%s12930_s26 + $0x20] sm:$0xff]  ;;  %v8810_v51 = vld [vmem:[%s12930_s26 + $0x18] sm:$0xff] }
  0x62   :  { %v8816_v52 = vld [vmem:[%s12930_s26 + $0x10] sm:$0xff]  ;;  %v8822_v53 = vld [vmem:[%s12930_s26 + $0x8] sm:$0xff]  ;;  %v8828_v54 = vld [vmem:[%s12930_s26] sm:$0xff] }
  0x63   :  { %v8834_v55 = vld [vmem:[%s12930_s26 + $0x1f8] sm:$0xff]  ;;  %v8840_v56 = vld [vmem:[%s12930_s26 + $0x1f0] sm:$0xff]  ;;  %v828_v57 = vld [vmem:[%s12930_s26 + $0x1e8] sm:$0xff] }
  0x64   :  { %v827_v58 = vld [vmem:[%s12930_s26 + $0x1e0] sm:$0xff]  ;;  %v826_v59 = vld [vmem:[%s12930_s26 + $0x1d8] sm:$0xff]  ;;  %v825_v60 = vld [vmem:[%s12930_s26 + $0x1d0] sm:$0xff] }
  0x65   :  { %v824_v61 = vld [vmem:[%s12930_s26 + $0x1c8] sm:$0xff]  ;;  %v823_v62 = vld [vmem:[%s12930_s26 + $0x1c0] sm:$0xff]  ;;  %v689_v2 = vld [vmem:[#allocation4 + $0x70] sm:$0xff] }
  0x66   :  { %v822_v9 = vld [vmem:[%s12930_s26 + $0x1b8] sm:$0xff]  ;;  %v821_v10 = vld [vmem:[%s12930_s26 + $0x1b0] sm:$0xff]  ;;  %v820_v11 = vld [vmem:[%s12930_s26 + $0x1a8] sm:$0xff] }
  0x67   :  { %v813_v18 = vld [vmem:[%s12930_s26 + $0x170] sm:$0xff] }
 0x118   :  { %v218_v12 = vpop.f32.mrf.mxu0  ;;  %v297_v13 = vpop.f32.mrf.mxu1 }
 0x119   :  { %7351 = vmatmul.mubr.msk.f32.vlgmr.msra.gmra.mxu0 %vm306_vm3, %v297_v13  ;;  %7352 = vmatmul.mubr.msk.f32.vlgmr.msra.gmra.mxu1 %vm306_vm3, %v218_v12  ;;  %v819_v12 = vld [vmem:[%s12930_s26 + $0x1a0] sm:$0xff]  ;;  %v818_v13 = vld [vmem:[%s12930_s26 + $0x198] sm:$0xff] }
 0x11a   :  { %v8168_v14 = vpop.f32.mrf.mxu1  ;;  %8170 = vmatpush3.msk.msra.mxu0 %vm148_vm1, %v142_v1  ;;  %8171 = vmatprep.mubr.msk.f32.mxu0 %vm8470_vm0, %v12903_v0  ;;  %v8163_v16 = vpop.f32.mrf.mxu0 }
 0x11b   :  { %8174 = vmatprep.subr.mxu0 %v12903_v0  ;;  %602 = vmatprep.mubr.f32.mxu1 %v12903_v0  ;;  %v817_v14 = vld [vmem:[%s12930_s26 + $0x190] sm:$0xff]  ;;  %v815_v16 = vld [vmem:[%s12930_s26 + $0x180] sm:$0xff] }
 0x11c   :  { %567 = vmatpush1.msra.mxu1 %v533_v19  ;;  %v812_v19 = vld [vmem:[%s12930_s26 + $0x168] sm:$0xff] }
 0x11d   :  { %8172 = vmatmul.mubr.msk.f32.vlgmr.msra.gmra.mxu0 %vm144_vm2, %v7353_v15  ;;  %568 = vmatprep.subr.mxu1 %v532_v20  ;;  %v816_v15 = vld [vmem:[%s12930_s26 + $0x188] sm:$0xff]  ;;  %v811_v20 = vld [vmem:[%s12930_s26 + $0x160] sm:$0xff] }
 0x11e   :  { %8175 = vmatpush3.msk.msra.mxu0 %vm148_vm1, %v142_v1  ;;  %8176 = vmatprep.mubr.msk.f32.mxu0 %vm8470_vm0, %v12903_v0 }
 0x11f   :  { %569 = vmatpush1.msra.mxu1 %v531_v21  ;;  %846 = vmatprep.subr.mxu0 %v8644_v23  ;;  %v810_v21 = vld [vmem:[%s12930_s26 + $0x158] sm:$0xff] }
 0x120   :  { %722 = vmatprep.subr.mxu1 %v690_v22  ;;  %v809_v22 = vld [vmem:[%s12930_s26 + $0x150] sm:$0xff] }
 0x121   :  { %8177 = vmatmul.mubr.msk.f32.vlgmr.msra.gmra.mxu0 %vm144_vm2, %v7357_v17  ;;  %v814_v17 = vld [vmem:[%s12930_s26 + $0x178] sm:$0xff] }
 0x122   :  { %847 = vmatpush1.msra.mxu0 %v8649_v24 }
 0x123   :  { %848 = vmatprep.subr.mxu0 %v8654_v25 }
 0x124   :  { %849 = vmatpush1.msra.mxu0 %v8660_v26 }
 0x125   :  { %850 = vmatprep.subr.mxu0 %v8666_v27 }
 0x126   :  { %851 = vmatpush1.msra.mxu0 %v8672_v28 }
 0x127   :  { %852 = vmatprep.subr.mxu0 %v8678_v29 }
 0x128   :  { %853 = vmatpush1.msra.mxu0 %v8684_v30 }
 0x129   :  { %854 = vmatprep.subr.mxu0 %v8690_v31 }
 0x12a   :  { %855 = vmatpush1.msra.mxu0 %v8696_v32 }
 0x12b   :  { %856 = vmatprep.subr.mxu0 %v8702_v33 }
 0x12c   :  { %857 = vmatpush1.msra.mxu0 %v8708_v34 }
 0x12d   :  { %858 = vmatprep.subr.mxu0 %v8714_v35 }
 0x12e   :  { %859 = vmatpush1.msra.mxu0 %v8720_v36 }
 0x12f   :  { %860 = vmatprep.subr.mxu0 %v8726_v37 }
 0x130   :  { %861 = vmatpush1.msra.mxu0 %v8732_v38 }
 0x131   :  { %862 = vmatprep.subr.mxu0 %v8738_v39 }
 0x132   :  { %863 = vmatpush1.msra.mxu0 %v8744_v40 }
 0x133   :  { %864 = vmatprep.subr.mxu0 %v8750_v41 }
 0x134   :  { %865 = vmatpush1.msra.mxu0 %v8756_v42 }
 0x135   :  { %866 = vmatprep.subr.mxu0 %v8762_v43 }
 0x136   :  { %867 = vmatpush1.msra.mxu0 %v8768_v44 }
 0x137   :  { %868 = vmatprep.subr.mxu0 %v8774_v45 }
 0x138   :  { %869 = vmatpush1.msra.mxu0 %v8780_v46 }
 0x139   :  { %870 = vmatprep.subr.mxu0 %v8786_v47 }
 0x13a   :  { %871 = vmatpush1.msra.mxu0 %v8792_v48 }
 0x13b   :  { %872 = vmatprep.subr.mxu0 %v8798_v49 }
 0x13c   :  { %873 = vmatpush1.msra.mxu0 %v8804_v50 }
 0x13d   :  { %874 = vmatprep.subr.mxu0 %v8810_v51 }
 0x13e   :  { %875 = vmatpush1.msra.mxu0 %v8816_v52 }
 0x13f   :  { %876 = vmatprep.subr.mxu0 %v8822_v53 }
 0x140   :  { %877 = vmatpush1.msra.mxu0 %v8828_v54 }
 0x141   :  { %878 = vmatprep.subr.mxu0 %v8834_v55 }
 0x142   :  { %879 = vmatpush2.msra.mxu0 %v8840_v56 }
 0x143   :  { %880 = vmatprep.subr.mxu0 %v828_v57 }
 0x144   :  { %881 = vmatpush2.msra.mxu0 %v827_v58 }
 0x145   :  { %882 = vmatprep.subr.mxu0 %v826_v59 }
 0x146   :  { %883 = vmatpush2.msra.mxu0 %v825_v60 }
 0x147   :  { %884 = vmatprep.subr.mxu0 %v824_v61 }
 0x148   :  { %885 = vmatpush2.msra.mxu0 %v823_v62 }
 0x149   :  { %886 = vmatprep.subr.mxu0 %v822_v9 }
 0x14a   :  { %887 = vmatpush2.msra.mxu0 %v821_v10 }
 0x14b   :  { %888 = vmatprep.subr.mxu0 %v820_v11 }
 0x14c   :  { %889 = vmatpush2.msra.mxu0 %v819_v12 }
 0x14d   :  { %890 = vmatprep.subr.mxu0 %v818_v13 }
 0x14e   :  { %891 = vmatpush2.msra.mxu0 %v817_v14 }
 0x14f   :  { %892 = vmatprep.subr.mxu0 %v816_v15 }
 0x150   :  { %893 = vmatpush2.msra.mxu0 %v815_v16 }
 0x151   :  { %894 = vmatprep.subr.mxu0 %v814_v17 }
 0x152   :  { %895 = vmatpush2.msra.mxu0 %v813_v18 }
 0x153   :  { %896 = vmatprep.subr.mxu0 %v812_v19 }
 0x154   :  { %897 = vmatpush2.msra.mxu0 %v811_v20 }
 0x155   :  { %898 = vmatprep.subr.mxu0 %v810_v21 }
 0x156   :  { %899 = vmatpush2.msra.mxu0 %v809_v22 }
 0x1d9   :  { %v8863_v63 = vpop.f32.mrf.mxu0 }
 0x1db   :  { %v8865_v1 = vpop.f32.mrf.mxu0 }
 0x1dd   :  { %v526_v3 = vpop.f32.mrf.mxu0 }
 0x1de   :  { %7356 = vmatmul.mubr.msk.f32.vlgmr.msra.gmra.mxu1 %vm306_vm3, %v526_v3 }
 0x1df   :  { %v8173_v6 = vpop.f32.mrf.mxu0  ;;  %723 = vmatpush1.msra.mxu1 %v689_v2  ;;  %758 = vmatprep.mubr.f32.mxu1 %v12903_v0 }
 0x1e0   :  { %724 = vmatprep.subr.mxu1 %v688_v4 }
 0x1e1   :  { %v682_v7 = vpop.f32.mrf.mxu0  ;;  %725 = vmatpush1.msra.mxu1 %v687_v5 }
 0x1e2   :  { %7360 = vmatmul.mubr.msk.f32.vlgmr.msra.gmra.mxu1 %vm306_vm3, %v682_v7  ;;  %943 = vmatprep.subr.mxu1 %v8644_v23  ;;  %v808_v23 = vld [vmem:[%s12930_s26 + $0x148] sm:$0xff] }
 0x1e3   :  { %v8178_v8 = vpop.f32.mrf.mxu0  ;;  %944 = vmatpush1.msra.mxu1 %v8649_v24  ;;  %900 = vmatprep.subr.mxu0 %v808_v23  ;;  %v807_v24 = vld [vmem:[%s12930_s26 + $0x140] sm:$0xff] }
 0x1e4   :  { %945 = vmatprep.subr.mxu1 %v8654_v25  ;;  %901 = vmatpush2.msra.mxu0 %v807_v24  ;;  %v806_v25 = vld [vmem:[%s12930_s26 + $0x138] sm:$0xff] }
 0x1e5   :  { %946 = vmatpush1.msra.mxu1 %v8660_v26  ;;  %v805_v26 = vld [vmem:[%s12930_s26 + $0x130] sm:$0xff]  ;;  %902 = vmatprep.subr.mxu0 %v806_v25 }
 0x1e6   :  { %947 = vmatprep.subr.mxu1 %v8666_v27  ;;  %v804_v27 = vld [vmem:[%s12930_s26 + $0x128] sm:$0xff]  ;;  %903 = vmatpush2.msra.mxu0 %v805_v26 }
 0x1e7   :  { %948 = vmatpush1.msra.mxu1 %v8672_v28  ;;  %v803_v28 = vld [vmem:[%s12930_s26 + $0x120] sm:$0xff]  ;;  %904 = vmatprep.subr.mxu0 %v804_v27 }
 0x1e8   :  { %949 = vmatprep.subr.mxu1 %v8678_v29  ;;  %v802_v29 = vld [vmem:[%s12930_s26 + $0x118] sm:$0xff]  ;;  %905 = vmatpush2.msra.mxu0 %v803_v28 }
 0x1e9   :  { %950 = vmatpush1.msra.mxu1 %v8684_v30  ;;  %v801_v30 = vld [vmem:[%s12930_s26 + $0x110] sm:$0xff]  ;;  %906 = vmatprep.subr.mxu0 %v802_v29 }
 0x1ea   :  { %951 = vmatprep.subr.mxu1 %v8690_v31  ;;  %v800_v31 = vld [vmem:[%s12930_s26 + $0x108] sm:$0xff]  ;;  %907 = vmatpush2.msra.mxu0 %v801_v30 }
 0x1eb   :  { %952 = vmatpush1.msra.mxu1 %v8696_v32  ;;  %v799_v32 = vld [vmem:[%s12930_s26 + $0x100] sm:$0xff]  ;;  %908 = vmatprep.subr.mxu0 %v800_v31 }
 0x1ec   :  { %953 = vmatprep.subr.mxu1 %v8702_v33  ;;  %909 = vmatpush2.msra.mxu0 %v799_v32  ;;  %v450_v33 = vpop.f32.mrf.mxu1 }
 0x1ed   :  { %954 = vmatpush1.msra.mxu1 %v8708_v34 }
 0x1ee   :  { %955 = vmatprep.subr.mxu1 %v8714_v35  ;;  %v452_v34 = vpop.f32.mrf.mxu1 }
 0x1ef   :  { %956 = vmatpush1.msra.mxu1 %v8720_v36  ;;  %v451_v36 = vadd.f32 %v450_v33, %v8863_v63 }
 0x1f0   :  { %957 = vmatprep.subr.mxu1 %v8726_v37 }
 0x1f1   :  { %958 = vmatpush1.msra.mxu1 %v8732_v38  ;;  %v453_v38 = vadd.f32 %v452_v34, %v8865_v1 }
 0x1f2   :  { %959 = vmatprep.subr.mxu1 %v8738_v39 }
 0x1f3   :  { %960 = vmatpush1.msra.mxu1 %v8744_v40 }
 0x1f4   :  { %961 = vmatprep.subr.mxu1 %v8750_v41 }
 0x1f5   :  { %962 = vmatpush1.msra.mxu1 %v8756_v42 }
 0x1f6   :  { %963 = vmatprep.subr.mxu1 %v8762_v43 }
 0x1f7   :  { %964 = vmatpush1.msra.mxu1 %v8768_v44 }
 0x1f8   :  { %965 = vmatprep.subr.mxu1 %v8774_v45 }
 0x1f9   :  { %966 = vmatpush1.msra.mxu1 %v8780_v46 }
 0x1fa   :  { %967 = vmatprep.subr.mxu1 %v8786_v47 }
 0x1fb   :  { %968 = vmatpush1.msra.mxu1 %v8792_v48 }
 0x1fc   :  { %969 = vmatprep.subr.mxu1 %v8798_v49 }
 0x1fd   :  { %970 = vmatpush1.msra.mxu1 %v8804_v50 }
 0x1fe   :  { %971 = vmatprep.subr.mxu1 %v8810_v51 }
 0x1ff   :  { %972 = vmatpush1.msra.mxu1 %v8816_v52 }
 0x200   :  { %973 = vmatprep.subr.mxu1 %v8822_v53 }
 0x201   :  { %974 = vmatpush1.msra.mxu1 %v8828_v54 }
 0x202   :  { %975 = vmatprep.subr.mxu1 %v8834_v55 }
 0x203   :  { %976 = vmatpush2.msra.mxu1 %v8840_v56 }
 0x204   :  { %977 = vmatprep.subr.mxu1 %v828_v57 }
 0x205   :  { %978 = vmatpush2.msra.mxu1 %v827_v58 }
 0x206   :  { %979 = vmatprep.subr.mxu1 %v826_v59  ;;  %v917_v59 = vlaneseq }
 0x207   :  { %980 = vmatpush2.msra.mxu1 %v825_v60 }
 0x208   :  { %981 = vmatprep.subr.mxu1 %v824_v61  ;;  %v918_v60 = vshrl.u32 %v917_v59, 7  ;;  %v1171_v59 = vld [vmem:[%s12887_s6 + $0xe0] sm:$0xff] }
 0x209   :  { %982 = vmatpush2.msra.mxu1 %v823_v62 }
 0x20a   :  { %983 = vmatprep.subr.mxu1 %v822_v9  ;;  %v8979_v61 = vsub.s32 0, %v918_v60 }
 0x20b   :  { %984 = vmatpush2.msra.mxu1 %v821_v10 }
 0x20c   :  { %985 = vmatprep.subr.mxu1 %v820_v11 }
 0x20d   :  { %986 = vmatpush2.msra.mxu1 %v819_v12 }
 0x20e   :  { %987 = vmatprep.subr.mxu1 %v818_v13 }
 0x20f   :  { %988 = vmatpush2.msra.mxu1 %v817_v14 }
 0x210   :  { %989 = vmatprep.subr.mxu1 %v816_v15 }
 0x211   :  { %990 = vmatpush2.msra.mxu1 %v815_v16 }
 0x212   :  { %991 = vmatprep.subr.mxu1 %v814_v17 }
 0x213   :  { %992 = vmatpush2.msra.mxu1 %v813_v18 }
 0x214   :  { %993 = vmatprep.subr.mxu1 %v812_v19 }
 0x215   :  { %994 = vmatpush2.msra.mxu1 %v811_v20 }
 0x216   :  { %995 = vmatprep.subr.mxu1 %v810_v21 }
 0x217   :  { %996 = vmatpush2.msra.mxu1 %v809_v22 }
 0x218   :  { %997 = vmatprep.subr.mxu1 %v808_v23 }
 0x219   :  { %998 = vmatpush2.msra.mxu1 %v807_v24 }
 0x21a   :  { %999 = vmatprep.subr.mxu1 %v806_v25  ;;  %v1026_v25 = vld [vmem:[%s12885_s4] ss:$2 sm:$0x3] }
 0x21b   :  { %1000 = vmatpush2.msra.mxu1 %v805_v26  ;;  %v8987_v26 = vsub.s32 1, %v918_v60  ;;  %v7391_v60 = vld [vmem:[%s12887_s6 + $0x2b8] sm:$0xff] }
 0x21c   :  { %1001 = vmatprep.subr.mxu1 %v804_v27 }
 0x21d   :  { %1002 = vmatpush2.msra.mxu1 %v803_v28  ;;  %12931 = vst [vmem:[#allocation16_spill] sm:$0xff] %v8987_v26  ;;  %v7361_v28 = vld [vmem:[%s12885_s4 + $0x1] ss:$2 sm:$0x3]  ;;  %v1035_v33 = vrot.slane %v1026_v25, %v8987_v26 }
 0x21e   :  { %1003 = vmatprep.subr.mxu1 %v802_v29 }
 0x21f   :  { %1004 = vmatpush2.msra.mxu1 %v801_v30  ;;  %v1031_v30 = vrot.slane %v1026_v25, %v8979_v61  ;;  %v1157_v25 = vld [vmem:[%s12887_s6 + $0x70] sm:$0xff] }
 0x220   :  { %1005 = vmatprep.subr.mxu1 %v800_v31 }
 0x221   :  { %1006 = vmatpush2.msra.mxu1 %v799_v32 }
 0x29e   :  { %v604_v35 = vpop.f32.mrf.mxu1 }
 0x29f   :  { %v609_v39 = vadd.f32 %v604_v35, %v451_v36  ;;  %v1046_v35 = vrot.slane %v7361_v28, %v8979_v61 }
 0x2a0   :  { %v606_v37 = vpop.f32.mrf.mxu1 }
 0x2a1   :  { %v610_v41 = vadd.f32 %v606_v37, %v453_v38  ;;  %v1050_v37 = vrot.slane %v7361_v28, %v8987_v26  ;;  %v1156_v28 = vld [vmem:[%s12887_s6 + $0x68] sm:$0xff] }
 0x2a2   :  { %v760_v40 = vpop.f32.mrf.mxu1 }
 0x2a3   :  { %v765_v42 = vadd.f32 %v760_v40, %v609_v39 }
 0x2a4   :  { %v762_v43 = vpop.f32.mrf.mxu1 }
 0x2a5   :  { %v831_v44 = vrot.slane %v765_v42, 4  ;;  %v766_v45 = vadd.f32 %v762_v43, %v610_v41 }
 0x2a7   :  { %v832_v46 = vadd.f32 %v831_v44, %v765_v42  ;;  %v837_v47 = vrot.slane %v766_v45, 4  ;;  %v1057_v44 = vld [vmem:[%s12886_s5] sm:$0xff] }
 0x2a9   :  { %v833_v48 = vrot.slane %v832_v46, 2  ;;  %v838_v49 = vadd.f32 %v837_v47, %v766_v45  ;;  %v7398_v47 = vld [vmem:[%s12887_s6 + $0x2f0] sm:$0xff] }
 0x2ab   :  { %v834_v50 = vadd.f32 %v833_v48, %v832_v46  ;;  %v839_v51 = vrot.slane %v838_v49, 2  ;;  %v7399_v46 = vld [vmem:[%s12887_s6 + $0x2f8] sm:$0xff]  ;;  %v7397_v48 = vld [vmem:[%s12887_s6 + $0x2e8] sm:$0xff] }
 0x2ad   :  { %v835_v52 = vrot.slane %v834_v50, 1  ;;  %v840_v53 = vadd.f32 %v839_v51, %v838_v49  ;;  %v1174_v49 = vld [vmem:[%s12887_s6 + $0xf8] sm:$0xff] }
 0x2ae   :  { %v7365_v51 = vld [vmem:[%s12886_s5 + $0x18] sm:$0xff] }
 0x2af   :  { %v841_v54 = vrot.slane %v840_v53, 1  ;;  %v836_v55 = vadd.f32 %v835_v52, %v834_v50  ;;  %v7396_v50 = vld [vmem:[%s12887_s6 + $0x2e0] sm:$0xff]  ;;  %v1058_v52 = vld [vmem:[%s12886_s5 + $0x8] sm:$0xff] }
 0x2b1   :  { %v842_v56 = vadd.f32 %v841_v54, %v840_v53  ;;  %v844_v58 = vmul.f32 0.125, %v836_v55  ;;  %v7395_v53 = vld [vmem:[%s12887_s6 + $0x2d8] sm:$0xff]  ;;  %v7394_v54 = vld [vmem:[%s12887_s6 + $0x2d0] sm:$0xff] }
 0x2b2   :  { %v1173_v55 = vld [vmem:[%s12887_s6 + $0xf0] sm:$0xff] }
 0x2b3   :  { %v845_v57 = vmul.f32 0.125, %v842_v56  ;;  %v7393_v56 = vld [vmem:[%s12887_s6 + $0x2c8] sm:$0xff] }
 0x2b5   :  { %910 = vmatprep.mubr.f32.mxu0 %v845_v57  ;;  %v1172_v57 = vld [vmem:[%s12887_s6 + $0xe8] sm:$0xff] }
 0x2b6   :  { %911 = vmatmul.mubr.f32.vlgmr.msra.gmra.mxu0 %v844_v58  ;;  %v7392_v58 = vld [vmem:[%s12887_s6 + $0x2c0] sm:$0xff] }
 0x2b7   :  { %1130 = vmatprep.mubr.f32.mxu0 %v12903_v0 }
 0x376   :  { %v912_v62 = vpop.f32.mrf.mxu0 }
 0x377   :  { %v920_v63 = vrot.slane %v912_v62, %v8979_v61  ;;  %v1170_v62 = vld [vmem:[%s12887_s6 + $0xd8] sm:$0xff] }
 0x378   :  { %v914_v1 = vpop.f32.mrf.mxu0 }
 0x379   :  { %v925_v2 = vsub.f32 %v765_v42, %v920_v63  ;;  %v924_v3 = vrot.slane %v914_v1, %v8979_v61  ;;  %v7390_v63 = vld [vmem:[%s12887_s6 + $0x2b0] sm:$0xff] }
 0x37a   :  { %v1169_v1 = vld [vmem:[%s12887_s6 + $0xd0] sm:$0xff] }
 0x37b   :  { %v927_v4 = vmul.f32 %v925_v2, %v925_v2  ;;  %v926_v5 = vsub.f32 %v766_v45, %v924_v3  ;;  %v7364_v45 = vld [vmem:[%s12886_s5 + $0x10] sm:$0xff]  ;;  %v1168_v3 = vld [vmem:[%s12887_s6 + $0xc8] sm:$0xff] }
 0x37d   :  { %v929_v6 = vrot.slane %v927_v4, 4  ;;  %v928_v7 = vmul.f32 %v926_v5, %v926_v5 }
 0x37f   :  { %v930_v8 = vadd.f32 %v929_v6, %v927_v4  ;;  %v935_v9 = vrot.slane %v928_v7, 4  ;;  %v7388_v4 = vld [vmem:[%s12887_s6 + $0x2a0] sm:$0xff]  ;;  %v7387_v6 = vld [vmem:[%s12887_s6 + $0x298] sm:$0xff] }
 0x381   :  { %v931_v10 = vrot.slane %v930_v8, 2  ;;  %v936_v11 = vadd.f32 %v935_v9, %v928_v7  ;;  %v1166_v7 = vld [vmem:[%s12887_s6 + $0xb8] sm:$0xff]  ;;  %v1165_v9 = vld [vmem:[%s12887_s6 + $0xb0] sm:$0xff] }
 0x383   :  { %v932_v12 = vadd.f32 %v931_v10, %v930_v8  ;;  %v937_v13 = vrot.slane %v936_v11, 2  ;;  %v7386_v8 = vld [vmem:[%s12887_s6 + $0x290] sm:$0xff]  ;;  %v7385_v10 = vld [vmem:[%s12887_s6 + $0x288] sm:$0xff] }
 0x385   :  { %v938_v14 = vadd.f32 %v937_v13, %v936_v11  ;;  %v933_v15 = vrot.slane %v932_v12, 1  ;;  %v1164_v11 = vld [vmem:[%s12887_s6 + $0xa8] sm:$0xff]  ;;  %v1163_v13 = vld [vmem:[%s12887_s6 + $0xa0] sm:$0xff] }
 0x387   :  { %v939_v16 = vrot.slane %v938_v14, 1  ;;  %v934_v17 = vadd.f32 %v933_v15, %v932_v12  ;;  %v7384_v12 = vld [vmem:[%s12887_s6 + $0x280] sm:$0xff]  ;;  %v1162_v15 = vld [vmem:[%s12887_s6 + $0x98] sm:$0xff] }
 0x389   :  { %v940_v18 = vadd.f32 %v939_v16, %v938_v14  ;;  %v941_v20 = vmul.f32 0.125, %v934_v17  ;;  %v7383_v14 = vld [vmem:[%s12887_s6 + $0x278] sm:$0xff]  ;;  %v7382_v16 = vld [vmem:[%s12887_s6 + $0x270] sm:$0xff] }
 0x38a   :  { %v1161_v17 = vld [vmem:[%s12887_s6 + $0x90] sm:$0xff] }
 0x38b   :  { %v942_v19 = vmul.f32 0.125, %v940_v18  ;;  %v7381_v18 = vld [vmem:[%s12887_s6 + $0x268] sm:$0xff] }
 0x38d   :  { %1007 = vmatprep.mubr.f32.mxu1 %v942_v19  ;;  %v1160_v19 = vld [vmem:[%s12887_s6 + $0x88] sm:$0xff] }
 0x38e   :  { %1008 = vmatmul.mubr.f32.vlgmr.msra.gmra.mxu1 %v941_v20  ;;  %v7380_v20 = vld [vmem:[%s12887_s6 + $0x260] sm:$0xff] }
 0x38f   :  { %1280 = vmatprep.mubr.f32.mxu1 %v12903_v0 }
 0x44e   :  { %v1009_v21 = vpop.f32.mrf.mxu1 }
 0x44f   :  { %v1010_v22 = vadd.f32 1e-05, %v1009_v21  ;;  %v1159_v21 = vld [vmem:[%s12887_s6 + $0x80] sm:$0xff] }
 0x450   :  { %v1011_v23 = vpop.f32.mrf.mxu1 }
 0x451   :  { %8253 = vrsqrt.f32 %v1010_v22  ;;  %v1012_v24 = vadd.f32 1e-05, %v1011_v23  ;;  %v7379_v22 = vld [vmem:[%s12887_s6 + $0x258] sm:$0xff] }
 0x452   :  { %v1158_v23 = vld [vmem:[%s12887_s6 + $0x78] sm:$0xff] }
 0x453   :  { %8255 = vrsqrt.f32 %v1012_v24  ;;  %v7378_v24 = vld [vmem:[%s12887_s6 + $0x250] sm:$0xff] }
 0x45e   :  { %v8254_v27 = vpop.eup %8253 }
 0x45f   :  { %v1019_v29 = vrot.slane %v8254_v27, %v8979_v61  ;;  %v7377_v27 = vld [vmem:[%s12887_s6 + $0x248] sm:$0xff] }
 0x460   :  { %v8256_v31 = vpop.eup %8255 }
 0x461   :  { %v1023_v32 = vrot.slane %v8256_v31, %v8979_v61  ;;  %v1024_v34 = vmul.f32 %v1019_v29, %v925_v2  ;;  %v7389_v2 = vld [vmem:[%s12887_s6 + $0x2a8] sm:$0xff]  ;;  %v7376_v29 = vld [vmem:[%s12887_s6 + $0x240] sm:$0xff]  ;;  %v7375_v31 = vld [vmem:[%s12887_s6 + $0x238] sm:$0xff] }
 0x463   :  { %v1025_v36 = vmul.f32 %v1023_v32, %v926_v5  ;;  %v1038_v38 = vmul.f32 %v1031_v30, %v1024_v34  ;;  %v1167_v5 = vld [vmem:[%s12887_s6 + $0xc0] sm:$0xff]  ;;  %v1154_v32 = vld [vmem:[%s12887_s6 + $0x58] sm:$0xff]  ;;  %v1153_v34 = vld [vmem:[%s12887_s6 + $0x50] sm:$0xff] }
 0x464   :  { %v1155_v30 = vld [vmem:[%s12887_s6 + $0x60] sm:$0xff] }
 0x465   :  { %v1039_v39 = vmul.f32 %v1035_v33, %v1025_v36  ;;  %v1053_v40 = vadd.f32 %v1046_v35, %v1038_v38  ;;  %v7374_v33 = vld [vmem:[%s12887_s6 + $0x230] sm:$0xff]  ;;  %v7373_v35 = vld [vmem:[%s12887_s6 + $0x228] sm:$0xff]  ;;  %v1151_v38 = vld [vmem:[%s12887_s6 + $0x40] sm:$0xff] }
 0x466   :  { %v1152_v36 = vld [vmem:[%s12887_s6 + $0x48] sm:$0xff] }
 0x467   :  { %v1054_v41 = vadd.f32 %v1050_v37, %v1039_v39  ;;  %v9000_v43 = vmax.f32 %v1053_v40, 0.0  ;;  %v7372_v37 = vld [vmem:[%s12887_s6 + $0x220] sm:$0xff]  ;;  %v7371_v39 = vld [vmem:[%s12887_s6 + $0x218] sm:$0xff] }
 0x468   :  { %v1150_v40 = vld [vmem:[%s12887_s6 + $0x38] sm:$0xff] }
 0x469   :  { %v8998_v42 = vmax.f32 %v1054_v41, 0.0  ;;  %v7370_v41 = vld [vmem:[%s12887_s6 + $0x210] sm:$0xff] }
 0x46b   :  { %1096 = vmatprep.subr.mxu0 %v8998_v42  ;;  %1246 = vmatprep.subr.mxu1 %v8998_v42 }
 0x46c   :  { %1097 = vmatpush1.msra.mxu0 %v9000_v43  ;;  %1247 = vmatpush1.msra.mxu1 %v9000_v43 }
 0x46d   :  { %7362 = vmatmul.mubr.msk.f32.vlgmr.msra.gmra.mxu0 %vm1059_vm4, %v1057_v44  ;;  %7366 = vmatmul.mubr.msk.f32.vlgmr.msra.gmra.mxu1 %vm1059_vm4, %v7364_v45  ;;  %v1149_v44 = vld [vmem:[%s12887_s6 + $0x30] sm:$0xff]  ;;  %v7369_v45 = vld [vmem:[%s12887_s6 + $0x208] sm:$0xff] }
 0x46e   :  { %1358 = vmatprep.subr.mxu0 %v7399_v46  ;;  %1136 = vmatprep.mubr.f32.mxu0 %v12903_v0  ;;  %v1148_v46 = vld [vmem:[%s12887_s6 + $0x28] sm:$0xff] }
 0x46f   :  { %1359 = vmatpush1.msra.mxu0 %v7398_v47  ;;  %1286 = vmatprep.mubr.f32.mxu1 %v12903_v0  ;;  %v7368_v47 = vld [vmem:[%s12887_s6 + $0x200] sm:$0xff] }
 0x470   :  { %1360 = vmatprep.subr.mxu0 %v7397_v48  ;;  %1435 = vmatprep.subr.mxu1 %v1174_v49  ;;  %v1147_v48 = vld [vmem:[%s12887_s6 + $0x20] sm:$0xff]  ;;  %v7431_v49 = vld [vmem:[%s12887_s6 + $0x3f8] sm:$0xff] }
 0x471   :  { %1361 = vmatpush1.msra.mxu0 %v7396_v50  ;;  %7367 = vmatmul.mubr.msk.f32.gmra.mxu1 %vm1059_vm4, %v7365_v51  ;;  %v1146_v50 = vld [vmem:[%s12887_s6 + $0x18] sm:$0xff]  ;;  %v7430_v51 = vld [vmem:[%s12887_s6 + $0x3f0] sm:$0xff] }
 0x472   :  { %7363 = vmatmul.mubr.msk.f32.gmra.mxu0 %vm1059_vm4, %v1058_v52  ;;  %1362 = vmatprep.subr.mxu0 %v7395_v53  ;;  %v1145_v52 = vld [vmem:[%s12887_s6 + $0x10] sm:$0xff]  ;;  %v7429_v53 = vld [vmem:[%s12887_s6 + $0x3e8] sm:$0xff] }
 0x473   :  { %1363 = vmatpush1.msra.mxu0 %v7394_v54  ;;  %1436 = vmatpush1.msra.mxu1 %v1173_v55  ;;  %v1144_v54 = vld [vmem:[%s12887_s6 + $0x8] sm:$0xff]  ;;  %v7428_v55 = vld [vmem:[%s12887_s6 + $0x3e0] sm:$0xff] }
 0x474   :  { %1364 = vmatprep.subr.mxu0 %v7393_v56  ;;  %1437 = vmatprep.subr.mxu1 %v1172_v57  ;;  %v1143_v56 = vld [vmem:[%s12887_s6] sm:$0xff]  ;;  %v7427_v57 = vld [vmem:[%s12887_s6 + $0x3d8] sm:$0xff] }
 0x475   :  { %1365 = vmatpush1.msra.mxu0 %v7392_v58  ;;  %1438 = vmatpush1.msra.mxu1 %v1171_v59  ;;  %v1206_v58 = vld [vmem:[%s12887_s6 + $0x1f8] sm:$0xff]  ;;  %v7426_v59 = vld [vmem:[%s12887_s6 + $0x3d0] sm:$0xff] }
 0x476   :  { %1366 = vmatprep.subr.mxu0 %v7391_v60  ;;  %1439 = vmatprep.subr.mxu1 %v1170_v62  ;;  %v1205_v60 = vld [vmem:[%s12887_s6 + $0x1f0] sm:$0xff]  ;;  %v7425_v62 = vld [vmem:[%s12887_s6 + $0x3c8] sm:$0xff] }
 0x477   :  { %1367 = vmatpush1.msra.mxu0 %v7390_v63  ;;  %1440 = vmatpush1.msra.mxu1 %v1169_v1  ;;  %v1204_v63 = vld [vmem:[%s12887_s6 + $0x1e8] sm:$0xff]  ;;  %v7424_v1 = vld [vmem:[%s12887_s6 + $0x3c0] sm:$0xff] }
 0x478   :  { %1368 = vmatprep.subr.mxu0 %v7389_v2  ;;  %1441 = vmatprep.subr.mxu1 %v1168_v3  ;;  %v1203_v2 = vld [vmem:[%s12887_s6 + $0x1e0] sm:$0xff]  ;;  %v7423_v3 = vld [vmem:[%s12887_s6 + $0x3b8] sm:$0xff] }
 0x479   :  { %1369 = vmatpush1.msra.mxu0 %v7388_v4  ;;  %1442 = vmatpush1.msra.mxu1 %v1167_v5  ;;  %v1202_v4 = vld [vmem:[%s12887_s6 + $0x1d8] sm:$0xff]  ;;  %v7422_v5 = vld [vmem:[%s12887_s6 + $0x3b0] sm:$0xff] }
 0x47a   :  { %1370 = vmatprep.subr.mxu0 %v7387_v6  ;;  %1443 = vmatprep.subr.mxu1 %v1166_v7  ;;  %v1201_v6 = vld [vmem:[%s12887_s6 + $0x1d0] sm:$0xff]  ;;  %v7421_v7 = vld [vmem:[%s12887_s6 + $0x3a8] sm:$0xff] }
 0x47b   :  { %1371 = vmatpush1.msra.mxu0 %v7386_v8  ;;  %1444 = vmatpush1.msra.mxu1 %v1165_v9  ;;  %v1200_v8 = vld [vmem:[%s12887_s6 + $0x1c8] sm:$0xff]  ;;  %v7420_v9 = vld [vmem:[%s12887_s6 + $0x3a0] sm:$0xff] }
 0x47c   :  { %1372 = vmatprep.subr.mxu0 %v7385_v10  ;;  %1445 = vmatprep.subr.mxu1 %v1164_v11  ;;  %v1199_v10 = vld [vmem:[%s12887_s6 + $0x1c0] sm:$0xff]  ;;  %v7419_v11 = vld [vmem:[%s12887_s6 + $0x398] sm:$0xff] }
 0x47d   :  { %1373 = vmatpush1.msra.mxu0 %v7384_v12  ;;  %1446 = vmatpush1.msra.mxu1 %v1163_v13  ;;  %v1198_v12 = vld [vmem:[%s12887_s6 + $0x1b8] sm:$0xff]  ;;  %v7418_v13 = vld [vmem:[%s12887_s6 + $0x390] sm:$0xff] }
 0x47e   :  { %1374 = vmatprep.subr.mxu0 %v7383_v14  ;;  %1447 = vmatprep.subr.mxu1 %v1162_v15  ;;  %v1197_v14 = vld [vmem:[%s12887_s6 + $0x1b0] sm:$0xff]  ;;  %v7417_v15 = vld [vmem:[%s12887_s6 + $0x388] sm:$0xff] }
 0x47f   :  { %1375 = vmatpush1.msra.mxu0 %v7382_v16  ;;  %1448 = vmatpush1.msra.mxu1 %v1161_v17  ;;  %v1196_v16 = vld [vmem:[%s12887_s6 + $0x1a8] sm:$0xff]  ;;  %v7416_v17 = vld [vmem:[%s12887_s6 + $0x380] sm:$0xff] }
 0x480   :  { %1376 = vmatprep.subr.mxu0 %v7381_v18  ;;  %1449 = vmatprep.subr.mxu1 %v1160_v19  ;;  %v1195_v18 = vld [vmem:[%s12887_s6 + $0x1a0] sm:$0xff]  ;;  %v7415_v19 = vld [vmem:[%s12887_s6 + $0x378] sm:$0xff] }
 0x481   :  { %1377 = vmatpush1.msra.mxu0 %v7380_v20  ;;  %1450 = vmatpush1.msra.mxu1 %v1159_v21  ;;  %v1194_v20 = vld [vmem:[%s12887_s6 + $0x198] sm:$0xff]  ;;  %v7414_v21 = vld [vmem:[%s12887_s6 + $0x370] sm:$0xff] }
 0x482   :  { %1378 = vmatprep.subr.mxu0 %v7379_v22  ;;  %1451 = vmatprep.subr.mxu1 %v1158_v23  ;;  %v1193_v22 = vld [vmem:[%s12887_s6 + $0x190] sm:$0xff]  ;;  %v7413_v23 = vld [vmem:[%s12887_s6 + $0x368] sm:$0xff] }
 0x483   :  { %1379 = vmatpush1.msra.mxu0 %v7378_v24  ;;  %1452 = vmatpush1.msra.mxu1 %v1157_v25  ;;  %v1192_v24 = vld [vmem:[%s12887_s6 + $0x188] sm:$0xff]  ;;  %v7412_v25 = vld [vmem:[%s12887_s6 + $0x360] sm:$0xff] }
 0x484   :  { %1380 = vmatprep.subr.mxu0 %v7377_v27  ;;  %1453 = vmatprep.subr.mxu1 %v1156_v28  ;;  %v1191_v27 = vld [vmem:[%s12887_s6 + $0x180] sm:$0xff]  ;;  %v7411_v28 = vld [vmem:[%s12887_s6 + $0x358] sm:$0xff] }
 0x485   :  { %1381 = vmatpush1.msra.mxu0 %v7376_v29  ;;  %1454 = vmatpush1.msra.mxu1 %v1155_v30  ;;  %v1190_v29 = vld [vmem:[%s12887_s6 + $0x178] sm:$0xff]  ;;  %v7410_v30 = vld [vmem:[%s12887_s6 + $0x350] sm:$0xff] }
 0x486   :  { %1382 = vmatprep.subr.mxu0 %v7375_v31  ;;  %1455 = vmatprep.subr.mxu1 %v1154_v32  ;;  %v1189_v31 = vld [vmem:[%s12887_s6 + $0x170] sm:$0xff]  ;;  %v7409_v32 = vld [vmem:[%s12887_s6 + $0x348] sm:$0xff] }
 0x487   :  { %1383 = vmatpush1.msra.mxu0 %v7374_v33  ;;  %1456 = vmatpush1.msra.mxu1 %v1153_v34  ;;  %v1188_v33 = vld [vmem:[%s12887_s6 + $0x168] sm:$0xff]  ;;  %v7408_v34 = vld [vmem:[%s12887_s6 + $0x340] sm:$0xff] }
 0x488   :  { %1384 = vmatprep.subr.mxu0 %v7373_v35  ;;  %1457 = vmatprep.subr.mxu1 %v1152_v36  ;;  %v1187_v35 = vld [vmem:[%s12887_s6 + $0x160] sm:$0xff]  ;;  %v7407_v36 = vld [vmem:[%s12887_s6 + $0x338] sm:$0xff] }
 0x489   :  { %1385 = vmatpush1.msra.mxu0 %v7372_v37  ;;  %1458 = vmatpush1.msra.mxu1 %v1151_v38  ;;  %v1186_v37 = vld [vmem:[%s12887_s6 + $0x158] sm:$0xff]  ;;  %v7406_v38 = vld [vmem:[%s12887_s6 + $0x330] sm:$0xff] }
 0x48a   :  { %1386 = vmatprep.subr.mxu0 %v7371_v39  ;;  %1459 = vmatprep.subr.mxu1 %v1150_v40  ;;  %v1185_v39 = vld [vmem:[%s12887_s6 + $0x150] sm:$0xff]  ;;  %v7405_v40 = vld [vmem:[%s12887_s6 + $0x328] sm:$0xff] }
 0x48b   :  { %1387 = vmatpush1.msra.mxu0 %v7370_v41  ;;  %1460 = vmatpush1.msra.mxu1 %v1149_v44  ;;  %v1184_v41 = vld [vmem:[%s12887_s6 + $0x148] sm:$0xff]  ;;  %v7404_v44 = vld [vmem:[%s12887_s6 + $0x320] sm:$0xff] }
 0x48c   :  { %1388 = vmatprep.subr.mxu0 %v7369_v45  ;;  %1461 = vmatprep.subr.mxu1 %v1148_v46  ;;  %v1183_v45 = vld [vmem:[%s12887_s6 + $0x140] sm:$0xff]  ;;  %v7403_v46 = vld [vmem:[%s12887_s6 + $0x318] sm:$0xff] }
 0x48d   :  { %1389 = vmatpush1.msra.mxu0 %v7368_v47  ;;  %1462 = vmatpush1.msra.mxu1 %v1147_v48  ;;  %v1182_v47 = vld [vmem:[%s12887_s6 + $0x138] sm:$0xff]  ;;  %v7402_v48 = vld [vmem:[%s12887_s6 + $0x310] sm:$0xff] }
 0x48e   :  { %1390 = vmatprep.subr.mxu0 %v7431_v49  ;;  %1463 = vmatprep.subr.mxu1 %v1146_v50  ;;  %v1181_v49 = vld [vmem:[%s12887_s6 + $0x130] sm:$0xff]  ;;  %v7401_v50 = vld [vmem:[%s12887_s6 + $0x308] sm:$0xff] }
 0x48f   :  { %1391 = vmatpush2.msra.mxu0 %v7430_v51  ;;  %1464 = vmatpush1.msra.mxu1 %v1145_v52  ;;  %v1180_v51 = vld [vmem:[%s12887_s6 + $0x128] sm:$0xff]  ;;  %v7400_v52 = vld [vmem:[%s12887_s6 + $0x300] sm:$0xff] }
 0x490   :  { %1392 = vmatprep.subr.mxu0 %v7429_v53  ;;  %1465 = vmatprep.subr.mxu1 %v1144_v54  ;;  %v1179_v53 = vld [vmem:[%s12887_s6 + $0x120] sm:$0xff]  ;;  %v1178_v54 = vld [vmem:[%s12887_s6 + $0x118] sm:$0xff] }
 0x491   :  { %1393 = vmatpush2.msra.mxu0 %v7428_v55  ;;  %1466 = vmatpush1.msra.mxu1 %v1143_v56  ;;  %v1177_v55 = vld [vmem:[%s12887_s6 + $0x110] sm:$0xff]  ;;  %v1176_v56 = vld [vmem:[%s12887_s6 + $0x108] sm:$0xff] }
 0x492   :  { %1394 = vmatprep.subr.mxu0 %v7427_v57  ;;  %1467 = vmatprep.subr.mxu1 %v1206_v58  ;;  %v1175_v57 = vld [vmem:[%s12887_s6 + $0x100] sm:$0xff]  ;;  %v7467_v58 = vld [vmem:[%s12887_s6 + $0x4f8] sm:$0xff] }
 0x493   :  { %1395 = vmatpush2.msra.mxu0 %v7426_v59  ;;  %1468 = vmatpush2.msra.mxu1 %v1205_v60 }
 0x494   :  { %1396 = vmatprep.subr.mxu0 %v7425_v62  ;;  %1469 = vmatprep.subr.mxu1 %v1204_v63 }
 0x495   :  { %1397 = vmatpush2.msra.mxu0 %v7424_v1  ;;  %1470 = vmatpush2.msra.mxu1 %v1203_v2  ;;  %v7466_v1 = vld [vmem:[%s12887_s6 + $0x4f0] sm:$0xff]  ;;  %v7465_v2 = vld [vmem:[%s12887_s6 + $0x4e8] sm:$0xff] }
 0x496   :  { %1398 = vmatprep.subr.mxu0 %v7423_v3  ;;  %1471 = vmatprep.subr.mxu1 %v1202_v4  ;;  %v7464_v4 = vld [vmem:[%s12887_s6 + $0x4e0] sm:$0xff] }
 0x497   :  { %1399 = vmatpush2.msra.mxu0 %v7422_v5  ;;  %1472 = vmatpush2.msra.mxu1 %v1201_v6 }
 0x498   :  { %1400 = vmatprep.subr.mxu0 %v7421_v7  ;;  %1473 = vmatprep.subr.mxu1 %v1200_v8  ;;  %v7463_v8 = vld [vmem:[%s12887_s6 + $0x4d8] sm:$0xff] }
 0x499   :  { %1401 = vmatpush2.msra.mxu0 %v7420_v9  ;;  %1474 = vmatpush2.msra.mxu1 %v1199_v10  ;;  %v7462_v9 = vld [vmem:[%s12887_s6 + $0x4d0] sm:$0xff]  ;;  %v7461_v10 = vld [vmem:[%s12887_s6 + $0x4c8] sm:$0xff] }
 0x49a   :  { %1402 = vmatprep.subr.mxu0 %v7419_v11  ;;  %1475 = vmatprep.subr.mxu1 %v1198_v12  ;;  %v7460_v11 = vld [vmem:[%s12887_s6 + $0x4c0] sm:$0xff]  ;;  %v7535_v12 = vld [vmem:[%s12887_s6 + $0x6f8] sm:$0xff] }
 0x49b   :  { %1403 = vmatpush2.msra.mxu0 %v7418_v13  ;;  %1476 = vmatpush2.msra.mxu1 %v1197_v14  ;;  %v7459_v13 = vld [vmem:[%s12887_s6 + $0x4b8] sm:$0xff]  ;;  %v7433_v14 = vld [vmem:[%s12886_s5 + $0x28] sm:$0xff] }
 0x49c   :  { %1404 = vmatprep.subr.mxu0 %v7417_v15  ;;  %1477 = vmatprep.subr.mxu1 %v1196_v16  ;;  %v7458_v15 = vld [vmem:[%s12887_s6 + $0x4b0] sm:$0xff]  ;;  %v7457_v16 = vld [vmem:[%s12887_s6 + $0x4a8] sm:$0xff] }
 0x49d   :  { %1405 = vmatpush2.msra.mxu0 %v7416_v17  ;;  %1478 = vmatpush2.msra.mxu1 %v1195_v18  ;;  %v7455_v17 = vld [vmem:[%s12887_s6 + $0x498] sm:$0xff]  ;;  %v7500_v18 = vld [vmem:[%s12886_s5 + $0x30] sm:$0xff] }
 0x49e   :  { %1406 = vmatprep.subr.mxu0 %v7415_v19  ;;  %1479 = vmatprep.subr.mxu1 %v1194_v20  ;;  %v7454_v19 = vld [vmem:[%s12887_s6 + $0x490] sm:$0xff] }
 0x49f   :  { %1407 = vmatpush2.msra.mxu0 %v7414_v21  ;;  %1480 = vmatpush2.msra.mxu1 %v1193_v22  ;;  %v7534_v20 = vld [vmem:[%s12887_s6 + $0x6f0] sm:$0xff]  ;;  %v7533_v21 = vld [vmem:[%s12887_s6 + $0x6e8] sm:$0xff] }
 0x4a0   :  { %1408 = vmatprep.subr.mxu0 %v7413_v23  ;;  %1481 = vmatprep.subr.mxu1 %v1192_v24  ;;  %v7453_v22 = vld [vmem:[%s12887_s6 + $0x488] sm:$0xff]  ;;  %v7532_v23 = vld [vmem:[%s12887_s6 + $0x6e0] sm:$0xff] }
 0x4a1   :  { %1409 = vmatpush2.msra.mxu0 %v7412_v25  ;;  %1482 = vmatpush2.msra.mxu1 %v1191_v27  ;;  %v7452_v24 = vld [vmem:[%s12887_s6 + $0x480] sm:$0xff]  ;;  %v7501_v25 = vld [vmem:[%s12886_s5 + $0x38] sm:$0xff] }
 0x4a2   :  { %1410 = vmatprep.subr.mxu0 %v7411_v28  ;;  %1483 = vmatprep.subr.mxu1 %v1190_v29  ;;  %v7531_v27 = vld [vmem:[%s12887_s6 + $0x6d8] sm:$0xff]  ;;  %v7530_v28 = vld [vmem:[%s12887_s6 + $0x6d0] sm:$0xff] }
 0x4a3   :  { %1411 = vmatpush2.msra.mxu0 %v7410_v30  ;;  %1484 = vmatpush2.msra.mxu1 %v1189_v31  ;;  %v7451_v29 = vld [vmem:[%s12887_s6 + $0x478] sm:$0xff]  ;;  %v7529_v30 = vld [vmem:[%s12887_s6 + $0x6c8] sm:$0xff]  ;;  %v7450_v31 = vld [vmem:[%s12887_s6 + $0x470] sm:$0xff] }
 0x4a4   :  { %1412 = vmatprep.subr.mxu0 %v7409_v32  ;;  %1485 = vmatprep.subr.mxu1 %v1188_v33  ;;  %v7528_v32 = vld [vmem:[%s12887_s6 + $0x6c0] sm:$0xff]  ;;  %v7449_v33 = vld [vmem:[%s12887_s6 + $0x468] sm:$0xff] }
 0x4a5   :  { %1413 = vmatpush2.msra.mxu0 %v7408_v34  ;;  %1486 = vmatpush2.msra.mxu1 %v1187_v35  ;;  %v7527_v34 = vld [vmem:[%s12887_s6 + $0x6b8] sm:$0xff]  ;;  %v7448_v35 = vld [vmem:[%s12887_s6 + $0x460] sm:$0xff] }
 0x4a6   :  { %1414 = vmatprep.subr.mxu0 %v7407_v36  ;;  %1487 = vmatprep.subr.mxu1 %v1186_v37  ;;  %v7526_v36 = vld [vmem:[%s12887_s6 + $0x6b0] sm:$0xff]  ;;  %v7447_v37 = vld [vmem:[%s12887_s6 + $0x458] sm:$0xff] }
 0x4a7   :  { %1415 = vmatpush2.msra.mxu0 %v7406_v38  ;;  %1488 = vmatpush2.msra.mxu1 %v1185_v39  ;;  %v7525_v38 = vld [vmem:[%s12887_s6 + $0x6a8] sm:$0xff]  ;;  %v7446_v39 = vld [vmem:[%s12887_s6 + $0x450] sm:$0xff] }
 0x4a8   :  { %1416 = vmatprep.subr.mxu0 %v7405_v40  ;;  %1489 = vmatprep.subr.mxu1 %v1184_v41  ;;  %v7524_v40 = vld [vmem:[%s12887_s6 + $0x6a0] sm:$0xff]  ;;  %v7445_v41 = vld [vmem:[%s12887_s6 + $0x448] sm:$0xff] }
 0x4a9   :  { %1417 = vmatpush2.msra.mxu0 %v7404_v44  ;;  %1490 = vmatpush2.msra.mxu1 %v1183_v45  ;;  %v7523_v44 = vld [vmem:[%s12887_s6 + $0x698] sm:$0xff]  ;;  %v7444_v45 = vld [vmem:[%s12887_s6 + $0x440] sm:$0xff] }
 0x4aa   :  { %1418 = vmatprep.subr.mxu0 %v7403_v46  ;;  %1491 = vmatprep.subr.mxu1 %v1182_v47  ;;  %v7522_v46 = vld [vmem:[%s12887_s6 + $0x690] sm:$0xff]  ;;  %v7443_v47 = vld [vmem:[%s12887_s6 + $0x438] sm:$0xff] }
 0x4ab   :  { %1419 = vmatpush2.msra.mxu0 %v7402_v48  ;;  %1492 = vmatpush2.msra.mxu1 %v1181_v49  ;;  %v7521_v48 = vld [vmem:[%s12887_s6 + $0x688] sm:$0xff]  ;;  %v7442_v49 = vld [vmem:[%s12887_s6 + $0x430] sm:$0xff] }
 0x4ac   :  { %1420 = vmatprep.subr.mxu0 %v7401_v50  ;;  %1493 = vmatprep.subr.mxu1 %v1180_v51  ;;  %v7520_v50 = vld [vmem:[%s12887_s6 + $0x680] sm:$0xff]  ;;  %v7441_v51 = vld [vmem:[%s12887_s6 + $0x428] sm:$0xff] }
 0x4ad   :  { %1421 = vmatpush2.msra.mxu0 %v7400_v52  ;;  %1494 = vmatpush2.msra.mxu1 %v1179_v53  ;;  %v7519_v52 = vld [vmem:[%s12887_s6 + $0x678] sm:$0xff]  ;;  %v7440_v53 = vld [vmem:[%s12887_s6 + $0x420] sm:$0xff] }
 0x4ae   :  { %1551 = vmatprep.subr.mxu0 %v8998_v42  ;;  %1495 = vmatprep.subr.mxu1 %v1178_v54  ;;  %v7518_v54 = vld [vmem:[%s12887_s6 + $0x670] sm:$0xff] }
 0x4af   :  { %1496 = vmatpush2.msra.mxu1 %v1177_v55  ;;  %v7439_v55 = vld [vmem:[%s12887_s6 + $0x418] sm:$0xff] }
 0x4b0   :  { %1497 = vmatprep.subr.mxu1 %v1176_v56  ;;  %v7517_v56 = vld [vmem:[%s12887_s6 + $0x668] sm:$0xff] }
 0x4b1   :  { %1498 = vmatpush2.msra.mxu1 %v1175_v57  ;;  %v7438_v57 = vld [vmem:[%s12887_s6 + $0x410] sm:$0xff] }
 0x4b2   :  { %1663 = vmatprep.subr.mxu1 %v7467_v58  ;;  %v7516_v58 = vld [vmem:[%s12887_s6 + $0x660] sm:$0xff] }
 0x52d   :  { %v1132_v59 = vpop.f32.mrf.mxu0  ;;  %v1282_v60 = vpop.f32.mrf.mxu1 }
 0x52f   :  { %v1134_v62 = vpop.f32.mrf.mxu0  ;;  %v1284_v63 = vpop.f32.mrf.mxu1 }
 0x530   :  { %1422 = vmatprep.mubr.f32.mxu0 %v1284_v63  ;;  %1499 = vmatprep.mubr.f32.mxu1 %v1134_v62  ;;  %v7436_v62 = vld [vmem:[%s12887_s6 + $0x400] sm:$0xff]  ;;  %v7514_v63 = vld [vmem:[%s12887_s6 + $0x650] sm:$0xff] }
 0x531   :  { %v1288_v3 = vpop.f32.mrf.mxu1  ;;  %1423 = vmatmul.mubr.f32.vlgmr.msra.gmra.mxu0 %v1282_v60  ;;  %1500 = vmatmul.mubr.f32.vlgmr.msra.gmra.mxu1 %v1132_v59  ;;  %v7437_v59 = vld [vmem:[%s12887_s6 + $0x408] sm:$0xff]  ;;  %v7515_v60 = vld [vmem:[%s12887_s6 + $0x658] sm:$0xff] }
 0x532   :  { %v1138_v5 = vpop.f32.mrf.mxu0  ;;  %1552 = vmatpush1.msra.mxu0 %v9000_v43  ;;  %1664 = vmatpush1.msra.mxu1 %v7466_v1  ;;  %v7499_v1 = vld [vmem:[%s12887_s6 + $0x5f8] sm:$0xff] }
 0x533   :  { %1783 = vmatprep.subr.mxu0 %v8998_v42  ;;  %v1290_v6 = vpop.f32.mrf.mxu1  ;;  %1665 = vmatprep.subr.mxu1 %v7465_v2  ;;  %v7432_v42 = vld [vmem:[%s12886_s5 + $0x20] sm:$0xff]  ;;  %v7513_v2 = vld [vmem:[%s12887_s6 + $0x648] sm:$0xff] }
 0x534   :  { %v1140_v7 = vpop.f32.mrf.mxu0  ;;  %1428 = vmatprep.mubr.f32.mxu0 %v1290_v6  ;;  %1666 = vmatpush1.msra.mxu1 %v7464_v4  ;;  %v7512_v4 = vld [vmem:[%s12887_s6 + $0x640] sm:$0xff]  ;;  %v7511_v6 = vld [vmem:[%s12887_s6 + $0x638] sm:$0xff] }
 0x535   :  { %1505 = vmatprep.mubr.f32.mxu1 %v1140_v7  ;;  %1429 = vmatmul.mubr.f32.gmra.mxu0 %v1288_v3  ;;  %v7498_v3 = vld [vmem:[%s12887_s6 + $0x5f0] sm:$0xff]  ;;  %v7496_v7 = vld [vmem:[%s12887_s6 + $0x5e0] sm:$0xff] }
 0x536   :  { %1506 = vmatmul.mubr.f32.gmra.mxu1 %v1138_v5  ;;  %1585 = vmatprep.mubr.f32.mxu0 %v12903_v0  ;;  %v7497_v5 = vld [vmem:[%s12887_s6 + $0x5e8] sm:$0xff] }
 0x537   :  { %1667 = vmatprep.subr.mxu1 %v7463_v8  ;;  %v7510_v8 = vld [vmem:[%s12887_s6 + $0x630] sm:$0xff] }
 0x538   :  { %1668 = vmatpush1.msra.mxu1 %v7462_v9  ;;  %v7495_v9 = vld [vmem:[%s12887_s6 + $0x5d8] sm:$0xff] }
 0x539   :  { %7434 = vmatmul.mubr.msk.f32.vlgmr.msra.gmra.mxu0 %vm1059_vm4, %v7432_v42  ;;  %1669 = vmatprep.subr.mxu1 %v7461_v10  ;;  %v7509_v42 = vld [vmem:[%s12887_s6 + $0x628] sm:$0xff]  ;;  %v7494_v10 = vld [vmem:[%s12887_s6 + $0x5d0] sm:$0xff] }
 0x53a   :  { %1784 = vmatpush1.msra.mxu0 %v9000_v43  ;;  %1591 = vmatprep.mubr.f32.mxu0 %v12903_v0  ;;  %v7456_v43 = vld [vmem:[%s12887_s6 + $0x4a0] sm:$0xff] }
 0x53b   :  { %1670 = vmatpush1.msra.mxu1 %v7460_v11  ;;  %1895 = vmatprep.subr.mxu0 %v7535_v12  ;;  %v7508_v11 = vld [vmem:[%s12887_s6 + $0x620] sm:$0xff]  ;;  %v7493_v12 = vld [vmem:[%s12887_s6 + $0x5c8] sm:$0xff] }
 0x53c   :  { %1671 = vmatprep.subr.mxu1 %v7459_v13  ;;  %v7507_v13 = vld [vmem:[%s12887_s6 + $0x618] sm:$0xff] }
 0x53d   :  { %7435 = vmatmul.mubr.msk.f32.gmra.mxu0 %vm1059_vm4, %v7433_v14  ;;  %1672 = vmatpush1.msra.mxu1 %v7458_v15  ;;  %v7492_v14 = vld [vmem:[%s12887_s6 + $0x5c0] sm:$0xff]  ;;  %v7506_v15 = vld [vmem:[%s12887_s6 + $0x610] sm:$0xff] }
 0x53e   :  { %1817 = vmatprep.mubr.f32.mxu0 %v12903_v0  ;;  %1673 = vmatprep.subr.mxu1 %v7457_v16  ;;  %v7491_v16 = vld [vmem:[%s12887_s6 + $0x5b8] sm:$0xff] }
 0x53f   :  { %1674 = vmatpush1.msra.mxu1 %v7456_v43  ;;  %v7505_v43 = vld [vmem:[%s12887_s6 + $0x608] sm:$0xff] }
 0x540   :  { %1675 = vmatprep.subr.mxu1 %v7455_v17  ;;  %v7490_v17 = vld [vmem:[%s12887_s6 + $0x5b0] sm:$0xff] }
 0x541   :  { %7502 = vmatmul.mubr.msk.f32.vlgmr.msra.gmra.mxu0 %vm1059_vm4, %v7500_v18  ;;  %1676 = vmatpush1.msra.mxu1 %v7454_v19  ;;  %v7504_v18 = vld [vmem:[%s12887_s6 + $0x600] sm:$0xff]  ;;  %v7489_v19 = vld [vmem:[%s12887_s6 + $0x5a8] sm:$0xff] }
 0x542   :  { %1823 = vmatprep.mubr.f32.mxu0 %v12903_v0  ;;  %1896 = vmatpush1.msra.mxu0 %v7534_v20  ;;  %v7567_v20 = vld [vmem:[%s12887_s6 + $0x7f8] sm:$0xff] }
 0x543   :  { %1897 = vmatprep.subr.mxu0 %v7533_v21  ;;  %1677 = vmatprep.subr.mxu1 %v7453_v22  ;;  %v7488_v21 = vld [vmem:[%s12887_s6 + $0x5a0] sm:$0xff]  ;;  %v7566_v22 = vld [vmem:[%s12887_s6 + $0x7f0] sm:$0xff] }
 0x544   :  { %1898 = vmatpush1.msra.mxu0 %v7532_v23  ;;  %1678 = vmatpush1.msra.mxu1 %v7452_v24  ;;  %v7487_v23 = vld [vmem:[%s12887_s6 + $0x598] sm:$0xff]  ;;  %v7565_v24 = vld [vmem:[%s12887_s6 + $0x7e8] sm:$0xff] }
 0x545   :  { %7503 = vmatmul.mubr.msk.f32.gmra.mxu0 %vm1059_vm4, %v7501_v25  ;;  %1899 = vmatprep.subr.mxu0 %v7531_v27  ;;  %v7486_v25 = vld [vmem:[%s12887_s6 + $0x590] sm:$0xff]  ;;  %v7564_v27 = vld [vmem:[%s12887_s6 + $0x7e0] sm:$0xff] }
 0x546   :  { %1900 = vmatpush1.msra.mxu0 %v7530_v28  ;;  %1679 = vmatprep.subr.mxu1 %v7451_v29  ;;  %v7485_v28 = vld [vmem:[%s12887_s6 + $0x588] sm:$0xff]  ;;  %v7563_v29 = vld [vmem:[%s12887_s6 + $0x7d8] sm:$0xff] }
 0x547   :  { %1901 = vmatprep.subr.mxu0 %v7529_v30  ;;  %1680 = vmatpush1.msra.mxu1 %v7450_v31  ;;  %v7484_v30 = vld [vmem:[%s12887_s6 + $0x580] sm:$0xff]  ;;  %v7562_v31 = vld [vmem:[%s12887_s6 + $0x7d0] sm:$0xff] }
 0x548   :  { %1902 = vmatpush1.msra.mxu0 %v7528_v32  ;;  %1681 = vmatprep.subr.mxu1 %v7449_v33  ;;  %v7483_v32 = vld [vmem:[%s12887_s6 + $0x578] sm:$0xff]  ;;  %v7561_v33 = vld [vmem:[%s12887_s6 + $0x7c8] sm:$0xff] }
 0x549   :  { %1903 = vmatprep.subr.mxu0 %v7527_v34  ;;  %1682 = vmatpush1.msra.mxu1 %v7448_v35  ;;  %v7482_v34 = vld [vmem:[%s12887_s6 + $0x570] sm:$0xff]  ;;  %v7560_v35 = vld [vmem:[%s12887_s6 + $0x7c0] sm:$0xff] }
 0x54a   :  { %1904 = vmatpush1.msra.mxu0 %v7526_v36  ;;  %1683 = vmatprep.subr.mxu1 %v7447_v37  ;;  %v7481_v36 = vld [vmem:[%s12887_s6 + $0x568] sm:$0xff]  ;;  %v7559_v37 = vld [vmem:[%s12887_s6 + $0x7b8] sm:$0xff] }
 0x54b   :  { %1905 = vmatprep.subr.mxu0 %v7525_v38  ;;  %1684 = vmatpush1.msra.mxu1 %v7446_v39  ;;  %v7480_v38 = vld [vmem:[%s12887_s6 + $0x560] sm:$0xff]  ;;  %v7558_v39 = vld [vmem:[%s12887_s6 + $0x7b0] sm:$0xff] }
 0x54c   :  { %1906 = vmatpush1.msra.mxu0 %v7524_v40  ;;  %1685 = vmatprep.subr.mxu1 %v7445_v41  ;;  %v7557_v40 = vld [vmem:[%s12887_s6 + $0x7a8] sm:$0xff]  ;;  %v7556_v41 = vld [vmem:[%s12887_s6 + $0x7a0] sm:$0xff] }
 0x54d   :  { %1907 = vmatprep.subr.mxu0 %v7523_v44  ;;  %1686 = vmatpush1.msra.mxu1 %v7444_v45  ;;  %v7479_v44 = vld [vmem:[%s12887_s6 + $0x558] sm:$0xff] }
 0x54e   :  { %1908 = vmatpush1.msra.mxu0 %v7522_v46  ;;  %1687 = vmatprep.subr.mxu1 %v7443_v47  ;;  %v7555_v45 = vld [vmem:[%s12887_s6 + $0x798] sm:$0xff]  ;;  %v7478_v46 = vld [vmem:[%s12887_s6 + $0x550] sm:$0xff] }
 0x54f   :  { %1909 = vmatprep.subr.mxu0 %v7521_v48  ;;  %1688 = vmatpush1.msra.mxu1 %v7442_v49  ;;  %v7554_v47 = vld [vmem:[%s12887_s6 + $0x790] sm:$0xff]  ;;  %v7477_v48 = vld [vmem:[%s12887_s6 + $0x548] sm:$0xff] }
 0x550   :  { %1910 = vmatpush1.msra.mxu0 %v7520_v50  ;;  %1689 = vmatprep.subr.mxu1 %v7441_v51  ;;  %v7553_v49 = vld [vmem:[%s12887_s6 + $0x788] sm:$0xff]  ;;  %v7476_v50 = vld [vmem:[%s12887_s6 + $0x540] sm:$0xff] }
 0x551   :  { %1911 = vmatprep.subr.mxu0 %v7519_v52  ;;  %1690 = vmatpush1.msra.mxu1 %v7440_v53  ;;  %v7552_v51 = vld [vmem:[%s12887_s6 + $0x780] sm:$0xff]  ;;  %v7475_v52 = vld [vmem:[%s12887_s6 + $0x538] sm:$0xff] }
 0x552   :  { %1912 = vmatpush1.msra.mxu0 %v7518_v54  ;;  %1691 = vmatprep.subr.mxu1 %v7439_v55  ;;  %v7551_v53 = vld [vmem:[%s12887_s6 + $0x778] sm:$0xff]  ;;  %v7474_v54 = vld [vmem:[%s12887_s6 + $0x530] sm:$0xff] }
 0x553   :  { %1913 = vmatprep.subr.mxu0 %v7517_v56  ;;  %1692 = vmatpush1.msra.mxu1 %v7438_v57  ;;  %v7550_v55 = vld [vmem:[%s12887_s6 + $0x770] sm:$0xff]  ;;  %v7473_v56 = vld [vmem:[%s12887_s6 + $0x528] sm:$0xff] }
 0x554   :  { %1914 = vmatpush1.msra.mxu0 %v7516_v58  ;;  %1693 = vmatprep.subr.mxu1 %v7437_v59  ;;  %v7549_v57 = vld [vmem:[%s12887_s6 + $0x768] sm:$0xff]  ;;  %v7472_v58 = vld [vmem:[%s12887_s6 + $0x520] sm:$0xff] }
 0x555   :  { %1915 = vmatprep.subr.mxu0 %v7515_v60  ;;  %1694 = vmatpush1.msra.mxu1 %v7436_v62  ;;  %v7548_v59 = vld [vmem:[%s12887_s6 + $0x760] sm:$0xff]  ;;  %v7471_v60 = vld [vmem:[%s12887_s6 + $0x518] sm:$0xff] }
 0x556   :  { %1916 = vmatpush1.msra.mxu0 %v7514_v63  ;;  %1695 = vmatprep.subr.mxu1 %v7499_v1  ;;  %v7547_v62 = vld [vmem:[%s12887_s6 + $0x758] sm:$0xff]  ;;  %v7470_v63 = vld [vmem:[%s12887_s6 + $0x510] sm:$0xff] }
 0x557   :  { %1917 = vmatprep.subr.mxu0 %v7513_v2  ;;  %1696 = vmatpush2.msra.mxu1 %v7498_v3  ;;  %v7546_v1 = vld [vmem:[%s12887_s6 + $0x750] sm:$0xff]  ;;  %v7469_v2 = vld [vmem:[%s12887_s6 + $0x508] sm:$0xff] }
 0x558   :  { %1918 = vmatpush1.msra.mxu0 %v7512_v4  ;;  %1697 = vmatprep.subr.mxu1 %v7497_v5  ;;  %v7545_v3 = vld [vmem:[%s12887_s6 + $0x748] sm:$0xff]  ;;  %v7468_v4 = vld [vmem:[%s12887_s6 + $0x500] sm:$0xff] }
 0x559   :  { %1919 = vmatprep.subr.mxu0 %v7511_v6  ;;  %1698 = vmatpush2.msra.mxu1 %v7496_v7  ;;  %v7544_v5 = vld [vmem:[%s12887_s6 + $0x740] sm:$0xff]  ;;  %v7543_v6 = vld [vmem:[%s12887_s6 + $0x738] sm:$0xff]  ;;  %v7542_v7 = vld [vmem:[%s12887_s6 + $0x730] sm:$0xff] }
 0x55a   :  { %1920 = vmatpush1.msra.mxu0 %v7510_v8  ;;  %1699 = vmatprep.subr.mxu1 %v7495_v9  ;;  %v7541_v8 = vld [vmem:[%s12887_s6 + $0x728] sm:$0xff]  ;;  %v7540_v9 = vld [vmem:[%s12887_s6 + $0x720] sm:$0xff] }
 0x55b   :  { %1921 = vmatprep.subr.mxu0 %v7509_v42  ;;  %1700 = vmatpush2.msra.mxu1 %v7494_v10  ;;  %v7539_v42 = vld [vmem:[%s12887_s6 + $0x718] sm:$0xff]  ;;  %v7538_v10 = vld [vmem:[%s12887_s6 + $0x710] sm:$0xff] }
 0x55c   :  { %1922 = vmatpush1.msra.mxu0 %v7508_v11  ;;  %1701 = vmatprep.subr.mxu1 %v7493_v12  ;;  %v7537_v11 = vld [vmem:[%s12887_s6 + $0x708] sm:$0xff]  ;;  %v7536_v12 = vld [vmem:[%s12887_s6 + $0x700] sm:$0xff] }
 0x55d   :  { %1923 = vmatprep.subr.mxu0 %v7507_v13  ;;  %1702 = vmatpush2.msra.mxu1 %v7492_v14  ;;  %v2007_v13 = vld [vmem:[#allocation6 + $0xf8] sm:$0xff] }
 0x55e   :  { %1924 = vmatpush1.msra.mxu0 %v7506_v15  ;;  %1703 = vmatprep.subr.mxu1 %v7491_v16 }
 0x55f   :  { %1925 = vmatprep.subr.mxu0 %v7505_v43  ;;  %1704 = vmatpush2.msra.mxu1 %v7490_v17 }
 0x560   :  { %1926 = vmatpush1.msra.mxu0 %v7504_v18  ;;  %1705 = vmatprep.subr.mxu1 %v7489_v19  ;;  %v2006_v19 = vld [vmem:[#allocation6 + $0xf0] sm:$0xff] }
 0x561   :  { %1927 = vmatprep.subr.mxu0 %v7567_v20  ;;  %1706 = vmatpush2.msra.mxu1 %v7488_v21  ;;  %v2005_v20 = vld [vmem:[#allocation6 + $0xe8] sm:$0xff] }
 0x562   :  { %1928 = vmatpush2.msra.mxu0 %v7566_v22  ;;  %1707 = vmatprep.subr.mxu1 %v7487_v23  ;;  %v2004_v22 = vld [vmem:[#allocation6 + $0xe0] sm:$0xff]  ;;  %v2003_v23 = vld [vmem:[#allocation6 + $0xd8] sm:$0xff] }
 0x563   :  { %1929 = vmatprep.subr.mxu0 %v7565_v24  ;;  %1708 = vmatpush2.msra.mxu1 %v7486_v25  ;;  %v2002_v25 = vld [vmem:[#allocation6 + $0xd0] sm:$0xff] }
 0x564   :  { %1930 = vmatpush2.msra.mxu0 %v7564_v27  ;;  %1709 = vmatprep.subr.mxu1 %v7485_v28  ;;  %v2001_v27 = vld [vmem:[#allocation6 + $0xc8] sm:$0xff] }
 0x565   :  { %1931 = vmatprep.subr.mxu0 %v7563_v29  ;;  %1710 = vmatpush2.msra.mxu1 %v7484_v30  ;;  %v2000_v29 = vld [vmem:[#allocation6 + $0xc0] sm:$0xff]  ;;  %v1999_v30 = vld [vmem:[#allocation6 + $0xb8] sm:$0xff] }
 0x566   :  { %1932 = vmatpush2.msra.mxu0 %v7562_v31  ;;  %1711 = vmatprep.subr.mxu1 %v7483_v32  ;;  %v1998_v32 = vld [vmem:[#allocation6 + $0xb0] sm:$0xff] }
 0x567   :  { %1933 = vmatprep.subr.mxu0 %v7561_v33  ;;  %1712 = vmatpush2.msra.mxu1 %v7482_v34  ;;  %v1997_v33 = vld [vmem:[#allocation6 + $0xa8] sm:$0xff] }
 0x568   :  { %1934 = vmatpush2.msra.mxu0 %v7560_v35  ;;  %1713 = vmatprep.subr.mxu1 %v7481_v36  ;;  %v1996_v35 = vld [vmem:[#allocation6 + $0xa0] sm:$0xff]  ;;  %v1995_v36 = vld [vmem:[#allocation6 + $0x98] sm:$0xff] }
 0x569   :  { %1935 = vmatprep.subr.mxu0 %v7559_v37  ;;  %1714 = vmatpush2.msra.mxu1 %v7480_v38  ;;  %v1994_v38 = vld [vmem:[#allocation6 + $0x90] sm:$0xff] }
 0x56a   :  { %1936 = vmatpush2.msra.mxu0 %v7558_v39  ;;  %1715 = vmatprep.subr.mxu1 %v7479_v44  ;;  %v1993_v39 = vld [vmem:[#allocation6 + $0x88] sm:$0xff]  ;;  %v1990_v44 = vld [vmem:[#allocation6 + $0x70] sm:$0xff] }
 0x56b   :  { %1937 = vmatprep.subr.mxu0 %v7557_v40  ;;  %1716 = vmatpush2.msra.mxu1 %v7478_v46  ;;  %v1992_v40 = vld [vmem:[#allocation6 + $0x80] sm:$0xff] }
 0x56c   :  { %1938 = vmatpush2.msra.mxu0 %v7556_v41  ;;  %1717 = vmatprep.subr.mxu1 %v7477_v48  ;;  %v1991_v41 = vld [vmem:[#allocation6 + $0x78] sm:$0xff]  ;;  %v1988_v46 = vld [vmem:[#allocation6 + $0x60] sm:$0xff]  ;;  %v1986_v48 = vld [vmem:[#allocation6 + $0x50] sm:$0xff] }
 0x56d   :  { %1939 = vmatprep.subr.mxu0 %v7555_v45  ;;  %1718 = vmatpush2.msra.mxu1 %v7476_v50  ;;  %v1989_v45 = vld [vmem:[#allocation6 + $0x68] sm:$0xff]  ;;  %v1984_v50 = vld [vmem:[#allocation6 + $0x40] sm:$0xff] }
 0x56e   :  { %1940 = vmatpush2.msra.mxu0 %v7554_v47  ;;  %1719 = vmatprep.subr.mxu1 %v7475_v52  ;;  %v1987_v47 = vld [vmem:[#allocation6 + $0x58] sm:$0xff]  ;;  %v1982_v52 = vld [vmem:[#allocation6 + $0x30] sm:$0xff] }
 0x56f   :  { %1941 = vmatprep.subr.mxu0 %v7553_v49  ;;  %1720 = vmatpush2.msra.mxu1 %v7474_v54  ;;  %v1985_v49 = vld [vmem:[#allocation6 + $0x48] sm:$0xff]  ;;  %v1980_v54 = vld [vmem:[#allocation6 + $0x20] sm:$0xff] }
 0x570   :  { %1942 = vmatpush2.msra.mxu0 %v7552_v51  ;;  %1721 = vmatprep.subr.mxu1 %v7473_v56  ;;  %v1983_v51 = vld [vmem:[#allocation6 + $0x38] sm:$0xff]  ;;  %v1978_v56 = vld [vmem:[#allocation6 + $0x10] sm:$0xff] }
 0x571   :  { %1943 = vmatprep.subr.mxu0 %v7551_v53  ;;  %1722 = vmatpush2.msra.mxu1 %v7472_v58  ;;  %v1981_v53 = vld [vmem:[#allocation6 + $0x28] sm:$0xff]  ;;  %v1976_v58 = vld [vmem:[#allocation6] sm:$0xff] }
 0x572   :  { %1944 = vmatpush2.msra.mxu0 %v7550_v55  ;;  %1723 = vmatprep.subr.mxu1 %v7471_v60  ;;  %v1979_v55 = vld [vmem:[#allocation6 + $0x18] sm:$0xff]  ;;  %v2038_v60 = vld [vmem:[#allocation6 + $0x1f0] sm:$0xff] }
 0x573   :  { %1945 = vmatprep.subr.mxu0 %v7549_v57  ;;  %1724 = vmatpush2.msra.mxu1 %v7470_v63  ;;  %v1977_v57 = vld [vmem:[#allocation6 + $0x8] sm:$0xff]  ;;  %v2036_v63 = vld [vmem:[#allocation6 + $0x1e0] sm:$0xff] }
 0x574   :  { %1946 = vmatpush2.msra.mxu0 %v7548_v59  ;;  %1725 = vmatprep.subr.mxu1 %v7469_v2  ;;  %v2039_v59 = vld [vmem:[#allocation6 + $0x1f8] sm:$0xff]  ;;  %v2034_v2 = vld [vmem:[#allocation6 + $0x1d0] sm:$0xff] }
 0x575   :  { %1947 = vmatprep.subr.mxu0 %v7547_v62  ;;  %1726 = vmatpush2.msra.mxu1 %v7468_v4  ;;  %v2037_v62 = vld [vmem:[#allocation6 + $0x1e8] sm:$0xff]  ;;  %v2032_v4 = vld [vmem:[#allocation6 + $0x1c0] sm:$0xff] }
 0x576   :  { %1948 = vmatpush2.msra.mxu0 %v7546_v1  ;;  %2057 = vmatprep.subr.mxu1 %v2007_v13  ;;  %v2035_v1 = vld [vmem:[#allocation6 + $0x1d8] sm:$0xff] }
 0x577   :  { %1949 = vmatprep.subr.mxu0 %v7545_v3  ;;  %v2033_v3 = vld [vmem:[#allocation6 + $0x1c8] sm:$0xff] }
 0x578   :  { %1950 = vmatpush2.msra.mxu0 %v7544_v5  ;;  %v2031_v5 = vld [vmem:[#allocation6 + $0x1b8] sm:$0xff] }
 0x579   :  { %1951 = vmatprep.subr.mxu0 %v7543_v6  ;;  %v2030_v6 = vld [vmem:[#allocation6 + $0x1b0] sm:$0xff] }
 0x57a   :  { %1952 = vmatpush2.msra.mxu0 %v7542_v7  ;;  %v2029_v7 = vld [vmem:[#allocation6 + $0x1a8] sm:$0xff] }
 0x57b   :  { %1953 = vmatprep.subr.mxu0 %v7541_v8  ;;  %v2028_v8 = vld [vmem:[#allocation6 + $0x1a0] sm:$0xff] }
 0x57c   :  { %1954 = vmatpush2.msra.mxu0 %v7540_v9  ;;  %v2027_v9 = vld [vmem:[#allocation6 + $0x198] sm:$0xff] }
 0x57d   :  { %1955 = vmatprep.subr.mxu0 %v7539_v42  ;;  %v2026_v42 = vld [vmem:[#allocation6 + $0x190] sm:$0xff] }
 0x57e   :  { %1956 = vmatpush2.msra.mxu0 %v7538_v10  ;;  %v2025_v10 = vld [vmem:[#allocation6 + $0x188] sm:$0xff] }
 0x57f   :  { %1957 = vmatprep.subr.mxu0 %v7537_v11  ;;  %v2024_v11 = vld [vmem:[#allocation6 + $0x180] sm:$0xff] }
 0x580   :  { %1958 = vmatpush2.msra.mxu0 %v7536_v12  ;;  %v2023_v12 = vld [vmem:[#allocation6 + $0x178] sm:$0xff] }
 0x581   :  { %2160 = vmatprep.subr.mxu0 %v2007_v13  ;;  %v2022_v13 = vld [vmem:[#allocation6 + $0x170] sm:$0xff] }
 0x5f1   :  { %v9816_v14 = vpop.f32.mrf.mxu0 }
 0x5f3   :  { %v9818_v15 = vpop.f32.mrf.mxu0 }
 0x5f5   :  { %v9820_v16 = vpop.f32.mrf.mxu0 }
 0x5f7   :  { %v9822_v43 = vpop.f32.mrf.mxu0 }
 0x5f9   :  { %v1587_v17 = vpop.f32.mrf.mxu0 }
 0x5fb   :  { %v1589_v18 = vpop.f32.mrf.mxu0 }
 0x5fc   :  { %1727 = vmatprep.mubr.f32.mxu1 %v1589_v18  ;;  %v2020_v18 = vld [vmem:[#allocation6 + $0x160] sm:$0xff] }
 0x5fd   :  { %v1593_v21 = vpop.f32.mrf.mxu0  ;;  %1728 = vmatmul.mubr.f32.vlgmr.msra.gmra.mxu1 %v1587_v17  ;;  %v2021_v17 = vld [vmem:[#allocation6 + $0x168] sm:$0xff] }
 0x5fe   :  { %2058 = vmatpush1.msra.mxu1 %v2006_v19 }
 0x5ff   :  { %v1595_v24 = vpop.f32.mrf.mxu0  ;;  %2059 = vmatprep.subr.mxu1 %v2005_v20 }
 0x600   :  { %1733 = vmatprep.mubr.f32.mxu1 %v1595_v24  ;;  %2060 = vmatpush1.msra.mxu1 %v2004_v22  ;;  %v2014_v24 = vld [vmem:[#allocation6 + $0x130] sm:$0xff] }
 0x601   :  { %1734 = vmatmul.mubr.f32.gmra.mxu1 %v1593_v21  ;;  %v1819_v28 = vpop.f32.mrf.mxu0  ;;  %2061 = vmatprep.subr.mxu1 %v2003_v23  ;;  %v2017_v21 = vld [vmem:[#allocation6 + $0x148] sm:$0xff] }
 0x602   :  { %2062 = vmatpush1.msra.mxu1 %v2002_v25 }
 0x603   :  { %v1821_v31 = vpop.f32.mrf.mxu0  ;;  %2063 = vmatprep.subr.mxu1 %v2001_v27 }
 0x604   :  { %1959 = vmatprep.mubr.f32.mxu0 %v1821_v31  ;;  %2064 = vmatpush1.msra.mxu1 %v2000_v29  ;;  %v2008_v31 = vld [vmem:[#allocation6 + $0x100] sm:$0xff] }
 0x605   :  { %v1825_v34 = vpop.f32.mrf.mxu0  ;;  %1960 = vmatmul.mubr.f32.vlgmr.msra.gmra.mxu0 %v1819_v28  ;;  %2065 = vmatprep.subr.mxu1 %v1999_v30  ;;  %v2011_v28 = vld [vmem:[#allocation6 + $0x118] sm:$0xff] }
 0x606   :  { %2066 = vmatpush1.msra.mxu1 %v1998_v32  ;;  %2161 = vmatpush1.msra.mxu0 %v2006_v19  ;;  %v2019_v19 = vld [vmem:[#allocation6 + $0x158] sm:$0xff] }
 0x607   :  { %v1827_v37 = vpop.f32.mrf.mxu0  ;;  %2067 = vmatprep.subr.mxu1 %v1997_v33  ;;  %2162 = vmatprep.subr.mxu0 %v2005_v20  ;;  %v2018_v20 = vld [vmem:[#allocation6 + $0x150] sm:$0xff] }
 0x608   :  { %1965 = vmatprep.mubr.f32.mxu0 %v1827_v37  ;;  %2068 = vmatpush1.msra.mxu1 %v1996_v35 }
 0x609   :  { %1966 = vmatmul.mubr.f32.gmra.mxu0 %v1825_v34  ;;  %2069 = vmatprep.subr.mxu1 %v1995_v36 }
 0x60a   :  { %2070 = vmatpush1.msra.mxu1 %v1994_v38  ;;  %2163 = vmatpush1.msra.mxu0 %v2004_v22  ;;  %v2016_v22 = vld [vmem:[#allocation6 + $0x140] sm:$0xff] }
 0x60b   :  { %2071 = vmatprep.subr.mxu1 %v1993_v39  ;;  %2164 = vmatprep.subr.mxu0 %v2003_v23  ;;  %v2015_v23 = vld [vmem:[#allocation6 + $0x138] sm:$0xff] }
 0x60c   :  { %2072 = vmatpush1.msra.mxu1 %v1992_v40  ;;  %2165 = vmatpush1.msra.mxu0 %v2002_v25  ;;  %v2013_v25 = vld [vmem:[#allocation6 + $0x128] sm:$0xff] }
 0x60d   :  { %2073 = vmatprep.subr.mxu1 %v1991_v41  ;;  %2166 = vmatprep.subr.mxu0 %v2001_v27  ;;  %v2012_v27 = vld [vmem:[#allocation6 + $0x120] sm:$0xff] }
 0x60e   :  { %2074 = vmatpush1.msra.mxu1 %v1990_v44  ;;  %2167 = vmatpush1.msra.mxu0 %v2000_v29  ;;  %v2010_v29 = vld [vmem:[#allocation6 + $0x110] sm:$0xff] }
 0x60f   :  { %2075 = vmatprep.subr.mxu1 %v1989_v45  ;;  %2168 = vmatprep.subr.mxu0 %v1999_v30  ;;  %v2009_v30 = vld [vmem:[#allocation6 + $0x108] sm:$0xff] }
 0x610   :  { %2076 = vmatpush1.msra.mxu1 %v1988_v46  ;;  %2169 = vmatpush1.msra.mxu0 %v1998_v32  ;;  %v1501_v32 = vpop.f32.mrf.mxu1 }
 0x611   :  { %2077 = vmatprep.subr.mxu1 %v1987_v47  ;;  %2170 = vmatprep.subr.mxu0 %v1997_v33 }
 0x612   :  { %2078 = vmatpush1.msra.mxu1 %v1986_v48  ;;  %2171 = vmatpush1.msra.mxu0 %v1996_v35  ;;  %v1503_v33 = vpop.f32.mrf.mxu1 }
 0x613   :  { %2079 = vmatprep.subr.mxu1 %v1985_v49  ;;  %2172 = vmatprep.subr.mxu0 %v1995_v36 }
 0x614   :  { %2080 = vmatpush1.msra.mxu1 %v1984_v50  ;;  %2173 = vmatpush1.msra.mxu0 %v1994_v38  ;;  %v1507_v34 = vpop.f32.mrf.mxu1 }
 0x615   :  { %2081 = vmatprep.subr.mxu1 %v1983_v51  ;;  %2174 = vmatprep.subr.mxu0 %v1993_v39 }
 0x616   :  { %2082 = vmatpush1.msra.mxu1 %v1982_v52  ;;  %2175 = vmatpush1.msra.mxu0 %v1992_v40  ;;  %v1509_v35 = vpop.f32.mrf.mxu1  ;;  %v1502_v40 = vadd.f32 %v1501_v32, %v9816_v14 }
 0x617   :  { %2083 = vmatprep.subr.mxu1 %v1981_v53  ;;  %2176 = vmatprep.subr.mxu0 %v1991_v41  ;;  %v1508_v41 = vadd.f32 %v1507_v34, %v9820_v16 }
 0x618   :  { %2084 = vmatpush1.msra.mxu1 %v1980_v54  ;;  %2177 = vmatpush1.msra.mxu0 %v1990_v44 }
 0x619   :  { %2085 = vmatprep.subr.mxu1 %v1979_v55  ;;  %2178 = vmatprep.subr.mxu0 %v1989_v45 }
 0x61a   :  { %2086 = vmatpush1.msra.mxu1 %v1978_v56  ;;  %2179 = vmatpush1.msra.mxu0 %v1988_v46  ;;  %v1504_v46 = vadd.f32 %v1503_v33, %v9818_v15 }
 0x61b   :  { %2180 = vmatprep.subr.mxu0 %v1987_v47  ;;  %2087 = vmatprep.subr.mxu1 %v1977_v57  ;;  %v1510_v47 = vadd.f32 %v1509_v35, %v9822_v43 }
 0x61c   :  { %2181 = vmatpush1.msra.mxu0 %v1986_v48  ;;  %2088 = vmatpush1.msra.mxu1 %v1976_v58 }
 0x61d   :  { %2182 = vmatprep.subr.mxu0 %v1985_v49  ;;  %2089 = vmatprep.subr.mxu1 %v2039_v59 }
 0x61e   :  { %2183 = vmatpush1.msra.mxu0 %v1984_v50  ;;  %2090 = vmatpush2.msra.mxu1 %v2038_v60 }
 0x61f   :  { %2184 = vmatprep.subr.mxu0 %v1983_v51  ;;  %2091 = vmatprep.subr.mxu1 %v2037_v62 }
 0x620   :  { %2185 = vmatpush1.msra.mxu0 %v1982_v52  ;;  %2092 = vmatpush2.msra.mxu1 %v2036_v63 }
 0x621   :  { %2186 = vmatprep.subr.mxu0 %v1981_v53  ;;  %2093 = vmatprep.subr.mxu1 %v2035_v1 }
 0x622   :  { %2187 = vmatpush1.msra.mxu0 %v1980_v54  ;;  %2094 = vmatpush2.msra.mxu1 %v2034_v2 }
 0x623   :  { %2188 = vmatprep.subr.mxu0 %v1979_v55  ;;  %2095 = vmatprep.subr.mxu1 %v2033_v3 }
 0x624   :  { %2189 = vmatpush1.msra.mxu0 %v1978_v56  ;;  %2096 = vmatpush2.msra.mxu1 %v2032_v4 }
 0x625   :  { %2190 = vmatprep.subr.mxu0 %v1977_v57  ;;  %2097 = vmatprep.subr.mxu1 %v2031_v5 }
 0x626   :  { %2191 = vmatpush1.msra.mxu0 %v1976_v58  ;;  %2098 = vmatpush2.msra.mxu1 %v2030_v6 }
 0x627   :  { %2192 = vmatprep.subr.mxu0 %v2039_v59  ;;  %2099 = vmatprep.subr.mxu1 %v2029_v7 }
 0x628   :  { %2193 = vmatpush2.msra.mxu0 %v2038_v60  ;;  %2100 = vmatpush2.msra.mxu1 %v2028_v8 }
 0x629   :  { %2194 = vmatprep.subr.mxu0 %v2037_v62  ;;  %2101 = vmatprep.subr.mxu1 %v2027_v9 }
 0x62a   :  { %2195 = vmatpush2.msra.mxu0 %v2036_v63  ;;  %2102 = vmatpush2.msra.mxu1 %v2026_v42 }
 0x62b   :  { %2196 = vmatprep.subr.mxu0 %v2035_v1  ;;  %2103 = vmatprep.subr.mxu1 %v2025_v10 }
 0x62c   :  { %2197 = vmatpush2.msra.mxu0 %v2034_v2  ;;  %2104 = vmatpush2.msra.mxu1 %v2024_v11 }
 0x62d   :  { %2198 = vmatprep.subr.mxu0 %v2033_v3  ;;  %2105 = vmatprep.subr.mxu1 %v2023_v12 }
 0x62e   :  { %2199 = vmatpush2.msra.mxu0 %v2032_v4  ;;  %2106 = vmatpush2.msra.mxu1 %v2022_v13 }
 0x62f   :  { %2200 = vmatprep.subr.mxu0 %v2031_v5  ;;  %2107 = vmatprep.subr.mxu1 %v2021_v17 }
 0x630   :  { %2201 = vmatpush2.msra.mxu0 %v2030_v6  ;;  %2108 = vmatpush2.msra.mxu1 %v2020_v18 }
 0x631   :  { %2202 = vmatprep.subr.mxu0 %v2029_v7  ;;  %2109 = vmatprep.subr.mxu1 %v2019_v19 }
 0x632   :  { %2203 = vmatpush2.msra.mxu0 %v2028_v8  ;;  %2110 = vmatpush2.msra.mxu1 %v2018_v20 }
 0x633   :  { %2204 = vmatprep.subr.mxu0 %v2027_v9  ;;  %2111 = vmatprep.subr.mxu1 %v2017_v21 }
 0x634   :  { %2205 = vmatpush2.msra.mxu0 %v2026_v42  ;;  %2112 = vmatpush2.msra.mxu1 %v2016_v22 }
 0x635   :  { %2206 = vmatprep.subr.mxu0 %v2025_v10  ;;  %2113 = vmatprep.subr.mxu1 %v2015_v23 }
 0x636   :  { %2207 = vmatpush2.msra.mxu0 %v2024_v11  ;;  %2114 = vmatpush2.msra.mxu1 %v2014_v24 }
 0x637   :  { %2208 = vmatprep.subr.mxu0 %v2023_v12  ;;  %2115 = vmatprep.subr.mxu1 %v2013_v25 }
 0x638   :  { %2209 = vmatpush2.msra.mxu0 %v2022_v13  ;;  %2116 = vmatpush2.msra.mxu1 %v2012_v27 }
 0x639   :  { %2210 = vmatprep.subr.mxu0 %v2021_v17  ;;  %2117 = vmatprep.subr.mxu1 %v2011_v28 }
 0x63a   :  { %2211 = vmatpush2.msra.mxu0 %v2020_v18  ;;  %2118 = vmatpush2.msra.mxu1 %v2010_v29 }
 0x63b   :  { %2212 = vmatprep.subr.mxu0 %v2019_v19  ;;  %2119 = vmatprep.subr.mxu1 %v2009_v30 }
 0x63c   :  { %2213 = vmatpush2.msra.mxu0 %v2018_v20  ;;  %2120 = vmatpush2.msra.mxu1 %v2008_v31 }
 0x63d   :  { %2214 = vmatprep.subr.mxu0 %v2017_v21 }
 0x63e   :  { %2215 = vmatpush2.msra.mxu0 %v2016_v22 }
 0x63f   :  { %2216 = vmatprep.subr.mxu0 %v2015_v23 }
 0x640   :  { %2217 = vmatpush2.msra.mxu0 %v2014_v24 }
 0x641   :  { %2218 = vmatprep.subr.mxu0 %v2013_v25 }
 0x642   :  { %2219 = vmatpush2.msra.mxu0 %v2012_v27 }
 0x643   :  { %2220 = vmatprep.subr.mxu0 %v2011_v28 }
 0x644   :  { %2221 = vmatpush2.msra.mxu0 %v2010_v29 }
 0x645   :  { %2222 = vmatprep.subr.mxu0 %v2009_v30 }
 0x646   :  { %2223 = vmatpush2.msra.mxu0 %v2008_v31 }
 0x6bd   :  { %v1729_v36 = vpop.f32.mrf.mxu1 }
 0x6be   :  { %v1740_v48 = vadd.f32 %v1729_v36, %v1502_v40 }
 0x6bf   :  { %v1731_v37 = vpop.f32.mrf.mxu1 }
 0x6c0   :  { %v1741_v51 = vadd.f32 %v1731_v37, %v1504_v46 }
 0x6c1   :  { %v1735_v38 = vpop.f32.mrf.mxu1 }
 0x6c2   :  { %v1742_v49 = vadd.f32 %v1735_v38, %v1508_v41 }
 0x6c3   :  { %v1737_v44 = vpop.f32.mrf.mxu1 }
 0x6c4   :  { %v1743_v52 = vadd.f32 %v1737_v44, %v1510_v47  ;;  %v7568_v47 = vld [vmem:[%s12889_s8 + $0x1] ss:$2 sm:$0x3] }
 0x6c5   :  { %v1961_v39 = vpop.f32.mrf.mxu0 }
 0x6c6   :  { %v1972_v53 = vadd.f32 %v1961_v39, %v1740_v48 }
 0x6c7   :  { %v1963_v45 = vpop.f32.mrf.mxu0 }
 0x6c8   :  { %v1973_v56 = vadd.f32 %v1963_v45, %v1741_v51  ;;  %v2245_v45 = vld [vmem:[%s12889_s8] ss:$2 sm:$0x3] }
 0x6c9   :  { %v1967_v50 = vpop.f32.mrf.mxu0 }
 0x6ca   :  { %v1974_v54 = vadd.f32 %v1967_v50, %v1742_v49  ;;  %v2250_v49 = vrot.slane %v2245_v45, %v8979_v61 }
 0x6cb   :  { %v1969_v55 = vpop.f32.mrf.mxu0 }
 0x6cc   :  { %v2040_v57 = vadd.f32 %v1974_v54, %v1972_v53  ;;  %v1975_v58 = vadd.f32 %v1969_v55, %v1743_v52  ;;  %v2254_v52 = vrot.slane %v2245_v45, %v8987_v26  ;;  %v2267_v55 = vrot.slane %v7568_v47, %v8979_v61  ;;  %v2411_v45 = vld [vmem:[%s12891_s10 + $0xc0] sm:$0xff] }
 0x6ce   :  { %v2041_v14 = vrot.slane %v2040_v57, 4  ;;  %v2047_v59 = vadd.f32 %v1975_v58, %v1973_v56 }
 0x6d0   :  { %v2042_v16 = vadd.f32 %v2041_v14, %v2040_v57  ;;  %v2048_v60 = vrot.slane %v2047_v59, 4  ;;  %v2271_v57 = vrot.slane %v7568_v47, %v8987_v26  ;;  %v2410_v47 = vld [vmem:[%s12891_s10 + $0xb8] sm:$0xff] }
 0x6d2   :  { %v2043_v62 = vrot.slane %v2042_v16, 2  ;;  %v2049_v63 = vadd.f32 %v2048_v60, %v2047_v59 }
 0x6d4   :  { %v2044_v15 = vadd.f32 %v2043_v62, %v2042_v16  ;;  %v2050_v1 = vrot.slane %v2049_v63, 2 }
 0x6d6   :  { %v2045_v43 = vrot.slane %v2044_v15, 1  ;;  %v2051_v2 = vadd.f32 %v2050_v1, %v2049_v63 }
 0x6d8   :  { %v2052_v3 = vrot.slane %v2051_v2, 1  ;;  %v2046_v4 = vadd.f32 %v2045_v43, %v2044_v15 }
 0x6da   :  { %v2053_v5 = vadd.f32 %v2052_v3, %v2051_v2  ;;  %v2055_v7 = vmul.f32 0.0625, %v2046_v4 }
 0x6dc   :  { %v2056_v6 = vmul.f32 0.0625, %v2053_v5  ;;  %v2282_v5 = vld [vmem:[%s12890_s9] sm:$0xff] }
 0x6de   :  { %2121 = vmatprep.mubr.f32.mxu1 %v2056_v6  ;;  %v7573_v6 = vld [vmem:[%s12890_s9 + $0x20] sm:$0xff] }
 0x6df   :  { %2122 = vmatmul.mubr.f32.vlgmr.msra.gmra.mxu1 %v2055_v7  ;;  %v7612_v7 = vld [vmem:[%s12891_s10 + $0x2f8] sm:$0xff] }
 0x6e0   :  { %2362 = vmatprep.mubr.f32.mxu1 %v12903_v0 }
 0x79f   :  { %v2123_v8 = vpop.f32.mrf.mxu1 }
 0x7a0   :  { %v2131_v9 = vrot.slane %v2123_v8, %v8979_v61  ;;  %v7611_v8 = vld [vmem:[%s12891_s10 + $0x2f0] sm:$0xff] }
 0x7a1   :  { %v2125_v42 = vpop.f32.mrf.mxu1 }
 0x7a2   :  { %v2136_v10 = vsub.f32 %v1972_v53, %v2131_v9  ;;  %v2138_v11 = vsub.f32 %v1974_v54, %v2131_v9  ;;  %v2135_v12 = vrot.slane %v2125_v42, %v8979_v61  ;;  %v7610_v9 = vld [vmem:[%s12891_s10 + $0x2e8] sm:$0xff]  ;;  %v2418_v42 = vld [vmem:[%s12891_s10 + $0xf8] sm:$0xff] }
 0x7a4   :  { %v2140_v13 = vmul.f32 %v2136_v10, %v2136_v10  ;;  %v2142_v17 = vmul.f32 %v2138_v11, %v2138_v11  ;;  %v2137_v18 = vsub.f32 %v1973_v56, %v2135_v12  ;;  %v2139_v19 = vsub.f32 %v1975_v58, %v2135_v12  ;;  %v2283_v12 = vld [vmem:[%s12890_s9 + $0x8] sm:$0xff] }
 0x7a6   :  { %v2144_v20 = vadd.f32 %v2142_v17, %v2140_v13  ;;  %v2141_v21 = vmul.f32 %v2137_v18, %v2137_v18  ;;  %v2143_v22 = vmul.f32 %v2139_v19, %v2139_v19  ;;  %v7608_v13 = vld [vmem:[%s12891_s10 + $0x2d8] sm:$0xff]  ;;  %v7607_v17 = vld [vmem:[%s12891_s10 + $0x2d0] sm:$0xff] }
 0x7a8   :  { %v2145_v23 = vrot.slane %v2144_v20, 4  ;;  %v2151_v24 = vadd.f32 %v2143_v22, %v2141_v21  ;;  %v2284_v21 = vld [vmem:[%s12890_s9 + $0x10] sm:$0xff]  ;;  %v7604_v22 = vld [vmem:[%s12891_s10 + $0x2b8] sm:$0xff] }
 0x7aa   :  { %v2146_v25 = vadd.f32 %v2145_v23, %v2144_v20  ;;  %v2152_v27 = vrot.slane %v2151_v24, 4  ;;  %v7575_v20 = vld [vmem:[%s12890_s9 + $0x30] sm:$0xff] }
 0x7ab   :  { %v7603_v23 = vld [vmem:[%s12891_s10 + $0x2b0] sm:$0xff] }
 0x7ac   :  { %v2147_v28 = vrot.slane %v2146_v25, 2  ;;  %v2153_v29 = vadd.f32 %v2152_v27, %v2151_v24  ;;  %v7602_v24 = vld [vmem:[%s12891_s10 + $0x2a8] sm:$0xff]  ;;  %v7576_v27 = vld [vmem:[%s12890_s9 + $0x38] sm:$0xff] }
 0x7ae   :  { %v2148_v30 = vadd.f32 %v2147_v28, %v2146_v25  ;;  %v2154_v31 = vrot.slane %v2153_v29, 2  ;;  %v7601_v25 = vld [vmem:[%s12891_s10 + $0x2a0] sm:$0xff]  ;;  %v2285_v28 = vld [vmem:[%s12890_s9 + $0x18] sm:$0xff] }
 0x7b0   :  { %v2149_v32 = vrot.slane %v2148_v30, 1  ;;  %v2155_v33 = vadd.f32 %v2154_v31, %v2153_v29  ;;  %v7600_v29 = vld [vmem:[%s12891_s10 + $0x298] sm:$0xff]  ;;  %v2417_v31 = vld [vmem:[%s12891_s10 + $0xf0] sm:$0xff] }
 0x7b2   :  { %v2156_v34 = vrot.slane %v2155_v33, 1  ;;  %v2150_v35 = vadd.f32 %v2149_v32, %v2148_v30  ;;  %v7599_v30 = vld [vmem:[%s12891_s10 + $0x290] sm:$0xff]  ;;  %v7598_v32 = vld [vmem:[%s12891_s10 + $0x288] sm:$0xff] }
 0x7b4   :  { %v2157_v36 = vadd.f32 %v2156_v34, %v2155_v33  ;;  %v2158_v38 = vmul.f32 0.0625, %v2150_v35  ;;  %v2416_v33 = vld [vmem:[%s12891_s10 + $0xe8] sm:$0xff]  ;;  %v7597_v34 = vld [vmem:[%s12891_s10 + $0x280] sm:$0xff] }
 0x7b5   :  { %v2415_v35 = vld [vmem:[%s12891_s10 + $0xe0] sm:$0xff] }
 0x7b6   :  { %v2159_v37 = vmul.f32 0.0625, %v2157_v36  ;;  %v7596_v36 = vld [vmem:[%s12891_s10 + $0x278] sm:$0xff] }
 0x7b8   :  { %2224 = vmatprep.mubr.f32.mxu0 %v2159_v37  ;;  %v2414_v37 = vld [vmem:[%s12891_s10 + $0xd8] sm:$0xff] }
 0x7b9   :  { %2225 = vmatmul.mubr.f32.vlgmr.msra.gmra.mxu0 %v2158_v38  ;;  %v7595_v38 = vld [vmem:[%s12891_s10 + $0x270] sm:$0xff] }
 0x7ba   :  { %2532 = vmatprep.mubr.f32.mxu0 %v12903_v0 }
 0x879   :  { %v2226_v39 = vpop.f32.mrf.mxu0 }
 0x87a   :  { %v2227_v40 = vadd.f32 1e-05, %v2226_v39  ;;  %v2413_v39 = vld [vmem:[%s12891_s10 + $0xd0] sm:$0xff] }
 0x87b   :  { %v2228_v41 = vpop.f32.mrf.mxu0 }
 0x87c   :  { %8257 = vrsqrt.f32 %v2227_v40  ;;  %v2229_v44 = vadd.f32 1e-05, %v2228_v41  ;;  %v7594_v40 = vld [vmem:[%s12891_s10 + $0x268] sm:$0xff] }
 0x87d   :  { %v2412_v41 = vld [vmem:[%s12891_s10 + $0xc8] sm:$0xff] }
 0x87e   :  { %8259 = vrsqrt.f32 %v2229_v44  ;;  %v7593_v44 = vld [vmem:[%s12891_s10 + $0x260] sm:$0xff] }
 0x889   :  { %v8258_v46 = vpop.eup %8257 }
 0x88a   :  { %v2236_v48 = vrot.slane %v8258_v46, %v8979_v61  ;;  %v7592_v46 = vld [vmem:[%s12891_s10 + $0x258] sm:$0xff] }
 0x88b   :  { %v8260_v50 = vpop.eup %8259 }
 0x88c   :  { %v2240_v51 = vrot.slane %v8260_v50, %v8979_v61  ;;  %v2243_v53 = vmul.f32 %v2236_v48, %v2138_v11  ;;  %v2241_v54 = vmul.f32 %v2236_v48, %v2136_v10  ;;  %v7609_v10 = vld [vmem:[%s12891_s10 + $0x2e0] sm:$0xff]  ;;  %v7574_v11 = vld [vmem:[%s12890_s9 + $0x28] sm:$0xff]  ;;  %v7591_v48 = vld [vmem:[%s12891_s10 + $0x250] sm:$0xff] }
 0x88d   :  { %v7590_v50 = vld [vmem:[%s12891_s10 + $0x248] sm:$0xff] }
 0x88e   :  { %v2244_v56 = vmul.f32 %v2240_v51, %v2139_v19  ;;  %v2259_v58 = vmul.f32 %v2250_v49, %v2243_v53  ;;  %v2242_v14 = vmul.f32 %v2240_v51, %v2137_v18  ;;  %v2257_v59 = vmul.f32 %v2250_v49, %v2241_v54  ;;  %v7606_v18 = vld [vmem:[%s12891_s10 + $0x2c8] sm:$0xff]  ;;  %v7605_v19 = vld [vmem:[%s12891_s10 + $0x2c0] sm:$0xff]  ;;  %v2409_v49 = vld [vmem:[%s12891_s10 + $0xb0] sm:$0xff] }
 0x88f   :  { %v2408_v51 = vld [vmem:[%s12891_s10 + $0xa8] sm:$0xff]  ;;  %v2407_v53 = vld [vmem:[%s12891_s10 + $0xa0] sm:$0xff]  ;;  %v7588_v54 = vld [vmem:[%s12891_s10 + $0x238] sm:$0xff] }
 0x890   :  { %v2260_v16 = vmul.f32 %v2254_v52, %v2244_v56  ;;  %v2258_v60 = vmul.f32 %v2254_v52, %v2242_v14  ;;  %v2276_v62 = vadd.f32 %v2267_v55, %v2259_v58  ;;  %v2274_v1 = vadd.f32 %v2267_v55, %v2257_v59  ;;  %v7589_v52 = vld [vmem:[%s12891_s10 + $0x240] sm:$0xff]  ;;  %v2406_v55 = vld [vmem:[%s12891_s10 + $0x98] sm:$0xff]  ;;  %v7587_v56 = vld [vmem:[%s12891_s10 + $0x230] sm:$0xff] }
 0x891   :  { %v7586_v58 = vld [vmem:[%s12891_s10 + $0x228] sm:$0xff]  ;;  %v7585_v59 = vld [vmem:[%s12891_s10 + $0x220] sm:$0xff] }
 0x892   :  { %v2277_v63 = vadd.f32 %v2271_v57, %v2260_v16  ;;  %v2275_v15 = vadd.f32 %v2271_v57, %v2258_v60  ;;  %v9846_v2 = vmax.f32 %v2276_v62, 0.0  ;;  %v9854_v4 = vmax.f32 %v2274_v1, 0.0  ;;  %v2405_v57 = vld [vmem:[%s12891_s10 + $0x90] sm:$0xff]  ;;  %v2404_v14 = vld [vmem:[%s12891_s10 + $0x88] sm:$0xff]  ;;  %v2403_v16 = vld [vmem:[%s12891_s10 + $0x80] sm:$0xff] }
 0x893   :  { %v7584_v60 = vld [vmem:[%s12891_s10 + $0x218] sm:$0xff]  ;;  %v7582_v1 = vld [vmem:[%s12891_s10 + $0x208] sm:$0xff] }
 0x894   :  { %v9844_v43 = vmax.f32 %v2277_v63, 0.0  ;;  %v9850_v3 = vmax.f32 %v2275_v15, 0.0  ;;  %v2402_v62 = vld [vmem:[%s12891_s10 + $0x78] sm:$0xff]  ;;  %v7583_v63 = vld [vmem:[%s12891_s10 + $0x210] sm:$0xff] }
 0x895   :  { %v2401_v15 = vld [vmem:[%s12891_s10 + $0x70] sm:$0xff] }
 0x896   :  { %2326 = vmatprep.subr.mxu1 %v9844_v43  ;;  %2496 = vmatprep.subr.mxu0 %v9844_v43 }
 0x897   :  { %2327 = vmatpush1.msra.mxu1 %v9846_v2  ;;  %2497 = vmatpush1.msra.mxu0 %v9846_v2 }
 0x898   :  { %2328 = vmatprep.subr.mxu1 %v9850_v3  ;;  %2498 = vmatprep.subr.mxu0 %v9850_v3 }
 0x899   :  { %2329 = vmatpush1.msra.mxu1 %v9854_v4  ;;  %2499 = vmatpush1.msra.mxu0 %v9854_v4 }
 0x89a   :  { %7569 = vmatmul.mubr.msk.f32.vlgmr.msra.gmra.mxu1 %vm306_vm3, %v2282_v5  ;;  %7577 = vmatmul.mubr.msk.f32.vlgmr.msra.gmra.mxu0 %vm306_vm3, %v7573_v6  ;;  %v2400_v5 = vld [vmem:[%s12891_s10 + $0x68] sm:$0xff]  ;;  %v7581_v6 = vld [vmem:[%s12891_s10 + $0x200] sm:$0xff] }
 0x89b   :  { %2622 = vmatprep.subr.mxu1 %v7612_v7  ;;  %2368 = vmatprep.mubr.f32.mxu1 %v12903_v0  ;;  %v2399_v7 = vld [vmem:[%s12891_s10 + $0x60] sm:$0xff] }
 0x89c   :  { %2623 = vmatpush1.msra.mxu1 %v7611_v8  ;;  %2538 = vmatprep.mubr.f32.mxu0 %v12903_v0  ;;  %v7644_v8 = vld [vmem:[%s12891_s10 + $0x3f8] sm:$0xff] }
 0x89d   :  { %2624 = vmatprep.subr.mxu1 %v7610_v9  ;;  %2711 = vmatprep.subr.mxu0 %v2418_v42  ;;  %v2398_v9 = vld [vmem:[%s12891_s10 + $0x58] sm:$0xff]  ;;  %v7643_v42 = vld [vmem:[%s12891_s10 + $0x3f0] sm:$0xff] }
 0x89e   :  { %2625 = vmatpush1.msra.mxu1 %v7609_v10  ;;  %7578 = vmatmul.mubr.msk.f32.gmra.mxu0 %vm306_vm3, %v7574_v11  ;;  %v2397_v10 = vld [vmem:[%s12891_s10 + $0x50] sm:$0xff]  ;;  %v7642_v11 = vld [vmem:[%s12891_s10 + $0x3e8] sm:$0xff] }
 0x89f   :  { %7570 = vmatmul.mubr.msk.f32.gmra.mxu1 %vm306_vm3, %v2283_v12  ;;  %2626 = vmatprep.subr.mxu1 %v7608_v13  ;;  %v2396_v12 = vld [vmem:[%s12891_s10 + $0x48] sm:$0xff]  ;;  %v7641_v13 = vld [vmem:[%s12891_s10 + $0x3e0] sm:$0xff] }
 0x8a0   :  { %2627 = vmatpush1.msra.mxu1 %v7607_v17  ;;  %2374 = vmatprep.mubr.f32.mxu1 %v12903_v0  ;;  %v2395_v17 = vld [vmem:[%s12891_s10 + $0x40] sm:$0xff] }
 0x8a1   :  { %2628 = vmatprep.subr.mxu1 %v7606_v18  ;;  %2544 = vmatprep.mubr.f32.mxu0 %v12903_v0  ;;  %v7640_v18 = vld [vmem:[%s12891_s10 + $0x3d8] sm:$0xff] }
 0x8a2   :  { %2629 = vmatpush1.msra.mxu1 %v7605_v19  ;;  %7579 = vmatmul.mubr.msk.f32.gmra.mxu0 %vm306_vm3, %v7575_v20  ;;  %v2394_v19 = vld [vmem:[%s12891_s10 + $0x38] sm:$0xff]  ;;  %v7639_v20 = vld [vmem:[%s12891_s10 + $0x3d0] sm:$0xff] }
 0x8a3   :  { %7571 = vmatmul.mubr.msk.f32.gmra.mxu1 %vm306_vm3, %v2284_v21  ;;  %2630 = vmatprep.subr.mxu1 %v7604_v22  ;;  %v2393_v21 = vld [vmem:[%s12891_s10 + $0x30] sm:$0xff]  ;;  %v7638_v22 = vld [vmem:[%s12891_s10 + $0x3c8] sm:$0xff] }
 0x8a4   :  { %2631 = vmatpush1.msra.mxu1 %v7603_v23  ;;  %2380 = vmatprep.mubr.f32.mxu1 %v12903_v0  ;;  %v2392_v23 = vld [vmem:[%s12891_s10 + $0x28] sm:$0xff] }
 0x8a5   :  { %2632 = vmatprep.subr.mxu1 %v7602_v24  ;;  %2550 = vmatprep.mubr.f32.mxu0 %v12903_v0  ;;  %v7637_v24 = vld [vmem:[%s12891_s10 + $0x3c0] sm:$0xff] }
 0x8a6   :  { %2633 = vmatpush1.msra.mxu1 %v7601_v25  ;;  %7580 = vmatmul.mubr.msk.f32.gmra.mxu0 %vm306_vm3, %v7576_v27  ;;  %v2391_v25 = vld [vmem:[%s12891_s10 + $0x20] sm:$0xff]  ;;  %v7636_v27 = vld [vmem:[%s12891_s10 + $0x3b8] sm:$0xff] }
 0x8a7   :  { %7572 = vmatmul.mubr.msk.f32.gmra.mxu1 %vm306_vm3, %v2285_v28  ;;  %2634 = vmatprep.subr.mxu1 %v7600_v29  ;;  %v2390_v28 = vld [vmem:[%s12891_s10 + $0x18] sm:$0xff]  ;;  %v7635_v29 = vld [vmem:[%s12891_s10 + $0x3b0] sm:$0xff] }
 0x8a8   :  { %2635 = vmatpush1.msra.mxu1 %v7599_v30  ;;  %2712 = vmatpush1.msra.mxu0 %v2417_v31  ;;  %v2389_v30 = vld [vmem:[%s12891_s10 + $0x10] sm:$0xff]  ;;  %v7634_v31 = vld [vmem:[%s12891_s10 + $0x3a8] sm:$0xff] }
 0x8a9   :  { %2636 = vmatprep.subr.mxu1 %v7598_v32  ;;  %2713 = vmatprep.subr.mxu0 %v2416_v33  ;;  %v2388_v32 = vld [vmem:[%s12891_s10 + $0x8] sm:$0xff]  ;;  %v7633_v33 = vld [vmem:[%s12891_s10 + $0x3a0] sm:$0xff] }
 0x8aa   :  { %2637 = vmatpush1.msra.mxu1 %v7597_v34  ;;  %2714 = vmatpush1.msra.mxu0 %v2415_v35  ;;  %v2387_v34 = vld [vmem:[%s12891_s10] sm:$0xff]  ;;  %v7632_v35 = vld [vmem:[%s12891_s10 + $0x398] sm:$0xff] }
 0x8ab   :  { %2638 = vmatprep.subr.mxu1 %v7596_v36  ;;  %2715 = vmatprep.subr.mxu0 %v2414_v37  ;;  %v2450_v36 = vld [vmem:[%s12891_s10 + $0x1f8] sm:$0xff]  ;;  %v7631_v37 = vld [vmem:[%s12891_s10 + $0x390] sm:$0xff] }
 0x8ac   :  { %2639 = vmatpush1.msra.mxu1 %v7595_v38  ;;  %2716 = vmatpush1.msra.mxu0 %v2413_v39  ;;  %v2449_v38 = vld [vmem:[%s12891_s10 + $0x1f0] sm:$0xff]  ;;  %v7630_v39 = vld [vmem:[%s12891_s10 + $0x388] sm:$0xff] }
 0x8ad   :  { %2640 = vmatprep.subr.mxu1 %v7594_v40  ;;  %2717 = vmatprep.subr.mxu0 %v2412_v41  ;;  %v2448_v40 = vld [vmem:[%s12891_s10 + $0x1e8] sm:$0xff]  ;;  %v7629_v41 = vld [vmem:[%s12891_s10 + $0x380] sm:$0xff] }
 0x8ae   :  { %2641 = vmatpush1.msra.mxu1 %v7593_v44  ;;  %2718 = vmatpush1.msra.mxu0 %v2411_v45  ;;  %v2447_v44 = vld [vmem:[%s12891_s10 + $0x1e0] sm:$0xff]  ;;  %v7628_v45 = vld [vmem:[%s12891_s10 + $0x378] sm:$0xff] }
 0x8af   :  { %2642 = vmatprep.subr.mxu1 %v7592_v46  ;;  %2719 = vmatprep.subr.mxu0 %v2410_v47  ;;  %v2446_v46 = vld [vmem:[%s12891_s10 + $0x1d8] sm:$0xff]  ;;  %v7627_v47 = vld [vmem:[%s12891_s10 + $0x370] sm:$0xff] }
 0x8b0   :  { %2643 = vmatpush1.msra.mxu1 %v7591_v48  ;;  %2720 = vmatpush1.msra.mxu0 %v2409_v49  ;;  %v2445_v48 = vld [vmem:[%s12891_s10 + $0x1d0] sm:$0xff]  ;;  %v7626_v49 = vld [vmem:[%s12891_s10 + $0x368] sm:$0xff] }
 0x8b1   :  { %2644 = vmatprep.subr.mxu1 %v7590_v50  ;;  %2721 = vmatprep.subr.mxu0 %v2408_v51  ;;  %v2444_v50 = vld [vmem:[%s12891_s10 + $0x1c8] sm:$0xff]  ;;  %v7625_v51 = vld [vmem:[%s12891_s10 + $0x360] sm:$0xff] }
 0x8b2   :  { %2645 = vmatpush1.msra.mxu1 %v7589_v52  ;;  %2722 = vmatpush1.msra.mxu0 %v2407_v53  ;;  %v2443_v52 = vld [vmem:[%s12891_s10 + $0x1c0] sm:$0xff]  ;;  %v7624_v53 = vld [vmem:[%s12891_s10 + $0x358] sm:$0xff] }
 0x8b3   :  { %2646 = vmatprep.subr.mxu1 %v7588_v54  ;;  %2723 = vmatprep.subr.mxu0 %v2406_v55  ;;  %v2442_v54 = vld [vmem:[%s12891_s10 + $0x1b8] sm:$0xff]  ;;  %v7623_v55 = vld [vmem:[%s12891_s10 + $0x350] sm:$0xff] }
 0x8b4   :  { %2647 = vmatpush1.msra.mxu1 %v7587_v56  ;;  %2724 = vmatpush1.msra.mxu0 %v2405_v57  ;;  %v2441_v56 = vld [vmem:[%s12891_s10 + $0x1b0] sm:$0xff]  ;;  %v7622_v57 = vld [vmem:[%s12891_s10 + $0x348] sm:$0xff] }
 0x8b5   :  { %2648 = vmatprep.subr.mxu1 %v7586_v58  ;;  %2725 = vmatprep.subr.mxu0 %v2404_v14  ;;  %v2440_v58 = vld [vmem:[%s12891_s10 + $0x1a8] sm:$0xff]  ;;  %v7621_v14 = vld [vmem:[%s12891_s10 + $0x340] sm:$0xff] }
 0x8b6   :  { %2649 = vmatpush1.msra.mxu1 %v7585_v59  ;;  %2726 = vmatpush1.msra.mxu0 %v2403_v16  ;;  %v2439_v59 = vld [vmem:[%s12891_s10 + $0x1a0] sm:$0xff]  ;;  %v7620_v16 = vld [vmem:[%s12891_s10 + $0x338] sm:$0xff] }
 0x8b7   :  { %2650 = vmatprep.subr.mxu1 %v7584_v60  ;;  %2727 = vmatprep.subr.mxu0 %v2402_v62  ;;  %v2438_v60 = vld [vmem:[%s12891_s10 + $0x198] sm:$0xff]  ;;  %v7619_v62 = vld [vmem:[%s12891_s10 + $0x330] sm:$0xff] }
 0x8b8   :  { %2651 = vmatpush1.msra.mxu1 %v7583_v63  ;;  %2728 = vmatpush1.msra.mxu0 %v2401_v15  ;;  %v2437_v63 = vld [vmem:[%s12891_s10 + $0x190] sm:$0xff]  ;;  %v7618_v15 = vld [vmem:[%s12891_s10 + $0x328] sm:$0xff] }
 0x8b9   :  { %2652 = vmatprep.subr.mxu1 %v7582_v1  ;;  %2729 = vmatprep.subr.mxu0 %v2400_v5  ;;  %v2436_v1 = vld [vmem:[%s12891_s10 + $0x188] sm:$0xff]  ;;  %v7617_v5 = vld [vmem:[%s12891_s10 + $0x320] sm:$0xff] }
 0x8ba   :  { %2653 = vmatpush1.msra.mxu1 %v7581_v6  ;;  %2730 = vmatpush1.msra.mxu0 %v2399_v7  ;;  %v2435_v6 = vld [vmem:[%s12891_s10 + $0x180] sm:$0xff]  ;;  %v7616_v7 = vld [vmem:[%s12891_s10 + $0x318] sm:$0xff] }
 0x8bb   :  { %2654 = vmatprep.subr.mxu1 %v7644_v8  ;;  %2731 = vmatprep.subr.mxu0 %v2398_v9  ;;  %v2434_v8 = vld [vmem:[%s12891_s10 + $0x178] sm:$0xff]  ;;  %v7615_v9 = vld [vmem:[%s12891_s10 + $0x310] sm:$0xff] }
 0x8bc   :  { %2655 = vmatpush2.msra.mxu1 %v7643_v42  ;;  %2732 = vmatpush1.msra.mxu0 %v2397_v10  ;;  %v2433_v42 = vld [vmem:[%s12891_s10 + $0x170] sm:$0xff]  ;;  %v7614_v10 = vld [vmem:[%s12891_s10 + $0x308] sm:$0xff] }
 0x8bd   :  { %2656 = vmatprep.subr.mxu1 %v7642_v11  ;;  %2733 = vmatprep.subr.mxu0 %v2396_v12  ;;  %v2432_v11 = vld [vmem:[%s12891_s10 + $0x168] sm:$0xff]  ;;  %v7613_v12 = vld [vmem:[%s12891_s10 + $0x300] sm:$0xff] }
 0x8be   :  { %2657 = vmatpush2.msra.mxu1 %v7641_v13  ;;  %2734 = vmatpush1.msra.mxu0 %v2395_v17  ;;  %v2431_v13 = vld [vmem:[%s12891_s10 + $0x160] sm:$0xff]  ;;  %v2430_v17 = vld [vmem:[%s12891_s10 + $0x158] sm:$0xff] }
 0x8bf   :  { %2658 = vmatprep.subr.mxu1 %v7640_v18  ;;  %2735 = vmatprep.subr.mxu0 %v2394_v19  ;;  %v2429_v18 = vld [vmem:[%s12891_s10 + $0x150] sm:$0xff]  ;;  %v2428_v19 = vld [vmem:[%s12891_s10 + $0x148] sm:$0xff] }
 0x8c0   :  { %2659 = vmatpush2.msra.mxu1 %v7639_v20  ;;  %2736 = vmatpush1.msra.mxu0 %v2393_v21  ;;  %v2427_v20 = vld [vmem:[%s12891_s10 + $0x140] sm:$0xff]  ;;  %v2426_v21 = vld [vmem:[%s12891_s10 + $0x138] sm:$0xff] }
 0x8c1   :  { %2660 = vmatprep.subr.mxu1 %v7638_v22  ;;  %2737 = vmatprep.subr.mxu0 %v2392_v23  ;;  %v2425_v22 = vld [vmem:[%s12891_s10 + $0x130] sm:$0xff]  ;;  %v2424_v23 = vld [vmem:[%s12891_s10 + $0x128] sm:$0xff] }
 0x8c2   :  { %2661 = vmatpush2.msra.mxu1 %v7637_v24  ;;  %2738 = vmatpush1.msra.mxu0 %v2391_v25  ;;  %v2423_v24 = vld [vmem:[%s12891_s10 + $0x120] sm:$0xff]  ;;  %v2422_v25 = vld [vmem:[%s12891_s10 + $0x118] sm:$0xff] }
 0x8c3   :  { %2662 = vmatprep.subr.mxu1 %v7636_v27  ;;  %2739 = vmatprep.subr.mxu0 %v2390_v28  ;;  %v2421_v27 = vld [vmem:[%s12891_s10 + $0x110] sm:$0xff]  ;;  %v2420_v28 = vld [vmem:[%s12891_s10 + $0x108] sm:$0xff] }
 0x8c4   :  { %2663 = vmatpush2.msra.mxu1 %v7635_v29  ;;  %2740 = vmatpush1.msra.mxu0 %v2389_v30  ;;  %v2419_v29 = vld [vmem:[%s12891_s10 + $0x100] sm:$0xff]  ;;  %v7684_v30 = vld [vmem:[%s12891_s10 + $0x4f8] sm:$0xff] }
 0x8c5   :  { %2664 = vmatprep.subr.mxu1 %v7634_v31  ;;  %2741 = vmatprep.subr.mxu0 %v2388_v32 }
 0x8c6   :  { %2665 = vmatpush2.msra.mxu1 %v7633_v33  ;;  %2742 = vmatpush1.msra.mxu0 %v2387_v34 }
 0x8c7   :  { %2666 = vmatprep.subr.mxu1 %v7632_v35  ;;  %2743 = vmatprep.subr.mxu0 %v2450_v36  ;;  %v7683_v35 = vld [vmem:[%s12891_s10 + $0x4f0] sm:$0xff]  ;;  %v7682_v36 = vld [vmem:[%s12891_s10 + $0x4e8] sm:$0xff] }
 0x8c8   :  { %2667 = vmatpush2.msra.mxu1 %v7631_v37  ;;  %2744 = vmatpush2.msra.mxu0 %v2449_v38 }
 0x8c9   :  { %2668 = vmatprep.subr.mxu1 %v7630_v39  ;;  %2745 = vmatprep.subr.mxu0 %v2448_v40 }
 0x8ca   :  { %2669 = vmatpush2.msra.mxu1 %v7629_v41  ;;  %2746 = vmatpush2.msra.mxu0 %v2447_v44  ;;  %v7681_v41 = vld [vmem:[%s12891_s10 + $0x4e0] sm:$0xff] }
 0x8cb   :  { %2670 = vmatprep.subr.mxu1 %v7628_v45  ;;  %2747 = vmatprep.subr.mxu0 %v2446_v46  ;;  %v7680_v45 = vld [vmem:[%s12891_s10 + $0x4d8] sm:$0xff] }
 0x8cc   :  { %2671 = vmatpush2.msra.mxu1 %v7627_v47  ;;  %2748 = vmatpush2.msra.mxu0 %v2445_v48  ;;  %v7679_v47 = vld [vmem:[%s12891_s10 + $0x4d0] sm:$0xff] }
 0x8cd   :  { %2672 = vmatprep.subr.mxu1 %v7626_v49  ;;  %2749 = vmatprep.subr.mxu0 %v2444_v50 }
 0x8ce   :  { %2673 = vmatpush2.msra.mxu1 %v7625_v51  ;;  %2750 = vmatpush2.msra.mxu0 %v2443_v52  ;;  %v7677_v51 = vld [vmem:[%s12891_s10 + $0x4c0] sm:$0xff] }
 0x8cf   :  { %2674 = vmatprep.subr.mxu1 %v7624_v53  ;;  %2751 = vmatprep.subr.mxu0 %v2442_v54  ;;  %v7676_v53 = vld [vmem:[%s12891_s10 + $0x4b8] sm:$0xff] }
 0x8d0   :  { %2675 = vmatpush2.msra.mxu1 %v7623_v55  ;;  %2752 = vmatpush2.msra.mxu0 %v2441_v56  ;;  %v7675_v56 = vld [vmem:[%s12891_s10 + $0x4b0] sm:$0xff] }
 0x8d1   :  { %2676 = vmatprep.subr.mxu1 %v7622_v57  ;;  %2753 = vmatprep.subr.mxu0 %v2440_v58  ;;  %v7674_v57 = vld [vmem:[%s12891_s10 + $0x4a8] sm:$0xff]  ;;  %v7673_v58 = vld [vmem:[%s12891_s10 + $0x4a0] sm:$0xff] }
 0x8d2   :  { %2677 = vmatpush2.msra.mxu1 %v7621_v14  ;;  %2754 = vmatpush2.msra.mxu0 %v2439_v59  ;;  %v7645_v14 = vld [vmem:[%s12890_s9 + $0x40] sm:$0xff]  ;;  %v7672_v59 = vld [vmem:[%s12891_s10 + $0x498] sm:$0xff] }
 0x8d3   :  { %2678 = vmatprep.subr.mxu1 %v7620_v16  ;;  %2755 = vmatprep.subr.mxu0 %v2438_v60  ;;  %v7671_v16 = vld [vmem:[%s12891_s10 + $0x490] sm:$0xff]  ;;  %v7670_v60 = vld [vmem:[%s12891_s10 + $0x488] sm:$0xff] }
 0x8d4   :  { %2679 = vmatpush2.msra.mxu1 %v7619_v62  ;;  %2756 = vmatpush2.msra.mxu0 %v2437_v63  ;;  %v7646_v62 = vld [vmem:[%s12890_s9 + $0x48] sm:$0xff]  ;;  %v7669_v63 = vld [vmem:[%s12891_s10 + $0x480] sm:$0xff] }
 0x8d5   :  { %2680 = vmatprep.subr.mxu1 %v7618_v15  ;;  %2757 = vmatprep.subr.mxu0 %v2436_v1  ;;  %v7668_v15 = vld [vmem:[%s12891_s10 + $0x478] sm:$0xff]  ;;  %v7667_v1 = vld [vmem:[%s12891_s10 + $0x470] sm:$0xff] }
 0x8d6   :  { %2681 = vmatpush2.msra.mxu1 %v7617_v5  ;;  %2758 = vmatpush2.msra.mxu0 %v2435_v6  ;;  %v7665_v5 = vld [vmem:[%s12891_s10 + $0x460] sm:$0xff]  ;;  %v7664_v6 = vld [vmem:[%s12891_s10 + $0x458] sm:$0xff] }
 0x8d7   :  { %2682 = vmatprep.subr.mxu1 %v7616_v7  ;;  %2759 = vmatprep.subr.mxu0 %v2434_v8  ;;  %v7663_v7 = vld [vmem:[%s12891_s10 + $0x450] sm:$0xff]  ;;  %v7662_v8 = vld [vmem:[%s12891_s10 + $0x448] sm:$0xff] }
 0x8d8   :  { %2683 = vmatpush2.msra.mxu1 %v7615_v9  ;;  %2760 = vmatpush2.msra.mxu0 %v2433_v42  ;;  %v7648_v9 = vld [vmem:[%s12890_s9 + $0x58] sm:$0xff]  ;;  %v7661_v42 = vld [vmem:[%s12891_s10 + $0x440] sm:$0xff] }
 0x8d9   :  { %2684 = vmatprep.subr.mxu1 %v7614_v10  ;;  %2761 = vmatprep.subr.mxu0 %v2432_v11  ;;  %v7660_v10 = vld [vmem:[%s12891_s10 + $0x438] sm:$0xff]  ;;  %v7659_v11 = vld [vmem:[%s12891_s10 + $0x430] sm:$0xff] }
 0x8da   :  { %2685 = vmatpush2.msra.mxu1 %v7613_v12  ;;  %2762 = vmatpush2.msra.mxu0 %v2431_v13  ;;  %v7658_v12 = vld [vmem:[%s12891_s10 + $0x428] sm:$0xff]  ;;  %v7717_v13 = vld [vmem:[%s12890_s9 + $0x60] sm:$0xff] }
 0x8db   :  { %2845 = vmatprep.subr.mxu1 %v9844_v43  ;;  %2763 = vmatprep.subr.mxu0 %v2430_v17  ;;  %v7657_v17 = vld [vmem:[%s12891_s10 + $0x420] sm:$0xff] }
 0x8dc   :  { %2764 = vmatpush2.msra.mxu0 %v2429_v18  ;;  %v7755_v18 = vld [vmem:[%s12891_s10 + $0x6f0] sm:$0xff] }
 0x8dd   :  { %2765 = vmatprep.subr.mxu0 %v2428_v19  ;;  %v7754_v19 = vld [vmem:[%s12891_s10 + $0x6e8] sm:$0xff] }
 0x8de   :  { %2766 = vmatpush2.msra.mxu0 %v2427_v20  ;;  %v7656_v20 = vld [vmem:[%s12891_s10 + $0x418] sm:$0xff] }
 0x8df   :  { %2767 = vmatprep.subr.mxu0 %v2426_v21  ;;  %v7753_v21 = vld [vmem:[%s12891_s10 + $0x6e0] sm:$0xff] }
 0x8e0   :  { %2768 = vmatpush2.msra.mxu0 %v2425_v22  ;;  %v7655_v22 = vld [vmem:[%s12891_s10 + $0x410] sm:$0xff] }
 0x8e1   :  { %2769 = vmatprep.subr.mxu0 %v2424_v23  ;;  %v7718_v23 = vld [vmem:[%s12890_s9 + $0x68] sm:$0xff] }
 0x8e2   :  { %2770 = vmatpush2.msra.mxu0 %v2423_v24  ;;  %v7752_v24 = vld [vmem:[%s12891_s10 + $0x6d8] sm:$0xff] }
 0x8e3   :  { %2771 = vmatprep.subr.mxu0 %v2422_v25  ;;  %v7751_v25 = vld [vmem:[%s12891_s10 + $0x6d0] sm:$0xff] }
 0x8e4   :  { %2772 = vmatpush2.msra.mxu0 %v2421_v27  ;;  %v7750_v27 = vld [vmem:[%s12891_s10 + $0x6c8] sm:$0xff] }
 0x8e5   :  { %2773 = vmatprep.subr.mxu0 %v2420_v28  ;;  %v7654_v28 = vld [vmem:[%s12891_s10 + $0x408] sm:$0xff] }
 0x8e6   :  { %2774 = vmatpush2.msra.mxu0 %v2419_v29  ;;  %v7749_v29 = vld [vmem:[%s12891_s10 + $0x6c0] sm:$0xff] }
 0x8e7   :  { %2971 = vmatprep.subr.mxu0 %v7684_v30  ;;  %v7653_v30 = vld [vmem:[%s12891_s10 + $0x400] sm:$0xff] }
 0x95a   :  { %v2364_v31 = vpop.f32.mrf.mxu1  ;;  %v2534_v32 = vpop.f32.mrf.mxu0 }
 0x95c   :  { %v2366_v33 = vpop.f32.mrf.mxu1  ;;  %v2536_v34 = vpop.f32.mrf.mxu0 }
 0x95d   :  { %2686 = vmatprep.mubr.f32.mxu1 %v2536_v34  ;;  %2775 = vmatprep.mubr.f32.mxu0 %v2366_v33  ;;  %v7747_v33 = vld [vmem:[%s12891_s10 + $0x6b0] sm:$0xff]  ;;  %v7746_v34 = vld [vmem:[%s12891_s10 + $0x6a8] sm:$0xff] }
 0x95e   :  { %v2540_v37 = vpop.f32.mrf.mxu0  ;;  %2687 = vmatmul.mubr.f32.vlgmr.msra.gmra.mxu1 %v2534_v32  ;;  %2776 = vmatmul.mubr.f32.vlgmr.msra.gmra.mxu0 %v2364_v31  ;;  %v7719_v31 = vld [vmem:[%s12890_s9 + $0x70] sm:$0xff]  ;;  %v7748_v32 = vld [vmem:[%s12891_s10 + $0x6b8] sm:$0xff] }
 0x95f   :  { %v2370_v38 = vpop.f32.mrf.mxu1  ;;  %2846 = vmatpush1.msra.mxu1 %v9846_v2  ;;  %2972 = vmatpush1.msra.mxu0 %v7683_v35  ;;  %v7716_v35 = vld [vmem:[%s12891_s10 + $0x5f8] sm:$0xff] }
 0x960   :  { %2847 = vmatprep.subr.mxu1 %v9850_v3  ;;  %v2542_v39 = vpop.f32.mrf.mxu0  ;;  %2973 = vmatprep.subr.mxu0 %v7682_v36  ;;  %v7745_v36 = vld [vmem:[%s12891_s10 + $0x6a0] sm:$0xff] }
 0x961   :  { %v2372_v40 = vpop.f32.mrf.mxu1  ;;  %2848 = vmatpush1.msra.mxu1 %v9854_v4  ;;  %2692 = vmatprep.mubr.f32.mxu1 %v2542_v39  ;;  %v7744_v39 = vld [vmem:[%s12891_s10 + $0x698] sm:$0xff] }
 0x962   :  { %2781 = vmatprep.mubr.f32.mxu0 %v2372_v40  ;;  %3113 = vmatprep.subr.mxu1 %v9844_v43  ;;  %v2546_v44 = vpop.f32.mrf.mxu0  ;;  %v7678_v43 = vld [vmem:[%s12891_s10 + $0x4c8] sm:$0xff]  ;;  %v7743_v40 = vld [vmem:[%s12891_s10 + $0x690] sm:$0xff] }
 0x963   :  { %v2376_v46 = vpop.f32.mrf.mxu1  ;;  %2693 = vmatmul.mubr.f32.gmra.mxu1 %v2540_v37  ;;  %2782 = vmatmul.mubr.f32.gmra.mxu0 %v2370_v38  ;;  %v7715_v37 = vld [vmem:[%s12891_s10 + $0x5f0] sm:$0xff]  ;;  %v7720_v38 = vld [vmem:[%s12890_s9 + $0x78] sm:$0xff] }
 0x964   :  { %v2548_v48 = vpop.f32.mrf.mxu0  ;;  %2974 = vmatpush1.msra.mxu0 %v7681_v41  ;;  %v7714_v41 = vld [vmem:[%s12891_s10 + $0x5e8] sm:$0xff] }
 0x965   :  { %v2378_v49 = vpop.f32.mrf.mxu1  ;;  %2698 = vmatprep.mubr.f32.mxu1 %v2548_v48  ;;  %2975 = vmatprep.subr.mxu0 %v7680_v45  ;;  %v7713_v45 = vld [vmem:[%s12891_s10 + $0x5e0] sm:$0xff]  ;;  %v7740_v48 = vld [vmem:[%s12891_s10 + $0x678] sm:$0xff] }
 0x966   :  { %2787 = vmatprep.mubr.f32.mxu0 %v2378_v49  ;;  %v2552_v50 = vpop.f32.mrf.mxu0  ;;  %2976 = vmatpush1.msra.mxu0 %v7679_v47  ;;  %v7712_v47 = vld [vmem:[%s12891_s10 + $0x5d8] sm:$0xff]  ;;  %v7711_v49 = vld [vmem:[%s12891_s10 + $0x5d0] sm:$0xff] }
 0x967   :  { %v2382_v52 = vpop.f32.mrf.mxu1  ;;  %2699 = vmatmul.mubr.f32.gmra.mxu1 %v2546_v44  ;;  %2788 = vmatmul.mubr.f32.gmra.mxu0 %v2376_v46  ;;  %v7742_v44 = vld [vmem:[%s12891_s10 + $0x688] sm:$0xff]  ;;  %v7741_v46 = vld [vmem:[%s12891_s10 + $0x680] sm:$0xff] }
 0x968   :  { %v2554_v54 = vpop.f32.mrf.mxu0  ;;  %2977 = vmatprep.subr.mxu0 %v7678_v43  ;;  %v7739_v43 = vld [vmem:[%s12891_s10 + $0x670] sm:$0xff] }
 0x969   :  { %v2384_v55 = vpop.f32.mrf.mxu1  ;;  %2704 = vmatprep.mubr.f32.mxu1 %v2554_v54  ;;  %2978 = vmatpush1.msra.mxu0 %v7677_v51  ;;  %v7738_v51 = vld [vmem:[%s12891_s10 + $0x668] sm:$0xff]  ;;  %v7708_v54 = vld [vmem:[%s12891_s10 + $0x5b8] sm:$0xff] }
 0x96a   :  { %2793 = vmatprep.mubr.f32.mxu0 %v2384_v55  ;;  %2979 = vmatprep.subr.mxu0 %v7676_v53  ;;  %v7737_v53 = vld [vmem:[%s12891_s10 + $0x660] sm:$0xff]  ;;  %v7736_v55 = vld [vmem:[%s12891_s10 + $0x658] sm:$0xff] }
 0x96b   :  { %2705 = vmatmul.mubr.f32.gmra.mxu1 %v2552_v50  ;;  %2794 = vmatmul.mubr.f32.gmra.mxu0 %v2382_v52  ;;  %v7710_v50 = vld [vmem:[%s12891_s10 + $0x5c8] sm:$0xff]  ;;  %v7709_v52 = vld [vmem:[%s12891_s10 + $0x5c0] sm:$0xff] }
 0x96c   :  { %2881 = vmatprep.mubr.f32.mxu1 %v12903_v0  ;;  %2980 = vmatpush1.msra.mxu0 %v7675_v56  ;;  %v7707_v56 = vld [vmem:[%s12891_s10 + $0x5b0] sm:$0xff] }
 0x96d   :  { %2981 = vmatprep.subr.mxu0 %v7674_v57  ;;  %v7735_v57 = vld [vmem:[%s12891_s10 + $0x650] sm:$0xff] }
 0x96e   :  { %2982 = vmatpush1.msra.mxu0 %v7673_v58  ;;  %v7706_v58 = vld [vmem:[%s12891_s10 + $0x5a8] sm:$0xff] }
 0x96f   :  { %7649 = vmatmul.mubr.msk.f32.vlgmr.msra.gmra.mxu1 %vm306_vm3, %v7645_v14  ;;  %2983 = vmatprep.subr.mxu0 %v7672_v59  ;;  %v7734_v14 = vld [vmem:[%s12891_s10 + $0x648] sm:$0xff]  ;;  %v7705_v59 = vld [vmem:[%s12891_s10 + $0x5a0] sm:$0xff] }
 0x970   :  { %3114 = vmatpush1.msra.mxu1 %v9846_v2  ;;  %2887 = vmatprep.mubr.f32.mxu1 %v12903_v0  ;;  %v7756_v2 = vld [vmem:[%s12891_s10 + $0x6f8] sm:$0xff] }
 0x971   :  { %3115 = vmatprep.subr.mxu1 %v9850_v3  ;;  %2984 = vmatpush1.msra.mxu0 %v7671_v16  ;;  %v7666_v3 = vld [vmem:[%s12891_s10 + $0x468] sm:$0xff]  ;;  %v7733_v16 = vld [vmem:[%s12891_s10 + $0x640] sm:$0xff] }
 0x972   :  { %3116 = vmatpush1.msra.mxu1 %v9854_v4  ;;  %2985 = vmatprep.subr.mxu0 %v7670_v60  ;;  %v7647_v4 = vld [vmem:[%s12890_s9 + $0x50] sm:$0xff]  ;;  %v7732_v60 = vld [vmem:[%s12891_s10 + $0x638] sm:$0xff] }
 0x973   :  { %7650 = vmatmul.mubr.msk.f32.gmra.mxu1 %vm306_vm3, %v7646_v62  ;;  %2986 = vmatpush1.msra.mxu0 %v7669_v63  ;;  %v7731_v62 = vld [vmem:[%s12891_s10 + $0x630] sm:$0xff]  ;;  %v7730_v63 = vld [vmem:[%s12891_s10 + $0x628] sm:$0xff] }
 0x974   :  { %2893 = vmatprep.mubr.f32.mxu1 %v12903_v0  ;;  %2987 = vmatprep.subr.mxu0 %v7668_v15  ;;  %v7729_v15 = vld [vmem:[%s12891_s10 + $0x620] sm:$0xff] }
 0x975   :  { %3239 = vmatprep.subr.mxu1 %v7756_v2  ;;  %2988 = vmatpush1.msra.mxu0 %v7667_v1  ;;  %v7704_v2 = vld [vmem:[%s12891_s10 + $0x598] sm:$0xff] }
 0x976   :  { %2989 = vmatprep.subr.mxu0 %v7666_v3  ;;  %v7728_v1 = vld [vmem:[%s12891_s10 + $0x618] sm:$0xff]  ;;  %v7703_v3 = vld [vmem:[%s12891_s10 + $0x590] sm:$0xff] }
 0x977   :  { %7651 = vmatmul.mubr.msk.f32.gmra.mxu1 %vm306_vm3, %v7647_v4  ;;  %2990 = vmatpush1.msra.mxu0 %v7665_v5  ;;  %v7727_v4 = vld [vmem:[%s12891_s10 + $0x610] sm:$0xff]  ;;  %v7702_v5 = vld [vmem:[%s12891_s10 + $0x588] sm:$0xff] }
 0x978   :  { %2899 = vmatprep.mubr.f32.mxu1 %v12903_v0  ;;  %2991 = vmatprep.subr.mxu0 %v7664_v6  ;;  %v7726_v6 = vld [vmem:[%s12891_s10 + $0x608] sm:$0xff] }
 0x979   :  { %2992 = vmatpush1.msra.mxu0 %v7663_v7  ;;  %v7701_v7 = vld [vmem:[%s12891_s10 + $0x580] sm:$0xff] }
 0x97a   :  { %2993 = vmatprep.subr.mxu0 %v7662_v8  ;;  %v7725_v8 = vld [vmem:[%s12891_s10 + $0x600] sm:$0xff] }
 0x97b   :  { %7652 = vmatmul.mubr.msk.f32.gmra.mxu1 %vm306_vm3, %v7648_v9  ;;  %2994 = vmatpush1.msra.mxu0 %v7661_v42  ;;  %v7700_v9 = vld [vmem:[%s12891_s10 + $0x578] sm:$0xff] }
 0x97c   :  { %3149 = vmatprep.mubr.f32.mxu1 %v12903_v0  ;;  %2995 = vmatprep.subr.mxu0 %v7660_v10  ;;  %v7788_v42 = vld [vmem:[%s12891_s10 + $0x7f8] sm:$0xff]  ;;  %v7699_v10 = vld [vmem:[%s12891_s10 + $0x570] sm:$0xff] }
 0x97d   :  { %2996 = vmatpush1.msra.mxu0 %v7659_v11  ;;  %v7787_v11 = vld [vmem:[%s12891_s10 + $0x7f0] sm:$0xff] }
 0x97e   :  { %2997 = vmatprep.subr.mxu0 %v7658_v12  ;;  %v7698_v12 = vld [vmem:[%s12891_s10 + $0x568] sm:$0xff] }
 0x97f   :  { %7721 = vmatmul.mubr.msk.f32.vlgmr.msra.gmra.mxu1 %vm306_vm3, %v7717_v13  ;;  %2998 = vmatpush1.msra.mxu0 %v7657_v17  ;;  %v7786_v13 = vld [vmem:[%s12891_s10 + $0x7e8] sm:$0xff]  ;;  %v7697_v17 = vld [vmem:[%s12891_s10 + $0x560] sm:$0xff] }
 0x980   :  { %3155 = vmatprep.mubr.f32.mxu1 %v12903_v0  ;;  %3240 = vmatpush1.msra.mxu1 %v7755_v18  ;;  %v7785_v18 = vld [vmem:[%s12891_s10 + $0x7e0] sm:$0xff] }
 0x981   :  { %3241 = vmatprep.subr.mxu1 %v7754_v19  ;;  %2999 = vmatprep.subr.mxu0 %v7656_v20  ;;  %v7696_v19 = vld [vmem:[%s12891_s10 + $0x558] sm:$0xff] }
 0x982   :  { %3242 = vmatpush1.msra.mxu1 %v7753_v21  ;;  %3000 = vmatpush1.msra.mxu0 %v7655_v22  ;;  %v7784_v20 = vld [vmem:[%s12891_s10 + $0x7d8] sm:$0xff]  ;;  %v7695_v21 = vld [vmem:[%s12891_s10 + $0x550] sm:$0xff] }
 0x983   :  { %7722 = vmatmul.mubr.msk.f32.gmra.mxu1 %vm306_vm3, %v7718_v23  ;;  %3243 = vmatprep.subr.mxu1 %v7752_v24  ;;  %v7783_v22 = vld [vmem:[%s12891_s10 + $0x7d0] sm:$0xff]  ;;  %v7694_v23 = vld [vmem:[%s12891_s10 + $0x548] sm:$0xff] }
 0x984   :  { %3161 = vmatprep.mubr.f32.mxu1 %v12903_v0  ;;  %3244 = vmatpush1.msra.mxu1 %v7751_v25  ;;  %v7782_v24 = vld [vmem:[%s12891_s10 + $0x7c8] sm:$0xff]  ;;  %v7693_v25 = vld [vmem:[%s12891_s10 + $0x540] sm:$0xff] }
 0x985   :  { %3245 = vmatprep.subr.mxu1 %v7750_v27  ;;  %3001 = vmatprep.subr.mxu0 %v7654_v28  ;;  %v7781_v27 = vld [vmem:[%s12891_s10 + $0x7c0] sm:$0xff]  ;;  %v7692_v28 = vld [vmem:[%s12891_s10 + $0x538] sm:$0xff] }
 0x986   :  { %3246 = vmatpush1.msra.mxu1 %v7749_v29  ;;  %3002 = vmatpush1.msra.mxu0 %v7653_v30  ;;  %v7780_v29 = vld [vmem:[%s12891_s10 + $0x7b8] sm:$0xff]  ;;  %v7691_v30 = vld [vmem:[%s12891_s10 + $0x530] sm:$0xff] }
 0x987   :  { %7723 = vmatmul.mubr.msk.f32.gmra.mxu1 %vm306_vm3, %v7719_v31  ;;  %3247 = vmatprep.subr.mxu1 %v7748_v32  ;;  %v7779_v31 = vld [vmem:[%s12891_s10 + $0x7b0] sm:$0xff]  ;;  %v7690_v32 = vld [vmem:[%s12891_s10 + $0x528] sm:$0xff] }
 0x988   :  { %3167 = vmatprep.mubr.f32.mxu1 %v12903_v0  ;;  %3248 = vmatpush1.msra.mxu1 %v7747_v33  ;;  %v7778_v33 = vld [vmem:[%s12891_s10 + $0x7a8] sm:$0xff] }
 0x989   :  { %3249 = vmatprep.subr.mxu1 %v7746_v34  ;;  %3003 = vmatprep.subr.mxu0 %v7716_v35  ;;  %v7689_v34 = vld [vmem:[%s12891_s10 + $0x520] sm:$0xff] }
 0x98a   :  { %3250 = vmatpush1.msra.mxu1 %v7745_v36  ;;  %3004 = vmatpush2.msra.mxu0 %v7715_v37  ;;  %v7777_v35 = vld [vmem:[%s12891_s10 + $0x7a0] sm:$0xff]  ;;  %v7688_v36 = vld [vmem:[%s12891_s10 + $0x518] sm:$0xff] }
 0x98b   :  { %7724 = vmatmul.mubr.msk.f32.gmra.mxu1 %vm306_vm3, %v7720_v38  ;;  %3251 = vmatprep.subr.mxu1 %v7744_v39  ;;  %v7776_v37 = vld [vmem:[%s12891_s10 + $0x798] sm:$0xff]  ;;  %v7687_v38 = vld [vmem:[%s12891_s10 + $0x510] sm:$0xff] }
 0x98c   :  { %3252 = vmatpush1.msra.mxu1 %v7743_v40  ;;  %3005 = vmatprep.subr.mxu0 %v7714_v41  ;;  %v7775_v39 = vld [vmem:[%s12891_s10 + $0x790] sm:$0xff]  ;;  %v7686_v40 = vld [vmem:[%s12891_s10 + $0x508] sm:$0xff] }
 0x98d   :  { %3253 = vmatprep.subr.mxu1 %v7742_v44  ;;  %3006 = vmatpush2.msra.mxu0 %v7713_v45  ;;  %v7774_v41 = vld [vmem:[%s12891_s10 + $0x788] sm:$0xff]  ;;  %v7685_v44 = vld [vmem:[%s12891_s10 + $0x500] sm:$0xff] }
 0x98e   :  { %3254 = vmatpush1.msra.mxu1 %v7741_v46  ;;  %3007 = vmatprep.subr.mxu0 %v7712_v47  ;;  %v7773_v45 = vld [vmem:[%s12891_s10 + $0x780] sm:$0xff]  ;;  %v7772_v46 = vld [vmem:[%s12891_s10 + $0x778] sm:$0xff]  ;;  %v7771_v47 = vld [vmem:[%s12891_s10 + $0x770] sm:$0xff] }
 0x98f   :  { %3255 = vmatprep.subr.mxu1 %v7740_v48  ;;  %3008 = vmatpush2.msra.mxu0 %v7711_v49  ;;  %v7770_v48 = vld [vmem:[%s12891_s10 + $0x768] sm:$0xff]  ;;  %v7769_v49 = vld [vmem:[%s12891_s10 + $0x760] sm:$0xff] }
 0x990   :  { %3256 = vmatpush1.msra.mxu1 %v7739_v43  ;;  %3009 = vmatprep.subr.mxu0 %v7710_v50  ;;  %v7768_v43 = vld [vmem:[%s12891_s10 + $0x758] sm:$0xff]  ;;  %v7767_v50 = vld [vmem:[%s12891_s10 + $0x750] sm:$0xff] }
 0x991   :  { %3257 = vmatprep.subr.mxu1 %v7738_v51  ;;  %3010 = vmatpush2.msra.mxu0 %v7709_v52  ;;  %v7766_v51 = vld [vmem:[%s12891_s10 + $0x748] sm:$0xff]  ;;  %v7765_v52 = vld [vmem:[%s12891_s10 + $0x740] sm:$0xff] }
 0x992   :  { %3258 = vmatpush1.msra.mxu1 %v7737_v53  ;;  %3011 = vmatprep.subr.mxu0 %v7708_v54  ;;  %v7764_v53 = vld [vmem:[%s12891_s10 + $0x738] sm:$0xff]  ;;  %v7763_v54 = vld [vmem:[%s12891_s10 + $0x730] sm:$0xff] }
 0x993   :  { %3259 = vmatprep.subr.mxu1 %v7736_v55  ;;  %3012 = vmatpush2.msra.mxu0 %v7707_v56  ;;  %v7762_v55 = vld [vmem:[%s12891_s10 + $0x728] sm:$0xff]  ;;  %v7761_v56 = vld [vmem:[%s12891_s10 + $0x720] sm:$0xff] }
 0x994   :  { %3260 = vmatpush1.msra.mxu1 %v7735_v57  ;;  %3013 = vmatprep.subr.mxu0 %v7706_v58  ;;  %v7760_v57 = vld [vmem:[%s12891_s10 + $0x718] sm:$0xff]  ;;  %v7759_v58 = vld [vmem:[%s12891_s10 + $0x710] sm:$0xff] }
 0x995   :  { %3261 = vmatprep.subr.mxu1 %v7734_v14  ;;  %3014 = vmatpush2.msra.mxu0 %v7705_v59  ;;  %v7758_v14 = vld [vmem:[%s12891_s10 + $0x708] sm:$0xff]  ;;  %v7757_v59 = vld [vmem:[%s12891_s10 + $0x700] sm:$0xff] }
 0x996   :  { %3262 = vmatpush1.msra.mxu1 %v7733_v16  ;;  %3015 = vmatprep.subr.mxu0 %v7704_v2  ;;  %v3367_v16 = vld [vmem:[#allocation7 + $0xf8] sm:$0xff] }
 0x997   :  { %3263 = vmatprep.subr.mxu1 %v7732_v60  ;;  %3016 = vmatpush2.msra.mxu0 %v7703_v3 }
 0x998   :  { %3264 = vmatpush1.msra.mxu1 %v7731_v62  ;;  %3017 = vmatprep.subr.mxu0 %v7702_v5 }
 0x999   :  { %3265 = vmatprep.subr.mxu1 %v7730_v63  ;;  %3018 = vmatpush2.msra.mxu0 %v7701_v7  ;;  %v3366_v7 = vld [vmem:[#allocation7 + $0xf0] sm:$0xff] }
 0x99a   :  { %3266 = vmatpush1.msra.mxu1 %v7729_v15  ;;  %3019 = vmatprep.subr.mxu0 %v7700_v9 }
 0x99b   :  { %3267 = vmatprep.subr.mxu1 %v7728_v1  ;;  %3020 = vmatpush2.msra.mxu0 %v7699_v10  ;;  %v3363_v10 = vld [vmem:[#allocation7 + $0xd8] sm:$0xff] }
 0x99c   :  { %3268 = vmatpush1.msra.mxu1 %v7727_v4  ;;  %3021 = vmatprep.subr.mxu0 %v7698_v12  ;;  %v3362_v12 = vld [vmem:[#allocation7 + $0xd0] sm:$0xff] }
 0x99d   :  { %3269 = vmatprep.subr.mxu1 %v7726_v6  ;;  %3022 = vmatpush2.msra.mxu0 %v7697_v17 }
 0x99e   :  { %3270 = vmatpush1.msra.mxu1 %v7725_v8  ;;  %3023 = vmatprep.subr.mxu0 %v7696_v19  ;;  %v3365_v8 = vld [vmem:[#allocation7 + $0xe8] sm:$0xff]  ;;  %v3359_v19 = vld [vmem:[#allocation7 + $0xb8] sm:$0xff] }
 0x99f   :  { %3271 = vmatprep.subr.mxu1 %v7788_v42  ;;  %3024 = vmatpush2.msra.mxu0 %v7695_v21  ;;  %v3364_v42 = vld [vmem:[#allocation7 + $0xe0] sm:$0xff]  ;;  %v3358_v21 = vld [vmem:[#allocation7 + $0xb0] sm:$0xff] }
 0x9a0   :  { %3272 = vmatpush2.msra.mxu1 %v7787_v11  ;;  %3025 = vmatprep.subr.mxu0 %v7694_v23 }
 0x9a1   :  { %3273 = vmatprep.subr.mxu1 %v7786_v13  ;;  %3026 = vmatpush2.msra.mxu0 %v7693_v25  ;;  %v3361_v13 = vld [vmem:[#allocation7 + $0xc8] sm:$0xff]  ;;  %v3355_v25 = vld [vmem:[#allocation7 + $0x98] sm:$0xff] }
 0x9a2   :  { %3274 = vmatpush2.msra.mxu1 %v7785_v18  ;;  %3027 = vmatprep.subr.mxu0 %v7692_v28  ;;  %v3360_v18 = vld [vmem:[#allocation7 + $0xc0] sm:$0xff]  ;;  %v3354_v28 = vld [vmem:[#allocation7 + $0x90] sm:$0xff] }
 0x9a3   :  { %3275 = vmatprep.subr.mxu1 %v7784_v20  ;;  %3028 = vmatpush2.msra.mxu0 %v7691_v30 }
 0x9a4   :  { %3276 = vmatpush2.msra.mxu1 %v7783_v22  ;;  %3029 = vmatprep.subr.mxu0 %v7690_v32  ;;  %v3357_v22 = vld [vmem:[#allocation7 + $0xa8] sm:$0xff] }
 0x9a5   :  { %3277 = vmatprep.subr.mxu1 %v7782_v24  ;;  %3030 = vmatpush2.msra.mxu0 %v7689_v34  ;;  %v3356_v24 = vld [vmem:[#allocation7 + $0xa0] sm:$0xff] }
 0x9a6   :  { %3278 = vmatpush2.msra.mxu1 %v7781_v27  ;;  %3031 = vmatprep.subr.mxu0 %v7688_v36 }
 0x9a7   :  { %3279 = vmatprep.subr.mxu1 %v7780_v29  ;;  %3032 = vmatpush2.msra.mxu0 %v7687_v38  ;;  %v3352_v38 = vld [vmem:[#allocation7 + $0x80] sm:$0xff] }
 0x9a8   :  { %3280 = vmatpush2.msra.mxu1 %v7779_v31  ;;  %3033 = vmatprep.subr.mxu0 %v7686_v40  ;;  %v3350_v40 = vld [vmem:[#allocation7 + $0x70] sm:$0xff] }
 0x9a9   :  { %3281 = vmatprep.subr.mxu1 %v7778_v33  ;;  %3034 = vmatpush2.msra.mxu0 %v7685_v44  ;;  %v3348_v44 = vld [vmem:[#allocation7 + $0x60] sm:$0xff] }
 0x9aa   :  { %3282 = vmatpush2.msra.mxu1 %v7777_v35  ;;  %3421 = vmatprep.subr.mxu0 %v3367_v16 }
 0x9ab   :  { %3283 = vmatprep.subr.mxu1 %v7776_v37  ;;  %v3353_v37 = vld [vmem:[#allocation7 + $0x88] sm:$0xff] }
 0x9ac   :  { %3284 = vmatpush2.msra.mxu1 %v7775_v39  ;;  %v3351_v39 = vld [vmem:[#allocation7 + $0x78] sm:$0xff] }
 0x9ad   :  { %3285 = vmatprep.subr.mxu1 %v7774_v41  ;;  %v3349_v41 = vld [vmem:[#allocation7 + $0x68] sm:$0xff] }
 0x9ae   :  { %3286 = vmatpush2.msra.mxu1 %v7773_v45  ;;  %v3347_v45 = vld [vmem:[#allocation7 + $0x58] sm:$0xff] }
 0x9af   :  { %3287 = vmatprep.subr.mxu1 %v7772_v46  ;;  %v3346_v46 = vld [vmem:[#allocation7 + $0x50] sm:$0xff] }
 0x9b0   :  { %3288 = vmatpush2.msra.mxu1 %v7771_v47  ;;  %v3345_v47 = vld [vmem:[#allocation7 + $0x48] sm:$0xff] }
 0x9b1   :  { %3289 = vmatprep.subr.mxu1 %v7770_v48  ;;  %v3344_v48 = vld [vmem:[#allocation7 + $0x40] sm:$0xff] }
 0x9b2   :  { %3290 = vmatpush2.msra.mxu1 %v7769_v49  ;;  %v3343_v49 = vld [vmem:[#allocation7 + $0x38] sm:$0xff] }
 0x9b3   :  { %3291 = vmatprep.subr.mxu1 %v7768_v43  ;;  %v3342_v43 = vld [vmem:[#allocation7 + $0x30] sm:$0xff] }
 0x9b4   :  { %3292 = vmatpush2.msra.mxu1 %v7767_v50  ;;  %v3341_v50 = vld [vmem:[#allocation7 + $0x28] sm:$0xff] }
 0x9b5   :  { %3293 = vmatprep.subr.mxu1 %v7766_v51  ;;  %v3340_v51 = vld [vmem:[#allocation7 + $0x20] sm:$0xff] }
 0x9b6   :  { %3294 = vmatpush2.msra.mxu1 %v7765_v52  ;;  %v3339_v52 = vld [vmem:[#allocation7 + $0x18] sm:$0xff] }
 0x9b7   :  { %3295 = vmatprep.subr.mxu1 %v7764_v53  ;;  %v3338_v53 = vld [vmem:[#allocation7 + $0x10] sm:$0xff] }
 0x9b8   :  { %3296 = vmatpush2.msra.mxu1 %v7763_v54  ;;  %v3337_v54 = vld [vmem:[#allocation7 + $0x8] sm:$0xff] }
 0x9b9   :  { %3297 = vmatprep.subr.mxu1 %v7762_v55  ;;  %v3336_v55 = vld [vmem:[#allocation7] sm:$0xff] }
 0x9ba   :  { %3298 = vmatpush2.msra.mxu1 %v7761_v56  ;;  %v3399_v56 = vld [vmem:[#allocation7 + $0x1f8] sm:$0xff] }
 0x9bb   :  { %3299 = vmatprep.subr.mxu1 %v7760_v57  ;;  %v3398_v57 = vld [vmem:[#allocation7 + $0x1f0] sm:$0xff] }
 0x9bc   :  { %3300 = vmatpush2.msra.mxu1 %v7759_v58  ;;  %v3397_v58 = vld [vmem:[#allocation7 + $0x1e8] sm:$0xff] }
 0x9bd   :  { %3301 = vmatprep.subr.mxu1 %v7758_v14  ;;  %v3396_v14 = vld [vmem:[#allocation7 + $0x1e0] sm:$0xff] }
 0x9be   :  { %3302 = vmatpush2.msra.mxu1 %v7757_v59  ;;  %v3395_v59 = vld [vmem:[#allocation7 + $0x1d8] sm:$0xff] }
 0x9bf   :  { %3536 = vmatprep.subr.mxu1 %v3367_v16  ;;  %v3394_v16 = vld [vmem:[#allocation7 + $0x1d0] sm:$0xff] }
 0xa1e   :  { %v10714_v60 = vpop.f32.mrf.mxu1 }
 0xa20   :  { %v10716_v62 = vpop.f32.mrf.mxu1 }
 0xa23   :  { %v10718_v63 = vpop.f32.mrf.mxu1 }
 0xa25   :  { %v10720_v15 = vpop.f32.mrf.mxu1 }
 0xa27   :  { %v10722_v2 = vpop.f32.mrf.mxu1 }
 0xa29   :  { %v10724_v1 = vpop.f32.mrf.mxu1 }
 0xa2b   :  { %v10726_v3 = vpop.f32.mrf.mxu1 }
 0xa2d   :  { %v10728_v4 = vpop.f32.mrf.mxu1 }
 0xa2f   :  { %v2883_v5 = vpop.f32.mrf.mxu1 }
 0xa31   :  { %v2885_v6 = vpop.f32.mrf.mxu1 }
 0xa32   :  { %3035 = vmatprep.mubr.f32.mxu0 %v2885_v6  ;;  %v3392_v6 = vld [vmem:[#allocation7 + $0x1c0] sm:$0xff] }
 0xa33   :  { %v2889_v9 = vpop.f32.mrf.mxu1  ;;  %3036 = vmatmul.mubr.f32.vlgmr.msra.gmra.mxu0 %v2883_v5  ;;  %v3393_v5 = vld [vmem:[#allocation7 + $0x1c8] sm:$0xff] }
 0xa34   :  { %3422 = vmatpush1.msra.mxu0 %v3366_v7 }
 0xa35   :  { %v2891_v11 = vpop.f32.mrf.mxu1  ;;  %3423 = vmatprep.subr.mxu0 %v3365_v8 }
 0xa36   :  { %3041 = vmatprep.mubr.f32.mxu0 %v2891_v11  ;;  %3424 = vmatpush1.msra.mxu0 %v3364_v42  ;;  %v3386_v11 = vld [vmem:[#allocation7 + $0x190] sm:$0xff] }
 0xa37   :  { %v2895_v17 = vpop.f32.mrf.mxu1  ;;  %3042 = vmatmul.mubr.f32.gmra.mxu0 %v2889_v9  ;;  %3425 = vmatprep.subr.mxu0 %v3363_v10  ;;  %v3389_v9 = vld [vmem:[#allocation7 + $0x1a8] sm:$0xff] }
 0xa38   :  { %3426 = vmatpush1.msra.mxu0 %v3362_v12 }
 0xa39   :  { %v2897_v20 = vpop.f32.mrf.mxu1  ;;  %3427 = vmatprep.subr.mxu0 %v3361_v13 }
 0xa3a   :  { %3047 = vmatprep.mubr.f32.mxu0 %v2897_v20  ;;  %3428 = vmatpush1.msra.mxu0 %v3360_v18  ;;  %v3380_v20 = vld [vmem:[#allocation7 + $0x160] sm:$0xff] }
 0xa3b   :  { %v2901_v23 = vpop.f32.mrf.mxu1  ;;  %3048 = vmatmul.mubr.f32.gmra.mxu0 %v2895_v17  ;;  %3429 = vmatprep.subr.mxu0 %v3359_v19  ;;  %v3383_v17 = vld [vmem:[#allocation7 + $0x178] sm:$0xff] }
 0xa3c   :  { %3430 = vmatpush1.msra.mxu0 %v3358_v21 }
 0xa3d   :  { %v2903_v27 = vpop.f32.mrf.mxu1  ;;  %3431 = vmatprep.subr.mxu0 %v3357_v22 }
 0xa3e   :  { %3053 = vmatprep.mubr.f32.mxu0 %v2903_v27  ;;  %3432 = vmatpush1.msra.mxu0 %v3356_v24  ;;  %v3374_v27 = vld [vmem:[#allocation7 + $0x130] sm:$0xff] }
 0xa3f   :  { %3054 = vmatmul.mubr.f32.gmra.mxu0 %v2901_v23  ;;  %v3151_v29 = vpop.f32.mrf.mxu1  ;;  %3433 = vmatprep.subr.mxu0 %v3355_v25  ;;  %v3377_v23 = vld [vmem:[#allocation7 + $0x148] sm:$0xff] }
 0xa40   :  { %3434 = vmatpush1.msra.mxu0 %v3354_v28 }
 0xa41   :  { %v3153_v30 = vpop.f32.mrf.mxu1  ;;  %3435 = vmatprep.subr.mxu0 %v3353_v37 }
 0xa42   :  { %3303 = vmatprep.mubr.f32.mxu1 %v3153_v30  ;;  %3436 = vmatpush1.msra.mxu0 %v3352_v38  ;;  %v3371_v30 = vld [vmem:[#allocation7 + $0x118] sm:$0xff] }
 0xa43   :  { %v3157_v31 = vpop.f32.mrf.mxu1  ;;  %3304 = vmatmul.mubr.f32.vlgmr.msra.gmra.mxu1 %v3151_v29  ;;  %3437 = vmatprep.subr.mxu0 %v3351_v39  ;;  %v3372_v29 = vld [vmem:[#allocation7 + $0x120] sm:$0xff] }
 0xa44   :  { %3537 = vmatpush1.msra.mxu1 %v3366_v7  ;;  %3438 = vmatpush1.msra.mxu0 %v3350_v40  ;;  %v3391_v7 = vld [vmem:[#allocation7 + $0x1b8] sm:$0xff] }
 0xa45   :  { %v3159_v32 = vpop.f32.mrf.mxu1  ;;  %3538 = vmatprep.subr.mxu1 %v3365_v8  ;;  %3439 = vmatprep.subr.mxu0 %v3349_v41  ;;  %v3390_v8 = vld [vmem:[#allocation7 + $0x1b0] sm:$0xff] }
 0xa46   :  { %3309 = vmatprep.mubr.f32.mxu1 %v3159_v32  ;;  %3539 = vmatpush1.msra.mxu1 %v3364_v42  ;;  %v3388_v42 = vld [vmem:[#allocation7 + $0x1a0] sm:$0xff]  ;;  %v3369_v32 = vld [vmem:[#allocation7 + $0x108] sm:$0xff] }
 0xa47   :  { %v3163_v33 = vpop.f32.mrf.mxu1  ;;  %3310 = vmatmul.mubr.f32.gmra.mxu1 %v3157_v31  ;;  %3540 = vmatprep.subr.mxu1 %v3363_v10  ;;  %v3387_v10 = vld [vmem:[#allocation7 + $0x198] sm:$0xff]  ;;  %v3370_v31 = vld [vmem:[#allocation7 + $0x110] sm:$0xff] }
 0xa48   :  { %3541 = vmatpush1.msra.mxu1 %v3362_v12  ;;  %3440 = vmatpush1.msra.mxu0 %v3348_v44  ;;  %v3385_v12 = vld [vmem:[#allocation7 + $0x188] sm:$0xff] }
 0xa49   :  { %v3165_v34 = vpop.f32.mrf.mxu1  ;;  %3542 = vmatprep.subr.mxu1 %v3361_v13  ;;  %3441 = vmatprep.subr.mxu0 %v3347_v45  ;;  %v3384_v13 = vld [vmem:[#allocation7 + $0x180] sm:$0xff] }
 0xa4a   :  { %3315 = vmatprep.mubr.f32.mxu1 %v3165_v34  ;;  %3543 = vmatpush1.msra.mxu1 %v3360_v18  ;;  %v3382_v18 = vld [vmem:[#allocation7 + $0x170] sm:$0xff]  ;;  %v2777_v34 = vpop.f32.mrf.mxu0 }
 0xa4b   :  { %v3169_v35 = vpop.f32.mrf.mxu1  ;;  %3316 = vmatmul.mubr.f32.gmra.mxu1 %v3163_v33  ;;  %3544 = vmatprep.subr.mxu1 %v3359_v19  ;;  %v3381_v19 = vld [vmem:[#allocation7 + $0x168] sm:$0xff]  ;;  %v3368_v33 = vld [vmem:[#allocation7 + $0x100] sm:$0xff] }
 0xa4c   :  { %3545 = vmatpush1.msra.mxu1 %v3358_v21  ;;  %3442 = vmatpush1.msra.mxu0 %v3346_v46  ;;  %v3379_v21 = vld [vmem:[#allocation7 + $0x158] sm:$0xff] }
 0xa4d   :  { %v3171_v36 = vpop.f32.mrf.mxu1  ;;  %3546 = vmatprep.subr.mxu1 %v3357_v22  ;;  %3443 = vmatprep.subr.mxu0 %v3345_v47  ;;  %v3378_v22 = vld [vmem:[#allocation7 + $0x150] sm:$0xff] }
 0xa4e   :  { %3321 = vmatprep.mubr.f32.mxu1 %v3171_v36  ;;  %3547 = vmatpush1.msra.mxu1 %v3356_v24  ;;  %v3376_v24 = vld [vmem:[#allocation7 + $0x140] sm:$0xff] }
 0xa4f   :  { %3322 = vmatmul.mubr.f32.gmra.mxu1 %v3169_v35  ;;  %3548 = vmatprep.subr.mxu1 %v3355_v25  ;;  %v3375_v25 = vld [vmem:[#allocation7 + $0x138] sm:$0xff]  ;;  %v2779_v35 = vpop.f32.mrf.mxu0 }
 0xa50   :  { %3549 = vmatpush1.msra.mxu1 %v3354_v28  ;;  %3444 = vmatpush1.msra.mxu0 %v3344_v48  ;;  %v3373_v28 = vld [vmem:[#allocation7 + $0x128] sm:$0xff] }
 0xa51   :  { %3550 = vmatprep.subr.mxu1 %v3353_v37  ;;  %3445 = vmatprep.subr.mxu0 %v3343_v49  ;;  %v2783_v36 = vpop.f32.mrf.mxu0 }
 0xa52   :  { %3551 = vmatpush1.msra.mxu1 %v3352_v38  ;;  %3446 = vmatpush1.msra.mxu0 %v3342_v43 }
 0xa53   :  { %3552 = vmatprep.subr.mxu1 %v3351_v39  ;;  %3447 = vmatprep.subr.mxu0 %v3341_v50  ;;  %v2785_v37 = vpop.f32.mrf.mxu0 }
 0xa54   :  { %3553 = vmatpush1.msra.mxu1 %v3350_v40  ;;  %3448 = vmatpush1.msra.mxu0 %v3340_v51 }
 0xa55   :  { %3554 = vmatprep.subr.mxu1 %v3349_v41  ;;  %3449 = vmatprep.subr.mxu0 %v3339_v52  ;;  %v2789_v38 = vpop.f32.mrf.mxu0 }
 0xa56   :  { %3555 = vmatpush1.msra.mxu1 %v3348_v44  ;;  %3450 = vmatpush1.msra.mxu0 %v3338_v53 }
 0xa57   :  { %3556 = vmatprep.subr.mxu1 %v3347_v45  ;;  %3451 = vmatprep.subr.mxu0 %v3337_v54  ;;  %v2791_v39 = vpop.f32.mrf.mxu0 }
 0xa58   :  { %3557 = vmatpush1.msra.mxu1 %v3346_v46  ;;  %3452 = vmatpush1.msra.mxu0 %v3336_v55 }
 0xa59   :  { %3558 = vmatprep.subr.mxu1 %v3345_v47  ;;  %3453 = vmatprep.subr.mxu0 %v3399_v56  ;;  %v2795_v40 = vpop.f32.mrf.mxu0 }
 0xa5a   :  { %3559 = vmatpush1.msra.mxu1 %v3344_v48  ;;  %3454 = vmatpush2.msra.mxu0 %v3398_v57 }
 0xa5b   :  { %3560 = vmatprep.subr.mxu1 %v3343_v49  ;;  %3455 = vmatprep.subr.mxu0 %v3397_v58  ;;  %v2797_v41 = vpop.f32.mrf.mxu0 }
 0xa5c   :  { %3561 = vmatpush1.msra.mxu1 %v3342_v43  ;;  %3456 = vmatpush2.msra.mxu0 %v3396_v14 }
 0xa5d   :  { %3562 = vmatprep.subr.mxu1 %v3341_v50  ;;  %3457 = vmatprep.subr.mxu0 %v3395_v59 }
 0xa5e   :  { %3563 = vmatpush1.msra.mxu1 %v3340_v51  ;;  %3458 = vmatpush2.msra.mxu0 %v3394_v16  ;;  %v2784_v51 = vadd.f32 %v2783_v36, %v10718_v63  ;;  %v2796_v63 = vadd.f32 %v2795_v40, %v10726_v3 }
 0xa5f   :  { %3564 = vmatprep.subr.mxu1 %v3339_v52  ;;  %3459 = vmatprep.subr.mxu0 %v3393_v5 }
 0xa60   :  { %3565 = vmatpush1.msra.mxu1 %v3338_v53  ;;  %3460 = vmatpush2.msra.mxu0 %v3392_v6  ;;  %v2778_v53 = vadd.f32 %v2777_v34, %v10714_v60 }
 0xa61   :  { %3566 = vmatprep.subr.mxu1 %v3337_v54  ;;  %3461 = vmatprep.subr.mxu0 %v3391_v7  ;;  %v2786_v54 = vadd.f32 %v2785_v37, %v10720_v15 }
 0xa62   :  { %3567 = vmatpush1.msra.mxu1 %v3336_v55  ;;  %3462 = vmatpush2.msra.mxu0 %v3390_v8  ;;  %v2790_v55 = vadd.f32 %v2789_v38, %v10722_v2  ;;  %v2798_v2 = vadd.f32 %v2797_v41, %v10728_v4 }
 0xa63   :  { %3568 = vmatprep.subr.mxu1 %v3399_v56  ;;  %3463 = vmatprep.subr.mxu0 %v3389_v9 }
 0xa64   :  { %3569 = vmatpush2.msra.mxu1 %v3398_v57  ;;  %3464 = vmatpush2.msra.mxu0 %v3388_v42  ;;  %v2780_v57 = vadd.f32 %v2779_v35, %v10716_v62 }
 0xa65   :  { %3570 = vmatprep.subr.mxu1 %v3397_v58  ;;  %3465 = vmatprep.subr.mxu0 %v3387_v10  ;;  %v2792_v58 = vadd.f32 %v2791_v39, %v10724_v1 }
 0xa66   :  { %3571 = vmatpush2.msra.mxu1 %v3396_v14  ;;  %3466 = vmatpush2.msra.mxu0 %v3386_v11 }
 0xa67   :  { %3572 = vmatprep.subr.mxu1 %v3395_v59  ;;  %3467 = vmatprep.subr.mxu0 %v3385_v12 }
 0xa68   :  { %3573 = vmatpush2.msra.mxu1 %v3394_v16  ;;  %3468 = vmatpush2.msra.mxu0 %v3384_v13 }
 0xa69   :  { %3574 = vmatprep.subr.mxu1 %v3393_v5  ;;  %3469 = vmatprep.subr.mxu0 %v3383_v17 }
 0xa6a   :  { %3575 = vmatpush2.msra.mxu1 %v3392_v6  ;;  %3470 = vmatpush2.msra.mxu0 %v3382_v18 }
 0xa6b   :  { %3576 = vmatprep.subr.mxu1 %v3391_v7  ;;  %3471 = vmatprep.subr.mxu0 %v3381_v19 }
 0xa6c   :  { %3577 = vmatpush2.msra.mxu1 %v3390_v8  ;;  %3472 = vmatpush2.msra.mxu0 %v3380_v20 }
 0xa6d   :  { %3578 = vmatprep.subr.mxu1 %v3389_v9  ;;  %3473 = vmatprep.subr.mxu0 %v3379_v21 }
 0xa6e   :  { %3579 = vmatpush2.msra.mxu1 %v3388_v42  ;;  %3474 = vmatpush2.msra.mxu0 %v3378_v22 }
 0xa6f   :  { %3580 = vmatprep.subr.mxu1 %v3387_v10  ;;  %3475 = vmatprep.subr.mxu0 %v3377_v23 }
 0xa70   :  { %3581 = vmatpush2.msra.mxu1 %v3386_v11  ;;  %3476 = vmatpush2.msra.mxu0 %v3376_v24 }
 0xa71   :  { %3582 = vmatprep.subr.mxu1 %v3385_v12  ;;  %3477 = vmatprep.subr.mxu0 %v3375_v25 }
 0xa72   :  { %3583 = vmatpush2.msra.mxu1 %v3384_v13  ;;  %3478 = vmatpush2.msra.mxu0 %v3374_v27 }
 0xa73   :  { %3584 = vmatprep.subr.mxu1 %v3383_v17  ;;  %3479 = vmatprep.subr.mxu0 %v3373_v28 }
 0xa74   :  { %3585 = vmatpush2.msra.mxu1 %v3382_v18  ;;  %3480 = vmatpush2.msra.mxu0 %v3372_v29 }
 0xa75   :  { %3586 = vmatprep.subr.mxu1 %v3381_v19  ;;  %3481 = vmatprep.subr.mxu0 %v3371_v30 }
 0xa76   :  { %3587 = vmatpush2.msra.mxu1 %v3380_v20  ;;  %3482 = vmatpush2.msra.mxu0 %v3370_v31 }
 0xa77   :  { %3588 = vmatprep.subr.mxu1 %v3379_v21  ;;  %3483 = vmatprep.subr.mxu0 %v3369_v32 }
 0xa78   :  { %3589 = vmatpush2.msra.mxu1 %v3378_v22  ;;  %3484 = vmatpush2.msra.mxu0 %v3368_v33 }
 0xa79   :  { %3590 = vmatprep.subr.mxu1 %v3377_v23 }
 0xa7a   :  { %3591 = vmatpush2.msra.mxu1 %v3376_v24 }
 0xa7b   :  { %3592 = vmatprep.subr.mxu1 %v3375_v25 }
 0xa7c   :  { %3593 = vmatpush2.msra.mxu1 %v3374_v27 }
 0xa7d   :  { %3594 = vmatprep.subr.mxu1 %v3373_v28 }
 0xa7e   :  { %3595 = vmatpush2.msra.mxu1 %v3372_v29 }
 0xa7f   :  { %3596 = vmatprep.subr.mxu1 %v3371_v30 }
 0xa80   :  { %3597 = vmatpush2.msra.mxu1 %v3370_v31 }
 0xa81   :  { %3598 = vmatprep.subr.mxu1 %v3369_v32 }
 0xa82   :  { %3599 = vmatpush2.msra.mxu1 %v3368_v33 }
 0xaf3   :  { %v3037_v44 = vpop.f32.mrf.mxu0 }
 0xaf4   :  { %v3060_v16 = vadd.f32 %v3037_v44, %v2778_v53 }
 0xaf5   :  { %v3039_v45 = vpop.f32.mrf.mxu0 }
 0xaf6   :  { %v3061_v8 = vadd.f32 %v3039_v45, %v2780_v57 }
 0xaf7   :  { %v3043_v46 = vpop.f32.mrf.mxu0 }
 0xaf8   :  { %v3062_v56 = vadd.f32 %v3043_v46, %v2784_v51 }
 0xaf9   :  { %v3045_v47 = vpop.f32.mrf.mxu0 }
 0xafa   :  { %v3063_v5 = vadd.f32 %v3045_v47, %v2786_v54 }
 0xafb   :  { %v3049_v48 = vpop.f32.mrf.mxu0 }
 0xafc   :  { %v3064_v6 = vadd.f32 %v3049_v48, %v2790_v55 }
 0xafd   :  { %v3051_v43 = vpop.f32.mrf.mxu0 }
 0xafe   :  { %v3065_v60 = vadd.f32 %v3051_v43, %v2792_v58 }
 0xaff   :  { %v3055_v14 = vpop.f32.mrf.mxu0 }
 0xb00   :  { %v3066_v12 = vadd.f32 %v3055_v14, %v2796_v63 }
 0xb01   :  { %v3057_v11 = vpop.f32.mrf.mxu0 }
 0xb02   :  { %v3067_v19 = vadd.f32 %v3057_v11, %v2798_v2 }
 0xb03   :  { %v3305_v49 = vpop.f32.mrf.mxu1 }
 0xb04   :  { %v3328_v42 = vadd.f32 %v3305_v49, %v3060_v16 }
 0xb05   :  { %v3307_v50 = vpop.f32.mrf.mxu1 }
 0xb06   :  { %v3329_v1 = vadd.f32 %v3307_v50, %v3061_v8 }
 0xb07   :  { %v3311_v52 = vpop.f32.mrf.mxu1 }
 0xb08   :  { %v3330_v7 = vadd.f32 %v3311_v52, %v3062_v56 }
 0xb09   :  { %v3313_v59 = vpop.f32.mrf.mxu1 }
 0xb0a   :  { %v3331_v15 = vadd.f32 %v3313_v59, %v3063_v5  ;;  %v3400_v13 = vadd.f32 %v3330_v7, %v3328_v42 }
 0xb0b   :  { %v3317_v9 = vpop.f32.mrf.mxu1 }
 0xb0c   :  { %v3332_v10 = vadd.f32 %v3317_v9, %v3064_v6  ;;  %v3409_v20 = vadd.f32 %v3331_v15, %v3329_v1 }
 0xb0d   :  { %v3319_v62 = vpop.f32.mrf.mxu1 }
 0xb0e   :  { %v3333_v17 = vadd.f32 %v3319_v62, %v3065_v60  ;;  %v3401_v21 = vadd.f32 %v3400_v13, %v3332_v10 }
 0xb0f   :  { %v3323_v18 = vpop.f32.mrf.mxu1 }
 0xb10   :  { %v3334_v22 = vadd.f32 %v3323_v18, %v3066_v12  ;;  %v3410_v23 = vadd.f32 %v3409_v20, %v3333_v17 }
 0xb11   :  { %v3325_v3 = vpop.f32.mrf.mxu1 }
 0xb12   :  { %v3402_v24 = vadd.f32 %v3401_v21, %v3334_v22  ;;  %v3335_v25 = vadd.f32 %v3325_v3, %v3067_v19 }
 0xb14   :  { %v3403_v27 = vrot.slane %v3402_v24, 4  ;;  %v3411_v28 = vadd.f32 %v3410_v23, %v3335_v25 }
 0xb16   :  { %v3404_v29 = vadd.f32 %v3403_v27, %v3402_v24  ;;  %v3412_v30 = vrot.slane %v3411_v28, 4  ;;  %v3625_v24 = vld [vmem:[%s12893_s12] ss:$2 sm:$0x3] }
 0xb18   :  { %v3405_v4 = vrot.slane %v3404_v29, 2  ;;  %v3413_v31 = vadd.f32 %v3412_v30, %v3411_v28  ;;  %v7789_v28 = vld [vmem:[%s12893_s12 + $0x1] ss:$2 sm:$0x3] }
 0xb1a   :  { %v3406_v32 = vadd.f32 %v3405_v4, %v3404_v29  ;;  %v3414_v33 = vrot.slane %v3413_v31, 2  ;;  %v3630_v29 = vrot.slane %v3625_v24, %v8979_v61 }
 0xb1c   :  { %v3407_v34 = vrot.slane %v3406_v32, 1  ;;  %v3415_v35 = vadd.f32 %v3414_v33, %v3413_v31  ;;  %v3634_v31 = vrot.slane %v3625_v24, %v8987_v26  ;;  %v7801_v24 = vld [vmem:[%s12894_s13 + $0x58] sm:$0xff] }
 0xb1e   :  { %v3416_v36 = vrot.slane %v3415_v35, 1  ;;  %v3408_v37 = vadd.f32 %v3407_v34, %v3406_v32  ;;  %v3651_v34 = vrot.slane %v7789_v28, %v8979_v61 }
 0xb20   :  { %v3417_v38 = vadd.f32 %v3416_v36, %v3415_v35  ;;  %v3419_v40 = vmul.f32 0.03125, %v3408_v37  ;;  %v3655_v37 = vrot.slane %v7789_v28, %v8987_v26  ;;  %v4049_v28 = vld [vmem:[#allocation9 + $0x290] sm:$0xff] }
 0xb22   :  { %v3420_v39 = vmul.f32 0.03125, %v3417_v38 }
 0xb24   :  { %3485 = vmatprep.mubr.f32.mxu0 %v3420_v39 }
 0xb25   :  { %3486 = vmatmul.mubr.f32.vlgmr.msra.gmra.mxu0 %v3419_v40 }
 0xb26   :  { %3771 = vmatprep.mubr.f32.mxu0 %v12903_v0 }
 0xbe5   :  { %v3487_v41 = vpop.f32.mrf.mxu0 }
 0xbe6   :  { %v3495_v44 = vrot.slane %v3487_v41, %v8979_v61 }
 0xbe7   :  { %v3489_v45 = vpop.f32.mrf.mxu0 }
 0xbe8   :  { %v10740_v46 = vsub.f32 %v3328_v42, %v3495_v44  ;;  %v3502_v47 = vsub.f32 %v3330_v7, %v3495_v44  ;;  %v3504_v48 = vsub.f32 %v3332_v10, %v3495_v44  ;;  %v3499_v49 = vrot.slane %v3489_v45, %v8979_v61 }
 0xbe9   :  { %v3506_v43 = vsub.f32 %v3334_v22, %v3495_v44 }
 0xbea   :  { %v3508_v50 = vmul.f32 %v10740_v46, %v10740_v46  ;;  %v3510_v51 = vmul.f32 %v3502_v47, %v3502_v47  ;;  %v3501_v52 = vsub.f32 %v3329_v1, %v3499_v49  ;;  %v3503_v53 = vsub.f32 %v3331_v15, %v3499_v49 }
 0xbeb   :  { %v3505_v54 = vsub.f32 %v3333_v17, %v3499_v49  ;;  %v3512_v55 = vmul.f32 %v3504_v48, %v3504_v48  ;;  %v3507_v57 = vsub.f32 %v3335_v25, %v3499_v49  ;;  %v3514_v59 = vmul.f32 %v3506_v43, %v3506_v43 }
 0xbec   :  { %v3516_v56 = vadd.f32 %v3510_v51, %v3508_v50  ;;  %v3509_v58 = vmul.f32 %v3501_v52, %v3501_v52  ;;  %v3511_v14 = vmul.f32 %v3503_v53, %v3503_v53 }
 0xbed   :  { %v3513_v5 = vmul.f32 %v3505_v54, %v3505_v54  ;;  %v3515_v63 = vmul.f32 %v3507_v57, %v3507_v57 }
 0xbee   :  { %v3517_v16 = vadd.f32 %v3516_v56, %v3512_v55  ;;  %v3525_v6 = vadd.f32 %v3511_v14, %v3509_v58 }
 0xbf0   :  { %v3518_v7 = vadd.f32 %v3517_v16, %v3514_v59  ;;  %v3526_v8 = vadd.f32 %v3525_v6, %v3513_v5 }
 0xbf2   :  { %v3519_v9 = vrot.slane %v3518_v7, 4  ;;  %v3527_v60 = vadd.f32 %v3526_v8, %v3515_v63 }
 0xbf4   :  { %v3520_v42 = vadd.f32 %v3519_v9, %v3518_v7  ;;  %v3528_v10 = vrot.slane %v3527_v60, 4  ;;  %v3674_v9 = vld [vmem:[%s12894_s13] sm:$0xff] }
 0xbf6   :  { %v3521_v2 = vrot.slane %v3520_v42, 2  ;;  %v3529_v11 = vadd.f32 %v3528_v10, %v3527_v60  ;;  %v7798_v60 = vld [vmem:[%s12894_s13 + $0x40] sm:$0xff]  ;;  %v4061_v10 = vld [vmem:[#allocation9 + $0x2f0] sm:$0xff] }
 0xbf8   :  { %v3522_v15 = vadd.f32 %v3521_v2, %v3520_v42  ;;  %v3530_v62 = vrot.slane %v3529_v11, 2  ;;  %v4062_v42 = vld [vmem:[#allocation9 + $0x2f8] sm:$0xff]  ;;  %v4060_v2 = vld [vmem:[#allocation9 + $0x2e8] sm:$0xff] }
 0xbfa   :  { %v3523_v12 = vrot.slane %v3522_v15, 1  ;;  %v3531_v1 = vadd.f32 %v3530_v62, %v3529_v11  ;;  %v3851_v11 = vld [vmem:[#allocation9 + $0xf8] sm:$0xff]  ;;  %v7799_v62 = vld [vmem:[%s12894_s13 + $0x48] sm:$0xff] }
 0xbfc   :  { %v3532_v13 = vrot.slane %v3531_v1, 1  ;;  %v3524_v17 = vadd.f32 %v3523_v12, %v3522_v15  ;;  %v4059_v15 = vld [vmem:[#allocation9 + $0x2e0] sm:$0xff] }
 0xbfd   :  { %v3675_v12 = vld [vmem:[%s12894_s13 + $0x8] sm:$0xff] }
 0xbfe   :  { %v3533_v18 = vadd.f32 %v3532_v13, %v3531_v1  ;;  %v3534_v20 = vmul.f32 0.03125, %v3524_v17  ;;  %v4058_v1 = vld [vmem:[#allocation9 + $0x2d8] sm:$0xff]  ;;  %v4057_v13 = vld [vmem:[#allocation9 + $0x2d0] sm:$0xff]  ;;  %v4056_v17 = vld [vmem:[#allocation9 + $0x2c8] sm:$0xff] }
 0xc00   :  { %v3535_v19 = vmul.f32 0.03125, %v3533_v18  ;;  %v4055_v18 = vld [vmem:[#allocation9 + $0x2c0] sm:$0xff] }
 0xc02   :  { %3600 = vmatprep.mubr.f32.mxu1 %v3535_v19  ;;  %v7800_v19 = vld [vmem:[%s12894_s13 + $0x50] sm:$0xff] }
 0xc03   :  { %3601 = vmatmul.mubr.f32.vlgmr.msra.gmra.mxu1 %v3534_v20  ;;  %v3676_v20 = vld [vmem:[%s12894_s13 + $0x10] sm:$0xff] }
 0xc04   :  { %3981 = vmatprep.mubr.f32.mxu1 %v12903_v0 }
 0xcc3   :  { %v3602_v21 = vpop.f32.mrf.mxu1 }
 0xcc4   :  { %v3603_v22 = vadd.f32 1e-05, %v3602_v21  ;;  %v4054_v21 = vld [vmem:[#allocation9 + $0x2b8] sm:$0xff] }
 0xcc5   :  { %v3604_v3 = vpop.f32.mrf.mxu1 }
 0xcc6   :  { %8261 = vrsqrt.f32 %v3603_v22  ;;  %v3605_v23 = vadd.f32 1e-05, %v3604_v3  ;;  %v4053_v22 = vld [vmem:[#allocation9 + $0x2b0] sm:$0xff]  ;;  %v4052_v3 = vld [vmem:[#allocation9 + $0x2a8] sm:$0xff] }
 0xcc8   :  { %8263 = vrsqrt.f32 %v3605_v23  ;;  %v4051_v23 = vld [vmem:[#allocation9 + $0x2a0] sm:$0xff] }
 0xcd3   :  { %v8262_v25 = vpop.eup %8261 }
 0xcd4   :  { %v3612_v27 = vrot.slane %v8262_v25, %v8979_v61  ;;  %v3677_v25 = vld [vmem:[%s12894_s13 + $0x18] sm:$0xff] }
 0xcd5   :  { %v8264_v30 = vpop.eup %8263 }
 0xcd6   :  { %v3616_v4 = vrot.slane %v8264_v30, %v8979_v61  ;;  %v3623_v32 = vmul.f32 %v3612_v27, %v3506_v43  ;;  %v3621_v33 = vmul.f32 %v3612_v27, %v3504_v48  ;;  %v3619_v35 = vmul.f32 %v3612_v27, %v3502_v47  ;;  %v4047_v30 = vld [vmem:[#allocation9 + $0x280] sm:$0xff] }
 0xcd7   :  { %v3617_v45 = vmul.f32 %v3612_v27, %v10740_v46  ;;  %v4050_v27 = vld [vmem:[#allocation9 + $0x298] sm:$0xff] }
 0xcd8   :  { %v3624_v36 = vmul.f32 %v3616_v4, %v3507_v57  ;;  %v3643_v38 = vmul.f32 %v3630_v29, %v3623_v32  ;;  %v3622_v39 = vmul.f32 %v3616_v4, %v3505_v54  ;;  %v3641_v40 = vmul.f32 %v3630_v29, %v3621_v33  ;;  %v4046_v32 = vld [vmem:[#allocation9 + $0x278] sm:$0xff]  ;;  %v4045_v33 = vld [vmem:[#allocation9 + $0x270] sm:$0xff] }
 0xcd9   :  { %v3620_v41 = vmul.f32 %v3616_v4, %v3503_v53  ;;  %v3618_v44 = vmul.f32 %v3616_v4, %v3501_v52  ;;  %v3639_v56 = vmul.f32 %v3630_v29, %v3619_v35  ;;  %v3637_v47 = vmul.f32 %v3630_v29, %v3617_v45  ;;  %v4048_v29 = vld [vmem:[#allocation9 + $0x288] sm:$0xff]  ;;  %v7802_v4 = vld [vmem:[%s12894_s13 + $0x60] sm:$0xff] }
 0xcda   :  { %v3644_v49 = vmul.f32 %v3634_v31, %v3624_v36  ;;  %v3642_v50 = vmul.f32 %v3634_v31, %v3622_v39  ;;  %v3664_v51 = vadd.f32 %v3651_v34, %v3643_v38  ;;  %v3662_v14 = vadd.f32 %v3651_v34, %v3641_v40  ;;  %v4043_v35 = vld [vmem:[#allocation9 + $0x260] sm:$0xff]  ;;  %v4042_v38 = vld [vmem:[#allocation9 + $0x258] sm:$0xff]  ;;  %v4041_v39 = vld [vmem:[#allocation9 + $0x250] sm:$0xff] }
 0xcdb   :  { %v3640_v55 = vmul.f32 %v3634_v31, %v3620_v41  ;;  %v3638_v58 = vmul.f32 %v3634_v31, %v3618_v44  ;;  %v3660_v54 = vadd.f32 %v3651_v34, %v3639_v56  ;;  %v3658_v5 = vadd.f32 %v3651_v34, %v3637_v47  ;;  %v3678_v31 = vld [vmem:[%s12894_s13 + $0x20] sm:$0xff]  ;;  %v4044_v34 = vld [vmem:[#allocation9 + $0x268] sm:$0xff]  ;;  %v7805_v56 = vld [vmem:[%s12894_s13 + $0x78] sm:$0xff] }
 0xcdc   :  { %v3665_v43 = vadd.f32 %v3655_v37, %v3644_v49  ;;  %v3663_v48 = vadd.f32 %v3655_v37, %v3642_v50  ;;  %v10761_v16 = vmax.f32 %v3664_v51, 0.0  ;;  %v10769_v53 = vmax.f32 %v3662_v14, 0.0  ;;  %v7803_v36 = vld [vmem:[%s12894_s13 + $0x68] sm:$0xff]  ;;  %v7804_v44 = vld [vmem:[%s12894_s13 + $0x70] sm:$0xff]  ;;  %v4038_v49 = vld [vmem:[#allocation9 + $0x238] sm:$0xff] }
 0xcdd   :  { %v3661_v59 = vadd.f32 %v3655_v37, %v3640_v55  ;;  %v3659_v52 = vadd.f32 %v3655_v37, %v3638_v58  ;;  %v10777_v7 = vmax.f32 %v3660_v54, 0.0  ;;  %v10785_v8 = vmax.f32 %v3658_v5, 0.0  ;;  %v3679_v37 = vld [vmem:[%s12894_s13 + $0x28] sm:$0xff]  ;;  %v3680_v45 = vld [vmem:[%s12894_s13 + $0x30] sm:$0xff]  ;;  %v4094_v5 = vld [vmem:[#allocation9 + $0x3f8] sm:$0xff] }
 0xcde   :  { %v10759_v57 = vmax.f32 %v3665_v43, 0.0  ;;  %v10765_v46 = vmax.f32 %v3663_v48, 0.0  ;;  %v4040_v40 = vld [vmem:[#allocation9 + $0x248] sm:$0xff]  ;;  %v4039_v41 = vld [vmem:[#allocation9 + $0x240] sm:$0xff]  ;;  %v4037_v50 = vld [vmem:[#allocation9 + $0x230] sm:$0xff] }
 0xcdf   :  { %v10773_v6 = vmax.f32 %v3661_v59, 0.0  ;;  %v10781_v63 = vmax.f32 %v3659_v52, 0.0  ;;  %v4036_v51 = vld [vmem:[#allocation9 + $0x228] sm:$0xff]  ;;  %v4035_v55 = vld [vmem:[#allocation9 + $0x220] sm:$0xff]  ;;  %v3681_v43 = vld [vmem:[%s12894_s13 + $0x38] sm:$0xff] }
 0xce0   :  { %3731 = vmatprep.subr.mxu0 %v10759_v57  ;;  %3941 = vmatprep.subr.mxu1 %v10759_v57  ;;  %v4034_v48 = vld [vmem:[#allocation9 + $0x218] sm:$0xff]  ;;  %v4033_v58 = vld [vmem:[#allocation9 + $0x210] sm:$0xff]  ;;  %v4032_v47 = vld [vmem:[#allocation9 + $0x208] sm:$0xff] }
 0xce1   :  { %3732 = vmatpush1.msra.mxu0 %v10761_v16  ;;  %3942 = vmatpush1.msra.mxu1 %v10761_v16  ;;  %v3850_v14 = vld [vmem:[#allocation9 + $0xf0] sm:$0xff]  ;;  %v3849_v59 = vld [vmem:[#allocation9 + $0xe8] sm:$0xff]  ;;  %v4031_v54 = vld [vmem:[#allocation9 + $0x200] sm:$0xff] }
 0xce2   :  { %3733 = vmatprep.subr.mxu0 %v10765_v46  ;;  %3943 = vmatprep.subr.mxu1 %v10765_v46  ;;  %v3848_v52 = vld [vmem:[#allocation9 + $0xe0] sm:$0xff] }
 0xce3   :  { %3734 = vmatpush1.msra.mxu0 %v10769_v53  ;;  %3944 = vmatpush1.msra.mxu1 %v10769_v53 }
 0xce4   :  { %3735 = vmatprep.subr.mxu0 %v10773_v6  ;;  %3945 = vmatprep.subr.mxu1 %v10773_v6 }
 0xce5   :  { %3736 = vmatpush1.msra.mxu0 %v10777_v7  ;;  %3946 = vmatpush1.msra.mxu1 %v10777_v7 }
 0xce6   :  { %3737 = vmatprep.subr.mxu0 %v10781_v63  ;;  %3947 = vmatprep.subr.mxu1 %v10781_v63 }
 0xce7   :  { %3738 = vmatpush1.msra.mxu0 %v10785_v8  ;;  %3948 = vmatpush1.msra.mxu1 %v10785_v8 }
 0xce8   :  { %7790 = vmatmul.mubr.msk.f32.vlgmr.msra.gmra.mxu0 %vm3682_vm5, %v3674_v9  ;;  %7806 = vmatmul.mubr.msk.f32.vlgmr.msra.gmra.mxu1 %vm3682_vm5, %v7798_v60  ;;  %v3847_v9 = vld [vmem:[#allocation9 + $0xd8] sm:$0xff]  ;;  %v4093_v60 = vld [vmem:[#allocation9 + $0x3f0] sm:$0xff] }
 0xce9   :  { %4095 = vmatprep.subr.mxu0 %v4062_v42  ;;  %3777 = vmatprep.mubr.f32.mxu0 %v12903_v0  ;;  %v3846_v42 = vld [vmem:[#allocation9 + $0xd0] sm:$0xff] }
 0xcea   :  { %4096 = vmatpush1.msra.mxu0 %v4061_v10  ;;  %3987 = vmatprep.mubr.f32.mxu1 %v12903_v0  ;;  %v4092_v10 = vld [vmem:[#allocation9 + $0x3e8] sm:$0xff] }
 0xceb   :  { %4097 = vmatprep.subr.mxu0 %v4060_v2  ;;  %4208 = vmatprep.subr.mxu1 %v3851_v11  ;;  %v3845_v2 = vld [vmem:[#allocation9 + $0xc8] sm:$0xff]  ;;  %v4091_v11 = vld [vmem:[#allocation9 + $0x3e0] sm:$0xff] }
 0xcec   :  { %4098 = vmatpush1.msra.mxu0 %v4059_v15  ;;  %7807 = vmatmul.mubr.msk.f32.gmra.mxu1 %vm3682_vm5, %v7799_v62  ;;  %v3844_v15 = vld [vmem:[#allocation9 + $0xc0] sm:$0xff]  ;;  %v4090_v62 = vld [vmem:[#allocation9 + $0x3d8] sm:$0xff] }
 0xced   :  { %7791 = vmatmul.mubr.msk.f32.gmra.mxu0 %vm3682_vm5, %v3675_v12  ;;  %4099 = vmatprep.subr.mxu0 %v4058_v1  ;;  %v3843_v12 = vld [vmem:[#allocation9 + $0xb8] sm:$0xff]  ;;  %v4089_v1 = vld [vmem:[#allocation9 + $0x3d0] sm:$0xff] }
 0xcee   :  { %4100 = vmatpush1.msra.mxu0 %v4057_v13  ;;  %3783 = vmatprep.mubr.f32.mxu0 %v12903_v0  ;;  %v3842_v13 = vld [vmem:[#allocation9 + $0xb0] sm:$0xff] }
 0xcef   :  { %4101 = vmatprep.subr.mxu0 %v4056_v17  ;;  %3993 = vmatprep.mubr.f32.mxu1 %v12903_v0  ;;  %v4088_v17 = vld [vmem:[#allocation9 + $0x3c8] sm:$0xff] }
 0xcf0   :  { %4102 = vmatpush1.msra.mxu0 %v4055_v18  ;;  %7808 = vmatmul.mubr.msk.f32.gmra.mxu1 %vm3682_vm5, %v7800_v19  ;;  %v3841_v18 = vld [vmem:[#allocation9 + $0xa8] sm:$0xff]  ;;  %v4087_v19 = vld [vmem:[#allocation9 + $0x3c0] sm:$0xff] }
 0xcf1   :  { %7792 = vmatmul.mubr.msk.f32.gmra.mxu0 %vm3682_vm5, %v3676_v20  ;;  %4103 = vmatprep.subr.mxu0 %v4054_v21  ;;  %v3840_v20 = vld [vmem:[#allocation9 + $0xa0] sm:$0xff]  ;;  %v4086_v21 = vld [vmem:[#allocation9 + $0x3b8] sm:$0xff] }
 0xcf2   :  { %4104 = vmatpush1.msra.mxu0 %v4053_v22  ;;  %3789 = vmatprep.mubr.f32.mxu0 %v12903_v0  ;;  %v3839_v22 = vld [vmem:[#allocation9 + $0x98] sm:$0xff] }
 0xcf3   :  { %4105 = vmatprep.subr.mxu0 %v4052_v3  ;;  %3999 = vmatprep.mubr.f32.mxu1 %v12903_v0  ;;  %v4085_v3 = vld [vmem:[#allocation9 + $0x3b0] sm:$0xff] }
 0xcf4   :  { %4106 = vmatpush1.msra.mxu0 %v4051_v23  ;;  %7809 = vmatmul.mubr.msk.f32.gmra.mxu1 %vm3682_vm5, %v7801_v24  ;;  %v3838_v23 = vld [vmem:[#allocation9 + $0x90] sm:$0xff]  ;;  %v4084_v24 = vld [vmem:[#allocation9 + $0x3a8] sm:$0xff] }
 0xcf5   :  { %7793 = vmatmul.mubr.msk.f32.gmra.mxu0 %vm3682_vm5, %v3677_v25  ;;  %4107 = vmatprep.subr.mxu0 %v4050_v27  ;;  %v3837_v25 = vld [vmem:[#allocation9 + $0x88] sm:$0xff]  ;;  %v4083_v27 = vld [vmem:[#allocation9 + $0x3a0] sm:$0xff] }
 0xcf6   :  { %4108 = vmatpush1.msra.mxu0 %v4049_v28  ;;  %3795 = vmatprep.mubr.f32.mxu0 %v12903_v0  ;;  %v3836_v28 = vld [vmem:[#allocation9 + $0x80] sm:$0xff] }
 0xcf7   :  { %4109 = vmatprep.subr.mxu0 %v4048_v29  ;;  %4005 = vmatprep.mubr.f32.mxu1 %v12903_v0  ;;  %v4082_v29 = vld [vmem:[#allocation9 + $0x398] sm:$0xff] }
 0xcf8   :  { %4110 = vmatpush1.msra.mxu0 %v4047_v30  ;;  %7810 = vmatmul.mubr.msk.f32.gmra.mxu1 %vm3682_vm5, %v7802_v4  ;;  %v3835_v30 = vld [vmem:[#allocation9 + $0x78] sm:$0xff]  ;;  %v4081_v4 = vld [vmem:[#allocation9 + $0x390] sm:$0xff] }
 0xcf9   :  { %7794 = vmatmul.mubr.msk.f32.gmra.mxu0 %vm3682_vm5, %v3678_v31  ;;  %4111 = vmatprep.subr.mxu0 %v4046_v32  ;;  %v3834_v31 = vld [vmem:[#allocation9 + $0x70] sm:$0xff]  ;;  %v4080_v32 = vld [vmem:[#allocation9 + $0x388] sm:$0xff] }
 0xcfa   :  { %4112 = vmatpush1.msra.mxu0 %v4045_v33  ;;  %3801 = vmatprep.mubr.f32.mxu0 %v12903_v0  ;;  %v3833_v33 = vld [vmem:[#allocation9 + $0x68] sm:$0xff] }
 0xcfb   :  { %4113 = vmatprep.subr.mxu0 %v4044_v34  ;;  %4011 = vmatprep.mubr.f32.mxu1 %v12903_v0  ;;  %v4079_v34 = vld [vmem:[#allocation9 + $0x380] sm:$0xff] }
 0xcfc   :  { %4114 = vmatpush1.msra.mxu0 %v4043_v35  ;;  %7811 = vmatmul.mubr.msk.f32.gmra.mxu1 %vm3682_vm5, %v7803_v36  ;;  %v3832_v35 = vld [vmem:[#allocation9 + $0x60] sm:$0xff]  ;;  %v4078_v36 = vld [vmem:[#allocation9 + $0x378] sm:$0xff] }
 0xcfd   :  { %7795 = vmatmul.mubr.msk.f32.gmra.mxu0 %vm3682_vm5, %v3679_v37  ;;  %4115 = vmatprep.subr.mxu0 %v4042_v38  ;;  %v3831_v37 = vld [vmem:[#allocation9 + $0x58] sm:$0xff]  ;;  %v4077_v38 = vld [vmem:[#allocation9 + $0x370] sm:$0xff] }
 0xcfe   :  { %4116 = vmatpush1.msra.mxu0 %v4041_v39  ;;  %3807 = vmatprep.mubr.f32.mxu0 %v12903_v0  ;;  %v3830_v39 = vld [vmem:[#allocation9 + $0x50] sm:$0xff] }
 0xcff   :  { %4117 = vmatprep.subr.mxu0 %v4040_v40  ;;  %4017 = vmatprep.mubr.f32.mxu1 %v12903_v0  ;;  %v4076_v40 = vld [vmem:[#allocation9 + $0x368] sm:$0xff] }
 0xd00   :  { %4118 = vmatpush1.msra.mxu0 %v4039_v41  ;;  %7812 = vmatmul.mubr.msk.f32.gmra.mxu1 %vm3682_vm5, %v7804_v44  ;;  %v3829_v41 = vld [vmem:[#allocation9 + $0x48] sm:$0xff]  ;;  %v4075_v44 = vld [vmem:[#allocation9 + $0x360] sm:$0xff] }
 0xd01   :  { %7796 = vmatmul.mubr.msk.f32.gmra.mxu0 %vm3682_vm5, %v3680_v45  ;;  %4119 = vmatprep.subr.mxu0 %v4038_v49  ;;  %v3828_v45 = vld [vmem:[#allocation9 + $0x40] sm:$0xff]  ;;  %v4074_v49 = vld [vmem:[#allocation9 + $0x358] sm:$0xff] }
 0xd02   :  { %4120 = vmatpush1.msra.mxu0 %v4037_v50  ;;  %3813 = vmatprep.mubr.f32.mxu0 %v12903_v0  ;;  %v3827_v50 = vld [vmem:[#allocation9 + $0x38] sm:$0xff] }
 0xd03   :  { %4121 = vmatprep.subr.mxu0 %v4036_v51  ;;  %4023 = vmatprep.mubr.f32.mxu1 %v12903_v0  ;;  %v4073_v51 = vld [vmem:[#allocation9 + $0x350] sm:$0xff] }
 0xd04   :  { %4122 = vmatpush1.msra.mxu0 %v4035_v55  ;;  %7813 = vmatmul.mubr.msk.f32.gmra.mxu1 %vm3682_vm5, %v7805_v56  ;;  %v3826_v55 = vld [vmem:[#allocation9 + $0x30] sm:$0xff]  ;;  %v4072_v56 = vld [vmem:[#allocation9 + $0x348] sm:$0xff] }
 0xd05   :  { %7797 = vmatmul.mubr.msk.f32.gmra.mxu0 %vm3682_vm5, %v3681_v43  ;;  %4123 = vmatprep.subr.mxu0 %v4034_v48  ;;  %v3825_v43 = vld [vmem:[#allocation9 + $0x28] sm:$0xff]  ;;  %v4071_v48 = vld [vmem:[#allocation9 + $0x340] sm:$0xff] }
 0xd06   :  { %4124 = vmatpush1.msra.mxu0 %v4033_v58  ;;  %4209 = vmatpush1.msra.mxu1 %v3850_v14  ;;  %v3824_v58 = vld [vmem:[#allocation9 + $0x20] sm:$0xff]  ;;  %v4070_v14 = vld [vmem:[#allocation9 + $0x338] sm:$0xff] }
 0xd07   :  { %4125 = vmatprep.subr.mxu0 %v4032_v47  ;;  %4210 = vmatprep.subr.mxu1 %v3849_v59  ;;  %v3823_v47 = vld [vmem:[#allocation9 + $0x18] sm:$0xff]  ;;  %v4069_v59 = vld [vmem:[#allocation9 + $0x330] sm:$0xff] }
 0xd08   :  { %4126 = vmatpush1.msra.mxu0 %v4031_v54  ;;  %4211 = vmatpush1.msra.mxu1 %v3848_v52  ;;  %v3822_v54 = vld [vmem:[#allocation9 + $0x10] sm:$0xff]  ;;  %v4068_v52 = vld [vmem:[#allocation9 + $0x328] sm:$0xff] }
 0xd09   :  { %4127 = vmatprep.subr.mxu0 %v4094_v5  ;;  %4212 = vmatprep.subr.mxu1 %v3847_v9  ;;  %v3821_v5 = vld [vmem:[#allocation9 + $0x8] sm:$0xff]  ;;  %v4067_v9 = vld [vmem:[#allocation9 + $0x320] sm:$0xff] }
 0xd0a   :  { %4128 = vmatpush2.msra.mxu0 %v4093_v60  ;;  %4213 = vmatpush1.msra.mxu1 %v3846_v42  ;;  %v3820_v60 = vld [vmem:[#allocation9] sm:$0xff]  ;;  %v4066_v42 = vld [vmem:[#allocation9 + $0x318] sm:$0xff] }
 0xd0b   :  { %4129 = vmatprep.subr.mxu0 %v4092_v10  ;;  %4214 = vmatprep.subr.mxu1 %v3845_v2  ;;  %v3883_v10 = vld [vmem:[#allocation9 + $0x1f8] sm:$0xff]  ;;  %v4065_v2 = vld [vmem:[#allocation9 + $0x310] sm:$0xff] }
 0xd0c   :  { %4130 = vmatpush2.msra.mxu0 %v4091_v11  ;;  %4215 = vmatpush1.msra.mxu1 %v3844_v15  ;;  %v3882_v11 = vld [vmem:[#allocation9 + $0x1f0] sm:$0xff]  ;;  %v4064_v15 = vld [vmem:[#allocation9 + $0x308] sm:$0xff] }
 0xd0d   :  { %4131 = vmatprep.subr.mxu0 %v4090_v62  ;;  %4216 = vmatprep.subr.mxu1 %v3843_v12  ;;  %v3881_v62 = vld [vmem:[#allocation9 + $0x1e8] sm:$0xff]  ;;  %v4063_v12 = vld [vmem:[#allocation9 + $0x300] sm:$0xff] }
 0xd0e   :  { %4132 = vmatpush2.msra.mxu0 %v4089_v1  ;;  %4217 = vmatpush1.msra.mxu1 %v3842_v13  ;;  %v3880_v1 = vld [vmem:[#allocation9 + $0x1e0] sm:$0xff]  ;;  %v3879_v13 = vld [vmem:[#allocation9 + $0x1d8] sm:$0xff] }
 0xd0f   :  { %4133 = vmatprep.subr.mxu0 %v4088_v17  ;;  %4218 = vmatprep.subr.mxu1 %v3841_v18  ;;  %v3878_v17 = vld [vmem:[#allocation9 + $0x1d0] sm:$0xff]  ;;  %v3877_v18 = vld [vmem:[#allocation9 + $0x1c8] sm:$0xff] }
 0xd10   :  { %4134 = vmatpush2.msra.mxu0 %v4087_v19  ;;  %4219 = vmatpush1.msra.mxu1 %v3840_v20  ;;  %v3876_v19 = vld [vmem:[#allocation9 + $0x1c0] sm:$0xff]  ;;  %v3875_v20 = vld [vmem:[#allocation9 + $0x1b8] sm:$0xff] }
 0xd11   :  { %4135 = vmatprep.subr.mxu0 %v4086_v21  ;;  %4220 = vmatprep.subr.mxu1 %v3839_v22  ;;  %v3874_v21 = vld [vmem:[#allocation9 + $0x1b0] sm:$0xff]  ;;  %v3873_v22 = vld [vmem:[#allocation9 + $0x1a8] sm:$0xff] }
 0xd12   :  { %4136 = vmatpush2.msra.mxu0 %v4085_v3  ;;  %4221 = vmatpush1.msra.mxu1 %v3838_v23  ;;  %v3872_v3 = vld [vmem:[#allocation9 + $0x1a0] sm:$0xff]  ;;  %v3871_v23 = vld [vmem:[#allocation9 + $0x198] sm:$0xff] }
 0xd13   :  { %4137 = vmatprep.subr.mxu0 %v4084_v24  ;;  %4222 = vmatprep.subr.mxu1 %v3837_v25  ;;  %v3870_v24 = vld [vmem:[#allocation9 + $0x190] sm:$0xff]  ;;  %v3869_v25 = vld [vmem:[#allocation9 + $0x188] sm:$0xff] }
 0xd14   :  { %4138 = vmatpush2.msra.mxu0 %v4083_v27  ;;  %4223 = vmatpush1.msra.mxu1 %v3836_v28  ;;  %v3868_v27 = vld [vmem:[#allocation9 + $0x180] sm:$0xff]  ;;  %v3867_v28 = vld [vmem:[#allocation9 + $0x178] sm:$0xff] }
 0xd15   :  { %4139 = vmatprep.subr.mxu0 %v4082_v29  ;;  %4224 = vmatprep.subr.mxu1 %v3835_v30  ;;  %v3866_v29 = vld [vmem:[#allocation9 + $0x170] sm:$0xff]  ;;  %v3865_v30 = vld [vmem:[#allocation9 + $0x168] sm:$0xff] }
 0xd16   :  { %4140 = vmatpush2.msra.mxu0 %v4081_v4  ;;  %4225 = vmatpush1.msra.mxu1 %v3834_v31  ;;  %v3864_v4 = vld [vmem:[#allocation9 + $0x160] sm:$0xff]  ;;  %v3863_v31 = vld [vmem:[#allocation9 + $0x158] sm:$0xff] }
 0xd17   :  { %4141 = vmatprep.subr.mxu0 %v4080_v32  ;;  %4226 = vmatprep.subr.mxu1 %v3833_v33  ;;  %v3862_v32 = vld [vmem:[#allocation9 + $0x150] sm:$0xff]  ;;  %v3861_v33 = vld [vmem:[#allocation9 + $0x148] sm:$0xff] }
 0xd18   :  { %4142 = vmatpush2.msra.mxu0 %v4079_v34  ;;  %4227 = vmatpush1.msra.mxu1 %v3832_v35  ;;  %v3860_v34 = vld [vmem:[#allocation9 + $0x140] sm:$0xff]  ;;  %v3859_v35 = vld [vmem:[#allocation9 + $0x138] sm:$0xff] }
 0xd19   :  { %4143 = vmatprep.subr.mxu0 %v4078_v36  ;;  %4228 = vmatprep.subr.mxu1 %v3831_v37  ;;  %v3858_v36 = vld [vmem:[#allocation9 + $0x130] sm:$0xff]  ;;  %v3857_v37 = vld [vmem:[#allocation9 + $0x128] sm:$0xff] }
 0xd1a   :  { %4144 = vmatpush2.msra.mxu0 %v4077_v38  ;;  %4229 = vmatpush1.msra.mxu1 %v3830_v39  ;;  %v3856_v38 = vld [vmem:[#allocation9 + $0x120] sm:$0xff]  ;;  %v3855_v39 = vld [vmem:[#allocation9 + $0x118] sm:$0xff] }
 0xd1b   :  { %4145 = vmatprep.subr.mxu0 %v4076_v40  ;;  %4230 = vmatprep.subr.mxu1 %v3829_v41  ;;  %v3854_v40 = vld [vmem:[#allocation9 + $0x110] sm:$0xff]  ;;  %v3853_v41 = vld [vmem:[#allocation9 + $0x108] sm:$0xff] }
 0xd1c   :  { %4146 = vmatpush2.msra.mxu0 %v4075_v44  ;;  %4231 = vmatpush1.msra.mxu1 %v3828_v45  ;;  %v3852_v44 = vld [vmem:[#allocation9 + $0x100] sm:$0xff]  ;;  %v4499_v45 = vld [vmem:[#allocation9 + $0x4f8] sm:$0xff] }
 0xd1d   :  { %4147 = vmatprep.subr.mxu0 %v4074_v49  ;;  %4232 = vmatprep.subr.mxu1 %v3827_v50 }
 0xd1e   :  { %4148 = vmatpush2.msra.mxu0 %v4073_v51  ;;  %4233 = vmatpush1.msra.mxu1 %v3826_v55 }
 0xd1f   :  { %4149 = vmatprep.subr.mxu0 %v4072_v56  ;;  %4234 = vmatprep.subr.mxu1 %v3825_v43  ;;  %v4498_v56 = vld [vmem:[#allocation9 + $0x4f0] sm:$0xff]  ;;  %v4497_v43 = vld [vmem:[#allocation9 + $0x4e8] sm:$0xff] }
 0xd20   :  { %4150 = vmatpush2.msra.mxu0 %v4071_v48  ;;  %4235 = vmatpush1.msra.mxu1 %v3824_v58 }
 0xd21   :  { %4151 = vmatprep.subr.mxu0 %v4070_v14  ;;  %4236 = vmatprep.subr.mxu1 %v3823_v47 }
 0xd22   :  { %4152 = vmatpush2.msra.mxu0 %v4069_v59  ;;  %4237 = vmatpush1.msra.mxu1 %v3822_v54  ;;  %v4496_v59 = vld [vmem:[#allocation9 + $0x4e0] sm:$0xff] }
 0xd23   :  { %4153 = vmatprep.subr.mxu0 %v4068_v52  ;;  %4238 = vmatprep.subr.mxu1 %v3821_v5 }
 0xd24   :  { %4154 = vmatpush2.msra.mxu0 %v4067_v9  ;;  %4239 = vmatpush1.msra.mxu1 %v3820_v60  ;;  %v4495_v60 = vld [vmem:[#allocation9 + $0x4d8] sm:$0xff] }
 0xd25   :  { %4155 = vmatprep.subr.mxu0 %v4066_v42  ;;  %4240 = vmatprep.subr.mxu1 %v3883_v10  ;;  %v4494_v10 = vld [vmem:[#allocation9 + $0x4d0] sm:$0xff] }
 0xd26   :  { %4156 = vmatpush2.msra.mxu0 %v4065_v2  ;;  %4241 = vmatpush2.msra.mxu1 %v3882_v11  ;;  %v4493_v11 = vld [vmem:[#allocation9 + $0x4c8] sm:$0xff] }
 0xd27   :  { %4157 = vmatprep.subr.mxu0 %v4064_v15  ;;  %4242 = vmatprep.subr.mxu1 %v3881_v62  ;;  %v4492_v62 = vld [vmem:[#allocation9 + $0x4c0] sm:$0xff] }
 0xd28   :  { %4158 = vmatpush2.msra.mxu0 %v4063_v12  ;;  %4243 = vmatpush2.msra.mxu1 %v3880_v1  ;;  %v4491_v1 = vld [vmem:[#allocation9 + $0x4b8] sm:$0xff] }
 0xd29   :  { %4378 = vmatprep.subr.mxu0 %v10759_v57  ;;  %4244 = vmatprep.subr.mxu1 %v3879_v13 }
 0xd2a   :  { %4245 = vmatpush2.msra.mxu1 %v3878_v17  ;;  %v4490_v17 = vld [vmem:[#allocation9 + $0x4b0] sm:$0xff] }
 0xd2b   :  { %4246 = vmatprep.subr.mxu1 %v3877_v18 }
 0xd2c   :  { %4247 = vmatpush2.msra.mxu1 %v3876_v19  ;;  %v4489_v19 = vld [vmem:[#allocation9 + $0x4a8] sm:$0xff] }
 0xd2d   :  { %4248 = vmatprep.subr.mxu1 %v3875_v20  ;;  %v4488_v20 = vld [vmem:[#allocation9 + $0x4a0] sm:$0xff] }
 0xd2e   :  { %4249 = vmatpush2.msra.mxu1 %v3874_v21 }
 0xd2f   :  { %4250 = vmatprep.subr.mxu1 %v3873_v22  ;;  %v4487_v22 = vld [vmem:[#allocation9 + $0x498] sm:$0xff] }
 0xd30   :  { %4251 = vmatpush2.msra.mxu1 %v3872_v3 }
 0xd31   :  { %4252 = vmatprep.subr.mxu1 %v3871_v23  ;;  %v4486_v23 = vld [vmem:[#allocation9 + $0x490] sm:$0xff] }
 0xd32   :  { %4253 = vmatpush2.msra.mxu1 %v3870_v24 }
 0xd33   :  { %4254 = vmatprep.subr.mxu1 %v3869_v25  ;;  %v4485_v25 = vld [vmem:[#allocation9 + $0x488] sm:$0xff] }
 0xd34   :  { %4255 = vmatpush2.msra.mxu1 %v3868_v27 }
 0xd35   :  { %4256 = vmatprep.subr.mxu1 %v3867_v28  ;;  %v4484_v28 = vld [vmem:[#allocation9 + $0x480] sm:$0xff] }
 0xd36   :  { %4257 = vmatpush2.msra.mxu1 %v3866_v29 }
 0xd37   :  { %4258 = vmatprep.subr.mxu1 %v3865_v30  ;;  %v4483_v30 = vld [vmem:[#allocation9 + $0x478] sm:$0xff] }
 0xd38   :  { %4259 = vmatpush2.msra.mxu1 %v3864_v4 }
 0xd39   :  { %4260 = vmatprep.subr.mxu1 %v3863_v31  ;;  %v4482_v31 = vld [vmem:[#allocation9 + $0x470] sm:$0xff] }
 0xd3a   :  { %4261 = vmatpush2.msra.mxu1 %v3862_v32 }
 0xd3b   :  { %4262 = vmatprep.subr.mxu1 %v3861_v33  ;;  %v4481_v33 = vld [vmem:[#allocation9 + $0x468] sm:$0xff] }
 0xd3c   :  { %4263 = vmatpush2.msra.mxu1 %v3860_v34 }
 0xd3d   :  { %4264 = vmatprep.subr.mxu1 %v3859_v35  ;;  %v4480_v35 = vld [vmem:[#allocation9 + $0x460] sm:$0xff] }
 0xd3e   :  { %4265 = vmatpush2.msra.mxu1 %v3858_v36 }
 0xd3f   :  { %4266 = vmatprep.subr.mxu1 %v3857_v37  ;;  %v4479_v37 = vld [vmem:[#allocation9 + $0x458] sm:$0xff] }
 0xd40   :  { %4267 = vmatpush2.msra.mxu1 %v3856_v38 }
 0xd41   :  { %4268 = vmatprep.subr.mxu1 %v3855_v39  ;;  %v4478_v39 = vld [vmem:[#allocation9 + $0x450] sm:$0xff] }
 0xd42   :  { %4269 = vmatpush2.msra.mxu1 %v3854_v40 }
 0xd43   :  { %4270 = vmatprep.subr.mxu1 %v3853_v41  ;;  %v4477_v41 = vld [vmem:[#allocation9 + $0x448] sm:$0xff] }
 0xd44   :  { %4271 = vmatpush2.msra.mxu1 %v3852_v44 }
 0xd45   :  { %4532 = vmatprep.subr.mxu1 %v4499_v45  ;;  %v4476_v45 = vld [vmem:[#allocation9 + $0x440] sm:$0xff] }
 0xda8   :  { %v3773_v49 = vpop.f32.mrf.mxu0  ;;  %v3983_v50 = vpop.f32.mrf.mxu1 }
 0xdaa   :  { %v3775_v51 = vpop.f32.mrf.mxu0  ;;  %v3985_v55 = vpop.f32.mrf.mxu1 }
 0xdab   :  { %4159 = vmatprep.mubr.f32.mxu0 %v3985_v55  ;;  %4272 = vmatprep.mubr.f32.mxu1 %v3775_v51  ;;  %v4474_v51 = vld [vmem:[#allocation9 + $0x430] sm:$0xff]  ;;  %v7814_v55 = vld [vmem:[%s12894_s13 + $0x80] sm:$0xff] }
 0xdac   :  { %v3989_v48 = vpop.f32.mrf.mxu1  ;;  %4160 = vmatmul.mubr.f32.vlgmr.msra.gmra.mxu0 %v3983_v50  ;;  %4273 = vmatmul.mubr.f32.vlgmr.msra.gmra.mxu1 %v3773_v49  ;;  %v4475_v50 = vld [vmem:[#allocation9 + $0x438] sm:$0xff] }
 0xdad   :  { %v3779_v58 = vpop.f32.mrf.mxu0  ;;  %4379 = vmatpush1.msra.mxu0 %v10761_v16  ;;  %4533 = vmatpush1.msra.mxu1 %v4498_v56  ;;  %v4473_v56 = vld [vmem:[#allocation9 + $0x428] sm:$0xff] }
 0xdae   :  { %4380 = vmatprep.subr.mxu0 %v10765_v46  ;;  %v3991_v14 = vpop.f32.mrf.mxu1  ;;  %4534 = vmatprep.subr.mxu1 %v4497_v43  ;;  %v4472_v43 = vld [vmem:[#allocation9 + $0x420] sm:$0xff] }
 0xdaf   :  { %v3781_v47 = vpop.f32.mrf.mxu0  ;;  %4381 = vmatpush1.msra.mxu0 %v10769_v53  ;;  %4165 = vmatprep.mubr.f32.mxu0 %v3991_v14  ;;  %v4470_v14 = vld [vmem:[#allocation9 + $0x410] sm:$0xff] }
 0xdb0   :  { %4278 = vmatprep.mubr.f32.mxu1 %v3781_v47  ;;  %4382 = vmatprep.subr.mxu0 %v10773_v6  ;;  %v3995_v54 = vpop.f32.mrf.mxu1  ;;  %v7831_v47 = vld [vmem:[%s12894_s13 + $0xc8] sm:$0xff] }
 0xdb1   :  { %v3785_v52 = vpop.f32.mrf.mxu0  ;;  %4166 = vmatmul.mubr.f32.gmra.mxu0 %v3989_v48  ;;  %4279 = vmatmul.mubr.f32.gmra.mxu1 %v3779_v58  ;;  %v7815_v48 = vld [vmem:[%s12894_s13 + $0x88] sm:$0xff]  ;;  %v4471_v58 = vld [vmem:[#allocation9 + $0x418] sm:$0xff] }
 0xdb2   :  { %4383 = vmatpush1.msra.mxu0 %v10777_v7  ;;  %v3997_v5 = vpop.f32.mrf.mxu1  ;;  %4535 = vmatpush1.msra.mxu1 %v4496_v59  ;;  %v4469_v59 = vld [vmem:[#allocation9 + $0x408] sm:$0xff] }
 0xdb3   :  { %4384 = vmatprep.subr.mxu0 %v10781_v63  ;;  %v3787_v9 = vpop.f32.mrf.mxu0  ;;  %4171 = vmatprep.mubr.f32.mxu0 %v3997_v5  ;;  %v4839_v5 = vld [vmem:[#allocation9 + $0x6f8] sm:$0xff] }
 0xdb4   :  { %4385 = vmatpush1.msra.mxu0 %v10785_v8  ;;  %4284 = vmatprep.mubr.f32.mxu1 %v3787_v9  ;;  %v4001_v42 = vpop.f32.mrf.mxu1  ;;  %v7832_v9 = vld [vmem:[%s12894_s13 + $0xd0] sm:$0xff] }
 0xdb5   :  { %4718 = vmatprep.subr.mxu0 %v10759_v57  ;;  %v3791_v2 = vpop.f32.mrf.mxu0  ;;  %4172 = vmatmul.mubr.f32.gmra.mxu0 %v3995_v54  ;;  %v4468_v54 = vld [vmem:[#allocation9 + $0x400] sm:$0xff] }
 0xdb6   :  { %4285 = vmatmul.mubr.f32.gmra.mxu1 %v3785_v52  ;;  %v4003_v15 = vpop.f32.mrf.mxu1  ;;  %4536 = vmatprep.subr.mxu1 %v4495_v60  ;;  %v4531_v52 = vld [vmem:[#allocation9 + $0x5f8] sm:$0xff]  ;;  %v4530_v60 = vld [vmem:[#allocation9 + $0x5f0] sm:$0xff] }
 0xdb7   :  { %v3793_v12 = vpop.f32.mrf.mxu0  ;;  %4177 = vmatprep.mubr.f32.mxu0 %v4003_v15  ;;  %4537 = vmatpush1.msra.mxu1 %v4494_v10  ;;  %v4529_v10 = vld [vmem:[#allocation9 + $0x5e8] sm:$0xff]  ;;  %v4836_v15 = vld [vmem:[#allocation9 + $0x6e0] sm:$0xff] }
 0xdb8   :  { %4290 = vmatprep.mubr.f32.mxu1 %v3793_v12  ;;  %v4007_v13 = vpop.f32.mrf.mxu1  ;;  %4538 = vmatprep.subr.mxu1 %v4493_v11  ;;  %v4528_v11 = vld [vmem:[#allocation9 + $0x5e0] sm:$0xff]  ;;  %v4835_v12 = vld [vmem:[#allocation9 + $0x6d8] sm:$0xff] }
 0xdb9   :  { %v3797_v18 = vpop.f32.mrf.mxu0  ;;  %4178 = vmatmul.mubr.f32.gmra.mxu0 %v4001_v42  ;;  %4539 = vmatpush1.msra.mxu1 %v4492_v62  ;;  %v4838_v42 = vld [vmem:[#allocation9 + $0x6f0] sm:$0xff]  ;;  %v4527_v62 = vld [vmem:[#allocation9 + $0x5d8] sm:$0xff] }
 0xdba   :  { %4291 = vmatmul.mubr.f32.gmra.mxu1 %v3791_v2  ;;  %v4009_v57 = vpop.f32.mrf.mxu1  ;;  %4540 = vmatprep.subr.mxu1 %v4491_v1  ;;  %v4837_v2 = vld [vmem:[#allocation9 + $0x6e8] sm:$0xff]  ;;  %v7833_v1 = vld [vmem:[%s12894_s13 + $0xd8] sm:$0xff] }
 0xdbb   :  { %v3799_v21 = vpop.f32.mrf.mxu0  ;;  %4183 = vmatprep.mubr.f32.mxu0 %v4009_v57  ;;  %4541 = vmatpush1.msra.mxu1 %v4490_v17  ;;  %v4834_v17 = vld [vmem:[#allocation9 + $0x6d0] sm:$0xff]  ;;  %v4524_v57 = vld [vmem:[#allocation9 + $0x5c0] sm:$0xff] }
 0xdbc   :  { %4296 = vmatprep.mubr.f32.mxu1 %v3799_v21  ;;  %v4013_v3 = vpop.f32.mrf.mxu1  ;;  %4542 = vmatprep.subr.mxu1 %v4489_v19  ;;  %v4833_v19 = vld [vmem:[#allocation9 + $0x6c8] sm:$0xff]  ;;  %v4523_v21 = vld [vmem:[#allocation9 + $0x5b8] sm:$0xff] }
 0xdbd   :  { %v3803_v24 = vpop.f32.mrf.mxu0  ;;  %4184 = vmatmul.mubr.f32.gmra.mxu0 %v4007_v13  ;;  %4543 = vmatpush1.msra.mxu1 %v4488_v20  ;;  %v4526_v13 = vld [vmem:[#allocation9 + $0x5d0] sm:$0xff]  ;;  %v4832_v20 = vld [vmem:[#allocation9 + $0x6c0] sm:$0xff] }
 0xdbe   :  { %4297 = vmatmul.mubr.f32.gmra.mxu1 %v3797_v18  ;;  %v4015_v27 = vpop.f32.mrf.mxu1  ;;  %4544 = vmatprep.subr.mxu1 %v4487_v22  ;;  %v4525_v18 = vld [vmem:[#allocation9 + $0x5c8] sm:$0xff]  ;;  %v7834_v22 = vld [vmem:[%s12894_s13 + $0xe0] sm:$0xff] }
 0xdbf   :  { %v3805_v29 = vpop.f32.mrf.mxu0  ;;  %4189 = vmatprep.mubr.f32.mxu0 %v4015_v27  ;;  %4545 = vmatpush1.msra.mxu1 %v4486_v23  ;;  %v4522_v23 = vld [vmem:[#allocation9 + $0x5b0] sm:$0xff]  ;;  %v4829_v27 = vld [vmem:[#allocation9 + $0x6a8] sm:$0xff] }
 0xdc0   :  { %4302 = vmatprep.mubr.f32.mxu1 %v3805_v29  ;;  %v4019_v4 = vpop.f32.mrf.mxu1  ;;  %4546 = vmatprep.subr.mxu1 %v4485_v25  ;;  %v4521_v25 = vld [vmem:[#allocation9 + $0x5a8] sm:$0xff] }
 0xdc1   :  { %v3809_v32 = vpop.f32.mrf.mxu0  ;;  %4190 = vmatmul.mubr.f32.gmra.mxu0 %v4013_v3  ;;  %4547 = vmatpush1.msra.mxu1 %v4484_v28  ;;  %v4831_v3 = vld [vmem:[#allocation9 + $0x6b8] sm:$0xff]  ;;  %v4520_v28 = vld [vmem:[#allocation9 + $0x5a0] sm:$0xff] }
 0xdc2   :  { %4303 = vmatmul.mubr.f32.gmra.mxu1 %v3803_v24  ;;  %v4021_v34 = vpop.f32.mrf.mxu1  ;;  %4548 = vmatprep.subr.mxu1 %v4483_v30  ;;  %v4830_v24 = vld [vmem:[#allocation9 + $0x6b0] sm:$0xff]  ;;  %v7835_v29 = vld [vmem:[%s12894_s13 + $0xe8] sm:$0xff]  ;;  %v4519_v30 = vld [vmem:[#allocation9 + $0x598] sm:$0xff] }
 0xdc3   :  { %v3811_v36 = vpop.f32.mrf.mxu0  ;;  %4195 = vmatprep.mubr.f32.mxu0 %v4021_v34  ;;  %4549 = vmatpush1.msra.mxu1 %v4482_v31  ;;  %v4827_v31 = vld [vmem:[#allocation9 + $0x698] sm:$0xff]  ;;  %v4517_v34 = vld [vmem:[#allocation9 + $0x588] sm:$0xff] }
 0xdc4   :  { %4308 = vmatprep.mubr.f32.mxu1 %v3811_v36  ;;  %v4025_v38 = vpop.f32.mrf.mxu1  ;;  %4550 = vmatprep.subr.mxu1 %v4481_v33  ;;  %v4826_v33 = vld [vmem:[#allocation9 + $0x690] sm:$0xff]  ;;  %v4825_v36 = vld [vmem:[#allocation9 + $0x688] sm:$0xff] }
 0xdc5   :  { %v3815_v40 = vpop.f32.mrf.mxu0  ;;  %4196 = vmatmul.mubr.f32.gmra.mxu0 %v4019_v4  ;;  %4551 = vmatpush1.msra.mxu1 %v4480_v35  ;;  %v4828_v4 = vld [vmem:[#allocation9 + $0x6a0] sm:$0xff]  ;;  %v7836_v35 = vld [vmem:[%s12894_s13 + $0xf0] sm:$0xff] }
 0xdc6   :  { %4309 = vmatmul.mubr.f32.gmra.mxu1 %v3809_v32  ;;  %v4027_v44 = vpop.f32.mrf.mxu1  ;;  %4552 = vmatprep.subr.mxu1 %v4479_v37  ;;  %v4518_v32 = vld [vmem:[#allocation9 + $0x590] sm:$0xff]  ;;  %v4516_v37 = vld [vmem:[#allocation9 + $0x580] sm:$0xff] }
 0xdc7   :  { %v3817_v49 = vpop.f32.mrf.mxu0  ;;  %4201 = vmatprep.mubr.f32.mxu0 %v4027_v44  ;;  %4553 = vmatpush1.msra.mxu1 %v4478_v39  ;;  %v4515_v39 = vld [vmem:[#allocation9 + $0x578] sm:$0xff] }
 0xdc8   :  { %4314 = vmatprep.mubr.f32.mxu1 %v3817_v49  ;;  %4554 = vmatprep.subr.mxu1 %v4477_v41  ;;  %v4514_v41 = vld [vmem:[#allocation9 + $0x570] sm:$0xff] }
 0xdc9   :  { %4202 = vmatmul.mubr.f32.gmra.mxu0 %v4025_v38  ;;  %4555 = vmatpush1.msra.mxu1 %v4476_v45  ;;  %v4824_v38 = vld [vmem:[#allocation9 + $0x680] sm:$0xff]  ;;  %v7837_v44 = vld [vmem:[%s12894_s13 + $0xf8] sm:$0xff]  ;;  %v4513_v45 = vld [vmem:[#allocation9 + $0x568] sm:$0xff] }
 0xdca   :  { %4315 = vmatmul.mubr.f32.gmra.mxu1 %v3815_v40  ;;  %4418 = vmatprep.mubr.f32.mxu0 %v12903_v0  ;;  %v4823_v40 = vld [vmem:[#allocation9 + $0x678] sm:$0xff]  ;;  %v4822_v49 = vld [vmem:[#allocation9 + $0x670] sm:$0xff] }
 0xdcb   :  { %4556 = vmatprep.subr.mxu1 %v4475_v50  ;;  %v4512_v50 = vld [vmem:[#allocation9 + $0x560] sm:$0xff] }
 0xdcc   :  { %4557 = vmatpush1.msra.mxu1 %v4474_v51  ;;  %v4821_v51 = vld [vmem:[#allocation9 + $0x668] sm:$0xff] }
 0xdcd   :  { %7822 = vmatmul.mubr.msk.f32.vlgmr.msra.gmra.mxu0 %vm3682_vm5, %v7814_v55  ;;  %4558 = vmatprep.subr.mxu1 %v4473_v56  ;;  %v4511_v55 = vld [vmem:[#allocation9 + $0x558] sm:$0xff]  ;;  %v4820_v56 = vld [vmem:[#allocation9 + $0x660] sm:$0xff] }
 0xdce   :  { %4719 = vmatpush1.msra.mxu0 %v10761_v16  ;;  %4424 = vmatprep.mubr.f32.mxu0 %v12903_v0  ;;  %v7816_v16 = vld [vmem:[%s12894_s13 + $0x90] sm:$0xff] }
 0xdcf   :  { %4720 = vmatprep.subr.mxu0 %v10765_v46  ;;  %4559 = vmatpush1.msra.mxu1 %v4472_v43  ;;  %v7817_v46 = vld [vmem:[%s12894_s13 + $0x98] sm:$0xff] }
 0xdd0   :  { %4721 = vmatpush1.msra.mxu0 %v10769_v53  ;;  %v7818_v53 = vld [vmem:[%s12894_s13 + $0xa0] sm:$0xff]  ;;  %4560 = vmatprep.subr.mxu1 %v4471_v58  ;;  %v4510_v43 = vld [vmem:[#allocation9 + $0x550] sm:$0xff] }
 0xdd1   :  { %4722 = vmatprep.subr.mxu0 %v10773_v6  ;;  %7823 = vmatmul.mubr.msk.f32.gmra.mxu0 %vm3682_vm5, %v7815_v48  ;;  %v7819_v6 = vld [vmem:[%s12894_s13 + $0xa8] sm:$0xff]  ;;  %v4819_v48 = vld [vmem:[#allocation9 + $0x658] sm:$0xff] }
 0xdd2   :  { %4723 = vmatpush1.msra.mxu0 %v10777_v7  ;;  %4430 = vmatprep.mubr.f32.mxu0 %v12903_v0  ;;  %v7820_v7 = vld [vmem:[%s12894_s13 + $0xb0] sm:$0xff]  ;;  %v4815_v58 = vld [vmem:[#allocation9 + $0x638] sm:$0xff] }
 0xdd3   :  { %4724 = vmatprep.subr.mxu0 %v10781_v63  ;;  %v7821_v63 = vld [vmem:[%s12894_s13 + $0xb8] sm:$0xff]  ;;  %4561 = vmatpush1.msra.mxu1 %v4470_v14  ;;  %v4505_v14 = vld [vmem:[#allocation9 + $0x528] sm:$0xff] }
 0xdd4   :  { %4725 = vmatpush1.msra.mxu0 %v10785_v8  ;;  %v7830_v8 = vld [vmem:[%s12894_s13 + $0xc0] sm:$0xff]  ;;  %4562 = vmatprep.subr.mxu1 %v4469_v59 }
 0xdd5   :  { %7824 = vmatmul.mubr.msk.f32.gmra.mxu0 %vm3682_vm5, %v7816_v16  ;;  %4563 = vmatpush1.msra.mxu1 %v4468_v54  ;;  %v4509_v16 = vld [vmem:[#allocation9 + $0x548] sm:$0xff]  ;;  %v4504_v59 = vld [vmem:[#allocation9 + $0x520] sm:$0xff] }
 0xdd6   :  { %4436 = vmatprep.mubr.f32.mxu0 %v12903_v0  ;;  %4564 = vmatprep.subr.mxu1 %v4531_v52  ;;  %v4813_v54 = vld [vmem:[#allocation9 + $0x628] sm:$0xff]  ;;  %v4503_v52 = vld [vmem:[#allocation9 + $0x518] sm:$0xff] }
 0xdd7   :  { %4872 = vmatprep.subr.mxu0 %v4839_v5  ;;  %4565 = vmatpush2.msra.mxu1 %v4530_v60  ;;  %v4812_v5 = vld [vmem:[#allocation9 + $0x620] sm:$0xff]  ;;  %v4811_v60 = vld [vmem:[#allocation9 + $0x618] sm:$0xff] }
 0xdd8   :  { %4566 = vmatprep.subr.mxu1 %v4529_v10  ;;  %v4810_v10 = vld [vmem:[#allocation9 + $0x610] sm:$0xff] }
 0xdd9   :  { %7825 = vmatmul.mubr.msk.f32.gmra.mxu0 %vm3682_vm5, %v7817_v46  ;;  %4567 = vmatpush2.msra.mxu1 %v4528_v11  ;;  %v4818_v46 = vld [vmem:[#allocation9 + $0x650] sm:$0xff]  ;;  %v4809_v11 = vld [vmem:[#allocation9 + $0x608] sm:$0xff] }
 0xdda   :  { %4442 = vmatprep.mubr.f32.mxu0 %v12903_v0  ;;  %4568 = vmatprep.subr.mxu1 %v4527_v62  ;;  %v4871_v62 = vld [vmem:[#allocation9 + $0x7f8] sm:$0xff] }
 0xddb   :  { %4569 = vmatpush2.msra.mxu1 %v4526_v13  ;;  %v4868_v13 = vld [vmem:[#allocation9 + $0x7e0] sm:$0xff] }
 0xddc   :  { %4570 = vmatprep.subr.mxu1 %v4525_v18  ;;  %v4866_v18 = vld [vmem:[#allocation9 + $0x7d0] sm:$0xff] }
 0xddd   :  { %7826 = vmatmul.mubr.msk.f32.gmra.mxu0 %vm3682_vm5, %v7818_v53  ;;  %4571 = vmatpush2.msra.mxu1 %v4524_v57  ;;  %v4508_v53 = vld [vmem:[#allocation9 + $0x540] sm:$0xff] }
 0xdde   :  { %4448 = vmatprep.mubr.f32.mxu0 %v12903_v0  ;;  %4572 = vmatprep.subr.mxu1 %v4523_v21  ;;  %v4864_v57 = vld [vmem:[#allocation9 + $0x7c0] sm:$0xff]  ;;  %v4862_v21 = vld [vmem:[#allocation9 + $0x7b0] sm:$0xff] }
 0xddf   :  { %4573 = vmatpush2.msra.mxu1 %v4522_v23  ;;  %v4859_v23 = vld [vmem:[#allocation9 + $0x798] sm:$0xff] }
 0xde0   :  { %4574 = vmatprep.subr.mxu1 %v4521_v25  ;;  %v4857_v25 = vld [vmem:[#allocation9 + $0x788] sm:$0xff] }
 0xde1   :  { %7827 = vmatmul.mubr.msk.f32.gmra.mxu0 %vm3682_vm5, %v7819_v6  ;;  %4575 = vmatpush2.msra.mxu1 %v4520_v28  ;;  %v4817_v6 = vld [vmem:[#allocation9 + $0x648] sm:$0xff]  ;;  %v4855_v28 = vld [vmem:[#allocation9 + $0x778] sm:$0xff] }
 0xde2   :  { %4454 = vmatprep.mubr.f32.mxu0 %v12903_v0  ;;  %4576 = vmatprep.subr.mxu1 %v4519_v30  ;;  %v4853_v30 = vld [vmem:[#allocation9 + $0x768] sm:$0xff] }
 0xde3   :  { %4577 = vmatpush2.msra.mxu1 %v4518_v32  ;;  %v4850_v32 = vld [vmem:[#allocation9 + $0x750] sm:$0xff] }
 0xde4   :  { %4578 = vmatprep.subr.mxu1 %v4517_v34  ;;  %v4848_v34 = vld [vmem:[#allocation9 + $0x740] sm:$0xff] }
 0xde5   :  { %7828 = vmatmul.mubr.msk.f32.gmra.mxu0 %vm3682_vm5, %v7820_v7  ;;  %4579 = vmatpush2.msra.mxu1 %v4516_v37  ;;  %v4507_v7 = vld [vmem:[#allocation9 + $0x538] sm:$0xff]  ;;  %v4845_v37 = vld [vmem:[#allocation9 + $0x728] sm:$0xff] }
 0xde6   :  { %4460 = vmatprep.mubr.f32.mxu0 %v12903_v0  ;;  %4580 = vmatprep.subr.mxu1 %v4515_v39  ;;  %v4843_v39 = vld [vmem:[#allocation9 + $0x718] sm:$0xff] }
 0xde7   :  { %4581 = vmatpush2.msra.mxu1 %v4514_v41  ;;  %v4841_v41 = vld [vmem:[#allocation9 + $0x708] sm:$0xff] }
 0xde8   :  { %4582 = vmatprep.subr.mxu1 %v4513_v45 }
 0xde9   :  { %7829 = vmatmul.mubr.msk.f32.gmra.mxu0 %vm3682_vm5, %v7821_v63  ;;  %4583 = vmatpush2.msra.mxu1 %v4512_v50  ;;  %v4816_v63 = vld [vmem:[#allocation9 + $0x640] sm:$0xff] }
 0xdea   :  { %4758 = vmatprep.mubr.f32.mxu0 %v12903_v0  ;;  %4584 = vmatprep.subr.mxu1 %v4511_v55 }
 0xdeb   :  { %4585 = vmatpush2.msra.mxu1 %v4510_v43 }
 0xdec   :  { %4586 = vmatprep.subr.mxu1 %v4509_v16 }
 0xded   :  { %7838 = vmatmul.mubr.msk.f32.vlgmr.msra.gmra.mxu0 %vm3682_vm5, %v7830_v8  ;;  %v4506_v8 = vld [vmem:[#allocation9 + $0x530] sm:$0xff]  ;;  %4587 = vmatpush2.msra.mxu1 %v4508_v53 }
 0xdee   :  { %4764 = vmatprep.mubr.f32.mxu0 %v12903_v0  ;;  %4873 = vmatpush1.msra.mxu0 %v4838_v42  ;;  %v4501_v42 = vld [vmem:[#allocation9 + $0x508] sm:$0xff] }
 0xdef   :  { %4874 = vmatprep.subr.mxu0 %v4837_v2  ;;  %4588 = vmatprep.subr.mxu1 %v4507_v7  ;;  %v4500_v2 = vld [vmem:[#allocation9 + $0x500] sm:$0xff] }
 0xdf0   :  { %4875 = vmatpush1.msra.mxu0 %v4836_v15  ;;  %4589 = vmatpush2.msra.mxu1 %v4506_v8  ;;  %v4808_v15 = vld [vmem:[#allocation9 + $0x600] sm:$0xff] }
 0xdf1   :  { %7839 = vmatmul.mubr.msk.f32.gmra.mxu0 %vm3682_vm5, %v7831_v47  ;;  %4876 = vmatprep.subr.mxu0 %v4835_v12  ;;  %v4814_v47 = vld [vmem:[#allocation9 + $0x630] sm:$0xff] }
 0xdf2   :  { %4770 = vmatprep.mubr.f32.mxu0 %v12903_v0  ;;  %4877 = vmatpush1.msra.mxu0 %v4834_v17  ;;  %v4870_v12 = vld [vmem:[#allocation9 + $0x7f0] sm:$0xff]  ;;  %v4867_v17 = vld [vmem:[#allocation9 + $0x7d8] sm:$0xff] }
 0xdf3   :  { %4878 = vmatprep.subr.mxu0 %v4833_v19  ;;  %4590 = vmatprep.subr.mxu1 %v4505_v14  ;;  %v4865_v19 = vld [vmem:[#allocation9 + $0x7c8] sm:$0xff] }
 0xdf4   :  { %4879 = vmatpush1.msra.mxu0 %v4832_v20  ;;  %4591 = vmatpush2.msra.mxu1 %v4504_v59  ;;  %v4863_v20 = vld [vmem:[#allocation9 + $0x7b8] sm:$0xff] }
 0xdf5   :  { %7840 = vmatmul.mubr.msk.f32.gmra.mxu0 %vm3682_vm5, %v7832_v9  ;;  %4880 = vmatprep.subr.mxu0 %v4831_v3  ;;  %v4502_v9 = vld [vmem:[#allocation9 + $0x510] sm:$0xff]  ;;  %v4860_v3 = vld [vmem:[#allocation9 + $0x7a0] sm:$0xff] }
 0xdf6   :  { %4776 = vmatprep.mubr.f32.mxu0 %v12903_v0  ;;  %4881 = vmatpush1.msra.mxu0 %v4830_v24  ;;  %v4858_v24 = vld [vmem:[#allocation9 + $0x790] sm:$0xff] }
 0xdf7   :  { %4882 = vmatprep.subr.mxu0 %v4829_v27  ;;  %4592 = vmatprep.subr.mxu1 %v4503_v52  ;;  %v4856_v27 = vld [vmem:[#allocation9 + $0x780] sm:$0xff] }
 0xdf8   :  { %4883 = vmatpush1.msra.mxu0 %v4828_v4  ;;  %4593 = vmatpush2.msra.mxu1 %v4502_v9  ;;  %v4852_v4 = vld [vmem:[#allocation9 + $0x760] sm:$0xff] }
 0xdf9   :  { %7841 = vmatmul.mubr.msk.f32.gmra.mxu0 %vm3682_vm5, %v7833_v1  ;;  %4884 = vmatprep.subr.mxu0 %v4827_v31  ;;  %v4869_v1 = vld [vmem:[#allocation9 + $0x7e8] sm:$0xff]  ;;  %v4851_v31 = vld [vmem:[#allocation9 + $0x758] sm:$0xff] }
 0xdfa   :  { %4782 = vmatprep.mubr.f32.mxu0 %v12903_v0  ;;  %4885 = vmatpush1.msra.mxu0 %v4826_v33  ;;  %v4849_v33 = vld [vmem:[#allocation9 + $0x748] sm:$0xff] }
 0xdfb   :  { %4886 = vmatprep.subr.mxu0 %v4825_v36  ;;  %4594 = vmatprep.subr.mxu1 %v4501_v42  ;;  %v4846_v36 = vld [vmem:[#allocation9 + $0x730] sm:$0xff] }
 0xdfc   :  { %4887 = vmatpush1.msra.mxu0 %v4824_v38  ;;  %4595 = vmatpush2.msra.mxu1 %v4500_v2  ;;  %v4844_v38 = vld [vmem:[#allocation9 + $0x720] sm:$0xff] }
 0xdfd   :  { %7842 = vmatmul.mubr.msk.f32.gmra.mxu0 %vm3682_vm5, %v7834_v22  ;;  %4888 = vmatprep.subr.mxu0 %v4823_v40  ;;  %v4861_v22 = vld [vmem:[#allocation9 + $0x7a8] sm:$0xff]  ;;  %v4842_v40 = vld [vmem:[#allocation9 + $0x710] sm:$0xff] }
 0xdfe   :  { %4788 = vmatprep.mubr.f32.mxu0 %v12903_v0  ;;  %4889 = vmatpush1.msra.mxu0 %v4822_v49 }
 0xdff   :  { %4890 = vmatprep.subr.mxu0 %v4821_v51 }
 0xe00   :  { %4891 = vmatpush1.msra.mxu0 %v4820_v56 }
 0xe01   :  { %7843 = vmatmul.mubr.msk.f32.gmra.mxu0 %vm3682_vm5, %v7835_v29  ;;  %4892 = vmatprep.subr.mxu0 %v4819_v48  ;;  %v4854_v29 = vld [vmem:[#allocation9 + $0x770] sm:$0xff] }
 0xe02   :  { %4794 = vmatprep.mubr.f32.mxu0 %v12903_v0  ;;  %4893 = vmatpush1.msra.mxu0 %v4818_v46 }
 0xe03   :  { %4894 = vmatprep.subr.mxu0 %v4817_v6 }
 0xe04   :  { %4895 = vmatpush1.msra.mxu0 %v4816_v63 }
 0xe05   :  { %7844 = vmatmul.mubr.msk.f32.gmra.mxu0 %vm3682_vm5, %v7836_v35  ;;  %4896 = vmatprep.subr.mxu0 %v4815_v58  ;;  %v4847_v35 = vld [vmem:[#allocation9 + $0x738] sm:$0xff] }
 0xe06   :  { %4800 = vmatprep.mubr.f32.mxu0 %v12903_v0  ;;  %4897 = vmatpush1.msra.mxu0 %v4814_v47 }
 0xe07   :  { %4898 = vmatprep.subr.mxu0 %v4813_v54 }
 0xe08   :  { %4899 = vmatpush1.msra.mxu0 %v4812_v5 }
 0xe09   :  { %7845 = vmatmul.mubr.msk.f32.gmra.mxu0 %vm3682_vm5, %v7837_v44  ;;  %4900 = vmatprep.subr.mxu0 %v4811_v60  ;;  %v4840_v44 = vld [vmem:[#allocation9 + $0x700] sm:$0xff] }
 0xe0a   :  { %4901 = vmatpush1.msra.mxu0 %v4810_v10 }
 0xe0b   :  { %4902 = vmatprep.subr.mxu0 %v4809_v11 }
 0xe0c   :  { %4903 = vmatpush1.msra.mxu0 %v4808_v15 }
 0xe0d   :  { %4904 = vmatprep.subr.mxu0 %v4871_v62 }
 0xe0e   :  { %4905 = vmatpush2.msra.mxu0 %v4870_v12 }
 0xe0f   :  { %4906 = vmatprep.subr.mxu0 %v4869_v1 }
 0xe10   :  { %4907 = vmatpush2.msra.mxu0 %v4868_v13 }
 0xe11   :  { %4908 = vmatprep.subr.mxu0 %v4867_v17 }
 0xe12   :  { %4909 = vmatpush2.msra.mxu0 %v4866_v18 }
 0xe13   :  { %4910 = vmatprep.subr.mxu0 %v4865_v19 }
 0xe14   :  { %4911 = vmatpush2.msra.mxu0 %v4864_v57 }
 0xe15   :  { %4912 = vmatprep.subr.mxu0 %v4863_v20 }
 0xe16   :  { %4913 = vmatpush2.msra.mxu0 %v4862_v21 }
 0xe17   :  { %4914 = vmatprep.subr.mxu0 %v4861_v22 }
 0xe18   :  { %4915 = vmatpush2.msra.mxu0 %v4860_v3 }
 0xe19   :  { %4916 = vmatprep.subr.mxu0 %v4859_v23 }
 0xe1a   :  { %4917 = vmatpush2.msra.mxu0 %v4858_v24 }
 0xe1b   :  { %4918 = vmatprep.subr.mxu0 %v4857_v25 }
 0xe1c   :  { %4919 = vmatpush2.msra.mxu0 %v4856_v27 }
 0xe1d   :  { %4920 = vmatprep.subr.mxu0 %v4855_v28 }
 0xe1e   :  { %4921 = vmatpush2.msra.mxu0 %v4854_v29 }
 0xe1f   :  { %4922 = vmatprep.subr.mxu0 %v4853_v30 }
 0xe20   :  { %4923 = vmatpush2.msra.mxu0 %v4852_v4  ;;  %v5032_v4 = vld [vmem:[#allocation10 + $0xf8] sm:$0xff] }
 0xe21   :  { %4924 = vmatprep.subr.mxu0 %v4851_v31  ;;  %5094 = vmatprep.subr.mxu1 %v5032_v4  ;;  %v5031_v31 = vld [vmem:[#allocation10 + $0xf0] sm:$0xff] }
 0xe22   :  { %4925 = vmatpush2.msra.mxu0 %v4850_v32  ;;  %v5030_v32 = vld [vmem:[#allocation10 + $0xe8] sm:$0xff] }
 0xe23   :  { %4926 = vmatprep.subr.mxu0 %v4849_v33  ;;  %v5029_v33 = vld [vmem:[#allocation10 + $0xe0] sm:$0xff] }
 0xe24   :  { %4927 = vmatpush2.msra.mxu0 %v4848_v34  ;;  %v5028_v34 = vld [vmem:[#allocation10 + $0xd8] sm:$0xff] }
 0xe25   :  { %4928 = vmatprep.subr.mxu0 %v4847_v35  ;;  %v5027_v35 = vld [vmem:[#allocation10 + $0xd0] sm:$0xff] }
 0xe26   :  { %4929 = vmatpush2.msra.mxu0 %v4846_v36  ;;  %v5026_v36 = vld [vmem:[#allocation10 + $0xc8] sm:$0xff] }
 0xe27   :  { %4930 = vmatprep.subr.mxu0 %v4845_v37  ;;  %v5025_v37 = vld [vmem:[#allocation10 + $0xc0] sm:$0xff] }
 0xe28   :  { %4931 = vmatpush2.msra.mxu0 %v4844_v38  ;;  %v5024_v38 = vld [vmem:[#allocation10 + $0xb8] sm:$0xff] }
 0xe29   :  { %4932 = vmatprep.subr.mxu0 %v4843_v39  ;;  %v5023_v39 = vld [vmem:[#allocation10 + $0xb0] sm:$0xff] }
 0xe2a   :  { %4933 = vmatpush2.msra.mxu0 %v4842_v40  ;;  %v5022_v40 = vld [vmem:[#allocation10 + $0xa8] sm:$0xff] }
 0xe2b   :  { %4934 = vmatprep.subr.mxu0 %v4841_v41  ;;  %v5021_v41 = vld [vmem:[#allocation10 + $0xa0] sm:$0xff] }
 0xe2c   :  { %4935 = vmatpush2.msra.mxu0 %v4840_v44  ;;  %v5020_v44 = vld [vmem:[#allocation10 + $0x98] sm:$0xff] }
 0xe2d   :  { %5233 = vmatprep.subr.mxu0 %v5032_v4  ;;  %v5051_v4 = vld [vmem:[#allocation10 + $0x190] sm:$0xff] }
 0xe6c   :  { %v10965_v45 = vpop.f32.mrf.mxu0 }
 0xe6e   :  { %v10967_v49 = vpop.f32.mrf.mxu0 }
 0xe71   :  { %v10969_v50 = vpop.f32.mrf.mxu0 }
 0xe73   :  { %v10971_v51 = vpop.f32.mrf.mxu0 }
 0xe75   :  { %v10973_v55 = vpop.f32.mrf.mxu0 }
 0xe77   :  { %v10975_v56 = vpop.f32.mrf.mxu0 }
 0xe79   :  { %v10977_v43 = vpop.f32.mrf.mxu0 }
 0xe7b   :  { %v10979_v48 = vpop.f32.mrf.mxu0 }
 0xe7d   :  { %v10981_v16 = vpop.f32.mrf.mxu0 }
 0xe7f   :  { %v10983_v46 = vpop.f32.mrf.mxu0 }
 0xe81   :  { %v10985_v53 = vpop.f32.mrf.mxu0 }
 0xe83   :  { %v10987_v6 = vpop.f32.mrf.mxu0 }
 0xe85   :  { %v10989_v7 = vpop.f32.mrf.mxu0 }
 0xe87   :  { %v10991_v63 = vpop.f32.mrf.mxu0 }
 0xe89   :  { %v10993_v8 = vpop.f32.mrf.mxu0 }
 0xe8b   :  { %v10995_v58 = vpop.f32.mrf.mxu0 }
 0xe8d   :  { %v4420_v14 = vpop.f32.mrf.mxu0 }
 0xe8f   :  { %v4422_v47 = vpop.f32.mrf.mxu0 }
 0xe90   :  { %4596 = vmatprep.mubr.f32.mxu1 %v4422_v47  ;;  %v5018_v47 = vld [vmem:[#allocation10 + $0x88] sm:$0xff] }
 0xe91   :  { %v4426_v59 = vpop.f32.mrf.mxu0  ;;  %4597 = vmatmul.mubr.f32.vlgmr.msra.gmra.mxu1 %v4420_v14  ;;  %v5019_v14 = vld [vmem:[#allocation10 + $0x90] sm:$0xff] }
 0xe92   :  { %5095 = vmatpush1.msra.mxu1 %v5031_v31 }
 0xe93   :  { %v4428_v54 = vpop.f32.mrf.mxu0  ;;  %5096 = vmatprep.subr.mxu1 %v5030_v32 }
 0xe94   :  { %4602 = vmatprep.mubr.f32.mxu1 %v4428_v54  ;;  %5097 = vmatpush1.msra.mxu1 %v5029_v33  ;;  %v5016_v54 = vld [vmem:[#allocation10 + $0x78] sm:$0xff] }
 0xe95   :  { %v4432_v52 = vpop.f32.mrf.mxu0  ;;  %4603 = vmatmul.mubr.f32.gmra.mxu1 %v4426_v59  ;;  %5098 = vmatprep.subr.mxu1 %v5028_v34  ;;  %v5017_v59 = vld [vmem:[#allocation10 + $0x80] sm:$0xff] }
 0xe96   :  { %5099 = vmatpush1.msra.mxu1 %v5027_v35 }
 0xe97   :  { %v4434_v5 = vpop.f32.mrf.mxu0  ;;  %5100 = vmatprep.subr.mxu1 %v5026_v36 }
 0xe98   :  { %4608 = vmatprep.mubr.f32.mxu1 %v4434_v5  ;;  %5101 = vmatpush1.msra.mxu1 %v5025_v37  ;;  %v5014_v5 = vld [vmem:[#allocation10 + $0x68] sm:$0xff] }
 0xe99   :  { %v4438_v9 = vpop.f32.mrf.mxu0  ;;  %4609 = vmatmul.mubr.f32.gmra.mxu1 %v4432_v52  ;;  %5102 = vmatprep.subr.mxu1 %v5024_v38  ;;  %v5015_v52 = vld [vmem:[#allocation10 + $0x70] sm:$0xff] }
 0xe9a   :  { %5103 = vmatpush1.msra.mxu1 %v5023_v39 }
 0xe9b   :  { %v4440_v60 = vpop.f32.mrf.mxu0  ;;  %5104 = vmatprep.subr.mxu1 %v5022_v40 }
 0xe9c   :  { %4614 = vmatprep.mubr.f32.mxu1 %v4440_v60  ;;  %5105 = vmatpush1.msra.mxu1 %v5021_v41  ;;  %v5012_v60 = vld [vmem:[#allocation10 + $0x58] sm:$0xff] }
 0xe9d   :  { %v4444_v42 = vpop.f32.mrf.mxu0  ;;  %4615 = vmatmul.mubr.f32.gmra.mxu1 %v4438_v9  ;;  %5106 = vmatprep.subr.mxu1 %v5020_v44  ;;  %v5013_v9 = vld [vmem:[#allocation10 + $0x60] sm:$0xff] }
 0xe9e   :  { %5107 = vmatpush1.msra.mxu1 %v5019_v14 }
 0xe9f   :  { %v4446_v10 = vpop.f32.mrf.mxu0  ;;  %5108 = vmatprep.subr.mxu1 %v5018_v47 }
 0xea0   :  { %4620 = vmatprep.mubr.f32.mxu1 %v4446_v10  ;;  %5109 = vmatpush1.msra.mxu1 %v5017_v59  ;;  %v5010_v10 = vld [vmem:[#allocation10 + $0x48] sm:$0xff] }
 0xea1   :  { %v4450_v2 = vpop.f32.mrf.mxu0  ;;  %4621 = vmatmul.mubr.f32.gmra.mxu1 %v4444_v42  ;;  %5110 = vmatprep.subr.mxu1 %v5016_v54  ;;  %v5011_v42 = vld [vmem:[#allocation10 + $0x50] sm:$0xff] }
 0xea2   :  { %5111 = vmatpush1.msra.mxu1 %v5015_v52 }
 0xea3   :  { %v4452_v11 = vpop.f32.mrf.mxu0  ;;  %5112 = vmatprep.subr.mxu1 %v5014_v5 }
 0xea4   :  { %4626 = vmatprep.mubr.f32.mxu1 %v4452_v11  ;;  %5113 = vmatpush1.msra.mxu1 %v5013_v9  ;;  %v5008_v11 = vld [vmem:[#allocation10 + $0x38] sm:$0xff] }
 0xea5   :  { %v4456_v15 = vpop.f32.mrf.mxu0  ;;  %4627 = vmatmul.mubr.f32.gmra.mxu1 %v4450_v2  ;;  %5114 = vmatprep.subr.mxu1 %v5012_v60  ;;  %v5009_v2 = vld [vmem:[#allocation10 + $0x40] sm:$0xff] }
 0xea6   :  { %5115 = vmatpush1.msra.mxu1 %v5011_v42 }
 0xea7   :  { %v4458_v62 = vpop.f32.mrf.mxu0  ;;  %5116 = vmatprep.subr.mxu1 %v5010_v10 }
 0xea8   :  { %4632 = vmatprep.mubr.f32.mxu1 %v4458_v62  ;;  %5117 = vmatpush1.msra.mxu1 %v5009_v2  ;;  %v5006_v62 = vld [vmem:[#allocation10 + $0x28] sm:$0xff] }
 0xea9   :  { %v4462_v12 = vpop.f32.mrf.mxu0  ;;  %4633 = vmatmul.mubr.f32.gmra.mxu1 %v4456_v15  ;;  %5118 = vmatprep.subr.mxu1 %v5008_v11  ;;  %v5007_v15 = vld [vmem:[#allocation10 + $0x30] sm:$0xff] }
 0xeaa   :  { %5119 = vmatpush1.msra.mxu1 %v5007_v15 }
 0xeab   :  { %v4464_v1 = vpop.f32.mrf.mxu0  ;;  %5120 = vmatprep.subr.mxu1 %v5006_v62 }
 0xeac   :  { %4638 = vmatprep.mubr.f32.mxu1 %v4464_v1  ;;  %v5004_v1 = vld [vmem:[#allocation10 + $0x18] sm:$0xff] }
 0xead   :  { %4639 = vmatmul.mubr.f32.gmra.mxu1 %v4462_v12  ;;  %v4760_v13 = vpop.f32.mrf.mxu0  ;;  %v5005_v12 = vld [vmem:[#allocation10 + $0x20] sm:$0xff] }
 0xeae   :  { %5121 = vmatpush1.msra.mxu1 %v5005_v12 }
 0xeaf   :  { %v4762_v17 = vpop.f32.mrf.mxu0  ;;  %5122 = vmatprep.subr.mxu1 %v5004_v1 }
 0xeb0   :  { %4936 = vmatprep.mubr.f32.mxu0 %v4762_v17  ;;  %v5002_v17 = vld [vmem:[#allocation10 + $0x8] sm:$0xff] }
 0xeb1   :  { %v4766_v18 = vpop.f32.mrf.mxu0  ;;  %4937 = vmatmul.mubr.f32.vlgmr.msra.gmra.mxu0 %v4760_v13  ;;  %v5003_v13 = vld [vmem:[#allocation10 + $0x10] sm:$0xff] }
 0xeb2   :  { %5234 = vmatpush1.msra.mxu0 %v5031_v31  ;;  %5123 = vmatpush1.msra.mxu1 %v5003_v13  ;;  %v5050_v31 = vld [vmem:[#allocation10 + $0x188] sm:$0xff] }
 0xeb3   :  { %v4768_v19 = vpop.f32.mrf.mxu0  ;;  %5235 = vmatprep.subr.mxu0 %v5030_v32  ;;  %5124 = vmatprep.subr.mxu1 %v5002_v17  ;;  %v5049_v32 = vld [vmem:[#allocation10 + $0x180] sm:$0xff] }
 0xeb4   :  { %4942 = vmatprep.mubr.f32.mxu0 %v4768_v19  ;;  %5236 = vmatpush1.msra.mxu0 %v5029_v33  ;;  %v5064_v19 = vld [vmem:[#allocation10 + $0x1f8] sm:$0xff]  ;;  %v10997_v33 = vpop.f32.mrf.mxu1 }
 0xeb5   :  { %v4772_v57 = vpop.f32.mrf.mxu0  ;;  %4943 = vmatmul.mubr.f32.gmra.mxu0 %v4766_v18  ;;  %5237 = vmatprep.subr.mxu0 %v5028_v34  ;;  %v5001_v18 = vld [vmem:[#allocation10] sm:$0xff]  ;;  %v5048_v34 = vld [vmem:[#allocation10 + $0x178] sm:$0xff] }
 0xeb6   :  { %5238 = vmatpush1.msra.mxu0 %v5027_v35  ;;  %5125 = vmatpush1.msra.mxu1 %v5001_v18  ;;  %v5047_v35 = vld [vmem:[#allocation10 + $0x170] sm:$0xff] }
 0xeb7   :  { %v4774_v20 = vpop.f32.mrf.mxu0  ;;  %5239 = vmatprep.subr.mxu0 %v5026_v36  ;;  %5126 = vmatprep.subr.mxu1 %v5064_v19  ;;  %v5046_v36 = vld [vmem:[#allocation10 + $0x168] sm:$0xff] }
 0xeb8   :  { %4948 = vmatprep.mubr.f32.mxu0 %v4774_v20  ;;  %5240 = vmatpush1.msra.mxu0 %v5025_v37  ;;  %v5062_v20 = vld [vmem:[#allocation10 + $0x1e8] sm:$0xff]  ;;  %v5045_v37 = vld [vmem:[#allocation10 + $0x160] sm:$0xff] }
 0xeb9   :  { %v4778_v21 = vpop.f32.mrf.mxu0  ;;  %4949 = vmatmul.mubr.f32.gmra.mxu0 %v4772_v57  ;;  %5241 = vmatprep.subr.mxu0 %v5024_v38  ;;  %v5063_v57 = vld [vmem:[#allocation10 + $0x1f0] sm:$0xff]  ;;  %v10999_v38 = vpop.f32.mrf.mxu1 }
 0xeba   :  { %5242 = vmatpush1.msra.mxu0 %v5023_v39  ;;  %5127 = vmatpush2.msra.mxu1 %v5063_v57  ;;  %v5044_v39 = vld [vmem:[#allocation10 + $0x158] sm:$0xff] }
 0xebb   :  { %v4780_v22 = vpop.f32.mrf.mxu0  ;;  %5243 = vmatprep.subr.mxu0 %v5022_v40  ;;  %5128 = vmatprep.subr.mxu1 %v5062_v20  ;;  %v5043_v40 = vld [vmem:[#allocation10 + $0x150] sm:$0xff] }
 0xebc   :  { %4954 = vmatprep.mubr.f32.mxu0 %v4780_v22  ;;  %5244 = vmatpush1.msra.mxu0 %v5021_v41  ;;  %v5060_v22 = vld [vmem:[#allocation10 + $0x1d8] sm:$0xff]  ;;  %v5042_v41 = vld [vmem:[#allocation10 + $0x148] sm:$0xff] }
 0xebd   :  { %v4784_v3 = vpop.f32.mrf.mxu0  ;;  %4955 = vmatmul.mubr.f32.gmra.mxu0 %v4778_v21  ;;  %5245 = vmatprep.subr.mxu0 %v5020_v44  ;;  %v5061_v21 = vld [vmem:[#allocation10 + $0x1e0] sm:$0xff] }
 0xebe   :  { %5246 = vmatpush1.msra.mxu0 %v5019_v14  ;;  %5129 = vmatpush2.msra.mxu1 %v5061_v21  ;;  %v5041_v44 = vld [vmem:[#allocation10 + $0x140] sm:$0xff]  ;;  %v4280_v14 = vpop.f32.mrf.mxu1 }
 0xebf   :  { %v4786_v23 = vpop.f32.mrf.mxu0  ;;  %5247 = vmatprep.subr.mxu0 %v5018_v47  ;;  %5130 = vmatprep.subr.mxu1 %v5060_v22  ;;  %v5040_v47 = vld [vmem:[#allocation10 + $0x138] sm:$0xff] }
 0xec0   :  { %4960 = vmatprep.mubr.f32.mxu0 %v4786_v23  ;;  %5248 = vmatpush1.msra.mxu0 %v5017_v59  ;;  %v5058_v23 = vld [vmem:[#allocation10 + $0x1c8] sm:$0xff]  ;;  %v5039_v59 = vld [vmem:[#allocation10 + $0x130] sm:$0xff] }
 0xec1   :  { %v4790_v24 = vpop.f32.mrf.mxu0  ;;  %4961 = vmatmul.mubr.f32.gmra.mxu0 %v4784_v3  ;;  %5249 = vmatprep.subr.mxu0 %v5016_v54  ;;  %v5059_v3 = vld [vmem:[#allocation10 + $0x1d0] sm:$0xff]  ;;  %v5038_v54 = vld [vmem:[#allocation10 + $0x128] sm:$0xff] }
 0xec2   :  { %5250 = vmatpush1.msra.mxu0 %v5015_v52  ;;  %5131 = vmatpush2.msra.mxu1 %v5059_v3  ;;  %v5037_v52 = vld [vmem:[#allocation10 + $0x120] sm:$0xff] }
 0xec3   :  { %v4792_v25 = vpop.f32.mrf.mxu0  ;;  %5251 = vmatprep.subr.mxu0 %v5014_v5  ;;  %5132 = vmatprep.subr.mxu1 %v5058_v23  ;;  %v5036_v5 = vld [vmem:[#allocation10 + $0x118] sm:$0xff] }
 0xec4   :  { %4966 = vmatprep.mubr.f32.mxu0 %v4792_v25  ;;  %5252 = vmatpush1.msra.mxu0 %v5013_v9  ;;  %v5056_v25 = vld [vmem:[#allocation10 + $0x1b8] sm:$0xff]  ;;  %v5035_v9 = vld [vmem:[#allocation10 + $0x110] sm:$0xff] }
 0xec5   :  { %v4796_v27 = vpop.f32.mrf.mxu0  ;;  %4967 = vmatmul.mubr.f32.gmra.mxu0 %v4790_v24  ;;  %5253 = vmatprep.subr.mxu0 %v5012_v60  ;;  %v5057_v24 = vld [vmem:[#allocation10 + $0x1c0] sm:$0xff]  ;;  %v4282_v60 = vpop.f32.mrf.mxu1 }
 0xec6   :  { %5254 = vmatpush1.msra.mxu0 %v5011_v42  ;;  %5133 = vmatpush2.msra.mxu1 %v5057_v24  ;;  %v5034_v42 = vld [vmem:[#allocation10 + $0x108] sm:$0xff] }
 0xec7   :  { %v4798_v28 = vpop.f32.mrf.mxu0  ;;  %5255 = vmatprep.subr.mxu0 %v5010_v10  ;;  %5134 = vmatprep.subr.mxu1 %v5056_v25  ;;  %v5033_v10 = vld [vmem:[#allocation10 + $0x100] sm:$0xff] }
 0xec8   :  { %4972 = vmatprep.mubr.f32.mxu0 %v4798_v28  ;;  %5256 = vmatpush1.msra.mxu0 %v5009_v2  ;;  %v5054_v28 = vld [vmem:[#allocation10 + $0x1a8] sm:$0xff]  ;;  %v4286_v2 = vpop.f32.mrf.mxu1 }
 0xec9   :  { %v4802_v29 = vpop.f32.mrf.mxu0  ;;  %4973 = vmatmul.mubr.f32.gmra.mxu0 %v4796_v27  ;;  %5257 = vmatprep.subr.mxu0 %v5008_v11  ;;  %v5055_v27 = vld [vmem:[#allocation10 + $0x1b0] sm:$0xff] }
 0xeca   :  { %5258 = vmatpush1.msra.mxu0 %v5007_v15  ;;  %5135 = vmatpush2.msra.mxu1 %v5055_v27  ;;  %v4288_v11 = vpop.f32.mrf.mxu1 }
 0xecb   :  { %v4804_v30 = vpop.f32.mrf.mxu0  ;;  %5259 = vmatprep.subr.mxu0 %v5006_v62  ;;  %5136 = vmatprep.subr.mxu1 %v5054_v28 }
 0xecc   :  { %4978 = vmatprep.mubr.f32.mxu0 %v4804_v30  ;;  %5260 = vmatpush1.msra.mxu0 %v5005_v12  ;;  %v5052_v30 = vld [vmem:[#allocation10 + $0x198] sm:$0xff]  ;;  %v4292_v15 = vpop.f32.mrf.mxu1 }
 0xecd   :  { %4979 = vmatmul.mubr.f32.gmra.mxu0 %v4802_v29  ;;  %5261 = vmatprep.subr.mxu0 %v5004_v1  ;;  %v5053_v29 = vld [vmem:[#allocation10 + $0x1a0] sm:$0xff] }
 0xece   :  { %5262 = vmatpush1.msra.mxu0 %v5003_v13  ;;  %5137 = vmatpush2.msra.mxu1 %v5053_v29  ;;  %v4294_v62 = vpop.f32.mrf.mxu1 }
 0xecf   :  { %5263 = vmatprep.subr.mxu0 %v5002_v17  ;;  %5138 = vmatprep.subr.mxu1 %v5052_v30 }
 0xed0   :  { %5264 = vmatpush1.msra.mxu0 %v5001_v18  ;;  %5139 = vmatpush2.msra.mxu1 %v5051_v4  ;;  %v4298_v12 = vpop.f32.mrf.mxu1 }
 0xed1   :  { %5265 = vmatprep.subr.mxu0 %v5064_v19  ;;  %5140 = vmatprep.subr.mxu1 %v5050_v31 }
 0xed2   :  { %5266 = vmatpush2.msra.mxu0 %v5063_v57  ;;  %5141 = vmatpush2.msra.mxu1 %v5049_v32  ;;  %v4300_v1 = vpop.f32.mrf.mxu1 }
 0xed3   :  { %5267 = vmatprep.subr.mxu0 %v5062_v20  ;;  %5142 = vmatprep.subr.mxu1 %v5048_v34 }
 0xed4   :  { %5268 = vmatpush2.msra.mxu0 %v5061_v21  ;;  %5143 = vmatpush2.msra.mxu1 %v5047_v35  ;;  %v4304_v13 = vpop.f32.mrf.mxu1 }
 0xed5   :  { %5269 = vmatprep.subr.mxu0 %v5060_v22  ;;  %5144 = vmatprep.subr.mxu1 %v5046_v36 }
 0xed6   :  { %5270 = vmatpush2.msra.mxu0 %v5059_v3  ;;  %5145 = vmatpush2.msra.mxu1 %v5045_v37  ;;  %v4306_v17 = vpop.f32.mrf.mxu1 }
 0xed7   :  { %5271 = vmatprep.subr.mxu0 %v5058_v23  ;;  %5146 = vmatprep.subr.mxu1 %v5044_v39 }
 0xed8   :  { %5272 = vmatpush2.msra.mxu0 %v5057_v24  ;;  %5147 = vmatpush2.msra.mxu1 %v5043_v40  ;;  %v4310_v18 = vpop.f32.mrf.mxu1 }
 0xed9   :  { %5273 = vmatprep.subr.mxu0 %v5056_v25  ;;  %5148 = vmatprep.subr.mxu1 %v5042_v41 }
 0xeda   :  { %5274 = vmatpush2.msra.mxu0 %v5055_v27  ;;  %5149 = vmatpush2.msra.mxu1 %v5041_v44  ;;  %v11001_v19 = vpop.f32.mrf.mxu1 }
 0xedb   :  { %5275 = vmatprep.subr.mxu0 %v5054_v28  ;;  %5150 = vmatprep.subr.mxu1 %v5040_v47 }
 0xedc   :  { %5276 = vmatpush2.msra.mxu0 %v5053_v29  ;;  %5151 = vmatpush2.msra.mxu1 %v5039_v59  ;;  %v11003_v57 = vpop.f32.mrf.mxu1 }
 0xedd   :  { %5277 = vmatprep.subr.mxu0 %v5052_v30  ;;  %5152 = vmatprep.subr.mxu1 %v5038_v54 }
 0xede   :  { %5278 = vmatpush2.msra.mxu0 %v5051_v4  ;;  %5153 = vmatpush2.msra.mxu1 %v5037_v52  ;;  %v11005_v20 = vpop.f32.mrf.mxu1 }
 0xedf   :  { %5279 = vmatprep.subr.mxu0 %v5050_v31  ;;  %5154 = vmatprep.subr.mxu1 %v5036_v5 }
 0xee0   :  { %5280 = vmatpush2.msra.mxu0 %v5049_v32  ;;  %5155 = vmatpush2.msra.mxu1 %v5035_v9 }
 0xee1   :  { %5281 = vmatprep.subr.mxu0 %v5048_v34  ;;  %5156 = vmatprep.subr.mxu1 %v5034_v42 }
 0xee2   :  { %5282 = vmatpush2.msra.mxu0 %v5047_v35  ;;  %5157 = vmatpush2.msra.mxu1 %v5033_v10 }
 0xee3   :  { %5283 = vmatprep.subr.mxu0 %v5046_v36 }
 0xee4   :  { %5284 = vmatpush2.msra.mxu0 %v5045_v37 }
 0xee5   :  { %5285 = vmatprep.subr.mxu0 %v5044_v39 }
 0xee6   :  { %5286 = vmatpush2.msra.mxu0 %v5043_v40  ;;  %v4281_v40 = vadd.f32 %v4280_v14, %v10969_v50 }
 0xee7   :  { %5287 = vmatprep.subr.mxu0 %v5042_v41 }
 0xee8   :  { %5288 = vmatpush2.msra.mxu0 %v5041_v44  ;;  %v4275_v44 = vadd.f32 %v10997_v33, %v10965_v45  ;;  %v4295_v45 = vadd.f32 %v4294_v62, %v10979_v48 }
 0xee9   :  { %5289 = vmatprep.subr.mxu0 %v5040_v47  ;;  %v4283_v47 = vadd.f32 %v4282_v60, %v10971_v51  ;;  %v4299_v51 = vadd.f32 %v4298_v12, %v10981_v16 }
 0xeea   :  { %5290 = vmatpush2.msra.mxu0 %v5039_v59  ;;  %v4287_v59 = vadd.f32 %v4286_v2, %v10973_v55 }
 0xeeb   :  { %5291 = vmatprep.subr.mxu0 %v5038_v54 }
 0xeec   :  { %5292 = vmatpush2.msra.mxu0 %v5037_v52  ;;  %v4277_v52 = vadd.f32 %v10999_v38, %v10967_v49  ;;  %v4301_v38 = vadd.f32 %v4300_v1, %v10983_v46 }
 0xeed   :  { %5293 = vmatprep.subr.mxu0 %v5036_v5  ;;  %v4289_v5 = vadd.f32 %v4288_v11, %v10975_v56  ;;  %v4305_v11 = vadd.f32 %v4304_v13, %v10985_v53 }
 0xeee   :  { %5294 = vmatpush2.msra.mxu0 %v5035_v9  ;;  %v4293_v9 = vadd.f32 %v4292_v15, %v10977_v43 }
 0xeef   :  { %5295 = vmatprep.subr.mxu0 %v5034_v42 }
 0xef0   :  { %5296 = vmatpush2.msra.mxu0 %v5033_v10 }
 0xf51   :  { %v4598_v21 = vpop.f32.mrf.mxu1 }
 0xf52   :  { %v4645_v0 = vadd.f32 %v4598_v21, %v4275_v44 }
 0xf53   :  { %v4600_v22 = vpop.f32.mrf.mxu1 }
 0xf54   :  { %v4646_v55 = vadd.f32 %v4600_v22, %v4277_v52  ;;  %v4307_v22 = vadd.f32 %v4306_v17, %v10987_v6 }
 0xf55   :  { %v4604_v3 = vpop.f32.mrf.mxu1 }
 0xf56   :  { %v4647_v54 = vadd.f32 %v4604_v3, %v4281_v40 }
 0xf57   :  { %v4606_v23 = vpop.f32.mrf.mxu1 }
 0xf58   :  { %v4648_v50 = vadd.f32 %v4606_v23, %v4283_v47  ;;  %v4311_v23 = vadd.f32 %v4310_v18, %v10989_v7 }
 0xf59   :  { %v4610_v24 = vpop.f32.mrf.mxu1 }
 0xf5a   :  { %v4649_v14 = vadd.f32 %v4610_v24, %v4287_v59 }
 0xf5b   :  { %v4612_v25 = vpop.f32.mrf.mxu1 }
 0xf5c   :  { %v4650_v33 = vadd.f32 %v4612_v25, %v4289_v5 }
 0xf5d   :  { %v4616_v27 = vpop.f32.mrf.mxu1 }
 0xf5e   :  { %v4651_v2 = vadd.f32 %v4616_v27, %v4293_v9 }
 0xf5f   :  { %v4618_v28 = vpop.f32.mrf.mxu1 }
 0xf60   :  { %v4652_v15 = vadd.f32 %v4618_v28, %v4295_v45  ;;  %v4313_v28 = vadd.f32 %v11001_v19, %v10991_v63 }
 0xf61   :  { %v4622_v29 = vpop.f32.mrf.mxu1 }
 0xf62   :  { %v4653_v21 = vadd.f32 %v4622_v29, %v4299_v51 }
 0xf63   :  { %v4624_v4 = vpop.f32.mrf.mxu1 }
 0xf64   :  { %v4654_v46 = vadd.f32 %v4624_v4, %v4301_v38 }
 0xf65   :  { %v4628_v34 = vpop.f32.mrf.mxu1 }
 0xf66   :  { %v4655_v1 = vadd.f32 %v4628_v34, %v4305_v11 }
 0xf67   :  { %v4630_v37 = vpop.f32.mrf.mxu1 }
 0xf68   :  { %v4656_v29 = vadd.f32 %v4630_v37, %v4307_v22  ;;  %v12932_v22 = vmov 0.0  }
 0xf69   :  { %v4634_v42 = vpop.f32.mrf.mxu1 }
 0xf6b   :  { %v4636_v3 = vpop.f32.mrf.mxu1 }
 0xf6c   :  { %v4658_v34 = vadd.f32 %v4636_v3, %v4313_v28 }
 0xf6d   :  { %v4640_v6 = vpop.f32.mrf.mxu1 }
 0xf6f   :  { %v4642_v40 = vpop.f32.mrf.mxu1 }
 0xf71   :  { %v4938_v30 = vpop.f32.mrf.mxu0 }
 0xf72   :  { %v11020_v49 = vadd.f32 %v4938_v30, %v4645_v0  ;;  %v4657_v30 = vadd.f32 %v4634_v42, %v4311_v23 }
 0xf73   :  { %v4940_v31 = vpop.f32.mrf.mxu0 }
 0xf74   :  { %v11028_v62 = vadd.f32 %v4940_v31, %v4646_v55 }
 0xf75   :  { %v4944_v32 = vpop.f32.mrf.mxu0 }
 0xf76   :  { %v11016_v26 = vadd.f32 %v4944_v32, %v4647_v54  ;;  %v4317_v32 = vadd.f32 %v11003_v57, %v10993_v8 }
 0xf77   :  { %v4946_v35 = vpop.f32.mrf.mxu0 }
 0xf78   :  { %v11022_v56 = vadd.f32 %v4946_v35, %v4648_v50  ;;  %v5065_v16 = vadd.f32 %v11016_v26, %v11020_v49  ;;  %v4659_v44 = vadd.f32 %v4640_v6, %v4317_v32 }
 0xf79   :  { %v4950_v36 = vpop.f32.mrf.mxu0 }
 0xf7a   :  { %v11024_v43 = vadd.f32 %v4950_v36, %v4649_v14  ;;  %v5078_v13 = vadd.f32 %v11022_v56, %v11028_v62 }
 0xf7b   :  { %v4952_v39 = vpop.f32.mrf.mxu0 }
 0xf7c   :  { %v11032_v12 = vadd.f32 %v4952_v39, %v4650_v33  ;;  %v5066_v24 = vadd.f32 %v5065_v16, %v11024_v43  ;;  %v4319_v39 = vadd.f32 %v11005_v20, %v10995_v58 }
 0xf7d   :  { %v4956_v41 = vpop.f32.mrf.mxu0 }
 0xf7e   :  { %v11034_v0 = vadd.f32 %v4956_v41, %v4651_v2  ;;  %v5079_v7 = vadd.f32 %v5078_v13, %v11032_v12  ;;  %v4660_v57 = vadd.f32 %v4642_v40, %v4319_v39 }
 0xf7f   :  { %v4958_v10 = vpop.f32.mrf.mxu0 }
 0xf80   :  { %v11041_v25 = vadd.f32 %v4958_v10, %v4652_v15  ;;  %v5067_v18 = vadd.f32 %v5066_v24, %v11034_v0 }
 0xf81   :  { %v4962_v60 = vpop.f32.mrf.mxu0 }
 0xf82   :  { %v11043_v27 = vadd.f32 %v4962_v60, %v4653_v21  ;;  %v5080_v36 = vadd.f32 %v5079_v7, %v11041_v25 }
 0xf83   :  { %v4964_v48 = vpop.f32.mrf.mxu0 }
 0xf84   :  { %v4994_v4 = vadd.f32 %v4964_v48, %v4654_v46  ;;  %v5068_v63 = vadd.f32 %v5067_v18, %v11043_v27 }
 0xf85   :  { %v4968_v53 = vpop.f32.mrf.mxu0 }
 0xf86   :  { %v11049_v31 = vadd.f32 %v4968_v53, %v4655_v1  ;;  %v5081_v47 = vadd.f32 %v5080_v36, %v4994_v4 }
 0xf87   :  { %v4970_v17 = vpop.f32.mrf.mxu0 }
 0xf88   :  { %v4996_v19 = vadd.f32 %v4970_v17, %v4656_v29  ;;  %v5069_v59 = vadd.f32 %v5068_v63, %v11049_v31 }
 0xf89   :  { %v4974_v35 = vpop.f32.mrf.mxu0 }
 0xf8a   :  { %v11055_v37 = vadd.f32 %v4974_v35, %v4657_v30  ;;  %v5082_v52 = vadd.f32 %v5081_v47, %v4996_v19 }
 0xf8b   :  { %v4976_v41 = vpop.f32.mrf.mxu0 }
 0xf8c   :  { %v4998_v54 = vadd.f32 %v4976_v41, %v4658_v34  ;;  %v5070_v5 = vadd.f32 %v5069_v59, %v11055_v37 }
 0xf8d   :  { %v4980_v8 = vpop.f32.mrf.mxu0 }
 0xf8e   :  { %v4999_v9 = vadd.f32 %v4980_v8, %v4659_v44  ;;  %v5083_v10 = vadd.f32 %v5082_v52, %v4998_v54 }
 0xf8f   :  { %v4982_v42 = vpop.f32.mrf.mxu0 }
 0xf90   :  { %v5071_v50 = vadd.f32 %v5070_v5, %v4999_v9  ;;  %v5000_v14 = vadd.f32 %v4982_v42, %v4660_v57 }
 0xf92   :  { %v5072_v45 = vrot.slane %v5071_v50, 4  ;;  %v5084_v51 = vadd.f32 %v5083_v10, %v5000_v14 }
 0xf94   :  { %v5073_v58 = vadd.f32 %v5072_v45, %v5071_v50  ;;  %v5085_v20 = vrot.slane %v5084_v51, 4 }
 0xf96   :  { %v5074_v55 = vrot.slane %v5073_v58, 2  ;;  %v5086_v33 = vadd.f32 %v5085_v20, %v5084_v51 }
 0xf98   :  { %v5075_v60 = vadd.f32 %v5074_v55, %v5073_v58  ;;  %v5087_v2 = vrot.slane %v5086_v33, 2 }
 0xf9a   :  { %v5076_v38 = vrot.slane %v5075_v60, 1  ;;  %v5088_v11 = vadd.f32 %v5087_v2, %v5086_v33 }
 0xf9c   :  { %v5089_v15 = vrot.slane %v5088_v11, 1  ;;  %v5077_v21 = vadd.f32 %v5076_v38, %v5075_v60 }
 0xf9e   :  { %v5090_v3 = vadd.f32 %v5089_v15, %v5088_v11  ;;  %v5092_v16 = vmul.f32 0.015625, %v5077_v21 }
 0xfa0   :  { %v5093_v48 = vmul.f32 0.015625, %v5090_v3 }
 0xfa2   :  { %5158 = vmatprep.mubr.f32.mxu1 %v5093_v48 }
 0xfa3   :  { %5159 = vmatmul.mubr.f32.vlgmr.msra.gmra.mxu1 %v5092_v16 }
 0xfa4   :  { %5532 = vmatprep.mubr.f32.mxu1 %v12932_v22 }
0x1063   :  { %v5160_v23 = vpop.f32.mrf.mxu1 }
0x1064   :  { %v5168_v46 = vrot.slane %v5160_v23, %v8979_v61 }
0x1065   :  { %v5162_v1 = vpop.f32.mrf.mxu1 }
0x1066   :  { %v11064_v53 = vsub.f32 %v11020_v49, %v5168_v46  ;;  %v11067_v13 = vsub.f32 %v11016_v26, %v5168_v46  ;;  %v5172_v24 = vrot.slane %v5162_v1, %v8979_v61  ;;  %v11080_v6 = vsub.f32 %v11024_v43, %v5168_v46 }
0x1067   :  { %v11101_v32 = vsub.f32 %v11043_v27, %v5168_v46  ;;  %v5185_v44 = vsub.f32 %v11055_v37, %v5168_v46  ;;  %v5187_v57 = vsub.f32 %v4999_v9, %v5168_v46 }
0x1068   :  { %v11071_v28 = vsub.f32 %v11028_v62, %v5172_v24  ;;  %v11074_v29 = vsub.f32 %v11022_v56, %v5172_v24  ;;  %v11077_v30 = vsub.f32 %v11032_v12, %v5172_v24  ;;  %v5189_v49 = vmul.f32 %v11064_v53, %v11064_v53 }
0x1069   :  { %v5191_v26 = vmul.f32 %v11067_v13, %v11067_v13  ;;  %v11087_v17 = vsub.f32 %v11041_v25, %v5172_v24  ;;  %v11094_v12 = vsub.f32 %v11034_v0, %v5168_v46  ;;  %v11096_v43 = vsub.f32 %v4994_v4, %v5172_v24 }
0x106a   :  { %v5190_v62 = vmul.f32 %v11071_v28, %v11071_v28  ;;  %v5192_v56 = vmul.f32 %v11074_v29, %v11074_v29  ;;  %v5194_v7 = vmul.f32 %v11077_v30, %v11077_v30  ;;  %v5193_v25 = vmul.f32 %v11080_v6, %v11080_v6 }
0x106b   :  { %v5205_v34 = vadd.f32 %v5191_v26, %v5189_v49  ;;  %v11105_v35 = vsub.f32 %v4996_v19, %v5172_v24  ;;  %v5196_v36 = vmul.f32 %v11087_v17, %v11087_v17  ;;  %v5183_v4 = vsub.f32 %v11049_v31, %v5168_v46 }
0x106c   :  { %v5218_v18 = vadd.f32 %v5192_v56, %v5190_v62  ;;  %v5195_v63 = vmul.f32 %v11094_v12, %v11094_v12  ;;  %v5186_v40 = vsub.f32 %v4998_v54, %v5172_v24  ;;  %v5198_v27 = vmul.f32 %v11096_v43, %v11096_v43  ;;  %v5330_v62 = vld [vmem:[%s12897_s16] ss:$2 sm:$0x3] }
0x106d   :  { %v5206_v39 = vadd.f32 %v5205_v34, %v5193_v25  ;;  %v5197_v19 = vmul.f32 %v11101_v32, %v11101_v32  ;;  %v5188_v59 = vsub.f32 %v5000_v14, %v5172_v24  ;;  %v5200_v8 = vmul.f32 %v11105_v35, %v11105_v35 }
0x106e   :  { %v5219_v0 = vadd.f32 %v5218_v18, %v5194_v7  ;;  %v5199_v52 = vmul.f32 %v5183_v4, %v5183_v4  ;;  %v5202_v42 = vmul.f32 %v5186_v40, %v5186_v40  ;;  %v5201_v10 = vmul.f32 %v5185_v44, %v5185_v44  ;;  %v7846_v18 = vld [vmem:[%s12897_s16 + $0x1] ss:$2 sm:$0x3] }
0x106f   :  { %v5207_v47 = vadd.f32 %v5206_v39, %v5195_v63  ;;  %v5204_v45 = vmul.f32 %v5188_v59, %v5188_v59  ;;  %v5203_v58 = vmul.f32 %v5187_v57, %v5187_v57  ;;  %v11128_v25 = vrot.slane %v5330_v62, %v8979_v61 }
0x1070   :  { %v5220_v41 = vadd.f32 %v5219_v0, %v5196_v36  ;;  %v12933_v0 = vld [vmem:[#allocation16_spill] sm:$0xff] }
0x1071   :  { %v5208_v5 = vadd.f32 %v5207_v47, %v5197_v19  ;;  %v5339_v63 = vrot.slane %v5330_v62, %v12933_v0 }
0x1072   :  { %v5221_v31 = vadd.f32 %v5220_v41, %v5198_v27  ;;  %v11133_v41 = vrot.slane %v7846_v18, %v8979_v61 }
0x1073   :  { %v5209_v50 = vadd.f32 %v5208_v5, %v5199_v52 }
0x1074   :  { %v5222_v54 = vadd.f32 %v5221_v31, %v5200_v8  ;;  %v11136_v8 = vrot.slane %v7846_v18, %v12933_v0 }
0x1075   :  { %v5210_v37 = vadd.f32 %v5209_v50, %v5201_v10 }
0x1076   :  { %v5223_v51 = vadd.f32 %v5222_v54, %v5202_v42 }
0x1077   :  { %v5211_v55 = vadd.f32 %v5210_v37, %v5203_v58 }
0x1078   :  { %v5224_v20 = vadd.f32 %v5223_v51, %v5204_v45 }
0x1079   :  { %v5212_v60 = vrot.slane %v5211_v55, 4 }
0x107a   :  { %v5225_v33 = vrot.slane %v5224_v20, 4 }
0x107b   :  { %v5213_v2 = vadd.f32 %v5212_v60, %v5211_v55 }
0x107c   :  { %v5226_v14 = vadd.f32 %v5225_v33, %v5224_v20 }
0x107d   :  { %v5214_v11 = vrot.slane %v5213_v2, 2 }
0x107e   :  { %v5227_v38 = vrot.slane %v5226_v14, 2 }
0x107f   :  { %v5215_v9 = vadd.f32 %v5214_v11, %v5213_v2 }
0x1080   :  { %v5228_v15 = vadd.f32 %v5227_v38, %v5226_v14 }
0x1081   :  { %v5216_v3 = vrot.slane %v5215_v9, 1 }
0x1082   :  { %v5229_v21 = vrot.slane %v5228_v15, 1 }
0x1083   :  { %v5217_v16 = vadd.f32 %v5216_v3, %v5215_v9 }
0x1084   :  { %v5230_v48 = vadd.f32 %v5229_v21, %v5228_v15 }
0x1085   :  { %v5231_v46 = vmul.f32 0.015625, %v5217_v16 }
0x1086   :  { %v5232_v23 = vmul.f32 0.015625, %v5230_v48 }
0x1088   :  { %5297 = vmatprep.mubr.f32.mxu0 %v5232_v23 }
0x1089   :  { %5298 = vmatmul.mubr.f32.vlgmr.msra.gmra.mxu0 %v5231_v46 }
0x108a   :  { %5822 = vmatprep.mubr.f32.mxu0 %v12932_v22 }
0x1149   :  { %v5299_v1 = vpop.f32.mrf.mxu0 }
0x114a   :  { %v5300_v24 = vadd.f32 1e-05, %v5299_v1 }
0x114b   :  { %v5301_v49 = vpop.f32.mrf.mxu0 }
0x114c   :  { %8265 = vrsqrt.f32 %v5300_v24  ;;  %v5302_v26 = vadd.f32 1e-05, %v5301_v49 }
0x114e   :  { %8267 = vrsqrt.f32 %v5302_v26 }
0x1159   :  { %v8266_v56 = vpop.eup %8265 }
0x115a   :  { %v5309_v7 = vrot.slane %v8266_v56, %v8979_v61 }
0x115b   :  { %v8268_v34 = vpop.eup %8267 }
0x115c   :  { %v5313_v36 = vrot.slane %v8268_v34, %v8979_v61  ;;  %v5328_v39 = vmul.f32 %v5309_v7, %v5187_v57  ;;  %v5326_v27 = vmul.f32 %v5309_v7, %v5185_v44  ;;  %v5324_v19 = vmul.f32 %v5309_v7, %v5183_v4 }
0x115d   :  { %v5322_v57 = vmul.f32 %v5309_v7, %v11101_v32  ;;  %v5320_v50 = vmul.f32 %v5309_v7, %v11094_v12  ;;  %v5318_v32 = vmul.f32 %v5309_v7, %v11080_v6  ;;  %v5316_v55 = vmul.f32 %v5309_v7, %v11067_v13 }
0x115e   :  { %v5329_v47 = vmul.f32 %v5313_v36, %v5188_v59  ;;  %v5356_v31 = vmul.f32 %v11128_v25, %v5328_v39  ;;  %v5327_v52 = vmul.f32 %v5313_v36, %v5186_v40  ;;  %v5354_v5 = vmul.f32 %v11128_v25, %v5326_v27 }
0x115f   :  { %v5325_v42 = vmul.f32 %v5313_v36, %v11105_v35  ;;  %v5323_v54 = vmul.f32 %v5313_v36, %v11096_v43  ;;  %v5352_v59 = vmul.f32 %v11128_v25, %v5324_v19  ;;  %v5350_v43 = vmul.f32 %v11128_v25, %v5322_v57  ;;  %v5403_v19 = vld [vmem:[%s12898_s17] sm:$0xff]  ;;  %v5404_v57 = vld [vmem:[%s12898_s17 + $0x8] sm:$0xff] }
0x1160   :  { %v5357_v44 = vmul.f32 %v5339_v63, %v5329_v47  ;;  %v5355_v10 = vmul.f32 %v5339_v63, %v5327_v52  ;;  %v5385_v61 = vadd.f32 %v11133_v41, %v5356_v31  ;;  %v5383_v35 = vadd.f32 %v11133_v41, %v5354_v5  ;;  %v7863_v47 = vld [vmem:[%s12898_s17 + $0x80] sm:$0xff]  ;;  %v7925_v31 = vld [vmem:[%s12899_s18 + $0x2f0] sm:$0xff]  ;;  %v7924_v52 = vld [vmem:[%s12899_s18 + $0x2e8] sm:$0xff] }
0x1161   :  { %v5353_v4 = vmul.f32 %v5339_v63, %v5325_v42  ;;  %v5351_v51 = vmul.f32 %v5339_v63, %v5323_v54  ;;  %v5321_v20 = vmul.f32 %v5313_v36, %v11087_v17  ;;  %v5381_v33 = vadd.f32 %v11133_v41, %v5352_v59  ;;  %v5660_v5 = vld [vmem:[%s12899_s18 + $0xf8] sm:$0xff]  ;;  %v7923_v42 = vld [vmem:[%s12899_s18 + $0x2e0] sm:$0xff]  ;;  %v7864_v54 = vld [vmem:[%s12898_s17 + $0x88] sm:$0xff] }
0x1162   :  { %v5386_v45 = vadd.f32 %v11136_v8, %v5357_v44  ;;  %v5384_v40 = vadd.f32 %v11136_v8, %v5355_v10  ;;  %v11156_v12 = vmax.f32 %v5385_v61, 0.0  ;;  %v5348_v60 = vmul.f32 %v11128_v25, %v5320_v50  ;;  %v7922_v44 = vld [vmem:[%s12899_s18 + $0x2d8] sm:$0xff]  ;;  %v7921_v10 = vld [vmem:[%s12899_s18 + $0x2d0] sm:$0xff]  ;;  %v7920_v61 = vld [vmem:[%s12899_s18 + $0x2c8] sm:$0xff] }
0x1163   :  { %v5382_v37 = vadd.f32 %v11136_v8, %v5353_v4  ;;  %v5319_v14 = vmul.f32 %v5313_v36, %v11077_v30  ;;  %v5380_v2 = vadd.f32 %v11136_v8, %v5351_v51  ;;  %v5349_v38 = vmul.f32 %v5339_v63, %v5321_v20  ;;  %v7919_v4 = vld [vmem:[%s12899_s18 + $0x2c0] sm:$0xff]  ;;  %v7865_v59 = vld [vmem:[%s12898_s17 + $0x90] sm:$0xff]  ;;  %v7916_v51 = vld [vmem:[%s12899_s18 + $0x2a8] sm:$0xff] }
0x1164   :  { %v11151_v58 = vmax.f32 %v5386_v45, 0.0  ;;  %v11163_v6 = vmax.f32 %v5384_v40, 0.0  ;;  %v5317_v17 = vmul.f32 %v5313_v36, %v11074_v29  ;;  %v11169_v13 = vmax.f32 %v5383_v35, 0.0  ;;  %v5405_v50 = vld [vmem:[%s12898_s17 + $0x10] sm:$0xff]  ;;  %v7918_v45 = vld [vmem:[%s12899_s18 + $0x2b8] sm:$0xff]  ;;  %v7915_v35 = vld [vmem:[%s12899_s18 + $0x2a0] sm:$0xff] }
0x1165   :  { %v5379_v11 = vadd.f32 %v11133_v41, %v5350_v43  ;;  %v5347_v30 = vmul.f32 %v5339_v63, %v5319_v14  ;;  %v5346_v15 = vmul.f32 %v11128_v25, %v5318_v32  ;;  %v11175_v9 = vmax.f32 %v5382_v37, 0.0  ;;  %v7917_v40 = vld [vmem:[%s12899_s18 + $0x2b0] sm:$0xff]  ;;  %v7866_v43 = vld [vmem:[%s12898_s17 + $0x98] sm:$0xff]  ;;  %v5407_v14 = vld [vmem:[%s12898_s17 + $0x20] sm:$0xff] }
0x1166   :  { %5484 = vmatprep.subr.mxu1 %v11151_v58  ;;  %5774 = vmatprep.subr.mxu0 %v11151_v58  ;;  %v5378_v21 = vadd.f32 %v11136_v8, %v5349_v38  ;;  %v5345_v29 = vmul.f32 %v5339_v63, %v5317_v17  ;;  %v5315_v3 = vmul.f32 %v5313_v36, %v11071_v28  ;;  %v11181_v48 = vmax.f32 %v5381_v33, 0.0  ;;  %v5406_v32 = vld [vmem:[%s12898_s17 + $0x18] sm:$0xff]  ;;  %v7913_v20 = vld [vmem:[%s12899_s18 + $0x290] sm:$0xff]  ;;  %v7911_v33 = vld [vmem:[%s12899_s18 + $0x280] sm:$0xff] }
0x1167   :  { %5485 = vmatpush1.msra.mxu1 %v11156_v12  ;;  %5775 = vmatpush1.msra.mxu0 %v11156_v12  ;;  %v5377_v16 = vadd.f32 %v11133_v41, %v5348_v60  ;;  %v5344_v23 = vmul.f32 %v11128_v25, %v5316_v55  ;;  %v5314_v46 = vmul.f32 %v5309_v7, %v11064_v53  ;;  %v11188_v1 = vmax.f32 %v5380_v2, 0.0  ;;  %v7914_v37 = vld [vmem:[%s12899_s18 + $0x298] sm:$0xff]  ;;  %v7912_v55 = vld [vmem:[%s12899_s18 + $0x288] sm:$0xff]  ;;  %v7867_v60 = vld [vmem:[%s12898_s17 + $0xa0] sm:$0xff] }
0x1168   :  { %5486 = vmatprep.subr.mxu1 %v11163_v6  ;;  %5776 = vmatprep.subr.mxu0 %v11163_v6  ;;  %v5376_v28 = vadd.f32 %v11136_v8, %v5347_v30  ;;  %v5343_v24 = vmul.f32 %v5339_v63, %v5315_v3  ;;  %v11193_v49 = vmax.f32 %v5379_v11, 0.0  ;;  %v5375_v26 = vadd.f32 %v11133_v41, %v5346_v15  ;;  %v7910_v2 = vld [vmem:[%s12899_s18 + $0x278] sm:$0xff]  ;;  %v7909_v38 = vld [vmem:[%s12899_s18 + $0x270] sm:$0xff]  ;;  %v7908_v17 = vld [vmem:[%s12899_s18 + $0x268] sm:$0xff] }
0x1169   :  { %5487 = vmatpush1.msra.mxu1 %v11169_v13  ;;  %5777 = vmatpush1.msra.mxu0 %v11169_v13  ;;  %v5342_v62 = vmul.f32 %v11128_v25, %v5314_v46  ;;  %v11199_v53 = vmax.f32 %v5378_v21, 0.0  ;;  %v5374_v56 = vadd.f32 %v11136_v8, %v5345_v29  ;;  %v11204_v7 = vmax.f32 %v5377_v16, 0.0  ;;  %v7907_v11 = vld [vmem:[%s12899_s18 + $0x260] sm:$0xff]  ;;  %v7868_v30 = vld [vmem:[%s12898_s17 + $0xa8] sm:$0xff]  ;;  %v7906_v21 = vld [vmem:[%s12899_s18 + $0x258] sm:$0xff] }
0x116a   :  { %5488 = vmatprep.subr.mxu1 %v11175_v9  ;;  %5778 = vmatprep.subr.mxu0 %v11175_v9  ;;  %v5373_v18 = vadd.f32 %v11133_v41, %v5344_v23  ;;  %v11209_v25 = vmax.f32 %v5376_v28, 0.0  ;;  %v5372_v34 = vadd.f32 %v11136_v8, %v5343_v24  ;;  %v11214_v36 = vmax.f32 %v5375_v26, 0.0  ;;  %v7926_v8 = vld [vmem:[%s12899_s18 + $0x2f8] sm:$0xff]  ;;  %v5408_v15 = vld [vmem:[%s12898_s17 + $0x28] sm:$0xff]  ;;  %v7905_v29 = vld [vmem:[%s12899_s18 + $0x250] sm:$0xff] }
0x116b   :  { %5489 = vmatpush1.msra.mxu1 %v11181_v48  ;;  %5779 = vmatpush1.msra.mxu0 %v11181_v48  ;;  %v5371_v0 = vadd.f32 %v11133_v41, %v5342_v62  ;;  %v11219_v63 = vmax.f32 %v5374_v56, 0.0  ;;  %v7904_v3 = vld [vmem:[%s12899_s18 + $0x248] sm:$0xff]  ;;  %v7903_v16 = vld [vmem:[%s12899_s18 + $0x240] sm:$0xff]  ;;  %v7869_v23 = vld [vmem:[%s12898_s17 + $0xb0] sm:$0xff] }
0x116c   :  { %5490 = vmatprep.subr.mxu1 %v11188_v1  ;;  %5780 = vmatprep.subr.mxu0 %v11188_v1  ;;  %v11223_v39 = vmax.f32 %v5373_v18, 0.0  ;;  %v11227_v27 = vmax.f32 %v5372_v34, 0.0  ;;  %v5409_v46 = vld [vmem:[%s12898_s17 + $0x30] sm:$0xff]  ;;  %v7902_v28 = vld [vmem:[%s12899_s18 + $0x238] sm:$0xff]  ;;  %v7900_v26 = vld [vmem:[%s12899_s18 + $0x228] sm:$0xff] }
0x116d   :  { %5491 = vmatpush1.msra.mxu1 %v11193_v49  ;;  %5781 = vmatpush1.msra.mxu0 %v11193_v49  ;;  %v11231_v41 = vmax.f32 %v5371_v0, 0.0  ;;  %v7901_v24 = vld [vmem:[%s12899_s18 + $0x230] sm:$0xff]  ;;  %v7899_v62 = vld [vmem:[%s12899_s18 + $0x220] sm:$0xff]  ;;  %v7870_v56 = vld [vmem:[%s12898_s17 + $0xb8] sm:$0xff] }
0x116e   :  { %5492 = vmatprep.subr.mxu1 %v11199_v53  ;;  %5782 = vmatprep.subr.mxu0 %v11199_v53  ;;  %v5410_v18 = vld [vmem:[%s12898_s17 + $0x38] sm:$0xff]  ;;  %v7897_v0 = vld [vmem:[%s12899_s18 + $0x210] sm:$0xff] }
0x116f   :  { %5493 = vmatpush1.msra.mxu1 %v11204_v7  ;;  %5783 = vmatpush1.msra.mxu0 %v11204_v7  ;;  %v7898_v34 = vld [vmem:[%s12899_s18 + $0x218] sm:$0xff] }
0x1170   :  { %5494 = vmatprep.subr.mxu1 %v11209_v25  ;;  %5784 = vmatprep.subr.mxu0 %v11209_v25 }
0x1171   :  { %5495 = vmatpush1.msra.mxu1 %v11214_v36  ;;  %5785 = vmatpush1.msra.mxu0 %v11214_v36 }
0x1172   :  { %5496 = vmatprep.subr.mxu1 %v11219_v63  ;;  %5786 = vmatprep.subr.mxu0 %v11219_v63 }
0x1173   :  { %5497 = vmatpush1.msra.mxu1 %v11223_v39  ;;  %5787 = vmatpush1.msra.mxu0 %v11223_v39 }
0x1174   :  { %5498 = vmatprep.subr.mxu1 %v11227_v27  ;;  %5788 = vmatprep.subr.mxu0 %v11227_v27 }
0x1175   :  { %5499 = vmatpush1.msra.mxu1 %v11231_v41  ;;  %5789 = vmatpush1.msra.mxu0 %v11231_v41 }
0x1176   :  { %7847 = vmatmul.mubr.msk.f32.vlgmr.msra.gmra.mxu1 %vm5419_vm6, %v5403_v19  ;;  %7879 = vmatmul.mubr.msk.f32.vlgmr.msra.gmra.mxu0 %vm5419_vm6, %v7863_v47  ;;  %v7896_v19 = vld [vmem:[%s12899_s18 + $0x208] sm:$0xff]  ;;  %v7895_v47 = vld [vmem:[%s12899_s18 + $0x200] sm:$0xff] }
0x1177   :  { %5984 = vmatprep.subr.mxu1 %v7926_v8  ;;  %5538 = vmatprep.mubr.f32.mxu1 %v12932_v22  ;;  %v7871_v8 = vld [vmem:[%s12898_s17 + $0xc0] sm:$0xff] }
0x1178   :  { %5985 = vmatpush1.msra.mxu1 %v7925_v31  ;;  %5828 = vmatprep.mubr.f32.mxu0 %v12932_v22  ;;  %v5411_v31 = vld [vmem:[%s12898_s17 + $0x40] sm:$0xff] }
0x1179   :  { %5986 = vmatprep.subr.mxu1 %v7924_v52  ;;  %6145 = vmatprep.subr.mxu0 %v5660_v5  ;;  %v7958_v52 = vld [vmem:[%s12899_s18 + $0x3f8] sm:$0xff]  ;;  %v7957_v5 = vld [vmem:[%s12899_s18 + $0x3f0] sm:$0xff] }
0x117a   :  { %5987 = vmatpush1.msra.mxu1 %v7923_v42  ;;  %7880 = vmatmul.mubr.msk.f32.gmra.mxu0 %vm5419_vm6, %v7864_v54  ;;  %v7956_v42 = vld [vmem:[%s12899_s18 + $0x3e8] sm:$0xff]  ;;  %v7955_v54 = vld [vmem:[%s12899_s18 + $0x3e0] sm:$0xff] }
0x117b   :  { %7848 = vmatmul.mubr.msk.f32.gmra.mxu1 %vm5419_vm6, %v5404_v57  ;;  %5988 = vmatprep.subr.mxu1 %v7922_v44  ;;  %v7872_v57 = vld [vmem:[%s12898_s17 + $0xc8] sm:$0xff] }
0x117c   :  { %5989 = vmatpush1.msra.mxu1 %v7921_v10  ;;  %5544 = vmatprep.mubr.f32.mxu1 %v12932_v22  ;;  %v5412_v44 = vld [vmem:[%s12898_s17 + $0x48] sm:$0xff]  ;;  %v7954_v10 = vld [vmem:[%s12899_s18 + $0x3d8] sm:$0xff] }
0x117d   :  { %5990 = vmatprep.subr.mxu1 %v7920_v61  ;;  %5834 = vmatprep.mubr.f32.mxu0 %v12932_v22  ;;  %v7953_v61 = vld [vmem:[%s12899_s18 + $0x3d0] sm:$0xff] }
0x117e   :  { %5991 = vmatpush1.msra.mxu1 %v7919_v4  ;;  %7881 = vmatmul.mubr.msk.f32.gmra.mxu0 %vm5419_vm6, %v7865_v59  ;;  %v7952_v4 = vld [vmem:[%s12899_s18 + $0x3c8] sm:$0xff]  ;;  %v7951_v59 = vld [vmem:[%s12899_s18 + $0x3c0] sm:$0xff] }
0x117f   :  { %7849 = vmatmul.mubr.msk.f32.gmra.mxu1 %vm5419_vm6, %v5405_v50  ;;  %5992 = vmatprep.subr.mxu1 %v7918_v45  ;;  %v7873_v50 = vld [vmem:[%s12898_s17 + $0xd0] sm:$0xff] }
0x1180   :  { %5993 = vmatpush1.msra.mxu1 %v7917_v40  ;;  %5550 = vmatprep.mubr.f32.mxu1 %v12932_v22  ;;  %v5413_v45 = vld [vmem:[%s12898_s17 + $0x50] sm:$0xff]  ;;  %v7950_v40 = vld [vmem:[%s12899_s18 + $0x3b8] sm:$0xff] }
0x1181   :  { %5994 = vmatprep.subr.mxu1 %v7916_v51  ;;  %5840 = vmatprep.mubr.f32.mxu0 %v12932_v22  ;;  %v7949_v51 = vld [vmem:[%s12899_s18 + $0x3b0] sm:$0xff] }
0x1182   :  { %5995 = vmatpush1.msra.mxu1 %v7915_v35  ;;  %7882 = vmatmul.mubr.msk.f32.gmra.mxu0 %vm5419_vm6, %v7866_v43  ;;  %v7948_v35 = vld [vmem:[%s12899_s18 + $0x3a8] sm:$0xff]  ;;  %v7947_v43 = vld [vmem:[%s12899_s18 + $0x3a0] sm:$0xff] }
0x1183   :  { %7850 = vmatmul.mubr.msk.f32.gmra.mxu1 %vm5419_vm6, %v5406_v32  ;;  %5996 = vmatprep.subr.mxu1 %v7914_v37  ;;  %v7874_v32 = vld [vmem:[%s12898_s17 + $0xd8] sm:$0xff] }
0x1184   :  { %5997 = vmatpush1.msra.mxu1 %v7913_v20  ;;  %5556 = vmatprep.mubr.f32.mxu1 %v12932_v22  ;;  %v5414_v37 = vld [vmem:[%s12898_s17 + $0x58] sm:$0xff] }
0x1185   :  { %5998 = vmatprep.subr.mxu1 %v7912_v55  ;;  %5846 = vmatprep.mubr.f32.mxu0 %v12932_v22  ;;  %v7946_v20 = vld [vmem:[%s12899_s18 + $0x398] sm:$0xff]  ;;  %v7945_v55 = vld [vmem:[%s12899_s18 + $0x390] sm:$0xff] }
0x1186   :  { %5999 = vmatpush1.msra.mxu1 %v7911_v33  ;;  %7883 = vmatmul.mubr.msk.f32.gmra.mxu0 %vm5419_vm6, %v7867_v60  ;;  %v7944_v33 = vld [vmem:[%s12899_s18 + $0x388] sm:$0xff]  ;;  %v7943_v60 = vld [vmem:[%s12899_s18 + $0x380] sm:$0xff] }
0x1187   :  { %7851 = vmatmul.mubr.msk.f32.gmra.mxu1 %vm5419_vm6, %v5407_v14  ;;  %6000 = vmatprep.subr.mxu1 %v7910_v2  ;;  %v7875_v14 = vld [vmem:[%s12898_s17 + $0xe0] sm:$0xff] }
0x1188   :  { %6001 = vmatpush1.msra.mxu1 %v7909_v38  ;;  %5562 = vmatprep.mubr.f32.mxu1 %v12932_v22  ;;  %v5415_v2 = vld [vmem:[%s12898_s17 + $0x60] sm:$0xff]  ;;  %v7942_v38 = vld [vmem:[%s12899_s18 + $0x378] sm:$0xff] }
0x1189   :  { %6002 = vmatprep.subr.mxu1 %v7908_v17  ;;  %5852 = vmatprep.mubr.f32.mxu0 %v12932_v22  ;;  %v7941_v17 = vld [vmem:[%s12899_s18 + $0x370] sm:$0xff] }
0x118a   :  { %6003 = vmatpush1.msra.mxu1 %v7907_v11  ;;  %7884 = vmatmul.mubr.msk.f32.gmra.mxu0 %vm5419_vm6, %v7868_v30  ;;  %v7940_v11 = vld [vmem:[%s12899_s18 + $0x368] sm:$0xff]  ;;  %v7939_v30 = vld [vmem:[%s12899_s18 + $0x360] sm:$0xff] }
0x118b   :  { %7852 = vmatmul.mubr.msk.f32.gmra.mxu1 %vm5419_vm6, %v5408_v15  ;;  %6004 = vmatprep.subr.mxu1 %v7906_v21  ;;  %v7876_v15 = vld [vmem:[%s12898_s17 + $0xe8] sm:$0xff] }
0x118c   :  { %6005 = vmatpush1.msra.mxu1 %v7905_v29  ;;  %5568 = vmatprep.mubr.f32.mxu1 %v12932_v22  ;;  %v5416_v21 = vld [vmem:[%s12898_s17 + $0x68] sm:$0xff]  ;;  %v7938_v29 = vld [vmem:[%s12899_s18 + $0x358] sm:$0xff] }
0x118d   :  { %6006 = vmatprep.subr.mxu1 %v7904_v3  ;;  %5858 = vmatprep.mubr.f32.mxu0 %v12932_v22  ;;  %v7937_v3 = vld [vmem:[%s12899_s18 + $0x350] sm:$0xff] }
0x118e   :  { %6007 = vmatpush1.msra.mxu1 %v7903_v16  ;;  %7885 = vmatmul.mubr.msk.f32.gmra.mxu0 %vm5419_vm6, %v7869_v23  ;;  %v7936_v16 = vld [vmem:[%s12899_s18 + $0x348] sm:$0xff]  ;;  %v7935_v23 = vld [vmem:[%s12899_s18 + $0x340] sm:$0xff] }
0x118f   :  { %7853 = vmatmul.mubr.msk.f32.gmra.mxu1 %vm5419_vm6, %v5409_v46  ;;  %6008 = vmatprep.subr.mxu1 %v7902_v28  ;;  %v7877_v46 = vld [vmem:[%s12898_s17 + $0xf0] sm:$0xff] }
0x1190   :  { %6009 = vmatpush1.msra.mxu1 %v7901_v24  ;;  %5574 = vmatprep.mubr.f32.mxu1 %v12932_v22  ;;  %v5417_v28 = vld [vmem:[%s12898_s17 + $0x70] sm:$0xff]  ;;  %v7934_v24 = vld [vmem:[%s12899_s18 + $0x338] sm:$0xff] }
0x1191   :  { %6010 = vmatprep.subr.mxu1 %v7900_v26  ;;  %5864 = vmatprep.mubr.f32.mxu0 %v12932_v22  ;;  %v7933_v26 = vld [vmem:[%s12899_s18 + $0x330] sm:$0xff] }
0x1192   :  { %6011 = vmatpush1.msra.mxu1 %v7899_v62  ;;  %7886 = vmatmul.mubr.msk.f32.gmra.mxu0 %vm5419_vm6, %v7870_v56  ;;  %v7932_v62 = vld [vmem:[%s12899_s18 + $0x328] sm:$0xff]  ;;  %v7931_v56 = vld [vmem:[%s12899_s18 + $0x320] sm:$0xff] }
0x1193   :  { %7854 = vmatmul.mubr.msk.f32.gmra.mxu1 %vm5419_vm6, %v5410_v18  ;;  %6012 = vmatprep.subr.mxu1 %v7898_v34  ;;  %v7878_v18 = vld [vmem:[%s12898_s17 + $0xf8] sm:$0xff] }
0x1194   :  { %6013 = vmatpush1.msra.mxu1 %v7897_v0  ;;  %5580 = vmatprep.mubr.f32.mxu1 %v12932_v22  ;;  %v5418_v34 = vld [vmem:[%s12898_s17 + $0x78] sm:$0xff] }
0x1195   :  { %6014 = vmatprep.subr.mxu1 %v7896_v19  ;;  %5870 = vmatprep.mubr.f32.mxu0 %v12932_v22  ;;  %v7930_v0 = vld [vmem:[%s12899_s18 + $0x318] sm:$0xff]  ;;  %v7929_v19 = vld [vmem:[%s12899_s18 + $0x310] sm:$0xff] }
0x1196   :  { %6015 = vmatpush1.msra.mxu1 %v7895_v47  ;;  %7887 = vmatmul.mubr.msk.f32.gmra.mxu0 %vm5419_vm6, %v7871_v8  ;;  %v5659_v47 = vld [vmem:[%s12899_s18 + $0xf0] sm:$0xff]  ;;  %v7928_v8 = vld [vmem:[%s12899_s18 + $0x308] sm:$0xff] }
0x1197   :  { %7855 = vmatmul.mubr.msk.f32.gmra.mxu1 %vm5419_vm6, %v5411_v31  ;;  %6016 = vmatprep.subr.mxu1 %v7958_v52  ;;  %v5658_v31 = vld [vmem:[%s12899_s18 + $0xe8] sm:$0xff]  ;;  %v7927_v52 = vld [vmem:[%s12899_s18 + $0x300] sm:$0xff] }
0x1198   :  { %6017 = vmatpush2.msra.mxu1 %v7957_v5  ;;  %5586 = vmatprep.mubr.f32.mxu1 %v12932_v22  ;;  %v5657_v5 = vld [vmem:[%s12899_s18 + $0xe0] sm:$0xff] }
0x1199   :  { %6018 = vmatprep.subr.mxu1 %v7956_v42  ;;  %5876 = vmatprep.mubr.f32.mxu0 %v12932_v22  ;;  %v5656_v42 = vld [vmem:[%s12899_s18 + $0xd8] sm:$0xff] }
0x119a   :  { %6019 = vmatpush2.msra.mxu1 %v7955_v54  ;;  %7888 = vmatmul.mubr.msk.f32.gmra.mxu0 %vm5419_vm6, %v7872_v57  ;;  %v5655_v54 = vld [vmem:[%s12899_s18 + $0xd0] sm:$0xff]  ;;  %v5654_v57 = vld [vmem:[%s12899_s18 + $0xc8] sm:$0xff] }
0x119b   :  { %7856 = vmatmul.mubr.msk.f32.gmra.mxu1 %vm5419_vm6, %v5412_v44  ;;  %6020 = vmatprep.subr.mxu1 %v7954_v10  ;;  %v5653_v44 = vld [vmem:[%s12899_s18 + $0xc0] sm:$0xff]  ;;  %v5652_v10 = vld [vmem:[%s12899_s18 + $0xb8] sm:$0xff] }
0x119c   :  { %6021 = vmatpush2.msra.mxu1 %v7953_v61  ;;  %5592 = vmatprep.mubr.f32.mxu1 %v12932_v22  ;;  %v5651_v61 = vld [vmem:[%s12899_s18 + $0xb0] sm:$0xff] }
0x119d   :  { %6022 = vmatprep.subr.mxu1 %v7952_v4  ;;  %5882 = vmatprep.mubr.f32.mxu0 %v12932_v22  ;;  %v5650_v4 = vld [vmem:[%s12899_s18 + $0xa8] sm:$0xff] }
0x119e   :  { %6023 = vmatpush2.msra.mxu1 %v7951_v59  ;;  %7889 = vmatmul.mubr.msk.f32.gmra.mxu0 %vm5419_vm6, %v7873_v50  ;;  %v5649_v59 = vld [vmem:[%s12899_s18 + $0xa0] sm:$0xff]  ;;  %v5648_v50 = vld [vmem:[%s12899_s18 + $0x98] sm:$0xff] }
0x119f   :  { %7857 = vmatmul.mubr.msk.f32.gmra.mxu1 %vm5419_vm6, %v5413_v45  ;;  %6024 = vmatprep.subr.mxu1 %v7950_v40  ;;  %v5647_v45 = vld [vmem:[%s12899_s18 + $0x90] sm:$0xff]  ;;  %v5646_v40 = vld [vmem:[%s12899_s18 + $0x88] sm:$0xff] }
0x11a0   :  { %6025 = vmatpush2.msra.mxu1 %v7949_v51  ;;  %5598 = vmatprep.mubr.f32.mxu1 %v12932_v22  ;;  %v5645_v51 = vld [vmem:[%s12899_s18 + $0x80] sm:$0xff] }
0x11a1   :  { %6026 = vmatprep.subr.mxu1 %v7948_v35  ;;  %5888 = vmatprep.mubr.f32.mxu0 %v12932_v22  ;;  %v5644_v35 = vld [vmem:[%s12899_s18 + $0x78] sm:$0xff] }
0x11a2   :  { %6027 = vmatpush2.msra.mxu1 %v7947_v43  ;;  %7890 = vmatmul.mubr.msk.f32.gmra.mxu0 %vm5419_vm6, %v7874_v32  ;;  %v5643_v43 = vld [vmem:[%s12899_s18 + $0x70] sm:$0xff]  ;;  %v5642_v32 = vld [vmem:[%s12899_s18 + $0x68] sm:$0xff] }
0x11a3   :  { %7858 = vmatmul.mubr.msk.f32.gmra.mxu1 %vm5419_vm6, %v5414_v37  ;;  %6028 = vmatprep.subr.mxu1 %v7946_v20  ;;  %v5641_v37 = vld [vmem:[%s12899_s18 + $0x60] sm:$0xff]  ;;  %v5640_v20 = vld [vmem:[%s12899_s18 + $0x58] sm:$0xff] }
0x11a4   :  { %6029 = vmatpush2.msra.mxu1 %v7945_v55  ;;  %5604 = vmatprep.mubr.f32.mxu1 %v12932_v22  ;;  %v5639_v55 = vld [vmem:[%s12899_s18 + $0x50] sm:$0xff] }
0x11a5   :  { %6030 = vmatprep.subr.mxu1 %v7944_v33  ;;  %5894 = vmatprep.mubr.f32.mxu0 %v12932_v22  ;;  %v5638_v33 = vld [vmem:[%s12899_s18 + $0x48] sm:$0xff] }
0x11a6   :  { %6031 = vmatpush2.msra.mxu1 %v7943_v60  ;;  %7891 = vmatmul.mubr.msk.f32.gmra.mxu0 %vm5419_vm6, %v7875_v14  ;;  %v5637_v60 = vld [vmem:[%s12899_s18 + $0x40] sm:$0xff]  ;;  %v5636_v14 = vld [vmem:[%s12899_s18 + $0x38] sm:$0xff] }
0x11a7   :  { %7859 = vmatmul.mubr.msk.f32.gmra.mxu1 %vm5419_vm6, %v5415_v2  ;;  %6032 = vmatprep.subr.mxu1 %v7942_v38  ;;  %v5635_v2 = vld [vmem:[%s12899_s18 + $0x30] sm:$0xff]  ;;  %v5634_v38 = vld [vmem:[%s12899_s18 + $0x28] sm:$0xff] }
0x11a8   :  { %6033 = vmatpush2.msra.mxu1 %v7941_v17  ;;  %5610 = vmatprep.mubr.f32.mxu1 %v12932_v22  ;;  %v5633_v17 = vld [vmem:[%s12899_s18 + $0x20] sm:$0xff] }
0x11a9   :  { %6034 = vmatprep.subr.mxu1 %v7940_v11  ;;  %5900 = vmatprep.mubr.f32.mxu0 %v12932_v22  ;;  %v5632_v11 = vld [vmem:[%s12899_s18 + $0x18] sm:$0xff] }
0x11aa   :  { %6035 = vmatpush2.msra.mxu1 %v7939_v30  ;;  %7892 = vmatmul.mubr.msk.f32.gmra.mxu0 %vm5419_vm6, %v7876_v15  ;;  %v5631_v30 = vld [vmem:[%s12899_s18 + $0x10] sm:$0xff]  ;;  %v5630_v15 = vld [vmem:[%s12899_s18 + $0x8] sm:$0xff] }
0x11ab   :  { %7860 = vmatmul.mubr.msk.f32.gmra.mxu1 %vm5419_vm6, %v5416_v21  ;;  %6036 = vmatprep.subr.mxu1 %v7938_v29  ;;  %v5629_v21 = vld [vmem:[%s12899_s18] sm:$0xff]  ;;  %v5692_v29 = vld [vmem:[%s12899_s18 + $0x1f8] sm:$0xff] }
0x11ac   :  { %6037 = vmatpush2.msra.mxu1 %v7937_v3  ;;  %5616 = vmatprep.mubr.f32.mxu1 %v12932_v22  ;;  %v5691_v3 = vld [vmem:[%s12899_s18 + $0x1f0] sm:$0xff] }
0x11ad   :  { %6038 = vmatprep.subr.mxu1 %v7936_v16  ;;  %5906 = vmatprep.mubr.f32.mxu0 %v12932_v22  ;;  %v5690_v16 = vld [vmem:[%s12899_s18 + $0x1e8] sm:$0xff] }
0x11ae   :  { %6039 = vmatpush2.msra.mxu1 %v7935_v23  ;;  %7893 = vmatmul.mubr.msk.f32.gmra.mxu0 %vm5419_vm6, %v7877_v46  ;;  %v5689_v23 = vld [vmem:[%s12899_s18 + $0x1e0] sm:$0xff]  ;;  %v5688_v46 = vld [vmem:[%s12899_s18 + $0x1d8] sm:$0xff] }
0x11af   :  { %7861 = vmatmul.mubr.msk.f32.gmra.mxu1 %vm5419_vm6, %v5417_v28  ;;  %6040 = vmatprep.subr.mxu1 %v7934_v24  ;;  %v5687_v28 = vld [vmem:[%s12899_s18 + $0x1d0] sm:$0xff]  ;;  %v5686_v24 = vld [vmem:[%s12899_s18 + $0x1c8] sm:$0xff] }
0x11b0   :  { %6041 = vmatpush2.msra.mxu1 %v7933_v26  ;;  %5622 = vmatprep.mubr.f32.mxu1 %v12932_v22  ;;  %v5685_v26 = vld [vmem:[%s12899_s18 + $0x1c0] sm:$0xff] }
0x11b1   :  { %6042 = vmatprep.subr.mxu1 %v7932_v62  ;;  %5912 = vmatprep.mubr.f32.mxu0 %v12932_v22  ;;  %v5684_v62 = vld [vmem:[%s12899_s18 + $0x1b8] sm:$0xff] }
0x11b2   :  { %6043 = vmatpush2.msra.mxu1 %v7931_v56  ;;  %7894 = vmatmul.mubr.msk.f32.gmra.mxu0 %vm5419_vm6, %v7878_v18  ;;  %v5683_v56 = vld [vmem:[%s12899_s18 + $0x1b0] sm:$0xff]  ;;  %v5682_v18 = vld [vmem:[%s12899_s18 + $0x1a8] sm:$0xff] }
0x11b3   :  { %7862 = vmatmul.mubr.msk.f32.gmra.mxu1 %vm5419_vm6, %v5418_v34  ;;  %6044 = vmatprep.subr.mxu1 %v7930_v0  ;;  %v5681_v34 = vld [vmem:[%s12899_s18 + $0x1a0] sm:$0xff]  ;;  %v5680_v0 = vld [vmem:[%s12899_s18 + $0x198] sm:$0xff] }
0x11b4   :  { %6045 = vmatpush2.msra.mxu1 %v7929_v19  ;;  %6146 = vmatpush1.msra.mxu0 %v5659_v47  ;;  %v5679_v19 = vld [vmem:[%s12899_s18 + $0x190] sm:$0xff]  ;;  %v5678_v47 = vld [vmem:[%s12899_s18 + $0x188] sm:$0xff] }
0x11b5   :  { %6046 = vmatprep.subr.mxu1 %v7928_v8  ;;  %6147 = vmatprep.subr.mxu0 %v5658_v31  ;;  %v5677_v8 = vld [vmem:[%s12899_s18 + $0x180] sm:$0xff]  ;;  %v5676_v31 = vld [vmem:[%s12899_s18 + $0x178] sm:$0xff] }
0x11b6   :  { %6047 = vmatpush2.msra.mxu1 %v7927_v52  ;;  %6148 = vmatpush1.msra.mxu0 %v5657_v5  ;;  %v5675_v52 = vld [vmem:[%s12899_s18 + $0x170] sm:$0xff]  ;;  %v5674_v5 = vld [vmem:[%s12899_s18 + $0x168] sm:$0xff] }
0x11b7   :  { %6387 = vmatprep.subr.mxu1 %v11151_v58  ;;  %6149 = vmatprep.subr.mxu0 %v5656_v42  ;;  %v5673_v42 = vld [vmem:[%s12899_s18 + $0x160] sm:$0xff] }
0x11b8   :  { %6150 = vmatpush1.msra.mxu0 %v5655_v54  ;;  %v5672_v54 = vld [vmem:[%s12899_s18 + $0x158] sm:$0xff] }
0x11b9   :  { %6151 = vmatprep.subr.mxu0 %v5654_v57  ;;  %v5671_v57 = vld [vmem:[%s12899_s18 + $0x150] sm:$0xff] }
0x11ba   :  { %6152 = vmatpush1.msra.mxu0 %v5653_v44  ;;  %v5670_v44 = vld [vmem:[%s12899_s18 + $0x148] sm:$0xff] }
0x11bb   :  { %6153 = vmatprep.subr.mxu0 %v5652_v10  ;;  %v5669_v10 = vld [vmem:[%s12899_s18 + $0x140] sm:$0xff] }
0x11bc   :  { %6154 = vmatpush1.msra.mxu0 %v5651_v61  ;;  %v5668_v61 = vld [vmem:[%s12899_s18 + $0x138] sm:$0xff] }
0x11bd   :  { %6155 = vmatprep.subr.mxu0 %v5650_v4  ;;  %v5667_v4 = vld [vmem:[%s12899_s18 + $0x130] sm:$0xff] }
0x11be   :  { %6156 = vmatpush1.msra.mxu0 %v5649_v59  ;;  %v5666_v59 = vld [vmem:[%s12899_s18 + $0x128] sm:$0xff] }
0x11bf   :  { %6157 = vmatprep.subr.mxu0 %v5648_v50  ;;  %v5665_v50 = vld [vmem:[%s12899_s18 + $0x120] sm:$0xff] }
0x11c0   :  { %6158 = vmatpush1.msra.mxu0 %v5647_v45  ;;  %v5664_v45 = vld [vmem:[%s12899_s18 + $0x118] sm:$0xff] }
0x11c1   :  { %6159 = vmatprep.subr.mxu0 %v5646_v40  ;;  %v5663_v40 = vld [vmem:[%s12899_s18 + $0x110] sm:$0xff] }
0x11c2   :  { %6160 = vmatpush1.msra.mxu0 %v5645_v51  ;;  %v5662_v51 = vld [vmem:[%s12899_s18 + $0x108] sm:$0xff] }
0x11c3   :  { %6161 = vmatprep.subr.mxu0 %v5644_v35  ;;  %v5661_v35 = vld [vmem:[%s12899_s18 + $0x100] sm:$0xff] }
0x11c4   :  { %6162 = vmatpush1.msra.mxu0 %v5643_v43 }
0x11c5   :  { %6163 = vmatprep.subr.mxu0 %v5642_v32 }
0x11c6   :  { %6164 = vmatpush1.msra.mxu0 %v5641_v37 }
0x11c7   :  { %6165 = vmatprep.subr.mxu0 %v5640_v20 }
0x11c8   :  { %6166 = vmatpush1.msra.mxu0 %v5639_v55 }
0x11c9   :  { %6167 = vmatprep.subr.mxu0 %v5638_v33 }
0x11ca   :  { %6168 = vmatpush1.msra.mxu0 %v5637_v60 }
0x11cb   :  { %6169 = vmatprep.subr.mxu0 %v5636_v14 }
0x11cc   :  { %6170 = vmatpush1.msra.mxu0 %v5635_v2 }
0x11cd   :  { %6171 = vmatprep.subr.mxu0 %v5634_v38 }
0x11ce   :  { %6172 = vmatpush1.msra.mxu0 %v5633_v17 }
0x11cf   :  { %6173 = vmatprep.subr.mxu0 %v5632_v11 }
0x11d0   :  { %6174 = vmatpush1.msra.mxu0 %v5631_v30 }
0x11d1   :  { %6175 = vmatprep.subr.mxu0 %v5630_v15 }
0x11d2   :  { %6176 = vmatpush1.msra.mxu0 %v5629_v21 }
0x11d3   :  { %6177 = vmatprep.subr.mxu0 %v5692_v29 }
0x11d4   :  { %6178 = vmatpush2.msra.mxu0 %v5691_v3 }
0x11d5   :  { %6179 = vmatprep.subr.mxu0 %v5690_v16 }
0x11d6   :  { %6180 = vmatpush2.msra.mxu0 %v5689_v23 }
0x11d7   :  { %6181 = vmatprep.subr.mxu0 %v5688_v46 }
0x11d8   :  { %6182 = vmatpush2.msra.mxu0 %v5687_v28 }
0x11d9   :  { %6183 = vmatprep.subr.mxu0 %v5686_v24 }
0x11da   :  { %6184 = vmatpush2.msra.mxu0 %v5685_v26 }
0x11db   :  { %6185 = vmatprep.subr.mxu0 %v5684_v62 }
0x11dc   :  { %6186 = vmatpush2.msra.mxu0 %v5683_v56 }
0x11dd   :  { %6187 = vmatprep.subr.mxu0 %v5682_v18 }
0x11de   :  { %6188 = vmatpush2.msra.mxu0 %v5681_v34 }
0x11df   :  { %6189 = vmatprep.subr.mxu0 %v5680_v0 }
0x11e0   :  { %6190 = vmatpush2.msra.mxu0 %v5679_v19 }
0x11e1   :  { %6191 = vmatprep.subr.mxu0 %v5678_v47 }
0x11e2   :  { %6192 = vmatpush2.msra.mxu0 %v5677_v8 }
0x11e3   :  { %6193 = vmatprep.subr.mxu0 %v5676_v31 }
0x11e4   :  { %6194 = vmatpush2.msra.mxu0 %v5675_v52 }
0x11e5   :  { %6195 = vmatprep.subr.mxu0 %v5674_v5 }
0x11e6   :  { %6196 = vmatpush2.msra.mxu0 %v5673_v42 }
0x11e7   :  { %6197 = vmatprep.subr.mxu0 %v5672_v54 }
0x11e8   :  { %6198 = vmatpush2.msra.mxu0 %v5671_v57 }
0x11e9   :  { %6199 = vmatprep.subr.mxu0 %v5670_v44 }
0x11ea   :  { %6200 = vmatpush2.msra.mxu0 %v5669_v10 }
0x11eb   :  { %6201 = vmatprep.subr.mxu0 %v5668_v61 }
0x11ec   :  { %6202 = vmatpush2.msra.mxu0 %v5667_v4 }
0x11ed   :  { %6203 = vmatprep.subr.mxu0 %v5666_v59 }
0x11ee   :  { %6204 = vmatpush2.msra.mxu0 %v5665_v50 }
0x11ef   :  { %6205 = vmatprep.subr.mxu0 %v5664_v45 }
0x11f0   :  { %6206 = vmatpush2.msra.mxu0 %v5663_v40 }
0x11f1   :  { %6207 = vmatprep.subr.mxu0 %v5662_v51 }
0x11f2   :  { %6208 = vmatpush2.msra.mxu0 %v5661_v35 }
0x1236   :  { %v5534_v43 = vpop.f32.mrf.mxu1  ;;  %v5824_v32 = vpop.f32.mrf.mxu0 }
0x1238   :  { %v5536_v37 = vpop.f32.mrf.mxu1  ;;  %v5826_v20 = vpop.f32.mrf.mxu0 }
0x1239   :  { %6048 = vmatprep.mubr.f32.mxu1 %v5826_v20  ;;  %6209 = vmatprep.mubr.f32.mxu0 %v5536_v37 }
0x123a   :  { %v5830_v55 = vpop.f32.mrf.mxu0  ;;  %6049 = vmatmul.mubr.f32.vlgmr.msra.gmra.mxu1 %v5824_v32  ;;  %6210 = vmatmul.mubr.f32.vlgmr.msra.gmra.mxu0 %v5534_v43 }
0x123b   :  { %v5540_v33 = vpop.f32.mrf.mxu1  ;;  %6388 = vmatpush1.msra.mxu1 %v11156_v12 }
0x123c   :  { %6389 = vmatprep.subr.mxu1 %v11163_v6  ;;  %v5832_v60 = vpop.f32.mrf.mxu0 }
0x123d   :  { %v5542_v14 = vpop.f32.mrf.mxu1  ;;  %6390 = vmatpush1.msra.mxu1 %v11169_v13  ;;  %6054 = vmatprep.mubr.f32.mxu1 %v5832_v60 }
0x123e   :  { %6215 = vmatprep.mubr.f32.mxu0 %v5542_v14  ;;  %6391 = vmatprep.subr.mxu1 %v11175_v9  ;;  %v5836_v2 = vpop.f32.mrf.mxu0 }
0x123f   :  { %v5546_v38 = vpop.f32.mrf.mxu1  ;;  %6055 = vmatmul.mubr.f32.gmra.mxu1 %v5830_v55  ;;  %6216 = vmatmul.mubr.f32.gmra.mxu0 %v5540_v33 }
0x1240   :  { %6392 = vmatpush1.msra.mxu1 %v11181_v48  ;;  %v5838_v17 = vpop.f32.mrf.mxu0 }
0x1241   :  { %6393 = vmatprep.subr.mxu1 %v11188_v1  ;;  %v5548_v11 = vpop.f32.mrf.mxu1  ;;  %6060 = vmatprep.mubr.f32.mxu1 %v5838_v17 }
0x1242   :  { %6394 = vmatpush1.msra.mxu1 %v11193_v49  ;;  %6221 = vmatprep.mubr.f32.mxu0 %v5548_v11  ;;  %v5842_v30 = vpop.f32.mrf.mxu0 }
0x1243   :  { %6395 = vmatprep.subr.mxu1 %v11199_v53  ;;  %v5552_v15 = vpop.f32.mrf.mxu1  ;;  %6061 = vmatmul.mubr.f32.gmra.mxu1 %v5836_v2 }
0x1244   :  { %6222 = vmatmul.mubr.f32.gmra.mxu0 %v5546_v38  ;;  %6396 = vmatpush1.msra.mxu1 %v11204_v7  ;;  %v5844_v21 = vpop.f32.mrf.mxu0 }
0x1245   :  { %6397 = vmatprep.subr.mxu1 %v11209_v25  ;;  %v5554_v29 = vpop.f32.mrf.mxu1  ;;  %6066 = vmatprep.mubr.f32.mxu1 %v5844_v21 }
0x1246   :  { %6398 = vmatpush1.msra.mxu1 %v11214_v36  ;;  %6227 = vmatprep.mubr.f32.mxu0 %v5554_v29  ;;  %v5848_v3 = vpop.f32.mrf.mxu0 }
0x1247   :  { %6399 = vmatprep.subr.mxu1 %v11219_v63  ;;  %v5558_v16 = vpop.f32.mrf.mxu1  ;;  %6067 = vmatmul.mubr.f32.gmra.mxu1 %v5842_v30 }
0x1248   :  { %6228 = vmatmul.mubr.f32.gmra.mxu0 %v5552_v15  ;;  %6400 = vmatpush1.msra.mxu1 %v11223_v39  ;;  %v5850_v23 = vpop.f32.mrf.mxu0 }
0x1249   :  { %6401 = vmatprep.subr.mxu1 %v11227_v27  ;;  %v5560_v46 = vpop.f32.mrf.mxu1  ;;  %6072 = vmatprep.mubr.f32.mxu1 %v5850_v23  ;;  %v8022_v23 = vld [vmem:[%s12899_s18 + $0x4f8] sm:$0xff] }
0x124a   :  { %6402 = vmatpush1.msra.mxu1 %v11231_v41  ;;  %6233 = vmatprep.mubr.f32.mxu0 %v5560_v46  ;;  %v5854_v28 = vpop.f32.mrf.mxu0  ;;  %v8010_v46 = vld [vmem:[%s12899_s18 + $0x498] sm:$0xff] }
0x124b   :  { %6871 = vmatprep.subr.mxu1 %v11151_v58  ;;  %v5564_v24 = vpop.f32.mrf.mxu1  ;;  %6073 = vmatmul.mubr.f32.gmra.mxu1 %v5848_v3  ;;  %v7959_v3 = vld [vmem:[%s12898_s17 + $0x100] sm:$0xff] }
0x124c   :  { %6234 = vmatmul.mubr.f32.gmra.mxu0 %v5558_v16  ;;  %v5856_v26 = vpop.f32.mrf.mxu0  ;;  %v7960_v16 = vld [vmem:[%s12898_s17 + $0x108] sm:$0xff]  ;;  %6597 = vmatprep.subr.mxu0 %v8022_v23 }
0x124d   :  { %v5566_v62 = vpop.f32.mrf.mxu1  ;;  %6078 = vmatprep.mubr.f32.mxu1 %v5856_v26  ;;  %v8008_v26 = vld [vmem:[%s12899_s18 + $0x488] sm:$0xff] }
0x124e   :  { %6239 = vmatprep.mubr.f32.mxu0 %v5566_v62  ;;  %v5860_v56 = vpop.f32.mrf.mxu0  ;;  %v8007_v62 = vld [vmem:[%s12899_s18 + $0x480] sm:$0xff]  ;;  %v8036_v23 = vld [vmem:[%s12899_s18 + $0x568] sm:$0xff] }
0x124f   :  { %v5570_v18 = vpop.f32.mrf.mxu1  ;;  %6079 = vmatmul.mubr.f32.gmra.mxu1 %v5854_v28  ;;  %v8009_v28 = vld [vmem:[%s12899_s18 + $0x490] sm:$0xff] }
0x1250   :  { %6240 = vmatmul.mubr.f32.gmra.mxu0 %v5564_v24  ;;  %v5862_v34 = vpop.f32.mrf.mxu0  ;;  %v7965_v24 = vld [vmem:[%s12898_s17 + $0x130] sm:$0xff] }
0x1251   :  { %v5572_v0 = vpop.f32.mrf.mxu1  ;;  %6084 = vmatprep.mubr.f32.mxu1 %v5862_v34  ;;  %v7966_v34 = vld [vmem:[%s12898_s17 + $0x138] sm:$0xff] }
0x1252   :  { %6245 = vmatprep.mubr.f32.mxu0 %v5572_v0  ;;  %v5866_v19 = vpop.f32.mrf.mxu0  ;;  %v8004_v0 = vld [vmem:[%s12899_s18 + $0x468] sm:$0xff] }
0x1253   :  { %v5576_v47 = vpop.f32.mrf.mxu1  ;;  %6085 = vmatmul.mubr.f32.gmra.mxu1 %v5860_v56  ;;  %v8006_v56 = vld [vmem:[%s12899_s18 + $0x478] sm:$0xff] }
0x1254   :  { %6246 = vmatmul.mubr.f32.gmra.mxu0 %v5570_v18  ;;  %v5868_v58 = vpop.f32.mrf.mxu0  ;;  %v8005_v18 = vld [vmem:[%s12899_s18 + $0x470] sm:$0xff] }
0x1255   :  { %v5578_v8 = vpop.f32.mrf.mxu1  ;;  %6090 = vmatprep.mubr.f32.mxu1 %v5868_v58  ;;  %v8001_v58 = vld [vmem:[%s12899_s18 + $0x450] sm:$0xff] }
0x1256   :  { %6251 = vmatprep.mubr.f32.mxu0 %v5578_v8  ;;  %v5872_v31 = vpop.f32.mrf.mxu0  ;;  %v7967_v8 = vld [vmem:[%s12898_s17 + $0x140] sm:$0xff] }
0x1257   :  { %v5582_v52 = vpop.f32.mrf.mxu1  ;;  %6091 = vmatmul.mubr.f32.gmra.mxu1 %v5866_v19  ;;  %v8003_v19 = vld [vmem:[%s12899_s18 + $0x460] sm:$0xff] }
0x1258   :  { %6252 = vmatmul.mubr.f32.gmra.mxu0 %v5576_v47  ;;  %v5874_v5 = vpop.f32.mrf.mxu0  ;;  %v8002_v47 = vld [vmem:[%s12899_s18 + $0x458] sm:$0xff] }
0x1259   :  { %v5584_v42 = vpop.f32.mrf.mxu1  ;;  %6096 = vmatprep.mubr.f32.mxu1 %v5874_v5  ;;  %v7998_v5 = vld [vmem:[%s12899_s18 + $0x438] sm:$0xff] }
0x125a   :  { %6257 = vmatprep.mubr.f32.mxu0 %v5584_v42  ;;  %v5878_v54 = vpop.f32.mrf.mxu0  ;;  %v7997_v42 = vld [vmem:[%s12899_s18 + $0x430] sm:$0xff] }
0x125b   :  { %v5588_v57 = vpop.f32.mrf.mxu1  ;;  %6097 = vmatmul.mubr.f32.gmra.mxu1 %v5872_v31  ;;  %v8000_v31 = vld [vmem:[%s12899_s18 + $0x448] sm:$0xff] }
0x125c   :  { %6258 = vmatmul.mubr.f32.gmra.mxu0 %v5582_v52  ;;  %v5880_v44 = vpop.f32.mrf.mxu0  ;;  %v7999_v52 = vld [vmem:[%s12899_s18 + $0x440] sm:$0xff] }
0x125d   :  { %v5590_v10 = vpop.f32.mrf.mxu1  ;;  %6102 = vmatprep.mubr.f32.mxu1 %v5880_v44  ;;  %v7995_v44 = vld [vmem:[%s12899_s18 + $0x420] sm:$0xff] }
0x125e   :  { %6263 = vmatprep.mubr.f32.mxu0 %v5590_v10  ;;  %v5884_v61 = vpop.f32.mrf.mxu0  ;;  %v7994_v10 = vld [vmem:[%s12899_s18 + $0x418] sm:$0xff] }
0x125f   :  { %v5594_v4 = vpop.f32.mrf.mxu1  ;;  %6103 = vmatmul.mubr.f32.gmra.mxu1 %v5878_v54  ;;  %v7968_v54 = vld [vmem:[%s12898_s17 + $0x148] sm:$0xff] }
0x1260   :  { %6264 = vmatmul.mubr.f32.gmra.mxu0 %v5588_v57  ;;  %v5886_v59 = vpop.f32.mrf.mxu0  ;;  %v7996_v57 = vld [vmem:[%s12899_s18 + $0x428] sm:$0xff] }
0x1261   :  { %v5596_v50 = vpop.f32.mrf.mxu1  ;;  %6108 = vmatprep.mubr.f32.mxu1 %v5886_v59  ;;  %v7992_v59 = vld [vmem:[%s12899_s18 + $0x408] sm:$0xff] }
0x1262   :  { %6269 = vmatprep.mubr.f32.mxu0 %v5596_v50  ;;  %v5890_v45 = vpop.f32.mrf.mxu0  ;;  %v7991_v50 = vld [vmem:[%s12899_s18 + $0x400] sm:$0xff] }
0x1263   :  { %v5600_v40 = vpop.f32.mrf.mxu1  ;;  %6109 = vmatmul.mubr.f32.gmra.mxu1 %v5884_v61  ;;  %v7993_v61 = vld [vmem:[%s12899_s18 + $0x410] sm:$0xff] }
0x1264   :  { %6270 = vmatmul.mubr.f32.gmra.mxu0 %v5594_v4  ;;  %v5892_v51 = vpop.f32.mrf.mxu0  ;;  %v7969_v4 = vld [vmem:[%s12898_s17 + $0x150] sm:$0xff] }
0x1265   :  { %v5602_v35 = vpop.f32.mrf.mxu1  ;;  %6114 = vmatprep.mubr.f32.mxu1 %v5892_v51  ;;  %v7970_v51 = vld [vmem:[%s12898_s17 + $0x158] sm:$0xff] }
0x1266   :  { %6275 = vmatprep.mubr.f32.mxu0 %v5602_v35  ;;  %v5896_v43 = vpop.f32.mrf.mxu0  ;;  %v8052_v35 = vld [vmem:[%s12899_s18 + $0x5e8] sm:$0xff] }
0x1267   :  { %v5606_v32 = vpop.f32.mrf.mxu1  ;;  %6115 = vmatmul.mubr.f32.gmra.mxu1 %v5890_v45  ;;  %v8054_v45 = vld [vmem:[%s12899_s18 + $0x5f8] sm:$0xff] }
0x1268   :  { %6276 = vmatmul.mubr.f32.gmra.mxu0 %v5600_v40  ;;  %v5898_v37 = vpop.f32.mrf.mxu0  ;;  %v8053_v40 = vld [vmem:[%s12899_s18 + $0x5f0] sm:$0xff] }
0x1269   :  { %v5608_v20 = vpop.f32.mrf.mxu1  ;;  %6120 = vmatprep.mubr.f32.mxu1 %v5898_v37  ;;  %v8049_v37 = vld [vmem:[%s12899_s18 + $0x5d0] sm:$0xff] }
0x126a   :  { %6281 = vmatprep.mubr.f32.mxu0 %v5608_v20  ;;  %v5902_v55 = vpop.f32.mrf.mxu0  ;;  %v7971_v20 = vld [vmem:[%s12898_s17 + $0x160] sm:$0xff] }
0x126b   :  { %v5612_v33 = vpop.f32.mrf.mxu1  ;;  %6121 = vmatmul.mubr.f32.gmra.mxu1 %v5896_v43  ;;  %v8051_v43 = vld [vmem:[%s12899_s18 + $0x5e0] sm:$0xff] }
0x126c   :  { %6282 = vmatmul.mubr.f32.gmra.mxu0 %v5606_v32  ;;  %v5904_v60 = vpop.f32.mrf.mxu0  ;;  %v8050_v32 = vld [vmem:[%s12899_s18 + $0x5d8] sm:$0xff] }
0x126d   :  { %v5614_v14 = vpop.f32.mrf.mxu1  ;;  %6126 = vmatprep.mubr.f32.mxu1 %v5904_v60  ;;  %v8046_v60 = vld [vmem:[%s12899_s18 + $0x5b8] sm:$0xff] }
0x126e   :  { %6287 = vmatprep.mubr.f32.mxu0 %v5614_v14  ;;  %v5908_v2 = vpop.f32.mrf.mxu0  ;;  %v8045_v14 = vld [vmem:[%s12899_s18 + $0x5b0] sm:$0xff] }
0x126f   :  { %v5618_v38 = vpop.f32.mrf.mxu1  ;;  %6127 = vmatmul.mubr.f32.gmra.mxu1 %v5902_v55  ;;  %v8048_v55 = vld [vmem:[%s12899_s18 + $0x5c8] sm:$0xff] }
0x1270   :  { %6288 = vmatmul.mubr.f32.gmra.mxu0 %v5612_v33  ;;  %v5910_v17 = vpop.f32.mrf.mxu0  ;;  %v8047_v33 = vld [vmem:[%s12899_s18 + $0x5c0] sm:$0xff] }
0x1271   :  { %v5620_v11 = vpop.f32.mrf.mxu1  ;;  %6132 = vmatprep.mubr.f32.mxu1 %v5910_v17  ;;  %v8043_v17 = vld [vmem:[%s12899_s18 + $0x5a0] sm:$0xff] }
0x1272   :  { %6293 = vmatprep.mubr.f32.mxu0 %v5620_v11  ;;  %v5914_v30 = vpop.f32.mrf.mxu0  ;;  %v8042_v11 = vld [vmem:[%s12899_s18 + $0x598] sm:$0xff] }
0x1273   :  { %v5624_v15 = vpop.f32.mrf.mxu1  ;;  %6133 = vmatmul.mubr.f32.gmra.mxu1 %v5908_v2  ;;  %v7972_v2 = vld [vmem:[%s12898_s17 + $0x168] sm:$0xff] }
0x1274   :  { %6294 = vmatmul.mubr.f32.gmra.mxu0 %v5618_v38  ;;  %v5916_v21 = vpop.f32.mrf.mxu0  ;;  %v8044_v38 = vld [vmem:[%s12899_s18 + $0x5a8] sm:$0xff] }
0x1275   :  { %v5626_v29 = vpop.f32.mrf.mxu1  ;;  %6138 = vmatprep.mubr.f32.mxu1 %v5916_v21  ;;  %v8040_v21 = vld [vmem:[%s12899_s18 + $0x588] sm:$0xff] }
0x1276   :  { %6299 = vmatprep.mubr.f32.mxu0 %v5626_v29  ;;  %v8039_v29 = vld [vmem:[%s12899_s18 + $0x580] sm:$0xff] }
0x1277   :  { %6139 = vmatmul.mubr.f32.gmra.mxu1 %v5914_v30  ;;  %v8041_v30 = vld [vmem:[%s12899_s18 + $0x590] sm:$0xff] }
0x1278   :  { %6300 = vmatmul.mubr.f32.gmra.mxu0 %v5624_v15  ;;  %6435 = vmatprep.mubr.f32.mxu1 %v12932_v22  ;;  %v7973_v15 = vld [vmem:[%s12898_s17 + $0x170] sm:$0xff] }
0x127b   :  { %7975 = vmatmul.mubr.msk.f32.vlgmr.msra.gmra.mxu1 %vm5419_vm6, %v7959_v3  ;;  %v8038_v3 = vld [vmem:[%s12899_s18 + $0x578] sm:$0xff] }
0x127c   :  { %6872 = vmatpush1.msra.mxu1 %v11156_v12  ;;  %6441 = vmatprep.mubr.f32.mxu1 %v12932_v22  ;;  %v7961_v12 = vld [vmem:[%s12898_s17 + $0x110] sm:$0xff] }
0x127d   :  { %6873 = vmatprep.subr.mxu1 %v11163_v6  ;;  %v8021_v6 = vld [vmem:[%s12899_s18 + $0x4f0] sm:$0xff] }
0x127e   :  { %6874 = vmatpush1.msra.mxu1 %v11169_v13  ;;  %6598 = vmatpush1.msra.mxu0 %v8021_v6  ;;  %v8020_v13 = vld [vmem:[%s12899_s18 + $0x4e8] sm:$0xff]  ;;  %v8035_v6 = vld [vmem:[%s12899_s18 + $0x560] sm:$0xff] }
0x127f   :  { %6875 = vmatprep.subr.mxu1 %v11175_v9  ;;  %7976 = vmatmul.mubr.msk.f32.gmra.mxu1 %vm5419_vm6, %v7960_v16  ;;  %v8019_v9 = vld [vmem:[%s12899_s18 + $0x4e0] sm:$0xff]  ;;  %v8037_v16 = vld [vmem:[%s12899_s18 + $0x570] sm:$0xff] }
0x1280   :  { %6876 = vmatpush1.msra.mxu1 %v11181_v48  ;;  %6447 = vmatprep.mubr.f32.mxu1 %v12932_v22  ;;  %v7962_v48 = vld [vmem:[%s12898_s17 + $0x118] sm:$0xff] }
0x1281   :  { %6877 = vmatprep.subr.mxu1 %v11188_v1  ;;  %6599 = vmatprep.subr.mxu0 %v8020_v13  ;;  %v8018_v1 = vld [vmem:[%s12899_s18 + $0x4d8] sm:$0xff] }
0x1282   :  { %6878 = vmatpush1.msra.mxu1 %v11193_v49  ;;  %6600 = vmatpush1.msra.mxu0 %v8019_v9  ;;  %v8017_v49 = vld [vmem:[%s12899_s18 + $0x4d0] sm:$0xff]  ;;  %v8034_v13 = vld [vmem:[%s12899_s18 + $0x558] sm:$0xff] }
0x1283   :  { %6879 = vmatprep.subr.mxu1 %v11199_v53  ;;  %7977 = vmatmul.mubr.msk.f32.gmra.mxu1 %vm5419_vm6, %v7961_v12  ;;  %v7963_v53 = vld [vmem:[%s12898_s17 + $0x120] sm:$0xff]  ;;  %v7974_v12 = vld [vmem:[%s12898_s17 + $0x178] sm:$0xff]  ;;  %v8033_v9 = vld [vmem:[%s12899_s18 + $0x550] sm:$0xff] }
0x1284   :  { %6880 = vmatpush1.msra.mxu1 %v11204_v7  ;;  %6453 = vmatprep.mubr.f32.mxu1 %v12932_v22  ;;  %v8016_v7 = vld [vmem:[%s12899_s18 + $0x4c8] sm:$0xff] }
0x1285   :  { %6881 = vmatprep.subr.mxu1 %v11209_v25  ;;  %6601 = vmatprep.subr.mxu0 %v8018_v1  ;;  %v8015_v25 = vld [vmem:[%s12899_s18 + $0x4c0] sm:$0xff]  ;;  %v8032_v1 = vld [vmem:[%s12899_s18 + $0x548] sm:$0xff] }
0x1286   :  { %6882 = vmatpush1.msra.mxu1 %v11214_v36  ;;  %6602 = vmatpush1.msra.mxu0 %v8017_v49  ;;  %v8014_v36 = vld [vmem:[%s12899_s18 + $0x4b8] sm:$0xff]  ;;  %v8031_v49 = vld [vmem:[%s12899_s18 + $0x540] sm:$0xff] }
0x1287   :  { %6883 = vmatprep.subr.mxu1 %v11219_v63  ;;  %7978 = vmatmul.mubr.msk.f32.gmra.mxu1 %vm5419_vm6, %v7962_v48  ;;  %v8013_v63 = vld [vmem:[%s12899_s18 + $0x4b0] sm:$0xff]  ;;  %v8055_v48 = vld [vmem:[%s12898_s17 + $0x180] sm:$0xff] }
0x1288   :  { %6884 = vmatpush1.msra.mxu1 %v11223_v39  ;;  %6459 = vmatprep.mubr.f32.mxu1 %v12932_v22  ;;  %v7964_v39 = vld [vmem:[%s12898_s17 + $0x128] sm:$0xff] }
0x1289   :  { %6885 = vmatprep.subr.mxu1 %v11227_v27  ;;  %6603 = vmatprep.subr.mxu0 %v8016_v7  ;;  %v8012_v27 = vld [vmem:[%s12899_s18 + $0x4a8] sm:$0xff]  ;;  %v8029_v7 = vld [vmem:[%s12899_s18 + $0x530] sm:$0xff] }
0x128a   :  { %6886 = vmatpush1.msra.mxu1 %v11231_v41  ;;  %6604 = vmatpush1.msra.mxu0 %v8015_v25  ;;  %v8011_v41 = vld [vmem:[%s12899_s18 + $0x4a0] sm:$0xff]  ;;  %v8056_v25 = vld [vmem:[%s12898_s17 + $0x188] sm:$0xff] }
0x128b   :  { %7979 = vmatmul.mubr.msk.f32.gmra.mxu1 %vm5419_vm6, %v7963_v53  ;;  %6605 = vmatprep.subr.mxu0 %v8014_v36  ;;  %v8030_v53 = vld [vmem:[%s12899_s18 + $0x538] sm:$0xff]  ;;  %v8028_v36 = vld [vmem:[%s12899_s18 + $0x528] sm:$0xff] }
0x128c   :  { %6465 = vmatprep.mubr.f32.mxu1 %v12932_v22  ;;  %6606 = vmatpush1.msra.mxu0 %v8013_v63  ;;  %v8027_v63 = vld [vmem:[%s12899_s18 + $0x520] sm:$0xff] }
0x128d   :  { %6607 = vmatprep.subr.mxu0 %v8012_v27  ;;  %v8025_v27 = vld [vmem:[%s12899_s18 + $0x510] sm:$0xff] }
0x128e   :  { %6608 = vmatpush1.msra.mxu0 %v8011_v41  ;;  %v8057_v41 = vld [vmem:[%s12898_s17 + $0x190] sm:$0xff] }
0x128f   :  { %7980 = vmatmul.mubr.msk.f32.gmra.mxu1 %vm5419_vm6, %v7964_v39  ;;  %6609 = vmatprep.subr.mxu0 %v8010_v46  ;;  %v8026_v39 = vld [vmem:[%s12899_s18 + $0x518] sm:$0xff]  ;;  %v8024_v46 = vld [vmem:[%s12899_s18 + $0x508] sm:$0xff] }
0x1290   :  { %6471 = vmatprep.mubr.f32.mxu1 %v12932_v22  ;;  %6610 = vmatpush1.msra.mxu0 %v8009_v28  ;;  %v8118_v28 = vld [vmem:[%s12899_s18 + $0x6f8] sm:$0xff] }
0x1291   :  { %6611 = vmatprep.subr.mxu0 %v8008_v26  ;;  %v12103_v26 = vld [vmem:[%s12899_s18 + $0x6f0] sm:$0xff]  ;;  %8179 = vmatprep.subr.mxu1 %v8118_v28 }
0x1292   :  { %6612 = vmatpush1.msra.mxu0 %v8007_v62  ;;  %v8058_v62 = vld [vmem:[%s12898_s17 + $0x198] sm:$0xff] }
0x1293   :  { %7981 = vmatmul.mubr.msk.f32.gmra.mxu1 %vm5419_vm6, %v7965_v24  ;;  %6613 = vmatprep.subr.mxu0 %v8006_v56  ;;  %v8023_v24 = vld [vmem:[%s12899_s18 + $0x500] sm:$0xff]  ;;  %v12114_v56 = vld [vmem:[%s12899_s18 + $0x6e8] sm:$0xff] }
0x1294   :  { %6477 = vmatprep.mubr.f32.mxu1 %v12932_v22  ;;  %6614 = vmatpush1.msra.mxu0 %v8005_v18  ;;  %v12119_v18 = vld [vmem:[%s12899_s18 + $0x6e0] sm:$0xff] }
0x1295   :  { %6615 = vmatprep.subr.mxu0 %v8004_v0  ;;  %v12132_v0 = vld [vmem:[%s12899_s18 + $0x6d0] sm:$0xff] }
0x1296   :  { %6616 = vmatpush1.msra.mxu0 %v8003_v19  ;;  %v8059_v19 = vld [vmem:[%s12898_s17 + $0x1a0] sm:$0xff] }
0x1297   :  { %7982 = vmatmul.mubr.msk.f32.gmra.mxu1 %vm5419_vm6, %v7966_v34  ;;  %6617 = vmatprep.subr.mxu0 %v8002_v47  ;;  %v12125_v34 = vld [vmem:[%s12899_s18 + $0x6d8] sm:$0xff]  ;;  %v12142_v47 = vld [vmem:[%s12899_s18 + $0x6c8] sm:$0xff] }
0x1298   :  { %6483 = vmatprep.mubr.f32.mxu1 %v12932_v22  ;;  %6618 = vmatpush1.msra.mxu0 %v8001_v58  ;;  %v12148_v58 = vld [vmem:[%s12899_s18 + $0x6c0] sm:$0xff] }
0x1299   :  { %6619 = vmatprep.subr.mxu0 %v8000_v31  ;;  %v12161_v31 = vld [vmem:[%s12899_s18 + $0x6b0] sm:$0xff] }
0x129a   :  { %6620 = vmatpush1.msra.mxu0 %v7999_v52  ;;  %v8060_v52 = vld [vmem:[%s12898_s17 + $0x1a8] sm:$0xff] }
0x129b   :  { %7983 = vmatmul.mubr.msk.f32.gmra.mxu1 %vm5419_vm6, %v7967_v8  ;;  %6621 = vmatprep.subr.mxu0 %v7998_v5  ;;  %v12154_v8 = vld [vmem:[%s12899_s18 + $0x6b8] sm:$0xff]  ;;  %v12171_v5 = vld [vmem:[%s12899_s18 + $0x6a8] sm:$0xff] }
0x129c   :  { %6489 = vmatprep.mubr.f32.mxu1 %v12932_v22  ;;  %6622 = vmatpush1.msra.mxu0 %v7997_v42  ;;  %v12177_v42 = vld [vmem:[%s12899_s18 + $0x6a0] sm:$0xff] }
0x129d   :  { %6623 = vmatprep.subr.mxu0 %v7996_v57  ;;  %v12190_v57 = vld [vmem:[%s12899_s18 + $0x690] sm:$0xff] }
0x129e   :  { %6624 = vmatpush1.msra.mxu0 %v7995_v44  ;;  %v8061_v44 = vld [vmem:[%s12898_s17 + $0x1b0] sm:$0xff] }
0x129f   :  { %7984 = vmatmul.mubr.msk.f32.gmra.mxu1 %vm5419_vm6, %v7968_v54  ;;  %6625 = vmatprep.subr.mxu0 %v7994_v10  ;;  %v12183_v54 = vld [vmem:[%s12899_s18 + $0x698] sm:$0xff]  ;;  %v12200_v10 = vld [vmem:[%s12899_s18 + $0x688] sm:$0xff] }
0x12a0   :  { %6495 = vmatprep.mubr.f32.mxu1 %v12932_v22  ;;  %6626 = vmatpush1.msra.mxu0 %v7993_v61  ;;  %v12206_v61 = vld [vmem:[%s12899_s18 + $0x680] sm:$0xff] }
0x12a1   :  { %6627 = vmatprep.subr.mxu0 %v7992_v59  ;;  %v12219_v59 = vld [vmem:[%s12899_s18 + $0x670] sm:$0xff] }
0x12a2   :  { %6628 = vmatpush1.msra.mxu0 %v7991_v50  ;;  %v8062_v50 = vld [vmem:[%s12898_s17 + $0x1b8] sm:$0xff] }
0x12a3   :  { %7985 = vmatmul.mubr.msk.f32.gmra.mxu1 %vm5419_vm6, %v7969_v4  ;;  %6629 = vmatprep.subr.mxu0 %v8054_v45  ;;  %v12212_v4 = vld [vmem:[%s12899_s18 + $0x678] sm:$0xff]  ;;  %v12229_v45 = vld [vmem:[%s12899_s18 + $0x668] sm:$0xff] }
0x12a4   :  { %6501 = vmatprep.mubr.f32.mxu1 %v12932_v22  ;;  %6630 = vmatpush2.msra.mxu0 %v8053_v40  ;;  %v12235_v40 = vld [vmem:[%s12899_s18 + $0x660] sm:$0xff] }
0x12a5   :  { %6631 = vmatprep.subr.mxu0 %v8052_v35  ;;  %v12248_v35 = vld [vmem:[%s12899_s18 + $0x650] sm:$0xff] }
0x12a6   :  { %6632 = vmatpush2.msra.mxu0 %v8051_v43  ;;  %v8063_v43 = vld [vmem:[%s12898_s17 + $0x1c0] sm:$0xff] }
0x12a7   :  { %7986 = vmatmul.mubr.msk.f32.gmra.mxu1 %vm5419_vm6, %v7970_v51  ;;  %6633 = vmatprep.subr.mxu0 %v8050_v32  ;;  %v12241_v51 = vld [vmem:[%s12899_s18 + $0x658] sm:$0xff]  ;;  %v12258_v32 = vld [vmem:[%s12899_s18 + $0x648] sm:$0xff] }
0x12a8   :  { %6507 = vmatprep.mubr.f32.mxu1 %v12932_v22  ;;  %6634 = vmatpush2.msra.mxu0 %v8049_v37  ;;  %v12264_v37 = vld [vmem:[%s12899_s18 + $0x640] sm:$0xff] }
0x12a9   :  { %6635 = vmatprep.subr.mxu0 %v8048_v55  ;;  %v12277_v55 = vld [vmem:[%s12899_s18 + $0x630] sm:$0xff] }
0x12aa   :  { %6636 = vmatpush2.msra.mxu0 %v8047_v33  ;;  %v8064_v33 = vld [vmem:[%s12898_s17 + $0x1c8] sm:$0xff] }
0x12ab   :  { %7987 = vmatmul.mubr.msk.f32.gmra.mxu1 %vm5419_vm6, %v7971_v20  ;;  %6637 = vmatprep.subr.mxu0 %v8046_v60  ;;  %v12270_v20 = vld [vmem:[%s12899_s18 + $0x638] sm:$0xff]  ;;  %v12287_v60 = vld [vmem:[%s12899_s18 + $0x628] sm:$0xff] }
0x12ac   :  { %6513 = vmatprep.mubr.f32.mxu1 %v12932_v22  ;;  %6638 = vmatpush2.msra.mxu0 %v8045_v14  ;;  %v12293_v14 = vld [vmem:[%s12899_s18 + $0x620] sm:$0xff] }
0x12ad   :  { %6639 = vmatprep.subr.mxu0 %v8044_v38  ;;  %v12306_v38 = vld [vmem:[%s12899_s18 + $0x610] sm:$0xff] }
0x12ae   :  { %6640 = vmatpush2.msra.mxu0 %v8043_v17  ;;  %v8065_v17 = vld [vmem:[%s12898_s17 + $0x1d0] sm:$0xff] }
0x12af   :  { %7988 = vmatmul.mubr.msk.f32.gmra.mxu1 %vm5419_vm6, %v7972_v2  ;;  %6641 = vmatprep.subr.mxu0 %v8042_v11  ;;  %v12299_v2 = vld [vmem:[%s12899_s18 + $0x618] sm:$0xff]  ;;  %v12316_v11 = vld [vmem:[%s12899_s18 + $0x608] sm:$0xff] }
0x12b0   :  { %6519 = vmatprep.mubr.f32.mxu1 %v12932_v22  ;;  %6642 = vmatpush2.msra.mxu0 %v8041_v30  ;;  %v12322_v30 = vld [vmem:[%s12899_s18 + $0x600] sm:$0xff] }
0x12b1   :  { %6643 = vmatprep.subr.mxu0 %v8040_v21  ;;  %v12335_v21 = vld [vmem:[%s12899_s18 + $0x7f0] sm:$0xff] }
0x12b2   :  { %6644 = vmatpush2.msra.mxu0 %v8039_v29  ;;  %v8066_v29 = vld [vmem:[%s12898_s17 + $0x1d8] sm:$0xff] }
0x12b3   :  { %7989 = vmatmul.mubr.msk.f32.gmra.mxu1 %vm5419_vm6, %v7973_v15  ;;  %6645 = vmatprep.subr.mxu0 %v8038_v3  ;;  %v12328_v15 = vld [vmem:[%s12899_s18 + $0x7f8] sm:$0xff]  ;;  %v12345_v3 = vld [vmem:[%s12899_s18 + $0x7e8] sm:$0xff] }
0x12b4   :  { %6525 = vmatprep.mubr.f32.mxu1 %v12932_v22  ;;  %6646 = vmatpush2.msra.mxu0 %v8037_v16  ;;  %v12351_v16 = vld [vmem:[%s12899_s18 + $0x7e0] sm:$0xff] }
0x12b5   :  { %6647 = vmatprep.subr.mxu0 %v8036_v23  ;;  %v12364_v23 = vld [vmem:[%s12899_s18 + $0x7d0] sm:$0xff] }
0x12b6   :  { %6648 = vmatpush2.msra.mxu0 %v8035_v6  ;;  %v8067_v6 = vld [vmem:[%s12898_s17 + $0x1e0] sm:$0xff] }
0x12b7   :  { %7990 = vmatmul.mubr.msk.f32.gmra.mxu1 %vm5419_vm6, %v7974_v12  ;;  %6649 = vmatprep.subr.mxu0 %v8034_v13  ;;  %v12357_v12 = vld [vmem:[%s12899_s18 + $0x7d8] sm:$0xff]  ;;  %v12374_v13 = vld [vmem:[%s12899_s18 + $0x7c8] sm:$0xff] }
0x12b8   :  { %6919 = vmatprep.mubr.f32.mxu1 %v12932_v22  ;;  %6650 = vmatpush2.msra.mxu0 %v8033_v9  ;;  %v12380_v9 = vld [vmem:[%s12899_s18 + $0x7c0] sm:$0xff] }
0x12b9   :  { %6651 = vmatprep.subr.mxu0 %v8032_v1  ;;  %v12393_v1 = vld [vmem:[%s12899_s18 + $0x7b0] sm:$0xff] }
0x12ba   :  { %6652 = vmatpush2.msra.mxu0 %v8031_v49  ;;  %v8068_v49 = vld [vmem:[%s12898_s17 + $0x1e8] sm:$0xff] }
0x12bb   :  { %8071 = vmatmul.mubr.msk.f32.vlgmr.msra.gmra.mxu1 %vm5419_vm6, %v8055_v48  ;;  %6653 = vmatprep.subr.mxu0 %v8030_v53  ;;  %v12386_v48 = vld [vmem:[%s12899_s18 + $0x7b8] sm:$0xff]  ;;  %v12403_v53 = vld [vmem:[%s12899_s18 + $0x7a8] sm:$0xff] }
0x12bc   :  { %6925 = vmatprep.mubr.f32.mxu1 %v12932_v22  ;;  %6654 = vmatpush2.msra.mxu0 %v8029_v7  ;;  %v12409_v7 = vld [vmem:[%s12899_s18 + $0x7a0] sm:$0xff] }
0x12bd   :  { %6655 = vmatprep.subr.mxu0 %v8028_v36  ;;  %8211 = vmatpush1.msra.mxu1 %v12103_v26  ;;  %v12422_v36 = vld [vmem:[%s12899_s18 + $0x790] sm:$0xff] }
0x12be   :  { %6656 = vmatpush2.msra.mxu0 %v8027_v63  ;;  %8180 = vmatprep.subr.mxu1 %v12114_v56  ;;  %v8069_v63 = vld [vmem:[%s12898_s17 + $0x1f0] sm:$0xff] }
0x12bf   :  { %8072 = vmatmul.mubr.msk.f32.gmra.mxu1 %vm5419_vm6, %v8056_v25  ;;  %6657 = vmatprep.subr.mxu0 %v8026_v39  ;;  %v12415_v25 = vld [vmem:[%s12899_s18 + $0x798] sm:$0xff]  ;;  %v12432_v39 = vld [vmem:[%s12899_s18 + $0x788] sm:$0xff] }
0x12c0   :  { %6931 = vmatprep.mubr.f32.mxu1 %v12932_v22  ;;  %6658 = vmatpush2.msra.mxu0 %v8025_v27  ;;  %v12438_v27 = vld [vmem:[%s12899_s18 + $0x780] sm:$0xff] }
0x12c1   :  { %6659 = vmatprep.subr.mxu0 %v8024_v46  ;;  %8212 = vmatpush1.msra.mxu1 %v12119_v18  ;;  %v12451_v46 = vld [vmem:[%s12899_s18 + $0x770] sm:$0xff] }
0x12c2   :  { %6660 = vmatpush2.msra.mxu0 %v8023_v24  ;;  %8181 = vmatprep.subr.mxu1 %v12125_v34  ;;  %12935 = vst [vmem:[#allocation17_spill] sm:$0xff] %v12451_v46  ;;  %v12461_v24 = vld [vmem:[%s12899_s18 + $0x768] sm:$0xff] }
0x12c3   :  { %8073 = vmatmul.mubr.msk.f32.gmra.mxu1 %vm5419_vm6, %v8057_v41  ;;  %7081 = vmatprep.subr.mxu0 %v8118_v28  ;;  %v12444_v41 = vld [vmem:[%s12899_s18 + $0x778] sm:$0xff]  ;;  %12936 = vst [vmem:[#allocation18_spill] sm:$0xff] %v12461_v24 }
0x12c4   :  { %6937 = vmatprep.mubr.f32.mxu1 %v12932_v22  ;;  %8213 = vmatpush1.msra.mxu1 %v12132_v0  ;;  %12934 = vst [vmem:[#allocation16_spill] sm:$0xff] %v12444_v41  ;;  %v8070_v28 = vld [vmem:[%s12898_s17 + $0x1f8] sm:$0xff] }
0x12c5   :  { %8182 = vmatprep.subr.mxu1 %v12142_v47 }
0x12c6   :  { %8214 = vmatpush1.msra.mxu1 %v12148_v58 }
0x12c7   :  { %8074 = vmatmul.mubr.msk.f32.gmra.mxu1 %vm5419_vm6, %v8058_v62  ;;  %8183 = vmatprep.subr.mxu1 %v12154_v8  ;;  %v12467_v62 = vld [vmem:[%s12899_s18 + $0x760] sm:$0xff] }
0x12c8   :  { %6943 = vmatprep.mubr.f32.mxu1 %v12932_v22  ;;  %8215 = vmatpush1.msra.mxu1 %v12161_v31  ;;  %12937 = vst [vmem:[#allocation19_spill] sm:$0xff] %v12467_v62 }
0x12c9   :  { %8184 = vmatprep.subr.mxu1 %v12171_v5 }
0x12ca   :  { %8216 = vmatpush1.msra.mxu1 %v12177_v42 }
0x12cb   :  { %8075 = vmatmul.mubr.msk.f32.gmra.mxu1 %vm5419_vm6, %v8059_v19  ;;  %8185 = vmatprep.subr.mxu1 %v12183_v54  ;;  %v12480_v19 = vld [vmem:[%s12899_s18 + $0x750] sm:$0xff] }
0x12cc   :  { %6949 = vmatprep.mubr.f32.mxu1 %v12932_v22  ;;  %8217 = vmatpush1.msra.mxu1 %v12190_v57  ;;  %12939 = vst [vmem:[#allocation21_spill] sm:$0xff] %v12480_v19 }
0x12cd   :  { %8186 = vmatprep.subr.mxu1 %v12200_v10 }
0x12ce   :  { %8218 = vmatpush1.msra.mxu1 %v12206_v61 }
0x12cf   :  { %8076 = vmatmul.mubr.msk.f32.gmra.mxu1 %vm5419_vm6, %v8060_v52  ;;  %8187 = vmatprep.subr.mxu1 %v12212_v4  ;;  %v12486_v52 = vld [vmem:[%s12899_s18 + $0x748] sm:$0xff] }
0x12d0   :  { %6955 = vmatprep.mubr.f32.mxu1 %v12932_v22  ;;  %8219 = vmatpush1.msra.mxu1 %v12219_v59  ;;  %12940 = vst [vmem:[#allocation22_spill] sm:$0xff] %v12486_v52 }
0x12d1   :  { %8188 = vmatprep.subr.mxu1 %v12229_v45 }
0x12d2   :  { %8220 = vmatpush1.msra.mxu1 %v12235_v40 }
0x12d3   :  { %8077 = vmatmul.mubr.msk.f32.gmra.mxu1 %vm5419_vm6, %v8061_v44  ;;  %8189 = vmatprep.subr.mxu1 %v12241_v51  ;;  %v12492_v44 = vld [vmem:[%s12899_s18 + $0x740] sm:$0xff] }
0x12d4   :  { %6961 = vmatprep.mubr.f32.mxu1 %v12932_v22  ;;  %8221 = vmatpush1.msra.mxu1 %v12248_v35  ;;  %12941 = vst [vmem:[#allocation23_spill] sm:$0xff] %v12492_v44 }
0x12d5   :  { %8190 = vmatprep.subr.mxu1 %v12258_v32 }
0x12d6   :  { %8222 = vmatpush1.msra.mxu1 %v12264_v37 }
0x12d7   :  { %8078 = vmatmul.mubr.msk.f32.gmra.mxu1 %vm5419_vm6, %v8062_v50  ;;  %8191 = vmatprep.subr.mxu1 %v12270_v20 }
0x12d8   :  { %6967 = vmatprep.mubr.f32.mxu1 %v12932_v22  ;;  %8223 = vmatpush1.msra.mxu1 %v12277_v55 }
0x12d9   :  { %8192 = vmatprep.subr.mxu1 %v12287_v60 }
0x12da   :  { %8224 = vmatpush1.msra.mxu1 %v12293_v14 }
0x12db   :  { %8079 = vmatmul.mubr.msk.f32.gmra.mxu1 %vm5419_vm6, %v8063_v43  ;;  %8193 = vmatprep.subr.mxu1 %v12299_v2 }
0x12dc   :  { %6973 = vmatprep.mubr.f32.mxu1 %v12932_v22  ;;  %8225 = vmatpush1.msra.mxu1 %v12306_v38 }
0x12dd   :  { %8194 = vmatprep.subr.mxu1 %v12316_v11 }
0x12de   :  { %8226 = vmatpush1.msra.mxu1 %v12322_v30 }
0x12df   :  { %8080 = vmatmul.mubr.msk.f32.gmra.mxu1 %vm5419_vm6, %v8064_v33  ;;  %8195 = vmatprep.subr.mxu1 %v12328_v15  ;;  %v12498_v33 = vld [vmem:[%s12899_s18 + $0x738] sm:$0xff] }
0x12e0   :  { %6979 = vmatprep.mubr.f32.mxu1 %v12932_v22  ;;  %8227 = vmatpush2.msra.mxu1 %v12335_v21  ;;  %12942 = vst [vmem:[#allocation24_spill] sm:$0xff] %v12498_v33 }
0x12e1   :  { %8196 = vmatprep.subr.mxu1 %v12345_v3 }
0x12e2   :  { %8228 = vmatpush2.msra.mxu1 %v12351_v16 }
0x12e3   :  { %8081 = vmatmul.mubr.msk.f32.gmra.mxu1 %vm5419_vm6, %v8065_v17  ;;  %8197 = vmatprep.subr.mxu1 %v12357_v12 }
0x12e4   :  { %6985 = vmatprep.mubr.f32.mxu1 %v12932_v22  ;;  %8229 = vmatpush2.msra.mxu1 %v12364_v23 }
0x12e5   :  { %8198 = vmatprep.subr.mxu1 %v12374_v13 }
0x12e6   :  { %8230 = vmatpush2.msra.mxu1 %v12380_v9 }
0x12e7   :  { %8082 = vmatmul.mubr.msk.f32.gmra.mxu1 %vm5419_vm6, %v8066_v29  ;;  %8199 = vmatprep.subr.mxu1 %v12386_v48  ;;  %v12506_v29 = vld [vmem:[%s12899_s18 + $0x730] sm:$0xff] }
0x12e8   :  { %6991 = vmatprep.mubr.f32.mxu1 %v12932_v22  ;;  %8231 = vmatpush2.msra.mxu1 %v12393_v1  ;;  %12944 = vst [vmem:[#allocation26_spill] sm:$0xff] %v12506_v29 }
0x12e9   :  { %8200 = vmatprep.subr.mxu1 %v12403_v53 }
0x12ea   :  { %8232 = vmatpush2.msra.mxu1 %v12409_v7 }
0x12eb   :  { %8083 = vmatmul.mubr.msk.f32.gmra.mxu1 %vm5419_vm6, %v8067_v6  ;;  %8201 = vmatprep.subr.mxu1 %v12415_v25 }
0x12ec   :  { %6997 = vmatprep.mubr.f32.mxu1 %v12932_v22  ;;  %8233 = vmatpush2.msra.mxu1 %v12422_v36 }
0x12ed   :  { %8202 = vmatprep.subr.mxu1 %v12432_v39 }
0x12ee   :  { %8234 = vmatpush2.msra.mxu1 %v12438_v27 }
0x12ef   :  { %8084 = vmatmul.mubr.msk.f32.gmra.mxu1 %vm5419_vm6, %v8068_v49  ;;  %8203 = vmatprep.subr.mxu1 %v12444_v41 }
0x12f0   :  { %7003 = vmatprep.mubr.f32.mxu1 %v12932_v22  ;;  %8235 = vmatpush2.msra.mxu1 %v12451_v46 }
0x12f1   :  { %8204 = vmatprep.subr.mxu1 %v12461_v24 }
0x12f2   :  { %8236 = vmatpush2.msra.mxu1 %v12467_v62 }
0x12f3   :  { %8085 = vmatmul.mubr.msk.f32.gmra.mxu1 %vm5419_vm6, %v8069_v63  ;;  %v12512_v63 = vld [vmem:[%s12899_s18 + $0x728] sm:$0xff] }
0x12f4   :  { %7009 = vmatprep.mubr.f32.mxu1 %v12932_v22  ;;  %v12473_v22 = vld [vmem:[%s12899_s18 + $0x758] sm:$0xff]  ;;  %12945 = vst [vmem:[#allocation27_spill] sm:$0xff] %v12512_v63 }
0x12f5   :  { %12938 = vst [vmem:[#allocation20_spill] sm:$0xff] %v12473_v22  ;;  %8205 = vmatprep.subr.mxu1 %v12473_v22 }
0x12f6   :  { %8237 = vmatpush2.msra.mxu1 %v12480_v19 }
0x12f7   :  { %8086 = vmatmul.mubr.msk.f32.gmra.mxu1 %vm5419_vm6, %v8070_v28  ;;  %8206 = vmatprep.subr.mxu1 %v12486_v52 }
0x12f8   :  { %8238 = vmatpush2.msra.mxu1 %v12492_v44 }
0x12f9   :  { %8207 = vmatprep.subr.mxu1 %v12498_v33 }
0x12fa   :  { %v6050_v50 = vpop.f32.mrf.mxu1  ;;  %v6211_v43 = vpop.f32.mrf.mxu0  ;;  %8239 = vmatpush2.msra.mxu1 %v12506_v29  ;;  %v12546_v29 = vld [vmem:[%s12899_s18 + $0x700] sm:$0xff] }
0x12fb   :  { %v12501_v17 = vadd.f32 %v6211_v43, %v6050_v50  ;;  %v12520_v50 = vld [vmem:[%s12899_s18 + $0x720] sm:$0xff]  ;;  %8208 = vmatprep.subr.mxu1 %v12512_v63  ;;  %v12526_v43 = vld [vmem:[%s12899_s18 + $0x718] sm:$0xff]  ;;  %12952 = vst [vmem:[#allocation34_spill] sm:$0xff] %v12546_v29 }
0x12fc   :  { %v6052_v6 = vpop.f32.mrf.mxu1  ;;  %v6213_v49 = vpop.f32.mrf.mxu0  ;;  %12947 = vst [vmem:[#allocation29_spill] sm:$0xff] %v12520_v50  ;;  %12948 = vst [vmem:[#allocation30_spill] sm:$0xff] %v12526_v43  ;;  %8240 = vmatpush2.msra.mxu1 %v12520_v50 }
0x12fd   :  { %12943 = vst [vmem:[#allocation25_spill] sm:$0xff] %v12501_v17  ;;  %v12515_v28 = vadd.f32 %v6213_v49, %v6052_v6  ;;  %v12532_v6 = vld [vmem:[%s12899_s18 + $0x710] sm:$0xff]  ;;  %8209 = vmatprep.subr.mxu1 %v12526_v43 }
0x12fe   :  { %12949 = vst [vmem:[#allocation31_spill] sm:$0xff] %v12532_v6  ;;  %8241 = vmatpush2.msra.mxu1 %v12532_v6 }
0x12ff   :  { %12946 = vst [vmem:[#allocation28_spill] sm:$0xff] %v12515_v28  ;;  %v6056_v17 = vpop.f32.mrf.mxu1  ;;  %v6217_v33 = vpop.f32.mrf.mxu0  ;;  %v12540_v28 = vld [vmem:[%s12899_s18 + $0x708] sm:$0xff] }
0x1300   :  { %v12535_v49 = vadd.f32 %v6217_v33, %v6056_v17  ;;  %12951 = vst [vmem:[#allocation33_spill] sm:$0xff] %v12540_v28  ;;  %8210 = vmatprep.subr.mxu1 %v12540_v28 }
0x1301   :  { %v6058_v63 = vpop.f32.mrf.mxu1  ;;  %v6219_v50 = vpop.f32.mrf.mxu0  ;;  %8242 = vmatpush2.msra.mxu1 %v12546_v29 }
0x1302   :  { %12950 = vst [vmem:[#allocation32_spill] sm:$0xff] %v12535_v49  ;;  %v12549_v44 = vadd.f32 %v6219_v50, %v6058_v63 }
0x1303   :  { %v6062_v33 = vpop.f32.mrf.mxu1 }
0x1304   :  { %12953 = vst [vmem:[#allocation35_spill] sm:$0xff] %v12549_v44  ;;  %v6223_v17 = vpop.f32.mrf.mxu0 }
0x1305   :  { %v12552_v49 = vadd.f32 %v6223_v17, %v6062_v33  ;;  %v6064_v43 = vpop.f32.mrf.mxu1 }
0x1306   :  { %v6225_v52 = vpop.f32.mrf.mxu0 }
0x1307   :  { %12954 = vst [vmem:[#allocation36_spill] sm:$0xff] %v12552_v49  ;;  %v12554_v6 = vadd.f32 %v6225_v52, %v6064_v43  ;;  %v6068_v19 = vpop.f32.mrf.mxu1 }
0x1308   :  { %v6229_v22 = vpop.f32.mrf.mxu0 }
0x1309   :  { %12955 = vst [vmem:[#allocation37_spill] sm:$0xff] %v12554_v6  ;;  %v12556_v62 = vadd.f32 %v6229_v22, %v6068_v19  ;;  %v6070_v24 = vpop.f32.mrf.mxu1 }
0x130a   :  { %v6231_v46 = vpop.f32.mrf.mxu0 }
0x130b   :  { %12956 = vst [vmem:[#allocation38_spill] sm:$0xff] %v12556_v62  ;;  %v12558_v41 = vadd.f32 %v6231_v46, %v6070_v24  ;;  %v6074_v63 = vpop.f32.mrf.mxu1 }
0x130c   :  { %v6235_v50 = vpop.f32.mrf.mxu0 }
0x130d   :  { %12957 = vst [vmem:[#allocation39_spill] sm:$0xff] %v12558_v41  ;;  %v12560_v44 = vadd.f32 %v6235_v50, %v6074_v63  ;;  %v6076_v29 = vpop.f32.mrf.mxu1 }
0x130e   :  { %v6237_v28 = vpop.f32.mrf.mxu0 }
0x130f   :  { %12958 = vst [vmem:[#allocation40_spill] sm:$0xff] %v12560_v44  ;;  %v12562_v33 = vadd.f32 %v6237_v28, %v6076_v29  ;;  %v6080_v17 = vpop.f32.mrf.mxu1 }
0x1310   :  { %v6241_v49 = vpop.f32.mrf.mxu0 }
0x1311   :  { %12959 = vst [vmem:[#allocation41_spill] sm:$0xff] %v12562_v33  ;;  %v12564_v52 = vadd.f32 %v6241_v49, %v6080_v17  ;;  %v6082_v43 = vpop.f32.mrf.mxu1 }
0x1312   :  { %v6243_v6 = vpop.f32.mrf.mxu0 }
0x1313   :  { %12960 = vst [vmem:[#allocation42_spill] sm:$0xff] %v12564_v52  ;;  %v12566_v22 = vadd.f32 %v6243_v6, %v6082_v43  ;;  %v6086_v19 = vpop.f32.mrf.mxu1 }
0x1314   :  { %v6247_v62 = vpop.f32.mrf.mxu0 }
0x1315   :  { %12961 = vst [vmem:[#allocation43_spill] sm:$0xff] %v12566_v22  ;;  %v12568_v46 = vadd.f32 %v6247_v62, %v6086_v19  ;;  %v6088_v24 = vpop.f32.mrf.mxu1 }
0x1316   :  { %v6249_v41 = vpop.f32.mrf.mxu0 }
0x1317   :  { %12962 = vst [vmem:[#allocation44_spill] sm:$0xff] %v12568_v46  ;;  %v12570_v63 = vadd.f32 %v6249_v41, %v6088_v24  ;;  %v6092_v50 = vpop.f32.mrf.mxu1 }
0x1318   :  { %v6253_v44 = vpop.f32.mrf.mxu0 }
0x1319   :  { %12963 = vst [vmem:[#allocation45_spill] sm:$0xff] %v12570_v63  ;;  %v12572_v29 = vadd.f32 %v6253_v44, %v6092_v50  ;;  %v6094_v28 = vpop.f32.mrf.mxu1 }
0x131a   :  { %v6255_v33 = vpop.f32.mrf.mxu0 }
0x131b   :  { %12964 = vst [vmem:[#allocation46_spill] sm:$0xff] %v12572_v29  ;;  %v12574_v49 = vadd.f32 %v6255_v33, %v6094_v28  ;;  %v6098_v17 = vpop.f32.mrf.mxu1 }
0x131c   :  { %v6259_v52 = vpop.f32.mrf.mxu0 }
0x131d   :  { %12965 = vst [vmem:[#allocation47_spill] sm:$0xff] %v12574_v49  ;;  %v12576_v6 = vadd.f32 %v6259_v52, %v6098_v17  ;;  %v6100_v43 = vpop.f32.mrf.mxu1 }
0x131e   :  { %v6261_v22 = vpop.f32.mrf.mxu0 }
0x131f   :  { %12966 = vst [vmem:[#allocation48_spill] sm:$0xff] %v12576_v6  ;;  %v12578_v62 = vadd.f32 %v6261_v22, %v6100_v43  ;;  %v6104_v19 = vpop.f32.mrf.mxu1 }
0x1320   :  { %v6265_v46 = vpop.f32.mrf.mxu0 }
0x1321   :  { %12967 = vst [vmem:[#allocation49_spill] sm:$0xff] %v12578_v62  ;;  %v12580_v41 = vadd.f32 %v6265_v46, %v6104_v19  ;;  %v6106_v24 = vpop.f32.mrf.mxu1 }
0x1322   :  { %v6267_v63 = vpop.f32.mrf.mxu0 }
0x1323   :  { %12968 = vst [vmem:[#allocation50_spill] sm:$0xff] %v12580_v41  ;;  %v12582_v44 = vadd.f32 %v6267_v63, %v6106_v24  ;;  %v6110_v50 = vpop.f32.mrf.mxu1 }
0x1324   :  { %v6271_v29 = vpop.f32.mrf.mxu0 }
0x1325   :  { %12969 = vst [vmem:[#allocation51_spill] sm:$0xff] %v12582_v44  ;;  %v12584_v33 = vadd.f32 %v6271_v29, %v6110_v50  ;;  %v6112_v28 = vpop.f32.mrf.mxu1 }
0x1326   :  { %v6273_v49 = vpop.f32.mrf.mxu0 }
0x1327   :  { %12970 = vst [vmem:[#allocation52_spill] sm:$0xff] %v12584_v33  ;;  %v12586_v52 = vadd.f32 %v6273_v49, %v6112_v28  ;;  %v6116_v17 = vpop.f32.mrf.mxu1 }
0x1328   :  { %v6277_v6 = vpop.f32.mrf.mxu0 }
0x1329   :  { %12971 = vst [vmem:[#allocation53_spill] sm:$0xff] %v12586_v52  ;;  %v12588_v22 = vadd.f32 %v6277_v6, %v6116_v17  ;;  %v6118_v43 = vpop.f32.mrf.mxu1 }
0x132a   :  { %v6279_v62 = vpop.f32.mrf.mxu0 }
0x132b   :  { %12972 = vst [vmem:[#allocation54_spill] sm:$0xff] %v12588_v22  ;;  %v12590_v46 = vadd.f32 %v6279_v62, %v6118_v43  ;;  %v6122_v19 = vpop.f32.mrf.mxu1 }
0x132c   :  { %v6283_v41 = vpop.f32.mrf.mxu0 }
0x132d   :  { %12973 = vst [vmem:[#allocation55_spill] sm:$0xff] %v12590_v46  ;;  %v12592_v63 = vadd.f32 %v6283_v41, %v6122_v19  ;;  %v6124_v24 = vpop.f32.mrf.mxu1 }
0x132e   :  { %v6285_v44 = vpop.f32.mrf.mxu0 }
0x132f   :  { %12974 = vst [vmem:[#allocation56_spill] sm:$0xff] %v12592_v63  ;;  %v12594_v29 = vadd.f32 %v6285_v44, %v6124_v24  ;;  %v6128_v50 = vpop.f32.mrf.mxu1 }
0x1330   :  { %v6289_v33 = vpop.f32.mrf.mxu0 }
0x1331   :  { %v12596_v49 = vadd.f32 %v6289_v33, %v6128_v50  ;;  %v6130_v28 = vpop.f32.mrf.mxu1 }
0x1332   :  { %v6291_v52 = vpop.f32.mrf.mxu0 }
0x1333   :  { %12975 = vst [vmem:[#allocation57_spill] sm:$0xff] %v12596_v49  ;;  %v12598_v6 = vadd.f32 %v6291_v52, %v6130_v28  ;;  %v6134_v17 = vpop.f32.mrf.mxu1 }
0x1334   :  { %v6295_v22 = vpop.f32.mrf.mxu0 }
0x1335   :  { %v12600_v62 = vadd.f32 %v6295_v22, %v6134_v17  ;;  %v6136_v43 = vpop.f32.mrf.mxu1 }
0x1336   :  { %v6297_v46 = vpop.f32.mrf.mxu0 }
0x1337   :  { %v12602_v41 = vadd.f32 %v6297_v46, %v6136_v43  ;;  %v6140_v19 = vpop.f32.mrf.mxu1 }
0x1338   :  { %v6301_v63 = vpop.f32.mrf.mxu0 }
0x1339   :  { %v12604_v44 = vadd.f32 %v6301_v63, %v6140_v19  ;;  %v12606_v24 = vpop.f32.mrf.mxu1 }
0x133b   :  { %v6437_v33 = vpop.f32.mrf.mxu1 }
0x133d   :  { %v6439_v50 = vpop.f32.mrf.mxu1 }
0x133e   :  { %6661 = vmatprep.mubr.f32.mxu0 %v6439_v50 }
0x133f   :  { %v6443_v49 = vpop.f32.mrf.mxu1  ;;  %6662 = vmatmul.mubr.f32.vlgmr.msra.gmra.mxu0 %v6437_v33 }
0x1340   :  { %7082 = vmatpush1.msra.mxu0 %v12103_v26 }
0x1341   :  { %v6445_v52 = vpop.f32.mrf.mxu1  ;;  %7083 = vmatprep.subr.mxu0 %v12114_v56 }
0x1342   :  { %6667 = vmatprep.mubr.f32.mxu0 %v6445_v52  ;;  %7084 = vmatpush1.msra.mxu0 %v12119_v18 }
0x1343   :  { %v6449_v22 = vpop.f32.mrf.mxu1  ;;  %6668 = vmatmul.mubr.f32.gmra.mxu0 %v6443_v49  ;;  %7085 = vmatprep.subr.mxu0 %v12125_v34 }
0x1344   :  { %7086 = vmatpush1.msra.mxu0 %v12132_v0 }
0x1345   :  { %v6451_v46 = vpop.f32.mrf.mxu1  ;;  %7087 = vmatprep.subr.mxu0 %v12142_v47 }
0x1346   :  { %6673 = vmatprep.mubr.f32.mxu0 %v6451_v46  ;;  %7088 = vmatpush1.msra.mxu0 %v12148_v58 }
0x1347   :  { %v6455_v63 = vpop.f32.mrf.mxu1  ;;  %6674 = vmatmul.mubr.f32.gmra.mxu0 %v6449_v22  ;;  %7089 = vmatprep.subr.mxu0 %v12154_v8 }
0x1348   :  { %7090 = vmatpush1.msra.mxu0 %v12161_v31 }
0x1349   :  { %v6457_v26 = vpop.f32.mrf.mxu1  ;;  %7091 = vmatprep.subr.mxu0 %v12171_v5 }
0x134a   :  { %6679 = vmatprep.mubr.f32.mxu0 %v6457_v26  ;;  %7092 = vmatpush1.msra.mxu0 %v12177_v42 }
0x134b   :  { %v6461_v56 = vpop.f32.mrf.mxu1  ;;  %6680 = vmatmul.mubr.f32.gmra.mxu0 %v6455_v63  ;;  %7093 = vmatprep.subr.mxu0 %v12183_v54 }
0x134c   :  { %7094 = vmatpush1.msra.mxu0 %v12190_v57 }
0x134d   :  { %v6463_v18 = vpop.f32.mrf.mxu1  ;;  %7095 = vmatprep.subr.mxu0 %v12200_v10 }
0x134e   :  { %6685 = vmatprep.mubr.f32.mxu0 %v6463_v18  ;;  %7096 = vmatpush1.msra.mxu0 %v12206_v61 }
0x134f   :  { %v6467_v34 = vpop.f32.mrf.mxu1  ;;  %6686 = vmatmul.mubr.f32.gmra.mxu0 %v6461_v56  ;;  %7097 = vmatprep.subr.mxu0 %v12212_v4 }
0x1350   :  { %7098 = vmatpush1.msra.mxu0 %v12219_v59 }
0x1351   :  { %v6469_v0 = vpop.f32.mrf.mxu1  ;;  %7099 = vmatprep.subr.mxu0 %v12229_v45 }
0x1352   :  { %6691 = vmatprep.mubr.f32.mxu0 %v6469_v0  ;;  %7100 = vmatpush1.msra.mxu0 %v12235_v40 }
0x1353   :  { %v6473_v47 = vpop.f32.mrf.mxu1  ;;  %6692 = vmatmul.mubr.f32.gmra.mxu0 %v6467_v34  ;;  %7101 = vmatprep.subr.mxu0 %v12241_v51 }
0x1354   :  { %7102 = vmatpush1.msra.mxu0 %v12248_v35  ;;  %v12976_v35 = vld [vmem:[#allocation16_spill] sm:$0xff] }
0x1355   :  { %v6475_v58 = vpop.f32.mrf.mxu1  ;;  %7103 = vmatprep.subr.mxu0 %v12258_v32  ;;  %v12977_v32 = vld [vmem:[#allocation17_spill] sm:$0xff] }
0x1356   :  { %6697 = vmatprep.mubr.f32.mxu0 %v6475_v58  ;;  %7104 = vmatpush1.msra.mxu0 %v12264_v37 }
0x1357   :  { %v6479_v8 = vpop.f32.mrf.mxu1  ;;  %6698 = vmatmul.mubr.f32.gmra.mxu0 %v6473_v47  ;;  %7105 = vmatprep.subr.mxu0 %v12270_v20  ;;  %v12978_v20 = vld [vmem:[#allocation18_spill] sm:$0xff] }
0x1358   :  { %7106 = vmatpush1.msra.mxu0 %v12277_v55  ;;  %v12979_v55 = vld [vmem:[#allocation19_spill] sm:$0xff] }
0x1359   :  { %v6481_v31 = vpop.f32.mrf.mxu1  ;;  %7107 = vmatprep.subr.mxu0 %v12287_v60 }
0x135a   :  { %6703 = vmatprep.mubr.f32.mxu0 %v6481_v31  ;;  %7108 = vmatpush1.msra.mxu0 %v12293_v14  ;;  %v12980_v14 = vld [vmem:[#allocation20_spill] sm:$0xff] }
0x135b   :  { %v6485_v5 = vpop.f32.mrf.mxu1  ;;  %6704 = vmatmul.mubr.f32.gmra.mxu0 %v6479_v8  ;;  %7109 = vmatprep.subr.mxu0 %v12299_v2  ;;  %v12981_v2 = vld [vmem:[#allocation21_spill] sm:$0xff] }
0x135c   :  { %7110 = vmatpush1.msra.mxu0 %v12306_v38 }
0x135d   :  { %v6487_v42 = vpop.f32.mrf.mxu1  ;;  %7111 = vmatprep.subr.mxu0 %v12316_v11  ;;  %v12982_v11 = vld [vmem:[#allocation22_spill] sm:$0xff] }
0x135e   :  { %6709 = vmatprep.mubr.f32.mxu0 %v6487_v42  ;;  %7112 = vmatpush1.msra.mxu0 %v12322_v30  ;;  %v12983_v30 = vld [vmem:[#allocation23_spill] sm:$0xff] }
0x135f   :  { %v6491_v54 = vpop.f32.mrf.mxu1  ;;  %6710 = vmatmul.mubr.f32.gmra.mxu0 %v6485_v5  ;;  %7113 = vmatprep.subr.mxu0 %v12328_v15 }
0x1360   :  { %7114 = vmatpush2.msra.mxu0 %v12335_v21  ;;  %v12984_v21 = vld [vmem:[#allocation24_spill] sm:$0xff] }
0x1361   :  { %v6493_v57 = vpop.f32.mrf.mxu1  ;;  %7115 = vmatprep.subr.mxu0 %v12345_v3  ;;  %v12985_v3 = vld [vmem:[#allocation26_spill] sm:$0xff] }
0x1362   :  { %6715 = vmatprep.mubr.f32.mxu0 %v6493_v57  ;;  %7116 = vmatpush2.msra.mxu0 %v12351_v16 }
0x1363   :  { %v6497_v10 = vpop.f32.mrf.mxu1  ;;  %6716 = vmatmul.mubr.f32.gmra.mxu0 %v6491_v54  ;;  %7117 = vmatprep.subr.mxu0 %v12357_v12  ;;  %v12986_v12 = vld [vmem:[#allocation27_spill] sm:$0xff] }
0x1364   :  { %7118 = vmatpush2.msra.mxu0 %v12364_v23  ;;  %v12987_v23 = vld [vmem:[#allocation29_spill] sm:$0xff] }
0x1365   :  { %v6499_v61 = vpop.f32.mrf.mxu1  ;;  %7119 = vmatprep.subr.mxu0 %v12374_v13 }
0x1366   :  { %6721 = vmatprep.mubr.f32.mxu0 %v6499_v61  ;;  %7120 = vmatpush2.msra.mxu0 %v12380_v9  ;;  %v12988_v9 = vld [vmem:[#allocation30_spill] sm:$0xff] }
0x1367   :  { %v6503_v4 = vpop.f32.mrf.mxu1  ;;  %6722 = vmatmul.mubr.f32.gmra.mxu0 %v6497_v10  ;;  %7121 = vmatprep.subr.mxu0 %v12386_v48  ;;  %v12989_v48 = vld [vmem:[#allocation31_spill] sm:$0xff] }
0x1368   :  { %7122 = vmatpush2.msra.mxu0 %v12393_v1 }
0x1369   :  { %v6505_v59 = vpop.f32.mrf.mxu1  ;;  %7123 = vmatprep.subr.mxu0 %v12403_v53  ;;  %v12990_v53 = vld [vmem:[#allocation33_spill] sm:$0xff] }
0x136a   :  { %6727 = vmatprep.mubr.f32.mxu0 %v6505_v59  ;;  %7124 = vmatpush2.msra.mxu0 %v12409_v7  ;;  %v12991_v7 = vld [vmem:[#allocation34_spill] sm:$0xff] }
0x136b   :  { %v6509_v45 = vpop.f32.mrf.mxu1  ;;  %6728 = vmatmul.mubr.f32.gmra.mxu0 %v6503_v4  ;;  %7125 = vmatprep.subr.mxu0 %v12415_v25  ;;  %v12671_v4 = vpop.f32.mrf.mxu0 }
0x136c   :  { %7126 = vmatpush2.msra.mxu0 %v12422_v36 }
0x136d   :  { %v6511_v40 = vpop.f32.mrf.mxu1  ;;  %7127 = vmatprep.subr.mxu0 %v12432_v39 }
0x136e   :  { %6733 = vmatprep.mubr.f32.mxu0 %v6511_v40  ;;  %7128 = vmatpush2.msra.mxu0 %v12438_v27 }
0x136f   :  { %v6515_v51 = vpop.f32.mrf.mxu1  ;;  %6734 = vmatmul.mubr.f32.gmra.mxu0 %v6509_v45  ;;  %7129 = vmatprep.subr.mxu0 %v12976_v35 }
0x1370   :  { %7130 = vmatpush2.msra.mxu0 %v12977_v32 }
0x1371   :  { %v6517_v37 = vpop.f32.mrf.mxu1  ;;  %7131 = vmatprep.subr.mxu0 %v12978_v20 }
0x1372   :  { %6739 = vmatprep.mubr.f32.mxu0 %v6517_v37  ;;  %7132 = vmatpush2.msra.mxu0 %v12979_v55 }
0x1373   :  { %v6521_v60 = vpop.f32.mrf.mxu1  ;;  %6740 = vmatmul.mubr.f32.gmra.mxu0 %v6515_v51  ;;  %7133 = vmatprep.subr.mxu0 %v12980_v14 }
0x1374   :  { %7134 = vmatpush2.msra.mxu0 %v12981_v2 }
0x1375   :  { %v6523_v38 = vpop.f32.mrf.mxu1  ;;  %7135 = vmatprep.subr.mxu0 %v12982_v11 }
0x1376   :  { %6745 = vmatprep.mubr.f32.mxu0 %v6523_v38  ;;  %7136 = vmatpush2.msra.mxu0 %v12983_v30 }
0x1377   :  { %v6527_v15 = vpop.f32.mrf.mxu1  ;;  %6746 = vmatmul.mubr.f32.gmra.mxu0 %v6521_v60  ;;  %7137 = vmatprep.subr.mxu0 %v12984_v21 }
0x1378   :  { %7138 = vmatpush2.msra.mxu0 %v12985_v3 }
0x1379   :  { %v6529_v16 = vpop.f32.mrf.mxu1  ;;  %7139 = vmatprep.subr.mxu0 %v12986_v12 }
0x137a   :  { %6751 = vmatprep.mubr.f32.mxu0 %v6529_v16  ;;  %7140 = vmatpush2.msra.mxu0 %v12987_v23 }
0x137b   :  { %6752 = vmatmul.mubr.f32.gmra.mxu0 %v6527_v15  ;;  %v6921_v13 = vpop.f32.mrf.mxu1  ;;  %7141 = vmatprep.subr.mxu0 %v12988_v9 }
0x137c   :  { %7142 = vmatpush2.msra.mxu0 %v12989_v48 }
0x137d   :  { %v6923_v1 = vpop.f32.mrf.mxu1  ;;  %7143 = vmatprep.subr.mxu0 %v12990_v53 }
0x137e   :  { %7144 = vmatpush2.msra.mxu0 %v12991_v7  ;;  %7145 = vmatprep.mubr.f32.mxu0 %v6923_v1 }
0x137f   :  { %v6927_v25 = vpop.f32.mrf.mxu1  ;;  %7146 = vmatmul.mubr.f32.vlgmr.msra.gmra.mxu0 %v6921_v13 }
0x1381   :  { %v6929_v36 = vpop.f32.mrf.mxu1 }
0x1382   :  { %7151 = vmatprep.mubr.f32.mxu0 %v6929_v36 }
0x1383   :  { %v6933_v39 = vpop.f32.mrf.mxu1  ;;  %7152 = vmatmul.mubr.f32.gmra.mxu0 %v6927_v25 }
0x1385   :  { %v6935_v27 = vpop.f32.mrf.mxu1 }
0x1386   :  { %7157 = vmatprep.mubr.f32.mxu0 %v6935_v27 }
0x1387   :  { %v6939_v49 = vpop.f32.mrf.mxu1  ;;  %7158 = vmatmul.mubr.f32.gmra.mxu0 %v6933_v39 }
0x1389   :  { %v6941_v28 = vpop.f32.mrf.mxu1 }
0x138a   :  { %7163 = vmatprep.mubr.f32.mxu0 %v6941_v28  ;;  %v12992_v28 = vld [vmem:[#allocation25_spill] sm:$0xff] }
0x138b   :  { %v6945_v17 = vpop.f32.mrf.mxu1  ;;  %7164 = vmatmul.mubr.f32.gmra.mxu0 %v6939_v49 }
0x138d   :  { %v6947_v43 = vpop.f32.mrf.mxu1 }
0x138e   :  { %7169 = vmatprep.mubr.f32.mxu0 %v6947_v43 }
0x138f   :  { %v6951_v19 = vpop.f32.mrf.mxu1  ;;  %7170 = vmatmul.mubr.f32.gmra.mxu0 %v6945_v17 }
0x1391   :  { %v6953_v33 = vpop.f32.mrf.mxu1 }
0x1392   :  { %7175 = vmatprep.mubr.f32.mxu0 %v6953_v33 }
0x1393   :  { %v6957_v50 = vpop.f32.mrf.mxu1  ;;  %7176 = vmatmul.mubr.f32.gmra.mxu0 %v6951_v19  ;;  %v12993_v19 = vld [vmem:[#allocation28_spill] sm:$0xff] }
0x1395   :  { %v6959_v52 = vpop.f32.mrf.mxu1 }
0x1396   :  { %7181 = vmatprep.mubr.f32.mxu0 %v6959_v52 }
0x1397   :  { %v6963_v22 = vpop.f32.mrf.mxu1  ;;  %7182 = vmatmul.mubr.f32.gmra.mxu0 %v6957_v50 }
0x1399   :  { %v6965_v46 = vpop.f32.mrf.mxu1 }
0x139a   :  { %7187 = vmatprep.mubr.f32.mxu0 %v6965_v46 }
0x139b   :  { %v6969_v63 = vpop.f32.mrf.mxu1  ;;  %7188 = vmatmul.mubr.f32.gmra.mxu0 %v6963_v22  ;;  %v12994_v22 = vld [vmem:[#allocation32_spill] sm:$0xff] }
0x139d   :  { %v6971_v26 = vpop.f32.mrf.mxu1 }
0x139e   :  { %7193 = vmatprep.mubr.f32.mxu0 %v6971_v26 }
0x139f   :  { %v6975_v56 = vpop.f32.mrf.mxu1  ;;  %7194 = vmatmul.mubr.f32.gmra.mxu0 %v6969_v63 }
0x13a1   :  { %v6977_v18 = vpop.f32.mrf.mxu1 }
0x13a2   :  { %7199 = vmatprep.mubr.f32.mxu0 %v6977_v18 }
0x13a3   :  { %v6981_v34 = vpop.f32.mrf.mxu1  ;;  %7200 = vmatmul.mubr.f32.gmra.mxu0 %v6975_v56  ;;  %v12995_v56 = vld [vmem:[#allocation35_spill] sm:$0xff] }
0x13a5   :  { %v6983_v0 = vpop.f32.mrf.mxu1 }
0x13a6   :  { %7205 = vmatprep.mubr.f32.mxu1 %v6983_v0 }
0x13a7   :  { %v6987_v47 = vpop.f32.mrf.mxu1  ;;  %7206 = vmatmul.mubr.f32.vlgmr.msra.gmra.mxu1 %v6981_v34 }
0x13a9   :  { %v6989_v58 = vpop.f32.mrf.mxu1 }
0x13aa   :  { %7211 = vmatprep.mubr.f32.mxu1 %v6989_v58 }
0x13ab   :  { %v6993_v8 = vpop.f32.mrf.mxu1  ;;  %7212 = vmatmul.mubr.f32.gmra.mxu1 %v6987_v47  ;;  %v12996_v47 = vld [vmem:[#allocation36_spill] sm:$0xff] }
0x13ad   :  { %v6995_v31 = vpop.f32.mrf.mxu1 }
0x13ae   :  { %7217 = vmatprep.mubr.f32.mxu1 %v6995_v31 }
0x13af   :  { %v6999_v5 = vpop.f32.mrf.mxu1  ;;  %7218 = vmatmul.mubr.f32.gmra.mxu1 %v6993_v8 }
0x13b1   :  { %v7001_v42 = vpop.f32.mrf.mxu1 }
0x13b2   :  { %7223 = vmatprep.mubr.f32.mxu1 %v7001_v42 }
0x13b3   :  { %v7005_v54 = vpop.f32.mrf.mxu1  ;;  %7224 = vmatmul.mubr.f32.gmra.mxu1 %v6999_v5  ;;  %v12997_v5 = vld [vmem:[#allocation37_spill] sm:$0xff] }
0x13b5   :  { %v7007_v57 = vpop.f32.mrf.mxu1 }
0x13b6   :  { %7229 = vmatprep.mubr.f32.mxu1 %v7007_v57 }
0x13b7   :  { %v7011_v10 = vpop.f32.mrf.mxu1  ;;  %7230 = vmatmul.mubr.f32.gmra.mxu1 %v7005_v54 }
0x13b9   :  { %v7013_v61 = vpop.f32.mrf.mxu1 }
0x13ba   :  { %7235 = vmatprep.mubr.f32.mxu1 %v7013_v61 }
0x13bb   :  { %7236 = vmatmul.mubr.f32.gmra.mxu1 %v7011_v10  ;;  %v12998_v10 = vld [vmem:[#allocation38_spill] sm:$0xff] }
0x13ff   :  { %v6663_v59 = vpop.f32.mrf.mxu0 }
0x1400   :  { %v6758_v17 = vadd.f32 %v6663_v59, %v12992_v28 }
0x1401   :  { %v6665_v45 = vpop.f32.mrf.mxu0 }
0x1402   :  { %v6759_v33 = vadd.f32 %v6665_v45, %v12993_v19 }
0x1403   :  { %v6669_v40 = vpop.f32.mrf.mxu0 }
0x1404   :  { %v6760_v46 = vadd.f32 %v6669_v40, %v12994_v22  ;;  %v12999_v40 = vld [vmem:[#allocation39_spill] sm:$0xff] }
0x1405   :  { %v6671_v51 = vpop.f32.mrf.mxu0 }
0x1406   :  { %v6761_v18 = vadd.f32 %v6671_v51, %v12995_v56 }
0x1407   :  { %v6675_v35 = vpop.f32.mrf.mxu0 }
0x1408   :  { %v6762_v58 = vadd.f32 %v6675_v35, %v12996_v47  ;;  %v13004_v47 = vld [vmem:[#allocation44_spill] sm:$0xff] }
0x1409   :  { %v6677_v32 = vpop.f32.mrf.mxu0 }
0x140a   :  { %v6763_v42 = vadd.f32 %v6677_v32, %v12997_v5  ;;  %v13001_v32 = vld [vmem:[#allocation41_spill] sm:$0xff] }
0x140b   :  { %v6681_v37 = vpop.f32.mrf.mxu0  ;;  %v13005_v5 = vld [vmem:[#allocation45_spill] sm:$0xff] }
0x140c   :  { %v6764_v61 = vadd.f32 %v6681_v37, %v12998_v10  ;;  %v13006_v10 = vld [vmem:[#allocation46_spill] sm:$0xff] }
0x140d   :  { %v6683_v20 = vpop.f32.mrf.mxu0 }
0x140e   :  { %v6765_v51 = vadd.f32 %v6683_v20, %v12999_v40  ;;  %v13002_v20 = vld [vmem:[#allocation42_spill] sm:$0xff]  ;;  %v13007_v40 = vld [vmem:[#allocation47_spill] sm:$0xff] }
0x140f   :  { %v6687_v55 = vpop.f32.mrf.mxu0 }
0x1411   :  { %v6689_v60 = vpop.f32.mrf.mxu0 }
0x1413   :  { %v6693_v14 = vpop.f32.mrf.mxu0 }
0x1415   :  { %v12673_v2 = vpop.f32.mrf.mxu0 }
0x1417   :  { %v12675_v38 = vpop.f32.mrf.mxu0 }
0x1419   :  { %v12677_v11 = vpop.f32.mrf.mxu0 }
0x141b   :  { %v12679_v30 = vpop.f32.mrf.mxu0 }
0x141d   :  { %v12681_v15 = vpop.f32.mrf.mxu0 }
0x141f   :  { %v12683_v21 = vpop.f32.mrf.mxu0 }
0x1421   :  { %v12685_v3 = vpop.f32.mrf.mxu0 }
0x1423   :  { %v12687_v16 = vpop.f32.mrf.mxu0 }
0x1425   :  { %v12689_v12 = vpop.f32.mrf.mxu0 }
0x1427   :  { %v12691_v23 = vpop.f32.mrf.mxu0 }
0x1429   :  { %v12693_v13 = vpop.f32.mrf.mxu0 }
0x142b   :  { %v12695_v9 = vpop.f32.mrf.mxu0 }
0x142d   :  { %v12697_v48 = vpop.f32.mrf.mxu0 }
0x142f   :  { %v12699_v1 = vpop.f32.mrf.mxu0 }
0x1431   :  { %v12701_v53 = vpop.f32.mrf.mxu0 }
0x1433   :  { %v12703_v7 = vpop.f32.mrf.mxu0 }
0x1435   :  { %v12705_v25 = vpop.f32.mrf.mxu0 }
0x1437   :  { %v12707_v36 = vpop.f32.mrf.mxu0 }
0x1439   :  { %v12709_v39 = vpop.f32.mrf.mxu0 }
0x143b   :  { %v12711_v27 = vpop.f32.mrf.mxu0 }
0x143d   :  { %v12713_v49 = vpop.f32.mrf.mxu0 }
0x143f   :  { %v7147_v43 = vpop.f32.mrf.mxu0 }
0x1440   :  { %v7242_v50 = vadd.f32 %v7147_v43, %v6758_v17  ;;  %v13000_v43 = vld [vmem:[#allocation40_spill] sm:$0xff] }
0x1441   :  { %v7149_v52 = vpop.f32.mrf.mxu0  ;;  %v6766_v35 = vadd.f32 %v6687_v55, %v13000_v43  ;;  %v13008_v43 = vld [vmem:[#allocation48_spill] sm:$0xff] }
0x1442   :  { %8269 = vtanh.f32 %v7242_v50  ;;  %v7243_v63 = vadd.f32 %v7149_v52, %v6759_v33  ;;  %v6767_v52 = vadd.f32 %v6689_v60, %v13001_v32  ;;  %v13003_v60 = vld [vmem:[#allocation43_spill] sm:$0xff] }
0x1443   :  { %v7153_v26 = vpop.f32.mrf.mxu0 }
0x1444   :  { %8271 = vtanh.f32 %v7243_v63  ;;  %v7244_v34 = vadd.f32 %v7153_v26, %v6760_v46  ;;  %v6768_v63 = vadd.f32 %v6693_v14, %v13002_v20 }
0x1445   :  { %v7155_v0 = vpop.f32.mrf.mxu0 }
0x1446   :  { %8273 = vtanh.f32 %v7244_v34  ;;  %v7245_v8 = vadd.f32 %v7155_v0, %v6761_v18  ;;  %v6769_v18 = vadd.f32 %v12673_v2, %v13003_v60 }
0x1447   :  { %v7159_v31 = vpop.f32.mrf.mxu0 }
0x1448   :  { %8275 = vtanh.f32 %v7245_v8  ;;  %v7246_v54 = vadd.f32 %v7159_v31, %v6762_v58  ;;  %v6770_v58 = vadd.f32 %v12675_v38, %v13004_v47  ;;  %v13013_v47 = vld [vmem:[#allocation53_spill] sm:$0xff] }
0x1449   :  { %v7161_v57 = vpop.f32.mrf.mxu0 }
0x144a   :  { %8277 = vtanh.f32 %v7246_v54  ;;  %v7247_v59 = vadd.f32 %v7161_v57, %v6763_v42  ;;  %v6771_v42 = vadd.f32 %v12677_v11, %v13005_v5 }
0x144b   :  { %v7165_v45 = vpop.f32.mrf.mxu0 }
0x144c   :  { %8279 = vtanh.f32 %v7247_v59  ;;  %v7248_v28 = vadd.f32 %v7165_v45, %v6764_v61  ;;  %v6772_v61 = vadd.f32 %v12679_v30, %v13006_v10 }
0x144d   :  { %v7167_v17 = vpop.f32.mrf.mxu0 }
0x144e   :  { %8281 = vtanh.f32 %v7248_v28  ;;  %v7249_v19 = vadd.f32 %v7167_v17, %v6765_v51  ;;  %v6773_v51 = vadd.f32 %v12681_v15, %v13007_v40 }
0x144f   :  { %v8270_v33 = vpop.eup %8269  ;;  %v7171_v50 = vpop.f32.mrf.mxu0 }
0x1450   :  { %7306 = vst [vmem:[%s12900_s19] sm:$0xff] %v8270_v33  ;;  %8283 = vtanh.f32 %v7249_v19  ;;  %v7250_v37 = vadd.f32 %v7171_v50, %v6766_v35  ;;  %v6774_v35 = vadd.f32 %v12683_v21, %v13008_v43  ;;  %v13009_v50 = vld [vmem:[#allocation49_spill] sm:$0xff] }
0x1451   :  { %v8272_v22 = vpop.eup %8271  ;;  %v7173_v46 = vpop.f32.mrf.mxu0  ;;  %v6775_v32 = vadd.f32 %v12685_v3, %v13009_v50  ;;  %v6786_v50 = vadd.f32 %v12707_v36, %v12600_v62  ;;  %v6304_v36 = vadd.f32 %v12671_v4, %v12606_v24 }
0x1452   :  { %7307 = vst.msk [vmem:[%s12900_s19 + $0x8] sm:$0xff] %vm5419_vm6, %v8272_v22  ;;  %8285 = vtanh.f32 %v7250_v37  ;;  %v7251_v55 = vadd.f32 %v7173_v46, %v6767_v52  ;;  %v13010_v22 = vld [vmem:[#allocation50_spill] sm:$0xff] }
0x1453   :  { %v8274_v26 = vpop.eup %8273  ;;  %v7177_v56 = vpop.f32.mrf.mxu0  ;;  %v6776_v46 = vadd.f32 %v12687_v16, %v13010_v22  ;;  %v6788_v22 = vadd.f32 %v12711_v27, %v12604_v44 }
0x1454   :  { %7308 = vst [vmem:[%s12900_s19 + $0x10] sm:$0xff] %v8274_v26  ;;  %8287 = vtanh.f32 %v7251_v55  ;;  %v7252_v34 = vadd.f32 %v7177_v56, %v6768_v63  ;;  %v13011_v55 = vld [vmem:[#allocation51_spill] sm:$0xff] }
0x1455   :  { %v8276_v0 = vpop.eup %8275  ;;  %v7179_v14 = vpop.f32.mrf.mxu0  ;;  %v6777_v26 = vadd.f32 %v12689_v12, %v13011_v55 }
0x1456   :  { %7309 = vst.msk [vmem:[%s12900_s19 + $0x18] sm:$0xff] %vm5419_vm6, %v8276_v0  ;;  %8289 = vtanh.f32 %v7252_v34  ;;  %v7253_v8 = vadd.f32 %v7179_v14, %v6769_v18  ;;  %v13012_v18 = vld [vmem:[#allocation52_spill] sm:$0xff] }
0x1457   :  { %v8278_v31 = vpop.eup %8277  ;;  %v7183_v2 = vpop.f32.mrf.mxu0  ;;  %v6778_v34 = vadd.f32 %v12691_v23, %v13012_v18 }
0x1458   :  { %7310 = vst [vmem:[%s12900_s19 + $0x20] sm:$0xff] %v8278_v31  ;;  %8291 = vtanh.f32 %v7253_v8  ;;  %v7254_v54 = vadd.f32 %v7183_v2, %v6770_v58  ;;  %v6779_v58 = vadd.f32 %v12693_v13, %v13013_v47  ;;  %v13014_v2 = vld [vmem:[#allocation54_spill] sm:$0xff] }
0x1459   :  { %v8280_v57 = vpop.eup %8279  ;;  %v7185_v38 = vpop.f32.mrf.mxu0  ;;  %v6780_v5 = vadd.f32 %v12695_v9, %v13014_v2 }
0x145a   :  { %7311 = vst.msk [vmem:[%s12900_s19 + $0x28] sm:$0xff] %vm5419_vm6, %v8280_v57  ;;  %8293 = vtanh.f32 %v7254_v54  ;;  %v7255_v59 = vadd.f32 %v7185_v38, %v6771_v42  ;;  %v13015_v57 = vld [vmem:[#allocation55_spill] sm:$0xff] }
0x145b   :  { %v8282_v45 = vpop.eup %8281  ;;  %v7189_v11 = vpop.f32.mrf.mxu0  ;;  %v6781_v38 = vadd.f32 %v12697_v48, %v13015_v57 }
0x145c   :  { %7312 = vst [vmem:[%s12900_s19 + $0x30] sm:$0xff] %v8282_v45  ;;  %8295 = vtanh.f32 %v7255_v59  ;;  %v7256_v28 = vadd.f32 %v7189_v11, %v6772_v61  ;;  %v13016_v59 = vld [vmem:[#allocation56_spill] sm:$0xff] }
0x145d   :  { %v8284_v17 = vpop.eup %8283  ;;  %v7191_v30 = vpop.f32.mrf.mxu0  ;;  %v6782_v45 = vadd.f32 %v12699_v1, %v13016_v59 }
0x145e   :  { %7313 = vst.msk [vmem:[%s12900_s19 + $0x38] sm:$0xff] %vm5419_vm6, %v8284_v17  ;;  %8297 = vtanh.f32 %v7256_v28  ;;  %v7257_v19 = vadd.f32 %v7191_v30, %v6773_v51  ;;  %v6783_v51 = vadd.f32 %v12701_v53, %v12594_v29  ;;  %v13017_v30 = vld [vmem:[#allocation57_spill] sm:$0xff]  ;;  %v6785_v53 = vadd.f32 %v12705_v25, %v12598_v6 }
0x145f   :  { %v8286_v33 = vpop.eup %8285  ;;  %v7195_v15 = vpop.f32.mrf.mxu0  ;;  %v6784_v43 = vadd.f32 %v12703_v7, %v13017_v30  ;;  %v6787_v25 = vadd.f32 %v12709_v39, %v12602_v41 }
0x1460   :  { %7314 = vst [vmem:[%s12900_s19 + $0x40] sm:$0xff] %v8286_v33  ;;  %8299 = vtanh.f32 %v7257_v19  ;;  %v7258_v52 = vadd.f32 %v7195_v15, %v6774_v35 }
0x1461   :  { %v8288_v37 = vpop.eup %8287  ;;  %v7197_v21 = vpop.f32.mrf.mxu0 }
0x1462   :  { %7315 = vst.msk [vmem:[%s12900_s19 + $0x48] sm:$0xff] %vm5419_vm6, %v8288_v37  ;;  %8301 = vtanh.f32 %v7258_v52  ;;  %v7259_v20 = vadd.f32 %v7197_v21, %v6775_v32 }
0x1463   :  { %v8290_v63 = vpop.eup %8289  ;;  %v7201_v3 = vpop.f32.mrf.mxu0 }
0x1464   :  { %7316 = vst [vmem:[%s12900_s19 + $0x50] sm:$0xff] %v8290_v63  ;;  %8303 = vtanh.f32 %v7259_v20  ;;  %v7260_v56 = vadd.f32 %v7201_v3, %v6776_v46  ;;  %v6789_v20 = vadd.f32 %v12713_v49, %v6304_v36 }
0x1465   :  { %v8292_v60 = vpop.eup %8291  ;;  %v7203_v16 = vpop.f32.mrf.mxu0 }
0x1466   :  { %7317 = vst.msk [vmem:[%s12900_s19 + $0x58] sm:$0xff] %vm5419_vm6, %v8292_v60  ;;  %8305 = vtanh.f32 %v7260_v56  ;;  %v7261_v0 = vadd.f32 %v7203_v16, %v6777_v26 }
0x1467   :  { %v8294_v14 = vpop.eup %8293  ;;  %v7207_v12 = vpop.f32.mrf.mxu1 }
0x1468   :  { %7318 = vst [vmem:[%s12900_s19 + $0x60] sm:$0xff] %v8294_v14  ;;  %8307 = vtanh.f32 %v7261_v0  ;;  %v7262_v8 = vadd.f32 %v7207_v12, %v6778_v34 }
0x1469   :  { %v8296_v31 = vpop.eup %8295  ;;  %v7209_v23 = vpop.f32.mrf.mxu1 }
0x146a   :  { %7319 = vst.msk [vmem:[%s12900_s19 + $0x68] sm:$0xff] %vm5419_vm6, %v8296_v31  ;;  %8309 = vtanh.f32 %v7262_v8  ;;  %v7263_v42 = vadd.f32 %v7209_v23, %v6779_v58 }
0x146b   :  { %v8298_v54 = vpop.eup %8297  ;;  %v7213_v13 = vpop.f32.mrf.mxu1 }
0x146c   :  { %7320 = vst [vmem:[%s12900_s19 + $0x70] sm:$0xff] %v8298_v54  ;;  %8311 = vtanh.f32 %v7263_v42  ;;  %v7264_v10 = vadd.f32 %v7213_v13, %v6780_v5 }
0x146d   :  { %v8300_v61 = vpop.eup %8299  ;;  %v7215_v9 = vpop.f32.mrf.mxu1 }
0x146e   :  { %7321 = vst.msk [vmem:[%s12900_s19 + $0x78] sm:$0xff] %vm5419_vm6, %v8300_v61  ;;  %8313 = vtanh.f32 %v7264_v10  ;;  %v7265_v11 = vadd.f32 %v7215_v9, %v6781_v38 }
0x146f   :  { %v8302_v40 = vpop.eup %8301  ;;  %v7219_v48 = vpop.f32.mrf.mxu1 }
0x1470   :  { %7322 = vst [vmem:[%s12900_s19 + $0x80] sm:$0xff] %v8302_v40  ;;  %8315 = vtanh.f32 %v7265_v11  ;;  %v7266_v28 = vadd.f32 %v7219_v48, %v6782_v45 }
0x1471   :  { %v8304_v17 = vpop.eup %8303  ;;  %v7221_v1 = vpop.f32.mrf.mxu1 }
0x1472   :  { %7323 = vst.msk [vmem:[%s12900_s19 + $0x88] sm:$0xff] %vm5419_vm6, %v8304_v17  ;;  %8317 = vtanh.f32 %v7266_v28  ;;  %v7267_v35 = vadd.f32 %v7221_v1, %v6783_v51 }
0x1473   :  { %v8306_v19 = vpop.eup %8305  ;;  %v7225_v29 = vpop.f32.mrf.mxu1 }
0x1474   :  { %7324 = vst [vmem:[%s12900_s19 + $0x90] sm:$0xff] %v8306_v19  ;;  %8319 = vtanh.f32 %v7267_v35  ;;  %v7268_v33 = vadd.f32 %v7225_v29, %v6784_v43 }
0x1475   :  { %v8308_v15 = vpop.eup %8307  ;;  %v7227_v7 = vpop.f32.mrf.mxu1 }
0x1476   :  { %7325 = vst.msk [vmem:[%s12900_s19 + $0x98] sm:$0xff] %vm5419_vm6, %v8308_v15  ;;  %8321 = vtanh.f32 %v7268_v33  ;;  %v7269_v32 = vadd.f32 %v7227_v7, %v6785_v53 }
0x1477   :  { %v8310_v52 = vpop.eup %8309  ;;  %v7231_v6 = vpop.f32.mrf.mxu1 }
0x1478   :  { %7326 = vst [vmem:[%s12900_s19 + $0xa0] sm:$0xff] %v8310_v52  ;;  %8323 = vtanh.f32 %v7269_v32  ;;  %v7270_v37 = vadd.f32 %v7231_v6, %v6786_v50 }
0x1479   :  { %v8312_v21 = vpop.eup %8311  ;;  %v7233_v62 = vpop.f32.mrf.mxu1 }
0x147a   :  { %7327 = vst.msk [vmem:[%s12900_s19 + $0xa8] sm:$0xff] %vm5419_vm6, %v8312_v21  ;;  %8325 = vtanh.f32 %v7270_v37  ;;  %v7271_v41 = vadd.f32 %v7233_v62, %v6787_v25 }
0x147b   :  { %v8314_v39 = vpop.eup %8313  ;;  %v7237_v46 = vpop.f32.mrf.mxu1 }
0x147c   :  { %7328 = vst [vmem:[%s12900_s19 + $0xb0] sm:$0xff] %v8314_v39  ;;  %8327 = vtanh.f32 %v7271_v41  ;;  %v7272_v24 = vadd.f32 %v7237_v46, %v6788_v22 }
0x147d   :  { %v8316_v4 = vpop.eup %8315  ;;  %v7239_v63 = vpop.f32.mrf.mxu1 }
0x147e   :  { %7329 = vst.msk [vmem:[%s12900_s19 + $0xb8] sm:$0xff] %vm5419_vm6, %v8316_v4  ;;  %8329 = vtanh.f32 %v7272_v24  ;;  %v7273_v44 = vadd.f32 %v7239_v63, %v6789_v20 }
0x147f   :  { %v8318_v27 = vpop.eup %8317 }
0x1480   :  { %7330 = vst [vmem:[%s12900_s19 + $0xc0] sm:$0xff] %v8318_v27  ;;  %8331 = vtanh.f32 %v7273_v44 }
0x1481   :  { %v8320_v49 = vpop.eup %8319 }
0x1482   :  { %7331 = vst.msk [vmem:[%s12900_s19 + $0xc8] sm:$0xff] %vm5419_vm6, %v8320_v49 }
0x1483   :  { %v8322_v3 = vpop.eup %8321 }
0x1484   :  { %7332 = vst [vmem:[%s12900_s19 + $0xd0] sm:$0xff] %v8322_v3 }
0x1485   :  { %v8324_v55 = vpop.eup %8323 }
0x1486   :  { %7333 = vst.msk [vmem:[%s12900_s19 + $0xd8] sm:$0xff] %vm5419_vm6, %v8324_v55 }
0x1487   :  { %v8326_v26 = vpop.eup %8325 }
0x1488   :  { %7334 = vst [vmem:[%s12900_s19 + $0xe0] sm:$0xff] %v8326_v26 }
0x1489   :  { %v8328_v56 = vpop.eup %8327 }
0x148a   :  { %7335 = vst.msk [vmem:[%s12900_s19 + $0xe8] sm:$0xff] %vm5419_vm6, %v8328_v56 }
0x148b   :  { %v8330_v60 = vpop.eup %8329 }
0x148c   :  { %7336 = vst [vmem:[%s12900_s19 + $0xf0] sm:$0xff] %v8330_v60 }
0x148d   :  { %v8332_v16 = vpop.eup %8331 }
0x148e   :  { %7337 = vst.msk [vmem:[%s12900_s19 + $0xf8] sm:$0xff] %vm5419_vm6, %v8332_v16 }
0x148f   :  { %7342 = vsyncpa [#allocation3], 1 }
0x1490   :  { %7343 = vsyncpa [#allocation5], 1 }
0x1491   :  { %7344 = vsyncpa [#allocation8], 1 }
0x1492   :  { %7345 = vsyncpa [#allocation11], 1 }

</bundles_post_ra>
